<compile_context>
chip_gen: v6e
topology: v6e:2x2x1
jax: 0.10.0
libtpu: 0.0.40
codegen_flags: <defaults>
</compile_context>

<pallas_src>
import functools

import jax
import jax.numpy as jnp
from jax.experimental import pallas as pl
from jax.experimental.pallas import tpu as pltpu

BN_EPS = 1e-5
LEAKY_SLOPE = 0.01            # nn.LeakyReLU default
MAX_TM = 2048                 # row tile for the conv matmuls (multiple of 8)
HEAD_TN = 256                 # batch-row tile for the dueling head
VMEM_LIMIT = 32 * 1024 * 1024


# ----------------------------- Pallas kernels ------------------------------

def conv_stats_kernel(m_total, fuse_bn_in, *refs):
    """One M-tile of (patches @ W + bias) with BN statistics accumulation.

    If `fuse_bn_in`, the previous layer's BatchNorm (scale, shift) + ReLU is
    applied to the patch tile before the matmul, so no standalone elementwise
    pass over the activation is needed.

    Outputs:
      y_ref     : [tm, Cout] bf16 pre-BN activations of this layer.
      coeff_ref : [2, Cout]  f32 (scale, shift) of this layer, written once at
                  finalize.
    Scratch:
      stats_ref : [2, Cout]  f32 running (sum, sum-of-squares).
    """
    if fuse_bn_in:
        (a_ref, cin_ref, w_ref, b_ref, g_ref, be_ref,
         y_ref, coeff_ref, stats_ref) = refs
    else:
        (a_ref, w_ref, b_ref, g_ref, be_ref,
         y_ref, coeff_ref, stats_ref) = refs

    i = pl.program_id(0)
    tm = a_ref.shape[0]

    a = a_ref[...]
    if fuse_bn_in:
        # Previous layer's BN + ReLU fused into this layer's prologue.  The
        # per-channel affine commutes with the patch gather, so applying it to
        # the (kh, kw, C)-tiled coefficients is exact.
        a = jnp.maximum(a.astype(jnp.float32) * cin_ref[0:1, :]
                        + cin_ref[1:2, :], 0.0)
        a = a.astype(jnp.bfloat16)

    y = jnp.dot(a, w_ref[...], preferred_element_type=jnp.float32) + b_ref[...]
    y_ref[...] = y.astype(y_ref.dtype)            # single bf16 round trip

    # Mask rows past the true M (ragged last tile) out of the statistics.
    ym = y
    if m_total % tm != 0:
        row = i * tm + jax.lax.broadcasted_iota(jnp.int32, (tm, 1), 0)
        ym = jnp.where(row < m_total, y, 0.0)
    part = jnp.concatenate([jnp.sum(ym, axis=0, keepdims=True),
                            jnp.sum(ym * ym, axis=0, keepdims=True)], axis=0)

    @pl.when(i == 0)
    def _init():
        stats_ref[...] = jnp.zeros_like(stats_ref)

    stats_ref[...] += part

    @pl.when(i == pl.num_programs(0) - 1)
    def _finalize():
        inv_m = 1.0 / m_total
        mu = stats_ref[0:1, :] * inv_m
        var = stats_ref[1:2, :] * inv_m - mu * mu    # single-pass variance (f32)
        scale = g_ref[...] * jax.lax.rsqrt(var + BN_EPS)
        shift = be_ref[...] - mu * scale
        coeff_ref[...] = jnp.concatenate([scale, shift], axis=0)


def duel_head_kernel(n_valid, nout, n_tiles, x_ref, c3_ref, w1_ref, b1_ref,
                     w2_ref, b2_ref, q_ref, av_ref):
    """Fused conv3-BN/ReLU prologue + dueling head, tiled over batch rows.

    Grid steps 0..n_tiles-1 compute [A | V] for one row tile into the tiny
    resident av scratch; one extra final step applies q = V + (A - A.mean())
    (global mean, exactly as the PyTorch module) and writes the q output.
    """
    i = pl.program_id(0)
    tn = x_ref.shape[0]

    @pl.when(i < n_tiles)
    def _compute():
        x = jnp.maximum(x_ref[...].astype(jnp.float32) * c3_ref[0:1, :]
                        + c3_ref[1:2, :], 0.0)            # conv3 BN + ReLU
        h = jnp.dot(x.astype(jnp.bfloat16), w1_ref[...],
                    preferred_element_type=jnp.float32) + b1_ref[...]
        h = jnp.where(h >= 0.0, h, LEAKY_SLOPE * h)       # LeakyReLU
        av = jnp.dot(h.astype(jnp.bfloat16), w2_ref[...],
                     preferred_element_type=jnp.float32) + b2_ref[...]
        if n_tiles == 1:
            av_ref[...] = av
        else:
            av_ref[pl.ds(i * tn, tn), :] = av

    @pl.when(i == n_tiles)
    def _finalize():
        av = av_ref[...]
        a = av[:n_valid, :nout]
        v = av[:n_valid, nout:nout + 1]
        # q = V + (A - A.mean())  -- global mean, as in the PyTorch module.
        q_ref[...] = v + (a - jnp.mean(a))


# --------------------------- pallas_call wrappers ---------------------------

def conv_layer(patches, w, b, gamma, beta, coeff_in=None):
    """patches: [M, K] bf16; w: [K, Cout] bf16; b/gamma/beta: [1, Cout] f32.
    coeff_in: optional [2, K] f32 (previous layer's BN scale/shift, tiled to K).
    Returns (y [M, Cout] bf16 pre-BN, coeff [2, Cout] f32 (scale, shift))."""
    m, k = patches.shape
    cout = w.shape[1]
    tm = min(m, MAX_TM)
    grid = (pl.cdiv(m, tm),)
    fuse = coeff_in is not None

    in_specs = [pl.BlockSpec((tm, k), lambda i: (i, 0))]
    args = [patches]
    if fuse:
        in_specs.append(pl.BlockSpec((2, k), lambda i: (0, 0)))
        args.append(coeff_in)
    in_specs += [pl.BlockSpec((k, cout), lambda i: (0, 0)),
                 pl.BlockSpec((1, cout), lambda i: (0, 0)),
                 pl.BlockSpec((1, cout), lambda i: (0, 0)),
                 pl.BlockSpec((1, cout), lambda i: (0, 0))]
    args += [w, b, gamma, beta]

    return pl.pallas_call(
        functools.partial(conv_stats_kernel, m, fuse),
        out_shape=(jax.ShapeDtypeStruct((m, cout), jnp.bfloat16),
                   jax.ShapeDtypeStruct((2, cout), jnp.float32)),
        grid=grid,
        in_specs=in_specs,
        out_specs=(pl.BlockSpec((tm, cout), lambda i: (i, 0)),
                   pl.BlockSpec((2, cout), lambda i: (0, 0))),
        scratch_shapes=[pltpu.VMEM((2, cout), jnp.float32)],
        compiler_params=pltpu.CompilerParams(
            dimension_semantics=("arbitrary",),      # stats accumulate over M
            vmem_limit_bytes=VMEM_LIMIT),
        cost_estimate=pl.CostEstimate(
            flops=2 * m * k * cout, transcendentals=0,
            bytes_accessed=m * k * 2 + k * cout * 2 + m * cout * 2),
    )(*args)


def duel_head(x, coeff3, w1, b1, w2, b2):
    """x: [N, lin_in] bf16 pre-BN conv3 output (NHWC flatten);
    coeff3: [2, lin_in] f32; w1: [lin_in, 256] bf16 (A||V hidden);
    w2: [256, nout+1] block-diagonal bf16."""
    n, lin_in = x.shape
    hidden = w1.shape[1]
    nout = w2.shape[1] - 1
    tn = min(n, HEAD_TN)
    n_tiles = pl.cdiv(n, tn)

    return pl.pallas_call(
        functools.partial(duel_head_kernel, n, nout, n_tiles),
        out_shape=jax.ShapeDtypeStruct((n, nout), jnp.float32),
        grid=(n_tiles + 1,),                 # + 1 finalize step (global A-mean)
        in_specs=[
            pl.BlockSpec((tn, lin_in), lambda i: (jnp.minimum(i, n_tiles - 1), 0)),
            pl.BlockSpec((2, lin_in), lambda i: (0, 0)),
            pl.BlockSpec((lin_in, hidden), lambda i: (0, 0)),
            pl.BlockSpec((1, hidden), lambda i: (0, 0)),
            pl.BlockSpec((hidden, nout + 1), lambda i: (0, 0)),
            pl.BlockSpec((1, nout + 1), lambda i: (0, 0)),
        ],
        out_specs=pl.BlockSpec((n, nout), lambda i: (0, 0)),
        scratch_shapes=[pltpu.VMEM((n_tiles * tn, nout + 1), jnp.float32)],
        compiler_params=pltpu.CompilerParams(
            dimension_semantics=("arbitrary",),
            vmem_limit_bytes=VMEM_LIMIT),
        cost_estimate=pl.CostEstimate(
            flops=2 * n * lin_in * hidden + 2 * n * hidden * (nout + 1),
            transcendentals=0,
            bytes_accessed=(n * lin_in * 2 + 2 * lin_in * 4 + lin_in * hidden * 2
                            + hidden * (nout + 1) * 2 + n * nout * 4)),
    )(x, coeff3, w1, b1, w2, b2)


# ------------------------------ JAX glue -----------------------------------

def conv_out_size(w, h, k, s):
    return (w - (k - 1) - 1) // s + 1, (h - (k - 1) - 1) // s + 1


def im2col_nhwc(x, kh, kw, sh, sw, k_pad=None):
    """x: [N, H, W, C] -> patches [N*OH*OW, kh*kw*C] (cols ordered kh, kw, C),
    optionally zero-padded to k_pad columns (lane-aligned K for the MXU)."""
    n, h, w, c = x.shape
    oh = (h - kh) // sh + 1
    ow = (w - kw) // sw + 1
    cols = []
    for i in range(kh):
        for j in range(kw):
            cols.append(x[:, i:i + sh * (oh - 1) + 1:sh,
                             j:j + sw * (ow - 1) + 1:sw, :])   # [N, OH, OW, C]
    p = jnp.stack(cols, axis=3)                                # [N,OH,OW,kh*kw,C]
    p = p.reshape(n * oh * ow, kh * kw * c)
    if k_pad is not None and k_pad > p.shape[1]:
        p = jnp.pad(p, ((0, 0), (0, k_pad - p.shape[1])))
    return p, oh, ow


def pad_cols(a, k_pad):
    return a if a.shape[1] == k_pad else jnp.pad(a, ((0, 0), (0, k_pad - a.shape[1])))


def dqn_forward(x_nchw, kp):
    """x_nchw: [N, 4, H, W] f32 -> q: [N, output_size] f32."""
    n = x_nchw.shape[0]
    # One transpose at entry (PyTorch NCHW contract); NHWC + bf16 from here on.
    x = jnp.transpose(x_nchw, (0, 2, 3, 1)).astype(jnp.bfloat16)

    # conv1 (4 -> 32): plain matmul + stats (no BN prologue on the raw image).
    pat, oh, ow = im2col_nhwc(x, 8, 8, 4, 4, k_pad=kp["w1"].shape[0])
    y1, c1 = conv_layer(pat, kp["w1"], kp["b1"], kp["g1"], kp["be1"])

    # conv2 (32 -> 64): BN1 + ReLU applied to the patch tile inside the kernel.
    pat, oh, ow = im2col_nhwc(y1.reshape(n, oh, ow, 32), 4, 4, 2, 2,
                              k_pad=kp["w2"].shape[0])
    c1k = pad_cols(jnp.tile(c1, (1, 16)), kp["w2"].shape[0])
    y2, c2 = conv_layer(pat, kp["w2"], kp["b2"], kp["g2"], kp["be2"], c1k)

    # conv3 (64 -> 64): BN2 + ReLU in the prologue; K zero-padded 576 -> 640.
    pat, oh, ow = im2col_nhwc(y2.reshape(n, oh, ow, 64), 3, 3, 1, 1,
                              k_pad=kp["w3"].shape[0])
    c2k = pad_cols(jnp.tile(c2, (1, 9)), kp["w3"].shape[0])
    y3, c3 = conv_layer(pat, kp["w3"], kp["b3"], kp["g3"], kp["be3"], c2k)

    # NHWC flatten is a free contiguous reshape; head weights were pre-permuted
    # to this (H, W, C) order.  BN3 + ReLU is fused into the head's prologue.
    flat = y3.reshape(n, oh * ow * 64)
    c3k = jnp.tile(c3, (1, oh * ow))
    return duel_head(flat, c3k, kp["hw1"], kp["hb1"], kp["hw2"], kp["hb2"])


# -------------------- parameters (PyTorch layout) + prep --------------------

def init_params(key, output_size, lin_in):
    ks = jax.random.split(key, 20)

    def rnd(k, shape, scale=0.05):
        return (scale * jax.random.normal(k, shape)).astype(jnp.float32)

    p = {}
    p["conv1_w"], p["conv1_b"] = rnd(ks[0], (32, 4, 8, 8)), rnd(ks[1], (32,))
    p["bn1_g"], p["bn1_b"] = 1.0 + rnd(ks[2], (32,)), rnd(ks[3], (32,))
    p["conv2_w"], p["conv2_b"] = rnd(ks[4], (64, 32, 4, 4)), rnd(ks[5], (64,))
    p["bn2_g"], p["bn2_b"] = 1.0 + rnd(ks[6], (64,)), rnd(ks[7], (64,))
    p["conv3_w"], p["conv3_b"] = rnd(ks[8], (64, 64, 3, 3)), rnd(ks[9], (64,))
    p["bn3_g"], p["bn3_b"] = 1.0 + rnd(ks[10], (64,)), rnd(ks[11], (64,))
    p["a1_w"], p["a1_b"] = rnd(ks[12], (128, lin_in), 0.02), rnd(ks[13], (128,))
    p["a2_w"], p["a2_b"] = rnd(ks[14], (output_size, 128)), rnd(ks[15], (output_size,))
    p["v1_w"], p["v1_b"] = rnd(ks[16], (128, lin_in), 0.02), rnd(ks[17], (128,))
    p["v2_w"], p["v2_b"] = rnd(ks[18], (1, 128)), rnd(ks[19], (1,))
    return p


def prepare_params(p, conv_h, conv_w):
    """One-time repack: NHWC patch order, lane-aligned K, fused dueling
    weights, bf16 matmul operands."""
    kp = {}

    def conv_w_prep(w):        # [Cout, Cin, KH, KW] -> [K_pad, Cout] bf16
        co, ci, kh, kw = w.shape
        k = kh * kw * ci
        k_pad = ((k + 127) // 128) * 128
        wm = w.transpose(2, 3, 1, 0).reshape(k, co)
        if k_pad != k:
            wm = jnp.pad(wm, ((0, k_pad - k), (0, 0)))
        return wm.astype(jnp.bfloat16)

    kp["w1"], kp["b1"] = conv_w_prep(p["conv1_w"]), p["conv1_b"].reshape(1, -1)
    kp["g1"], kp["be1"] = p["bn1_g"].reshape(1, -1), p["bn1_b"].reshape(1, -1)
    kp["w2"], kp["b2"] = conv_w_prep(p["conv2_w"]), p["conv2_b"].reshape(1, -1)
    kp["g2"], kp["be2"] = p["bn2_g"].reshape(1, -1), p["bn2_b"].reshape(1, -1)
    kp["w3"], kp["b3"] = conv_w_prep(p["conv3_w"]), p["conv3_b"].reshape(1, -1)
    kp["g3"], kp["be3"] = p["bn3_g"].reshape(1, -1), p["bn3_b"].reshape(1, -1)

    c3 = p["conv3_w"].shape[0]
    hidden = p["a1_w"].shape[0]

    def lin1_prep(w):          # permute rows (C,H,W)-flatten -> (H,W,C)-flatten
        w = w.reshape(hidden, c3, conv_h, conv_w).transpose(0, 2, 3, 1)
        return w.reshape(hidden, -1).T                    # [H*W*C, hidden]

    wa1, wv1 = lin1_prep(p["a1_w"]), lin1_prep(p["v1_w"])
    kp["hw1"] = jnp.concatenate([wa1, wv1], axis=1).astype(jnp.bfloat16)
    kp["hb1"] = jnp.concatenate([p["a1_b"], p["v1_b"]]).reshape(1, -1)

    nout = p["a2_w"].shape[0]
    w2 = jnp.zeros((2 * hidden, nout + 1), jnp.float32)
    w2 = w2.at[:hidden, :nout].set(p["a2_w"].T)           # A branch
    w2 = w2.at[hidden:, nout:].set(p["v2_w"].T)           # V branch
    kp["hw2"] = w2.astype(jnp.bfloat16)
    kp["hb2"] = jnp.concatenate([p["a2_b"], p["v2_b"]]).reshape(1, -1)
    return kp


# ----------------------- pure-JAX reference (f32) ---------------------------

def dqn_forward_ref(x, p):
    def conv_bn_relu_ref(x, w, b, g, beta, stride):
        y = jax.lax.conv_general_dilated(
            x, w, (stride, stride), "VALID",
            dimension_numbers=("NCHW", "OIHW", "NCHW"))
        y = y + b.reshape(1, -1, 1, 1)
        mu = jnp.mean(y, axis=(0, 2, 3), keepdims=True)
        var = jnp.mean(jnp.square(y - mu), axis=(0, 2, 3), keepdims=True)
        yh = (y - mu) * jax.lax.rsqrt(var + BN_EPS)
        return jnp.maximum(yh * g.reshape(1, -1, 1, 1)
                           + beta.reshape(1, -1, 1, 1), 0.0)

    def leaky(z):
        return jnp.where(z >= 0, z, LEAKY_SLOPE * z)

    x = conv_bn_relu_ref(x, p["conv1_w"], p["conv1_b"], p["bn1_g"], p["bn1_b"], 4)
    x = conv_bn_relu_ref(x, p["conv2_w"], p["conv2_b"], p["bn2_g"], p["bn2_b"], 2)
    x = conv_bn_relu_ref(x, p["conv3_w"], p["conv3_b"], p["bn3_g"], p["bn3_b"], 1)
    flat = x.reshape(x.shape[0], -1)
    ax = leaky(flat @ p["a1_w"].T + p["a1_b"]) @ p["a2_w"].T + p["a2_b"]
    vx = leaky(flat @ p["v1_w"].T + p["v1_b"]) @ p["v2_w"].T + p["v2_b"]
    return vx + (ax - jnp.mean(ax))


# --------------------------------- main -------------------------------------

if __name__ == "__main__":
    batch, output_size, h, w = 2, 4, 84, 84   # module defaults: h=84, w=84, Cin=4

    cw, ch = conv_out_size(w, h, 8, 4)
    cw, ch = conv_out_size(cw, ch, 4, 2)
    cw, ch = conv_out_size(cw, ch, 3, 1)
    lin_in = cw * ch * 64                     # 7*7*64 = 3136

    key = jax.random.PRNGKey(0)
    kx, kparam_key = jax.random.split(key)
    x = jax.random.normal(kx, (batch, 4, h, w), dtype=jnp.float32)
    params = init_params(kparam_key, output_size, lin_in)
    kparams = prepare_params(params, ch, cw)  # one-time repack (NHWC/bf16/fused)

    fwd = jax.jit(dqn_forward)
    q = jax.block_until_ready(fwd(x, kparams))
    q_ref = jax.block_until_ready(dqn_forward_ref(x, params))

    assert q.shape == (batch, output_size), q.shape
    # bf16 matmul path vs f32 reference -> looser tolerance than pure-f32.
    assert jnp.allclose(q, q_ref, atol=5e-2, rtol=5e-2), (q, q_ref)
    print("KERNEL_OK")
</pallas_src>

<mosaic_0001>
module attributes {stable_mosaic.version = 11 : i64} {
  func.func @conv_stats_kernel(%arg0: i32, %arg1: memref<800x256xbf16, #tpu.memory_space<vmem>>, %arg2: memref<256x32xbf16, #tpu.memory_space<vmem>>, %arg3: memref<1x32xf32, #tpu.memory_space<vmem>>, %arg4: memref<1x32xf32, #tpu.memory_space<vmem>>, %arg5: memref<1x32xf32, #tpu.memory_space<vmem>>, %arg6: memref<800x32xbf16, #tpu.memory_space<vmem>>, %arg7: memref<2x32xf32, #tpu.memory_space<vmem>>, %arg8: memref<2x32xf32, #tpu.memory_space<vmem>>) attributes {dimension_semantics = [#tpu.dimension_semantics<arbitrary>], iteration_bounds = array<i64: 1>, scalar_prefetch = 0 : i64, scratch_operands = 1 : i64, tpu.core_type = #tpu.core_type<tc>, window_params = [{transform_indices = @transform_0, window_bounds = array<i64: 800, 256>}, {pipeline_mode = #tpu.pipeline_mode<synchronous>, transform_indices = @transform_1, window_bounds = array<i64: 256, 32>}, {pipeline_mode = #tpu.pipeline_mode<synchronous>, transform_indices = @transform_2, window_bounds = array<i64: 1, 32>}, {pipeline_mode = #tpu.pipeline_mode<synchronous>, transform_indices = @transform_3, window_bounds = array<i64: 1, 32>}, {pipeline_mode = #tpu.pipeline_mode<synchronous>, transform_indices = @transform_4, window_bounds = array<i64: 1, 32>}, {transform_indices = @transform_5, window_bounds = array<i64: 800, 32>}, {pipeline_mode = #tpu.pipeline_mode<synchronous>, transform_indices = @transform_6, window_bounds = array<i64: 2, 32>}]} {
    %c0 = arith.constant 0 : index
    %c0_0 = arith.constant 0 : index
    %0 = vector.load %arg1[%c0, %c0_0] : memref<800x256xbf16, #tpu.memory_space<vmem>>, vector<800x256xbf16>
    %c0_1 = arith.constant 0 : index
    %c0_2 = arith.constant 0 : index
    %1 = vector.load %arg2[%c0_1, %c0_2] : memref<256x32xbf16, #tpu.memory_space<vmem>>, vector<256x32xbf16>
    %cst = arith.constant dense<0.000000e+00> : vector<800x32xf32>
    %2 = tpu.matmul %0, %1, %cst {dimension_numbers = #tpu.dot_dimension_numbers<[1], [0], [0], [1], [0, 0, 1, 1], [], []>} : vector<800x256xbf16>, vector<256x32xbf16>, vector<800x32xf32> -> vector<800x32xf32>
    %c0_3 = arith.constant 0 : index
    %c0_4 = arith.constant 0 : index
    %3 = vector.load %arg3[%c0_3, %c0_4] : memref<1x32xf32, #tpu.memory_space<vmem>>, vector<1x32xf32>
    %4 = vector.broadcast %3 : vector<1x32xf32> to vector<800x32xf32>
    %5 = arith.addf %2, %4 : vector<800x32xf32>
    %6 = arith.truncf %5 : vector<800x32xf32> to vector<800x32xbf16>
    %c0_5 = arith.constant 0 : index
    %c0_6 = arith.constant 0 : index
    %7 = vector.load %arg6[%c0_5, %c0_6] : memref<800x32xbf16, #tpu.memory_space<vmem>>, vector<800x32xbf16>
    tpu.vector_store %arg6[%c0_5, %c0_6], %6 {strides = array<i32>} : memref<800x32xbf16, #tpu.memory_space<vmem>>, vector<800x32xbf16>,
    %cst_7 = arith.constant dense<0.000000e+00> : vector<32xf32>
    %8 = vector.multi_reduction <add>, %5, %cst_7 [0] : vector<800x32xf32> to vector<32xf32>
    %9 = vector.shape_cast %8 : vector<32xf32> to vector<1x32xf32>
    %10 = arith.mulf %5, %5 : vector<800x32xf32>
    %cst_8 = arith.constant dense<0.000000e+00> : vector<32xf32>
    %11 = vector.multi_reduction <add>, %10, %cst_8 [0] : vector<800x32xf32> to vector<32xf32>
    %12 = vector.shape_cast %11 : vector<32xf32> to vector<1x32xf32>
    %13 = tpu.concatenate %9, %12 in 0 : vector<1x32xf32>, vector<1x32xf32> -> vector<2x32xf32>
    %c0_i32 = arith.constant 0 : i32
    %14 = arith.cmpi eq, %arg0, %c0_i32 : i32
    %15 = arith.extui %14 : i1 to i32
    %c0_i32_9 = arith.constant 0 : i32
    %16 = arith.cmpi ne, %15, %c0_i32_9 : i32
    scf.if %16 {
      %cst_16 = arith.constant 0.000000e+00 : f32
      %23 = vector.broadcast %cst_16 : f32 to vector<2x32xf32>
      %c0_17 = arith.constant 0 : index
      %c0_18 = arith.constant 0 : index
      %24 = vector.load %arg8[%c0_17, %c0_18] : memref<2x32xf32, #tpu.memory_space<vmem>>, vector<2x32xf32>
      tpu.vector_store %arg8[%c0_17, %c0_18], %23 {strides = array<i32>} : memref<2x32xf32, #tpu.memory_space<vmem>>, vector<2x32xf32>,
    } else {
    }
    %c0_10 = arith.constant 0 : index
    %c0_11 = arith.constant 0 : index
    %17 = vector.load %arg8[%c0_10, %c0_11] : memref<2x32xf32, #tpu.memory_space<vmem>>, vector<2x32xf32>
    %18 = arith.addf %17, %13 : vector<2x32xf32>
    %c0_12 = arith.constant 0 : index
    %c0_13 = arith.constant 0 : index
    %19 = vector.load %arg8[%c0_12, %c0_13] : memref<2x32xf32, #tpu.memory_space<vmem>>, vector<2x32xf32>
    tpu.vector_store %arg8[%c0_12, %c0_13], %18 {strides = array<i32>} : memref<2x32xf32, #tpu.memory_space<vmem>>, vector<2x32xf32>,
    %c0_i32_14 = arith.constant 0 : i32
    %20 = arith.cmpi eq, %arg0, %c0_i32_14 : i32
    %21 = arith.extui %20 : i1 to i32
    %c0_i32_15 = arith.constant 0 : i32
    %22 = arith.cmpi ne, %21, %c0_i32_15 : i32
    scf.if %22 {
      %c0_16 = arith.constant 0 : index
      %c0_17 = arith.constant 0 : index
      %23 = vector.load %arg8[%c0_16, %c0_17] : memref<2x32xf32, #tpu.memory_space<vmem>>, vector<1x32xf32>
      %cst_18 = arith.constant 1.250000e-03 : f32
      %24 = vector.broadcast %cst_18 : f32 to vector<1x32xf32>
      %25 = arith.mulf %23, %24 : vector<1x32xf32>
      %c1 = arith.constant 1 : index
      %c0_19 = arith.constant 0 : index
      %26 = vector.load %arg8[%c1, %c0_19] : memref<2x32xf32, #tpu.memory_space<vmem>>, vector<1x32xf32>
      %cst_20 = arith.constant 1.250000e-03 : f32
      %27 = vector.broadcast %cst_20 : f32 to vector<1x32xf32>
      %28 = arith.mulf %26, %27 : vector<1x32xf32>
      %29 = arith.mulf %25, %25 : vector<1x32xf32>
      %30 = arith.subf %28, %29 : vector<1x32xf32>
      %c0_21 = arith.constant 0 : index
      %c0_22 = arith.constant 0 : index
      %31 = vector.load %arg4[%c0_21, %c0_22] : memref<1x32xf32, #tpu.memory_space<vmem>>, vector<1x32xf32>
      %cst_23 = arith.constant 9.99999974E-6 : f32
      %32 = vector.broadcast %cst_23 : f32 to vector<1x32xf32>
      %33 = arith.addf %30, %32 : vector<1x32xf32>
      %34 = math.rsqrt %33 : vector<1x32xf32>
      %35 = arith.mulf %31, %34 : vector<1x32xf32>
      %c0_24 = arith.constant 0 : index
      %c0_25 = arith.constant 0 : index
      %36 = vector.load %arg5[%c0_24, %c0_25] : memref<1x32xf32, #tpu.memory_space<vmem>>, vector<1x32xf32>
      %37 = arith.mulf %25, %35 : vector<1x32xf32>
      %38 = arith.subf %36, %37 : vector<1x32xf32>
      %39 = tpu.concatenate %35, %38 in 0 : vector<1x32xf32>, vector<1x32xf32> -> vector<2x32xf32>
      %c0_26 = arith.constant 0 : index
      %c0_27 = arith.constant 0 : index
      %40 = vector.load %arg7[%c0_26, %c0_27] : memref<2x32xf32, #tpu.memory_space<vmem>>, vector<2x32xf32>
      tpu.vector_store %arg7[%c0_26, %c0_27], %39 {strides = array<i32>} : memref<2x32xf32, #tpu.memory_space<vmem>>, vector<2x32xf32>,
    } else {
    }
    return
  }
  func.func @transform_0(%arg0: i32) -> (i32, i32) {
    %c0_i32 = arith.constant 0 : i32
    %c0_i32_0 = arith.constant 0 : i32
    return %arg0, %c0_i32 : i32, i32
  }
  func.func @transform_1(%arg0: i32) -> (i32, i32) {
    %c0_i32 = arith.constant 0 : i32
    %c0_i32_0 = arith.constant 0 : i32
    %c0_i32_1 = arith.constant 0 : i32
    return %c0_i32, %c0_i32_0 : i32, i32
  }
  func.func @transform_2(%arg0: i32) -> (i32, i32) {
    %c0_i32 = arith.constant 0 : i32
    %c0_i32_0 = arith.constant 0 : i32
    %c0_i32_1 = arith.constant 0 : i32
    return %c0_i32, %c0_i32_0 : i32, i32
  }
  func.func @transform_3(%arg0: i32) -> (i32, i32) {
    %c0_i32 = arith.constant 0 : i32
    %c0_i32_0 = arith.constant 0 : i32
    %c0_i32_1 = arith.constant 0 : i32
    return %c0_i32, %c0_i32_0 : i32, i32
  }
  func.func @transform_4(%arg0: i32) -> (i32, i32) {
    %c0_i32 = arith.constant 0 : i32
    %c0_i32_0 = arith.constant 0 : i32
    %c0_i32_1 = arith.constant 0 : i32
    return %c0_i32, %c0_i32_0 : i32, i32
  }
  func.func @transform_5(%arg0: i32) -> (i32, i32) {
    %c0_i32 = arith.constant 0 : i32
    %c0_i32_0 = arith.constant 0 : i32
    return %arg0, %c0_i32 : i32, i32
  }
  func.func @transform_6(%arg0: i32) -> (i32, i32) {
    %c0_i32 = arith.constant 0 : i32
    %c0_i32_0 = arith.constant 0 : i32
    %c0_i32_1 = arith.constant 0 : i32
    return %c0_i32, %c0_i32_0 : i32, i32
  }
}

module attributes {stable_mosaic.version = 11 : i64} {
  func.func @conv_stats_kernel(%arg0: i32, %arg1: memref<162x512xbf16, #tpu.memory_space<vmem>>, %arg2: memref<2x512xf32, #tpu.memory_space<vmem>>, %arg3: memref<512x64xbf16, #tpu.memory_space<vmem>>, %arg4: memref<1x64xf32, #tpu.memory_space<vmem>>, %arg5: memref<1x64xf32, #tpu.memory_space<vmem>>, %arg6: memref<1x64xf32, #tpu.memory_space<vmem>>, %arg7: memref<162x64xbf16, #tpu.memory_space<vmem>>, %arg8: memref<2x64xf32, #tpu.memory_space<vmem>>, %arg9: memref<2x64xf32, #tpu.memory_space<vmem>>) attributes {dimension_semantics = [#tpu.dimension_semantics<arbitrary>], iteration_bounds = array<i64: 1>, scalar_prefetch = 0 : i64, scratch_operands = 1 : i64, tpu.core_type = #tpu.core_type<tc>, window_params = [{transform_indices = @transform_0, window_bounds = array<i64: 162, 512>}, {pipeline_mode = #tpu.pipeline_mode<synchronous>, transform_indices = @transform_1, window_bounds = array<i64: 2, 512>}, {pipeline_mode = #tpu.pipeline_mode<synchronous>, transform_indices = @transform_2, window_bounds = array<i64: 512, 64>}, {pipeline_mode = #tpu.pipeline_mode<synchronous>, transform_indices = @transform_3, window_bounds = array<i64: 1, 64>}, {pipeline_mode = #tpu.pipeline_mode<synchronous>, transform_indices = @transform_4, window_bounds = array<i64: 1, 64>}, {pipeline_mode = #tpu.pipeline_mode<synchronous>, transform_indices = @transform_5, window_bounds = array<i64: 1, 64>}, {transform_indices = @transform_6, window_bounds = array<i64: 162, 64>}, {pipeline_mode = #tpu.pipeline_mode<synchronous>, transform_indices = @transform_7, window_bounds = array<i64: 2, 64>}]} {
    %c0 = arith.constant 0 : index
    %c0_0 = arith.constant 0 : index
    %0 = vector.load %arg1[%c0, %c0_0] : memref<162x512xbf16, #tpu.memory_space<vmem>>, vector<162x512xbf16>
    %1 = arith.extf %0 : vector<162x512xbf16> to vector<162x512xf32>
    %c0_1 = arith.constant 0 : index
    %c0_2 = arith.constant 0 : index
    %2 = vector.load %arg2[%c0_1, %c0_2] : memref<2x512xf32, #tpu.memory_space<vmem>>, vector<1x512xf32>
    %3 = vector.broadcast %2 : vector<1x512xf32> to vector<162x512xf32>
    %4 = arith.mulf %1, %3 : vector<162x512xf32>
    %c1 = arith.constant 1 : index
    %c0_3 = arith.constant 0 : index
    %5 = vector.load %arg2[%c1, %c0_3] : memref<2x512xf32, #tpu.memory_space<vmem>>, vector<1x512xf32>
    %6 = vector.broadcast %5 : vector<1x512xf32> to vector<162x512xf32>
    %7 = arith.addf %4, %6 : vector<162x512xf32>
    %cst = arith.constant 0.000000e+00 : f32
    %8 = vector.broadcast %cst : f32 to vector<162x512xf32>
    %9 = arith.maximumf %7, %8 : vector<162x512xf32>
    %10 = arith.truncf %9 : vector<162x512xf32> to vector<162x512xbf16>
    %c0_4 = arith.constant 0 : index
    %c0_5 = arith.constant 0 : index
    %11 = vector.load %arg3[%c0_4, %c0_5] : memref<512x64xbf16, #tpu.memory_space<vmem>>, vector<512x64xbf16>
    %cst_6 = arith.constant dense<0.000000e+00> : vector<162x64xf32>
    %12 = tpu.matmul %10, %11, %cst_6 {dimension_numbers = #tpu.dot_dimension_numbers<[1], [0], [0], [1], [0, 0, 1, 1], [], []>} : vector<162x512xbf16>, vector<512x64xbf16>, vector<162x64xf32> -> vector<162x64xf32>
    %c0_7 = arith.constant 0 : index
    %c0_8 = arith.constant 0 : index
    %13 = vector.load %arg4[%c0_7, %c0_8] : memref<1x64xf32, #tpu.memory_space<vmem>>, vector<1x64xf32>
    %14 = vector.broadcast %13 : vector<1x64xf32> to vector<162x64xf32>
    %15 = arith.addf %12, %14 : vector<162x64xf32>
    %16 = arith.truncf %15 : vector<162x64xf32> to vector<162x64xbf16>
    %c0_9 = arith.constant 0 : index
    %c0_10 = arith.constant 0 : index
    %17 = vector.load %arg7[%c0_9, %c0_10] : memref<162x64xbf16, #tpu.memory_space<vmem>>, vector<162x64xbf16>
    tpu.vector_store %arg7[%c0_9, %c0_10], %16 {strides = array<i32>} : memref<162x64xbf16, #tpu.memory_space<vmem>>, vector<162x64xbf16>,
    %cst_11 = arith.constant dense<0.000000e+00> : vector<64xf32>
    %18 = vector.multi_reduction <add>, %15, %cst_11 [0] : vector<162x64xf32> to vector<64xf32>
    %19 = vector.shape_cast %18 : vector<64xf32> to vector<1x64xf32>
    %20 = arith.mulf %15, %15 : vector<162x64xf32>
    %cst_12 = arith.constant dense<0.000000e+00> : vector<64xf32>
    %21 = vector.multi_reduction <add>, %20, %cst_12 [0] : vector<162x64xf32> to vector<64xf32>
    %22 = vector.shape_cast %21 : vector<64xf32> to vector<1x64xf32>
    %23 = tpu.concatenate %19, %22 in 0 : vector<1x64xf32>, vector<1x64xf32> -> vector<2x64xf32>
    %c0_i32 = arith.constant 0 : i32
    %24 = arith.cmpi eq, %arg0, %c0_i32 : i32
    %25 = arith.extui %24 : i1 to i32
    %c0_i32_13 = arith.constant 0 : i32
    %26 = arith.cmpi ne, %25, %c0_i32_13 : i32
    scf.if %26 {
      %cst_20 = arith.constant 0.000000e+00 : f32
      %33 = vector.broadcast %cst_20 : f32 to vector<2x64xf32>
      %c0_21 = arith.constant 0 : index
      %c0_22 = arith.constant 0 : index
      %34 = vector.load %arg9[%c0_21, %c0_22] : memref<2x64xf32, #tpu.memory_space<vmem>>, vector<2x64xf32>
      tpu.vector_store %arg9[%c0_21, %c0_22], %33 {strides = array<i32>} : memref<2x64xf32, #tpu.memory_space<vmem>>, vector<2x64xf32>,
    } else {
    }
    %c0_14 = arith.constant 0 : index
    %c0_15 = arith.constant 0 : index
    %27 = vector.load %arg9[%c0_14, %c0_15] : memref<2x64xf32, #tpu.memory_space<vmem>>, vector<2x64xf32>
    %28 = arith.addf %27, %23 : vector<2x64xf32>
    %c0_16 = arith.constant 0 : index
    %c0_17 = arith.constant 0 : index
    %29 = vector.load %arg9[%c0_16, %c0_17] : memref<2x64xf32, #tpu.memory_space<vmem>>, vector<2x64xf32>
    tpu.vector_store %arg9[%c0_16, %c0_17], %28 {strides = array<i32>} : memref<2x64xf32, #tpu.memory_space<vmem>>, vector<2x64xf32>,
    %c0_i32_18 = arith.constant 0 : i32
    %30 = arith.cmpi eq, %arg0, %c0_i32_18 : i32
    %31 = arith.extui %30 : i1 to i32
    %c0_i32_19 = arith.constant 0 : i32
    %32 = arith.cmpi ne, %31, %c0_i32_19 : i32
    scf.if %32 {
      %c0_20 = arith.constant 0 : index
      %c0_21 = arith.constant 0 : index
      %33 = vector.load %arg9[%c0_20, %c0_21] : memref<2x64xf32, #tpu.memory_space<vmem>>, vector<1x64xf32>
      %cst_22 = arith.constant 0.00617283955 : f32
      %34 = vector.broadcast %cst_22 : f32 to vector<1x64xf32>
      %35 = arith.mulf %33, %34 : vector<1x64xf32>
      %c1_23 = arith.constant 1 : index
      %c0_24 = arith.constant 0 : index
      %36 = vector.load %arg9[%c1_23, %c0_24] : memref<2x64xf32, #tpu.memory_space<vmem>>, vector<1x64xf32>
      %cst_25 = arith.constant 0.00617283955 : f32
      %37 = vector.broadcast %cst_25 : f32 to vector<1x64xf32>
      %38 = arith.mulf %36, %37 : vector<1x64xf32>
      %39 = arith.mulf %35, %35 : vector<1x64xf32>
      %40 = arith.subf %38, %39 : vector<1x64xf32>
      %c0_26 = arith.constant 0 : index
      %c0_27 = arith.constant 0 : index
      %41 = vector.load %arg5[%c0_26, %c0_27] : memref<1x64xf32, #tpu.memory_space<vmem>>, vector<1x64xf32>
      %cst_28 = arith.constant 9.99999974E-6 : f32
      %42 = vector.broadcast %cst_28 : f32 to vector<1x64xf32>
      %43 = arith.addf %40, %42 : vector<1x64xf32>
      %44 = math.rsqrt %43 : vector<1x64xf32>
      %45 = arith.mulf %41, %44 : vector<1x64xf32>
      %c0_29 = arith.constant 0 : index
      %c0_30 = arith.constant 0 : index
      %46 = vector.load %arg6[%c0_29, %c0_30] : memref<1x64xf32, #tpu.memory_space<vmem>>, vector<1x64xf32>
      %47 = arith.mulf %35, %45 : vector<1x64xf32>
      %48 = arith.subf %46, %47 : vector<1x64xf32>
      %49 = tpu.concatenate %45, %48 in 0 : vector<1x64xf32>, vector<1x64xf32> -> vector<2x64xf32>
      %c0_31 = arith.constant 0 : index
      %c0_32 = arith.constant 0 : index
      %50 = vector.load %arg8[%c0_31, %c0_32] : memref<2x64xf32, #tpu.memory_space<vmem>>, vector<2x64xf32>
      tpu.vector_store %arg8[%c0_31, %c0_32], %49 {strides = array<i32>} : memref<2x64xf32, #tpu.memory_space<vmem>>, vector<2x64xf32>,
    } else {
    }
    return
  }
  func.func @transform_0(%arg0: i32) -> (i32, i32) {
    %c0_i32 = arith.constant 0 : i32
    %c0_i32_0 = arith.constant 0 : i32
    return %arg0, %c0_i32 : i32, i32
  }
  func.func @transform_1(%arg0: i32) -> (i32, i32) {
    %c0_i32 = arith.constant 0 : i32
    %c0_i32_0 = arith.constant 0 : i32
    %c0_i32_1 = arith.constant 0 : i32
    return %c0_i32, %c0_i32_0 : i32, i32
  }
  func.func @transform_2(%arg0: i32) -> (i32, i32) {
    %c0_i32 = arith.constant 0 : i32
    %c0_i32_0 = arith.constant 0 : i32
    %c0_i32_1 = arith.constant 0 : i32
    return %c0_i32, %c0_i32_0 : i32, i32
  }
  func.func @transform_3(%arg0: i32) -> (i32, i32) {
    %c0_i32 = arith.constant 0 : i32
    %c0_i32_0 = arith.constant 0 : i32
    %c0_i32_1 = arith.constant 0 : i32
    return %c0_i32, %c0_i32_0 : i32, i32
  }
  func.func @transform_4(%arg0: i32) -> (i32, i32) {
    %c0_i32 = arith.constant 0 : i32
    %c0_i32_0 = arith.constant 0 : i32
    %c0_i32_1 = arith.constant 0 : i32
    return %c0_i32, %c0_i32_0 : i32, i32
  }
  func.func @transform_5(%arg0: i32) -> (i32, i32) {
    %c0_i32 = arith.constant 0 : i32
    %c0_i32_0 = arith.constant 0 : i32
    %c0_i32_1 = arith.constant 0 : i32
    return %c0_i32, %c0_i32_0 : i32, i32
  }
  func.func @transform_6(%arg0: i32) -> (i32, i32) {
    %c0_i32 = arith.constant 0 : i32
    %c0_i32_0 = arith.constant 0 : i32
    return %arg0, %c0_i32 : i32, i32
  }
  func.func @transform_7(%arg0: i32) -> (i32, i32) {
    %c0_i32 = arith.constant 0 : i32
    %c0_i32_0 = arith.constant 0 : i32
    %c0_i32_1 = arith.constant 0 : i32
    return %c0_i32, %c0_i32_0 : i32, i32
  }
}

module attributes {stable_mosaic.version = 11 : i64} {
  func.func @conv_stats_kernel(%arg0: i32, %arg1: memref<98x640xbf16, #tpu.memory_space<vmem>>, %arg2: memref<2x640xf32, #tpu.memory_space<vmem>>, %arg3: memref<640x64xbf16, #tpu.memory_space<vmem>>, %arg4: memref<1x64xf32, #tpu.memory_space<vmem>>, %arg5: memref<1x64xf32, #tpu.memory_space<vmem>>, %arg6: memref<1x64xf32, #tpu.memory_space<vmem>>, %arg7: memref<98x64xbf16, #tpu.memory_space<vmem>>, %arg8: memref<2x64xf32, #tpu.memory_space<vmem>>, %arg9: memref<2x64xf32, #tpu.memory_space<vmem>>) attributes {dimension_semantics = [#tpu.dimension_semantics<arbitrary>], iteration_bounds = array<i64: 1>, scalar_prefetch = 0 : i64, scratch_operands = 1 : i64, tpu.core_type = #tpu.core_type<tc>, window_params = [{transform_indices = @transform_0, window_bounds = array<i64: 98, 640>}, {pipeline_mode = #tpu.pipeline_mode<synchronous>, transform_indices = @transform_1, window_bounds = array<i64: 2, 640>}, {pipeline_mode = #tpu.pipeline_mode<synchronous>, transform_indices = @transform_2, window_bounds = array<i64: 640, 64>}, {pipeline_mode = #tpu.pipeline_mode<synchronous>, transform_indices = @transform_3, window_bounds = array<i64: 1, 64>}, {pipeline_mode = #tpu.pipeline_mode<synchronous>, transform_indices = @transform_4, window_bounds = array<i64: 1, 64>}, {pipeline_mode = #tpu.pipeline_mode<synchronous>, transform_indices = @transform_5, window_bounds = array<i64: 1, 64>}, {transform_indices = @transform_6, window_bounds = array<i64: 98, 64>}, {pipeline_mode = #tpu.pipeline_mode<synchronous>, transform_indices = @transform_7, window_bounds = array<i64: 2, 64>}]} {
    %c0 = arith.constant 0 : index
    %c0_0 = arith.constant 0 : index
    %0 = vector.load %arg1[%c0, %c0_0] : memref<98x640xbf16, #tpu.memory_space<vmem>>, vector<98x640xbf16>
    %1 = arith.extf %0 : vector<98x640xbf16> to vector<98x640xf32>
    %c0_1 = arith.constant 0 : index
    %c0_2 = arith.constant 0 : index
    %2 = vector.load %arg2[%c0_1, %c0_2] : memref<2x640xf32, #tpu.memory_space<vmem>>, vector<1x640xf32>
    %3 = vector.broadcast %2 : vector<1x640xf32> to vector<98x640xf32>
    %4 = arith.mulf %1, %3 : vector<98x640xf32>
    %c1 = arith.constant 1 : index
    %c0_3 = arith.constant 0 : index
    %5 = vector.load %arg2[%c1, %c0_3] : memref<2x640xf32, #tpu.memory_space<vmem>>, vector<1x640xf32>
    %6 = vector.broadcast %5 : vector<1x640xf32> to vector<98x640xf32>
    %7 = arith.addf %4, %6 : vector<98x640xf32>
    %cst = arith.constant 0.000000e+00 : f32
    %8 = vector.broadcast %cst : f32 to vector<98x640xf32>
    %9 = arith.maximumf %7, %8 : vector<98x640xf32>
    %10 = arith.truncf %9 : vector<98x640xf32> to vector<98x640xbf16>
    %c0_4 = arith.constant 0 : index
    %c0_5 = arith.constant 0 : index
    %11 = vector.load %arg3[%c0_4, %c0_5] : memref<640x64xbf16, #tpu.memory_space<vmem>>, vector<640x64xbf16>
    %cst_6 = arith.constant dense<0.000000e+00> : vector<98x64xf32>
    %12 = tpu.matmul %10, %11, %cst_6 {dimension_numbers = #tpu.dot_dimension_numbers<[1], [0], [0], [1], [0, 0, 1, 1], [], []>} : vector<98x640xbf16>, vector<640x64xbf16>, vector<98x64xf32> -> vector<98x64xf32>
    %c0_7 = arith.constant 0 : index
    %c0_8 = arith.constant 0 : index
    %13 = vector.load %arg4[%c0_7, %c0_8] : memref<1x64xf32, #tpu.memory_space<vmem>>, vector<1x64xf32>
    %14 = vector.broadcast %13 : vector<1x64xf32> to vector<98x64xf32>
    %15 = arith.addf %12, %14 : vector<98x64xf32>
    %16 = arith.truncf %15 : vector<98x64xf32> to vector<98x64xbf16>
    %c0_9 = arith.constant 0 : index
    %c0_10 = arith.constant 0 : index
    %17 = vector.load %arg7[%c0_9, %c0_10] : memref<98x64xbf16, #tpu.memory_space<vmem>>, vector<98x64xbf16>
    tpu.vector_store %arg7[%c0_9, %c0_10], %16 {strides = array<i32>} : memref<98x64xbf16, #tpu.memory_space<vmem>>, vector<98x64xbf16>,
    %cst_11 = arith.constant dense<0.000000e+00> : vector<64xf32>
    %18 = vector.multi_reduction <add>, %15, %cst_11 [0] : vector<98x64xf32> to vector<64xf32>
    %19 = vector.shape_cast %18 : vector<64xf32> to vector<1x64xf32>
    %20 = arith.mulf %15, %15 : vector<98x64xf32>
    %cst_12 = arith.constant dense<0.000000e+00> : vector<64xf32>
    %21 = vector.multi_reduction <add>, %20, %cst_12 [0] : vector<98x64xf32> to vector<64xf32>
    %22 = vector.shape_cast %21 : vector<64xf32> to vector<1x64xf32>
    %23 = tpu.concatenate %19, %22 in 0 : vector<1x64xf32>, vector<1x64xf32> -> vector<2x64xf32>
    %c0_i32 = arith.constant 0 : i32
    %24 = arith.cmpi eq, %arg0, %c0_i32 : i32
    %25 = arith.extui %24 : i1 to i32
    %c0_i32_13 = arith.constant 0 : i32
    %26 = arith.cmpi ne, %25, %c0_i32_13 : i32
    scf.if %26 {
      %cst_20 = arith.constant 0.000000e+00 : f32
      %33 = vector.broadcast %cst_20 : f32 to vector<2x64xf32>
      %c0_21 = arith.constant 0 : index
      %c0_22 = arith.constant 0 : index
      %34 = vector.load %arg9[%c0_21, %c0_22] : memref<2x64xf32, #tpu.memory_space<vmem>>, vector<2x64xf32>
      tpu.vector_store %arg9[%c0_21, %c0_22], %33 {strides = array<i32>} : memref<2x64xf32, #tpu.memory_space<vmem>>, vector<2x64xf32>,
    } else {
    }
    %c0_14 = arith.constant 0 : index
    %c0_15 = arith.constant 0 : index
    %27 = vector.load %arg9[%c0_14, %c0_15] : memref<2x64xf32, #tpu.memory_space<vmem>>, vector<2x64xf32>
    %28 = arith.addf %27, %23 : vector<2x64xf32>
    %c0_16 = arith.constant 0 : index
    %c0_17 = arith.constant 0 : index
    %29 = vector.load %arg9[%c0_16, %c0_17] : memref<2x64xf32, #tpu.memory_space<vmem>>, vector<2x64xf32>
    tpu.vector_store %arg9[%c0_16, %c0_17], %28 {strides = array<i32>} : memref<2x64xf32, #tpu.memory_space<vmem>>, vector<2x64xf32>,
    %c0_i32_18 = arith.constant 0 : i32
    %30 = arith.cmpi eq, %arg0, %c0_i32_18 : i32
    %31 = arith.extui %30 : i1 to i32
    %c0_i32_19 = arith.constant 0 : i32
    %32 = arith.cmpi ne, %31, %c0_i32_19 : i32
    scf.if %32 {
      %c0_20 = arith.constant 0 : index
      %c0_21 = arith.constant 0 : index
      %33 = vector.load %arg9[%c0_20, %c0_21] : memref<2x64xf32, #tpu.memory_space<vmem>>, vector<1x64xf32>
      %cst_22 = arith.constant 0.0102040814 : f32
      %34 = vector.broadcast %cst_22 : f32 to vector<1x64xf32>
      %35 = arith.mulf %33, %34 : vector<1x64xf32>
      %c1_23 = arith.constant 1 : index
      %c0_24 = arith.constant 0 : index
      %36 = vector.load %arg9[%c1_23, %c0_24] : memref<2x64xf32, #tpu.memory_space<vmem>>, vector<1x64xf32>
      %cst_25 = arith.constant 0.0102040814 : f32
      %37 = vector.broadcast %cst_25 : f32 to vector<1x64xf32>
      %38 = arith.mulf %36, %37 : vector<1x64xf32>
      %39 = arith.mulf %35, %35 : vector<1x64xf32>
      %40 = arith.subf %38, %39 : vector<1x64xf32>
      %c0_26 = arith.constant 0 : index
      %c0_27 = arith.constant 0 : index
      %41 = vector.load %arg5[%c0_26, %c0_27] : memref<1x64xf32, #tpu.memory_space<vmem>>, vector<1x64xf32>
      %cst_28 = arith.constant 9.99999974E-6 : f32
      %42 = vector.broadcast %cst_28 : f32 to vector<1x64xf32>
      %43 = arith.addf %40, %42 : vector<1x64xf32>
      %44 = math.rsqrt %43 : vector<1x64xf32>
      %45 = arith.mulf %41, %44 : vector<1x64xf32>
      %c0_29 = arith.constant 0 : index
      %c0_30 = arith.constant 0 : index
      %46 = vector.load %arg6[%c0_29, %c0_30] : memref<1x64xf32, #tpu.memory_space<vmem>>, vector<1x64xf32>
      %47 = arith.mulf %35, %45 : vector<1x64xf32>
      %48 = arith.subf %46, %47 : vector<1x64xf32>
      %49 = tpu.concatenate %45, %48 in 0 : vector<1x64xf32>, vector<1x64xf32> -> vector<2x64xf32>
      %c0_31 = arith.constant 0 : index
      %c0_32 = arith.constant 0 : index
      %50 = vector.load %arg8[%c0_31, %c0_32] : memref<2x64xf32, #tpu.memory_space<vmem>>, vector<2x64xf32>
      tpu.vector_store %arg8[%c0_31, %c0_32], %49 {strides = array<i32>} : memref<2x64xf32, #tpu.memory_space<vmem>>, vector<2x64xf32>,
    } else {
    }
    return
  }
  func.func @transform_0(%arg0: i32) -> (i32, i32) {
    %c0_i32 = arith.constant 0 : i32
    %c0_i32_0 = arith.constant 0 : i32
    return %arg0, %c0_i32 : i32, i32
  }
  func.func @transform_1(%arg0: i32) -> (i32, i32) {
    %c0_i32 = arith.constant 0 : i32
    %c0_i32_0 = arith.constant 0 : i32
    %c0_i32_1 = arith.constant 0 : i32
    return %c0_i32, %c0_i32_0 : i32, i32
  }
  func.func @transform_2(%arg0: i32) -> (i32, i32) {
    %c0_i32 = arith.constant 0 : i32
    %c0_i32_0 = arith.constant 0 : i32
    %c0_i32_1 = arith.constant 0 : i32
    return %c0_i32, %c0_i32_0 : i32, i32
  }
  func.func @transform_3(%arg0: i32) -> (i32, i32) {
    %c0_i32 = arith.constant 0 : i32
    %c0_i32_0 = arith.constant 0 : i32
    %c0_i32_1 = arith.constant 0 : i32
    return %c0_i32, %c0_i32_0 : i32, i32
  }
  func.func @transform_4(%arg0: i32) -> (i32, i32) {
    %c0_i32 = arith.constant 0 : i32
    %c0_i32_0 = arith.constant 0 : i32
    %c0_i32_1 = arith.constant 0 : i32
    return %c0_i32, %c0_i32_0 : i32, i32
  }
  func.func @transform_5(%arg0: i32) -> (i32, i32) {
    %c0_i32 = arith.constant 0 : i32
    %c0_i32_0 = arith.constant 0 : i32
    %c0_i32_1 = arith.constant 0 : i32
    return %c0_i32, %c0_i32_0 : i32, i32
  }
  func.func @transform_6(%arg0: i32) -> (i32, i32) {
    %c0_i32 = arith.constant 0 : i32
    %c0_i32_0 = arith.constant 0 : i32
    return %arg0, %c0_i32 : i32, i32
  }
  func.func @transform_7(%arg0: i32) -> (i32, i32) {
    %c0_i32 = arith.constant 0 : i32
    %c0_i32_0 = arith.constant 0 : i32
    %c0_i32_1 = arith.constant 0 : i32
    return %c0_i32, %c0_i32_0 : i32, i32
  }
}

module attributes {stable_mosaic.version = 11 : i64} {
  func.func @duel_head_kernel(%arg0: i32, %arg1: memref<2x3136xbf16, #tpu.memory_space<vmem>>, %arg2: memref<2x3136xf32, #tpu.memory_space<vmem>>, %arg3: memref<3136x256xbf16, #tpu.memory_space<vmem>>, %arg4: memref<1x256xf32, #tpu.memory_space<vmem>>, %arg5: memref<256x5xbf16, #tpu.memory_space<vmem>>, %arg6: memref<1x5xf32, #tpu.memory_space<vmem>>, %arg7: memref<2x4xf32, #tpu.memory_space<vmem>>, %arg8: memref<2x5xf32, #tpu.memory_space<vmem>>) attributes {dimension_semantics = [#tpu.dimension_semantics<arbitrary>], iteration_bounds = array<i64: 2>, scalar_prefetch = 0 : i64, scratch_operands = 1 : i64, tpu.core_type = #tpu.core_type<tc>, window_params = [{transform_indices = @transform_0, window_bounds = array<i64: 2, 3136>}, {pipeline_mode = #tpu.pipeline_mode<synchronous>, transform_indices = @transform_1, window_bounds = array<i64: 2, 3136>}, {pipeline_mode = #tpu.pipeline_mode<synchronous>, transform_indices = @transform_2, window_bounds = array<i64: 3136, 256>}, {pipeline_mode = #tpu.pipeline_mode<synchronous>, transform_indices = @transform_3, window_bounds = array<i64: 1, 256>}, {pipeline_mode = #tpu.pipeline_mode<synchronous>, transform_indices = @transform_4, window_bounds = array<i64: 256, 5>}, {pipeline_mode = #tpu.pipeline_mode<synchronous>, transform_indices = @transform_5, window_bounds = array<i64: 1, 5>}, {pipeline_mode = #tpu.pipeline_mode<synchronous>, transform_indices = @transform_6, window_bounds = array<i64: 2, 4>}]} {
    %c1_i32 = arith.constant 1 : i32
    %0 = arith.cmpi slt, %arg0, %c1_i32 : i32
    %1 = arith.extui %0 : i1 to i32
    %c0_i32 = arith.constant 0 : i32
    %2 = arith.cmpi ne, %1, %c0_i32 : i32
    scf.if %2 {
      %c0 = arith.constant 0 : index
      %c0_2 = arith.constant 0 : index
      %6 = vector.load %arg1[%c0, %c0_2] : memref<2x3136xbf16, #tpu.memory_space<vmem>>, vector<2x3136xbf16>
      %7 = arith.extf %6 : vector<2x3136xbf16> to vector<2x3136xf32>
      %c0_3 = arith.constant 0 : index
      %c0_4 = arith.constant 0 : index
      %8 = vector.load %arg2[%c0_3, %c0_4] : memref<2x3136xf32, #tpu.memory_space<vmem>>, vector<1x3136xf32>
      %9 = vector.broadcast %8 : vector<1x3136xf32> to vector<2x3136xf32>
      %10 = arith.mulf %7, %9 : vector<2x3136xf32>
      %c1 = arith.constant 1 : index
      %c0_5 = arith.constant 0 : index
      %11 = vector.load %arg2[%c1, %c0_5] : memref<2x3136xf32, #tpu.memory_space<vmem>>, vector<1x3136xf32>
      %12 = vector.broadcast %11 : vector<1x3136xf32> to vector<2x3136xf32>
      %13 = arith.addf %10, %12 : vector<2x3136xf32>
      %cst = arith.constant 0.000000e+00 : f32
      %14 = vector.broadcast %cst : f32 to vector<2x3136xf32>
      %15 = arith.maximumf %13, %14 : vector<2x3136xf32>
      %16 = arith.truncf %15 : vector<2x3136xf32> to vector<2x3136xbf16>
      %c0_6 = arith.constant 0 : index
      %c0_7 = arith.constant 0 : index
      %17 = vector.load %arg3[%c0_6, %c0_7] : memref<3136x256xbf16, #tpu.memory_space<vmem>>, vector<3136x256xbf16>
      %cst_8 = arith.constant dense<0.000000e+00> : vector<2x256xf32>
      %18 = tpu.matmul %16, %17, %cst_8 {dimension_numbers = #tpu.dot_dimension_numbers<[1], [0], [0], [1], [0, 0, 1, 1], [], []>} : vector<2x3136xbf16>, vector<3136x256xbf16>, vector<2x256xf32> -> vector<2x256xf32>
      %c0_9 = arith.constant 0 : index
      %c0_10 = arith.constant 0 : index
      %19 = vector.load %arg4[%c0_9, %c0_10] : memref<1x256xf32, #tpu.memory_space<vmem>>, vector<1x256xf32>
      %20 = vector.broadcast %19 : vector<1x256xf32> to vector<2x256xf32>
      %21 = arith.addf %18, %20 : vector<2x256xf32>
      %cst_11 = arith.constant 0.000000e+00 : f32
      %22 = vector.broadcast %cst_11 : f32 to vector<2x256xf32>
      %23 = arith.cmpf oge, %21, %22 : vector<2x256xf32>
      %cst_12 = arith.constant 0.00999999977 : f32
      %24 = vector.broadcast %cst_12 : f32 to vector<2x256xf32>
      %25 = arith.mulf %24, %21 : vector<2x256xf32>
      %26 = arith.select %23, %21, %25 : vector<2x256xi1>, vector<2x256xf32>
      %27 = arith.truncf %26 : vector<2x256xf32> to vector<2x256xbf16>
      %c0_13 = arith.constant 0 : index
      %c0_14 = arith.constant 0 : index
      %28 = vector.load %arg5[%c0_13, %c0_14] : memref<256x5xbf16, #tpu.memory_space<vmem>>, vector<256x5xbf16>
      %cst_15 = arith.constant dense<0.000000e+00> : vector<2x5xf32>
      %29 = tpu.matmul %27, %28, %cst_15 {dimension_numbers = #tpu.dot_dimension_numbers<[1], [0], [0], [1], [0, 0, 1, 1], [], []>} : vector<2x256xbf16>, vector<256x5xbf16>, vector<2x5xf32> -> vector<2x5xf32>
      %c0_16 = arith.constant 0 : index
      %c0_17 = arith.constant 0 : index
      %30 = vector.load %arg6[%c0_16, %c0_17] : memref<1x5xf32, #tpu.memory_space<vmem>>, vector<1x5xf32>
      %31 = vector.broadcast %30 : vector<1x5xf32> to vector<2x5xf32>
      %32 = arith.addf %29, %31 : vector<2x5xf32>
      %c0_18 = arith.constant 0 : index
      %c0_19 = arith.constant 0 : index
      %33 = vector.load %arg8[%c0_18, %c0_19] : memref<2x5xf32, #tpu.memory_space<vmem>>, vector<2x5xf32>
      tpu.vector_store %arg8[%c0_18, %c0_19], %32 {strides = array<i32>} : memref<2x5xf32, #tpu.memory_space<vmem>>, vector<2x5xf32>,
    } else {
    }
    %c1_i32_0 = arith.constant 1 : i32
    %3 = arith.cmpi eq, %arg0, %c1_i32_0 : i32
    %4 = arith.extui %3 : i1 to i32
    %c0_i32_1 = arith.constant 0 : i32
    %5 = arith.cmpi ne, %4, %c0_i32_1 : i32
    scf.if %5 {
      %c0 = arith.constant 0 : index
      %c0_2 = arith.constant 0 : index
      %6 = vector.load %arg8[%c0, %c0_2] : memref<2x5xf32, #tpu.memory_space<vmem>>, vector<2x5xf32>
      %7 = vector.extract_strided_slice %6 {offsets = [0, 0], sizes = [2, 4], strides = [1, 1]} : vector<2x5xf32> to vector<2x4xf32>
      %8 = vector.extract_strided_slice %6 {offsets = [0, 4], sizes = [2, 1], strides = [1, 1]} : vector<2x5xf32> to vector<2x1xf32>
      %9 = vector.shape_cast %7 : vector<2x4xf32> to vector<1x2x4xf32>
      %cst = arith.constant dense<0.000000e+00> : vector<1xf32>
      %10 = vector.multi_reduction <add>, %9, %cst [1, 2] : vector<1x2x4xf32> to vector<1xf32>
      %11 = vector.shape_cast %10 : vector<1xf32> to vector<1x1x1xf32>
      %12 = vector.extract %11[0, 0, 0] : f32 from vector<1x1x1xf32>
      %cst_3 = arith.constant 8.000000e+00 : f32
      %13 = arith.divf %12, %cst_3 : f32
      %14 = vector.broadcast %13 : f32 to vector<2x4xf32>
      %15 = arith.subf %7, %14 : vector<2x4xf32>
      %16 = vector.broadcast %8 : vector<2x1xf32> to vector<2x4xf32>
      %17 = arith.addf %16, %15 : vector<2x4xf32>
      %c0_4 = arith.constant 0 : index
      %c0_5 = arith.constant 0 : index
      %18 = vector.load %arg7[%c0_4, %c0_5] : memref<2x4xf32, #tpu.memory_space<vmem>>, vector<2x4xf32>
      tpu.vector_store %arg7[%c0_4, %c0_5], %17 {strides = array<i32>} : memref<2x4xf32, #tpu.memory_space<vmem>>, vector<2x4xf32>,
    } else {
    }
    return
  }
  func.func @transform_0(%arg0: i32) -> (i32, i32) {
    %c0_i32 = arith.constant 0 : i32
    %0 = arith.minsi %arg0, %c0_i32 : i32
    %c0_i32_0 = arith.constant 0 : i32
    %c0_i32_1 = arith.constant 0 : i32
    return %0, %c0_i32_0 : i32, i32
  }
  func.func @transform_1(%arg0: i32) -> (i32, i32) {
    %c0_i32 = arith.constant 0 : i32
    %c0_i32_0 = arith.constant 0 : i32
    %c0_i32_1 = arith.constant 0 : i32
    return %c0_i32, %c0_i32_0 : i32, i32
  }
  func.func @transform_2(%arg0: i32) -> (i32, i32) {
    %c0_i32 = arith.constant 0 : i32
    %c0_i32_0 = arith.constant 0 : i32
    %c0_i32_1 = arith.constant 0 : i32
    return %c0_i32, %c0_i32_0 : i32, i32
  }
  func.func @transform_3(%arg0: i32) -> (i32, i32) {
    %c0_i32 = arith.constant 0 : i32
    %c0_i32_0 = arith.constant 0 : i32
    %c0_i32_1 = arith.constant 0 : i32
    return %c0_i32, %c0_i32_0 : i32, i32
  }
  func.func @transform_4(%arg0: i32) -> (i32, i32) {
    %c0_i32 = arith.constant 0 : i32
    %c0_i32_0 = arith.constant 0 : i32
    %c0_i32_1 = arith.constant 0 : i32
    return %c0_i32, %c0_i32_0 : i32, i32
  }
  func.func @transform_5(%arg0: i32) -> (i32, i32) {
    %c0_i32 = arith.constant 0 : i32
    %c0_i32_0 = arith.constant 0 : i32
    %c0_i32_1 = arith.constant 0 : i32
    return %c0_i32, %c0_i32_0 : i32, i32
  }
  func.func @transform_6(%arg0: i32) -> (i32, i32) {
    %c0_i32 = arith.constant 0 : i32
    %c0_i32_0 = arith.constant 0 : i32
    %c0_i32_1 = arith.constant 0 : i32
    return %c0_i32, %c0_i32_0 : i32, i32
  }
}

</mosaic_0001>

<bundles_post_ra>
// kernel: dqn_forward.4
= control target key start
LH: loop header
LB: loop body
LE: loop exit
PB: predicated region body
PF: predicated region fallthrough
CT: control target
= control target key end

     0   :  { %v2765_v0 = vmov 0   ;;  %vm1591_vm0 = vcmask 257024   ;;  %vm1692_vm1 = vcmask 261120   ;;  %vm2209_vm2 = vcmask 254976   ;;  %s4443_s1 = inlined_call_operand.vmem [shape: bf16[256,32], index: 1, kind: input, shape index: {}]   ;;  %s4444_s0 = inlined_call_operand.vmem [shape: bf16[800,256], index: 0, kind: input, shape index: {}]   ;;  %s4445_s2 = inlined_call_operand.vmem [shape: f32[1,32], index: 2, kind: input, shape index: {}]   ;;  %s4446_s5 = inlined_call_operand.vmem [shape: bf16[800,32], index: 5, kind: output, shape index: {0}]   ;;  %s4447_s3 = inlined_call_operand.vmem [shape: f32[1,32], index: 3, kind: input, shape index: {}]   ;;  %s4448_s4 = inlined_call_operand.vmem [shape: f32[1,32], index: 4, kind: input, shape index: {}]   ;;  %s4449_s6 = inlined_call_operand.vmem [shape: f32[2,32], index: 6, kind: output, shape index: {1}]  }
   0x1   :  { %758 = vmatprep.subr.bf16.mxu0 %v2765_v0  ;;  %v2598_v1 = vld [vmem:[%s4443_s1 + $0x38] sm:$0xff]   ;;  %2564 = vmatprep.subr.bf16.mxu1 %v2765_v0  ;;  %v2599_v2 = vld [vmem:[%s4443_s1 + $0x30] sm:$0xff]   ;;  %v2600_v3 = vld [vmem:[%s4443_s1 + $0x28] sm:$0xff]   ;;  %vm2203_vm3 = vcmask 1040384  }
   0x2   :  { %759 = vmatpush1.bf16.msra.mxu0 %v2598_v1  ;;  %2580 = vmatpush1.bf16.msra.mxu1 %v2598_v1  ;;  %v2601_v4 = vld [vmem:[%s4443_s1 + $0x20] sm:$0xff]   ;;  %v2602_v5 = vld [vmem:[%s4443_s1 + $0x18] sm:$0xff]   ;;  %v2603_v7 = vld [vmem:[%s4443_s1 + $0x10] sm:$0xff]  }
   0x3   :  { %760 = vmatprep.subr.bf16.mxu0 %v2765_v0  ;;  %2565 = vmatprep.subr.bf16.mxu1 %v2765_v0  ;;  %v2616_v6 = vld [vmem:[%s4444_s0 + $0x4] ss:$8 sps:$4 sm:$0xff]   ;;  %v2606_v10 = vld [vmem:[%s4443_s1 + $0x78] sm:$0xff]   ;;  %v2607_v12 = vld [vmem:[%s4443_s1 + $0x70] sm:$0xff]  }
   0x4   :  { %790 = vmatprep.mubr.bf16.mxu0 %v2616_v6  ;;  %v2604_v8 = vld [vmem:[%s4443_s1 + $0x8] sm:$0xff]   ;;  %v2605_v9 = vld [vmem:[%s4443_s1] sm:$0xff]   ;;  %v2652_v11 = vld [vmem:[%s4444_s0 + $0x194] ss:$8 sps:$4 sm:$0xff]  }
   0x5   :  { %990 = vmatprep.mubr.bf16.mxu1 %v2652_v11  ;;  %v2608_v13 = vld [vmem:[%s4443_s1 + $0x68] sm:$0xff]   ;;  %v2609_v14 = vld [vmem:[%s4443_s1 + $0x60] sm:$0xff]   ;;  %v2610_v15 = vld [vmem:[%s4443_s1 + $0x58] sm:$0xff]  }
   0x6   :  { %761 = vmatpush1.bf16.msra.mxu0 %v2599_v2  ;;  %2581 = vmatpush1.bf16.msra.mxu1 %v2599_v2  ;;  %v2611_v16 = vld [vmem:[%s4443_s1 + $0x50] sm:$0xff]   ;;  %v2612_v17 = vld [vmem:[%s4443_s1 + $0x48] sm:$0xff]   ;;  %v2613_v18 = vld [vmem:[%s4443_s1 + $0x40] sm:$0xff]  }
   0x7   :  { %762 = vmatprep.subr.bf16.mxu0 %v2765_v0  ;;  %2566 = vmatprep.subr.bf16.mxu1 %v2765_v0  ;;  %v2614_v19 = vld [vmem:[%s4444_s0] ss:$8 sps:$4 sm:$0xff]   ;;  %v2650_v20 = vld [vmem:[%s4444_s0 + $0x190] ss:$8 sps:$4 sm:$0xff]   ;;  %v2617_v21 = vld [vmem:[%s4444_s0 + $0x14] ss:$8 sps:$4 sm:$0xff]  }
   0x8   :  { %v2656_v22 = vld [vmem:[%s4444_s0 + $0x1a4] ss:$8 sps:$4 sm:$0xff]   ;;  %v2619_v23 = vld [vmem:[%s4444_s0 + $0x10] ss:$8 sps:$4 sm:$0xff]   ;;  %v2658_v24 = vld [vmem:[%s4444_s0 + $0x1a0] ss:$8 sps:$4 sm:$0xff]  }
   0x9   :  { %v2620_v25 = vld [vmem:[%s4444_s0 + $0x24] ss:$8 sps:$4 sm:$0xff]   ;;  %v2662_v26 = vld [vmem:[%s4444_s0 + $0x1b4] ss:$8 sps:$4 sm:$0xff]   ;;  %v2622_v27 = vld [vmem:[%s4444_s0 + $0x20] ss:$8 sps:$4 sm:$0xff]  }
   0xa   :  { %763 = vmatpush1.bf16.msra.mxu0 %v2600_v3  ;;  %2582 = vmatpush1.bf16.msra.mxu1 %v2600_v3  ;;  %v2664_v28 = vld [vmem:[%s4444_s0 + $0x1b0] ss:$8 sps:$4 sm:$0xff]   ;;  %v2623_v29 = vld [vmem:[%s4444_s0 + $0x34] ss:$8 sps:$4 sm:$0xff]   ;;  %v2668_v30 = vld [vmem:[%s4444_s0 + $0x1c4] ss:$8 sps:$4 sm:$0xff]  }
   0xb   :  { %764 = vmatprep.subr.bf16.mxu0 %v2765_v0  ;;  %2567 = vmatprep.subr.bf16.mxu1 %v2765_v0  ;;  %v2625_v31 = vld [vmem:[%s4444_s0 + $0x30] ss:$8 sps:$4 sm:$0xff]   ;;  %v2670_v32 = vld [vmem:[%s4444_s0 + $0x1c0] ss:$8 sps:$4 sm:$0xff]   ;;  %v2626_v33 = vld [vmem:[%s4444_s0 + $0x44] ss:$8 sps:$4 sm:$0xff]  }
   0xc   :  { %v2674_v34 = vld [vmem:[%s4444_s0 + $0x1d4] ss:$8 sps:$4 sm:$0xff]   ;;  %v2628_v35 = vld [vmem:[%s4444_s0 + $0x40] ss:$8 sps:$4 sm:$0xff]   ;;  %v2676_v36 = vld [vmem:[%s4444_s0 + $0x1d0] ss:$8 sps:$4 sm:$0xff]  }
   0xd   :  { %v2629_v37 = vld [vmem:[%s4444_s0 + $0x54] ss:$8 sps:$4 sm:$0xff]   ;;  %v2680_v38 = vld [vmem:[%s4444_s0 + $0x1e4] ss:$8 sps:$4 sm:$0xff]   ;;  %v2631_v39 = vld [vmem:[%s4444_s0 + $0x50] ss:$8 sps:$4 sm:$0xff]  }
   0xe   :  { %765 = vmatpush1.bf16.msra.mxu0 %v2601_v4  ;;  %2583 = vmatpush1.bf16.msra.mxu1 %v2601_v4  ;;  %v2682_v40 = vld [vmem:[%s4444_s0 + $0x1e0] ss:$8 sps:$4 sm:$0xff]   ;;  %v2632_v41 = vld [vmem:[%s4444_s0 + $0x64] ss:$8 sps:$4 sm:$0xff]   ;;  %v2686_v42 = vld [vmem:[%s4444_s0 + $0x1f4] ss:$8 sps:$4 sm:$0xff]  }
   0xf   :  { %766 = vmatprep.subr.bf16.mxu0 %v2765_v0  ;;  %2568 = vmatprep.subr.bf16.mxu1 %v2765_v0  ;;  %v2634_v43 = vld [vmem:[%s4444_s0 + $0x60] ss:$8 sps:$4 sm:$0xff]   ;;  %v2688_v44 = vld [vmem:[%s4444_s0 + $0x1f0] ss:$8 sps:$4 sm:$0xff]   ;;  %v2635_v45 = vld [vmem:[%s4444_s0 + $0x74] ss:$8 sps:$4 sm:$0xff]  }
  0x10   :  { %v2692_v46 = vld [vmem:[%s4444_s0 + $0x204] ss:$8 sps:$4 sm:$0xff]   ;;  %v2637_v47 = vld [vmem:[%s4444_s0 + $0x70] ss:$8 sps:$4 sm:$0xff]   ;;  %v2694_v48 = vld [vmem:[%s4444_s0 + $0x200] ss:$8 sps:$4 sm:$0xff]  }
  0x11   :  { %v2638_v49 = vld [vmem:[%s4444_s0 + $0x84] ss:$8 sps:$4 sm:$0xff]   ;;  %v2698_v50 = vld [vmem:[%s4444_s0 + $0x214] ss:$8 sps:$4 sm:$0xff]   ;;  %v2640_v51 = vld [vmem:[%s4444_s0 + $0x80] ss:$8 sps:$4 sm:$0xff]  }
  0x12   :  { %767 = vmatpush1.bf16.msra.mxu0 %v2602_v5  ;;  %2584 = vmatpush1.bf16.msra.mxu1 %v2602_v5  ;;  %v2700_v52 = vld [vmem:[%s4444_s0 + $0x210] ss:$8 sps:$4 sm:$0xff]   ;;  %v2641_v53 = vld [vmem:[%s4444_s0 + $0x94] ss:$8 sps:$4 sm:$0xff]   ;;  %v2704_v54 = vld [vmem:[%s4444_s0 + $0x224] ss:$8 sps:$4 sm:$0xff]  }
  0x13   :  { %768 = vmatprep.subr.bf16.mxu0 %v2765_v0  ;;  %2569 = vmatprep.subr.bf16.mxu1 %v2765_v0  ;;  %v2643_v55 = vld [vmem:[%s4444_s0 + $0x90] ss:$8 sps:$4 sm:$0xff]   ;;  %v2706_v56 = vld [vmem:[%s4444_s0 + $0x220] ss:$8 sps:$4 sm:$0xff]   ;;  %v2644_v57 = vld [vmem:[%s4444_s0 + $0xa4] ss:$8 sps:$4 sm:$0xff]  }
  0x14   :  { %v2710_v58 = vld [vmem:[%s4444_s0 + $0x234] ss:$8 sps:$4 sm:$0xff]   ;;  %v2646_v59 = vld [vmem:[%s4444_s0 + $0xa0] ss:$8 sps:$4 sm:$0xff]   ;;  %v2712_v60 = vld [vmem:[%s4444_s0 + $0x230] ss:$8 sps:$4 sm:$0xff]  }
  0x15   :  { %v2647_v61 = vld [vmem:[%s4444_s0 + $0xb4] ss:$8 sps:$4 sm:$0xff]   ;;  %v2716_v62 = vld [vmem:[%s4444_s0 + $0x244] ss:$8 sps:$4 sm:$0xff]   ;;  %v2649_v63 = vld [vmem:[%s4444_s0 + $0xb0] ss:$8 sps:$4 sm:$0xff]  }
  0x16   :  { %769 = vmatpush1.bf16.msra.mxu0 %v2603_v7  ;;  %2585 = vmatpush1.bf16.msra.mxu1 %v2603_v7  ;;  %v2653_v1 = vld [vmem:[%s4444_s0 + $0xc4] ss:$8 sps:$4 sm:$0xff]   ;;  %v2722_v2 = vld [vmem:[%s4444_s0 + $0x254] ss:$8 sps:$4 sm:$0xff]   ;;  %v2655_v3 = vld [vmem:[%s4444_s0 + $0xc0] ss:$8 sps:$4 sm:$0xff]  }
  0x17   :  { %770 = vmatprep.subr.bf16.mxu0 %v2765_v0  ;;  %2570 = vmatprep.subr.bf16.mxu1 %v2765_v0  ;;  %v2724_v4 = vld [vmem:[%s4444_s0 + $0x250] ss:$8 sps:$4 sm:$0xff]   ;;  %v2659_v5 = vld [vmem:[%s4444_s0 + $0xd4] ss:$8 sps:$4 sm:$0xff]   ;;  %v2727_v6 = vld [vmem:[%s4444_s0 + $0x264] ss:$8 sps:$4 sm:$0xff]  }
  0x18   :  { %v2661_v7 = vld [vmem:[%s4444_s0 + $0xd0] ss:$8 sps:$4 sm:$0xff]   ;;  %v2667_v11 = vld [vmem:[%s4444_s0 + $0xe0] ss:$8 sps:$4 sm:$0xff]  }
  0x1a   :  { %771 = vmatpush1.bf16.msra.mxu0 %v2604_v8  ;;  %2586 = vmatpush1.bf16.msra.mxu1 %v2604_v8  ;;  %v2729_v8 = vld [vmem:[%s4444_s0 + $0x260] ss:$8 sps:$4 sm:$0xff]  }
  0x1b   :  { %772 = vmatprep.subr.bf16.mxu0 %v2765_v0  ;;  %2571 = vmatprep.subr.bf16.mxu1 %v2765_v0 }
  0x1e   :  { %773 = vmatpush1.bf16.msra.mxu0 %v2605_v9  ;;  %2587 = vmatpush1.bf16.msra.mxu1 %v2605_v9  ;;  %v2665_v9 = vld [vmem:[%s4444_s0 + $0xe4] ss:$8 sps:$4 sm:$0xff]  }
  0x1f   :  { %774 = vmatprep.subr.bf16.mxu0 %v2765_v0  ;;  %2572 = vmatprep.subr.bf16.mxu1 %v2765_v0 }
  0x22   :  { %775 = vmatpush2.bf16.msra.mxu0 %v2606_v10  ;;  %2588 = vmatpush2.bf16.msra.mxu1 %v2606_v10  ;;  %v2730_v10 = vld [vmem:[%s4444_s0 + $0x274] ss:$8 sps:$4 sm:$0xff]  }
  0x23   :  { %776 = vmatprep.subr.bf16.mxu0 %v2765_v0  ;;  %2573 = vmatprep.subr.bf16.mxu1 %v2765_v0 }
  0x26   :  { %777 = vmatpush2.bf16.msra.mxu0 %v2607_v12  ;;  %2589 = vmatpush2.bf16.msra.mxu1 %v2607_v12  ;;  %v2732_v12 = vld [vmem:[%s4444_s0 + $0x270] ss:$8 sps:$4 sm:$0xff]  }
  0x27   :  { %778 = vmatprep.subr.bf16.mxu0 %v2765_v0  ;;  %2574 = vmatprep.subr.bf16.mxu1 %v2765_v0 }
  0x2a   :  { %779 = vmatpush2.bf16.msra.mxu0 %v2608_v13  ;;  %2590 = vmatpush2.bf16.msra.mxu1 %v2608_v13  ;;  %v2671_v13 = vld [vmem:[%s4444_s0 + $0xf4] ss:$8 sps:$4 sm:$0xff]  }
  0x2b   :  { %780 = vmatprep.subr.bf16.mxu0 %v2765_v0  ;;  %2575 = vmatprep.subr.bf16.mxu1 %v2765_v0 }
  0x2e   :  { %781 = vmatpush2.bf16.msra.mxu0 %v2609_v14  ;;  %2591 = vmatpush2.bf16.msra.mxu1 %v2609_v14  ;;  %v2733_v14 = vld [vmem:[%s4444_s0 + $0x284] ss:$8 sps:$4 sm:$0xff]  }
  0x2f   :  { %782 = vmatprep.subr.bf16.mxu0 %v2765_v0  ;;  %2576 = vmatprep.subr.bf16.mxu1 %v2765_v0 }
  0x32   :  { %783 = vmatpush2.bf16.msra.mxu0 %v2610_v15  ;;  %2592 = vmatpush2.bf16.msra.mxu1 %v2610_v15  ;;  %v2673_v15 = vld [vmem:[%s4444_s0 + $0xf0] ss:$8 sps:$4 sm:$0xff]  }
  0x33   :  { %784 = vmatprep.subr.bf16.mxu0 %v2765_v0  ;;  %2577 = vmatprep.subr.bf16.mxu1 %v2765_v0 }
  0x36   :  { %785 = vmatpush2.bf16.msra.mxu0 %v2611_v16  ;;  %2593 = vmatpush2.bf16.msra.mxu1 %v2611_v16  ;;  %v2735_v16 = vld [vmem:[%s4444_s0 + $0x280] ss:$8 sps:$4 sm:$0xff]  }
  0x37   :  { %786 = vmatprep.subr.bf16.mxu0 %v2765_v0  ;;  %2578 = vmatprep.subr.bf16.mxu1 %v2765_v0 }
  0x3a   :  { %787 = vmatpush2.bf16.msra.mxu0 %v2612_v17  ;;  %2594 = vmatpush2.bf16.msra.mxu1 %v2612_v17  ;;  %v2677_v17 = vld [vmem:[%s4444_s0 + $0x104] ss:$8 sps:$4 sm:$0xff]  }
  0x3b   :  { %788 = vmatprep.subr.bf16.mxu0 %v2765_v0  ;;  %2579 = vmatprep.subr.bf16.mxu1 %v2765_v0  ;;  %v2718_v0 = vld [vmem:[%s4444_s0 + $0x240] ss:$8 sps:$4 sm:$0xff]  }
  0x3e   :  { %789 = vmatpush2.bf16.msra.mxu0 %v2613_v18  ;;  %2595 = vmatpush2.bf16.msra.mxu1 %v2613_v18  ;;  %v2736_v18 = vld [vmem:[%s4444_s0 + $0x294] ss:$8 sps:$4 sm:$0xff]  }
  0x41   :  { %791 = vmatmul.mubr.bf16.vlgmr.msra.gmra.mxu0 %v2614_v19  ;;  %991 = vmatmul.mubr.bf16.vlgmr.msra.gmra.mxu1 %v2650_v20  ;;  %v2679_v19 = vld [vmem:[%s4444_s0 + $0x100] ss:$8 sps:$4 sm:$0xff]   ;;  %v2738_v20 = vld [vmem:[%s4444_s0 + $0x290] ss:$8 sps:$4 sm:$0xff]  }
  0x42   :  { %798 = vmatprep.mubr.bf16.mxu0 %v2617_v21  ;;  %998 = vmatprep.mubr.bf16.mxu1 %v2656_v22  ;;  %v2683_v21 = vld [vmem:[%s4444_s0 + $0x114] ss:$8 sps:$4 sm:$0xff]   ;;  %v2739_v22 = vld [vmem:[%s4444_s0 + $0x2a4] ss:$8 sps:$4 sm:$0xff]  }
  0x49   :  { %799 = vmatmul.mubr.bf16.gmra.mxu0 %v2619_v23  ;;  %999 = vmatmul.mubr.bf16.gmra.mxu1 %v2658_v24  ;;  %v2685_v23 = vld [vmem:[%s4444_s0 + $0x110] ss:$8 sps:$4 sm:$0xff]   ;;  %v2741_v24 = vld [vmem:[%s4444_s0 + $0x2a0] ss:$8 sps:$4 sm:$0xff]  }
  0x4a   :  { %806 = vmatprep.mubr.bf16.mxu0 %v2620_v25  ;;  %1006 = vmatprep.mubr.bf16.mxu1 %v2662_v26  ;;  %v2689_v25 = vld [vmem:[%s4444_s0 + $0x124] ss:$8 sps:$4 sm:$0xff]   ;;  %v2742_v26 = vld [vmem:[%s4444_s0 + $0x2b4] ss:$8 sps:$4 sm:$0xff]  }
  0x51   :  { %807 = vmatmul.mubr.bf16.gmra.mxu0 %v2622_v27  ;;  %1007 = vmatmul.mubr.bf16.gmra.mxu1 %v2664_v28  ;;  %v2691_v27 = vld [vmem:[%s4444_s0 + $0x120] ss:$8 sps:$4 sm:$0xff]   ;;  %v2744_v28 = vld [vmem:[%s4444_s0 + $0x2b0] ss:$8 sps:$4 sm:$0xff]  }
  0x52   :  { %814 = vmatprep.mubr.bf16.mxu0 %v2623_v29  ;;  %1014 = vmatprep.mubr.bf16.mxu1 %v2668_v30  ;;  %v2695_v29 = vld [vmem:[%s4444_s0 + $0x134] ss:$8 sps:$4 sm:$0xff]   ;;  %v2745_v30 = vld [vmem:[%s4444_s0 + $0x2c4] ss:$8 sps:$4 sm:$0xff]  }
  0x59   :  { %815 = vmatmul.mubr.bf16.gmra.mxu0 %v2625_v31  ;;  %1015 = vmatmul.mubr.bf16.gmra.mxu1 %v2670_v32  ;;  %v2697_v31 = vld [vmem:[%s4444_s0 + $0x130] ss:$8 sps:$4 sm:$0xff]   ;;  %v2747_v32 = vld [vmem:[%s4444_s0 + $0x2c0] ss:$8 sps:$4 sm:$0xff]  }
  0x5a   :  { %822 = vmatprep.mubr.bf16.mxu0 %v2626_v33  ;;  %1022 = vmatprep.mubr.bf16.mxu1 %v2674_v34  ;;  %v2701_v33 = vld [vmem:[%s4444_s0 + $0x144] ss:$8 sps:$4 sm:$0xff]   ;;  %v2748_v34 = vld [vmem:[%s4444_s0 + $0x2d4] ss:$8 sps:$4 sm:$0xff]  }
  0x61   :  { %823 = vmatmul.mubr.bf16.gmra.mxu0 %v2628_v35  ;;  %1023 = vmatmul.mubr.bf16.gmra.mxu1 %v2676_v36  ;;  %v2703_v35 = vld [vmem:[%s4444_s0 + $0x140] ss:$8 sps:$4 sm:$0xff]   ;;  %v2750_v36 = vld [vmem:[%s4444_s0 + $0x2d0] ss:$8 sps:$4 sm:$0xff]  }
  0x62   :  { %830 = vmatprep.mubr.bf16.mxu0 %v2629_v37  ;;  %1030 = vmatprep.mubr.bf16.mxu1 %v2680_v38  ;;  %v2707_v37 = vld [vmem:[%s4444_s0 + $0x154] ss:$8 sps:$4 sm:$0xff]   ;;  %v2751_v38 = vld [vmem:[%s4444_s0 + $0x2e4] ss:$8 sps:$4 sm:$0xff]  }
  0x69   :  { %831 = vmatmul.mubr.bf16.gmra.mxu0 %v2631_v39  ;;  %1031 = vmatmul.mubr.bf16.gmra.mxu1 %v2682_v40  ;;  %v2709_v39 = vld [vmem:[%s4444_s0 + $0x150] ss:$8 sps:$4 sm:$0xff]   ;;  %v2753_v40 = vld [vmem:[%s4444_s0 + $0x2e0] ss:$8 sps:$4 sm:$0xff]  }
  0x6a   :  { %838 = vmatprep.mubr.bf16.mxu0 %v2632_v41  ;;  %1038 = vmatprep.mubr.bf16.mxu1 %v2686_v42  ;;  %v2713_v41 = vld [vmem:[%s4444_s0 + $0x164] ss:$8 sps:$4 sm:$0xff]   ;;  %v2754_v42 = vld [vmem:[%s4444_s0 + $0x2f4] ss:$8 sps:$4 sm:$0xff]  }
  0x71   :  { %839 = vmatmul.mubr.bf16.gmra.mxu0 %v2634_v43  ;;  %1039 = vmatmul.mubr.bf16.gmra.mxu1 %v2688_v44  ;;  %v2715_v43 = vld [vmem:[%s4444_s0 + $0x160] ss:$8 sps:$4 sm:$0xff]   ;;  %v2756_v44 = vld [vmem:[%s4444_s0 + $0x2f0] ss:$8 sps:$4 sm:$0xff]  }
  0x72   :  { %846 = vmatprep.mubr.bf16.mxu0 %v2635_v45  ;;  %1046 = vmatprep.mubr.bf16.mxu1 %v2692_v46  ;;  %v2719_v45 = vld [vmem:[%s4444_s0 + $0x174] ss:$8 sps:$4 sm:$0xff]   ;;  %v2757_v46 = vld [vmem:[%s4444_s0 + $0x304] ss:$8 sps:$4 sm:$0xff]  }
  0x79   :  { %847 = vmatmul.mubr.bf16.gmra.mxu0 %v2637_v47  ;;  %1047 = vmatmul.mubr.bf16.gmra.mxu1 %v2694_v48  ;;  %v2721_v47 = vld [vmem:[%s4444_s0 + $0x170] ss:$8 sps:$4 sm:$0xff]   ;;  %v2759_v48 = vld [vmem:[%s4444_s0 + $0x300] ss:$8 sps:$4 sm:$0xff]  }
  0x7a   :  { %854 = vmatprep.mubr.bf16.mxu0 %v2638_v49  ;;  %1054 = vmatprep.mubr.bf16.mxu1 %v2698_v50  ;;  %v2725_v49 = vld [vmem:[%s4444_s0 + $0x184] ss:$8 sps:$4 sm:$0xff]   ;;  %v2760_v50 = vld [vmem:[%s4444_s0 + $0x314] ss:$8 sps:$4 sm:$0xff]  }
  0x81   :  { %855 = vmatmul.mubr.bf16.gmra.mxu0 %v2640_v51  ;;  %1055 = vmatmul.mubr.bf16.gmra.mxu1 %v2700_v52  ;;  %v71_v51 = vld [vmem:[%s4444_s0 + $0x180] sm:$0xff]  ;;  %v72_v52 = vld [vmem:[%s4444_s0 + $0x188] sm:$0xff] }
  0x82   :  { %862 = vmatprep.mubr.bf16.mxu0 %v2641_v53  ;;  %1062 = vmatprep.mubr.bf16.mxu1 %v2704_v54  ;;  %v121_v53 = vld [vmem:[%s4444_s0 + $0x310] sm:$0xff]  ;;  %v122_v54 = vld [vmem:[%s4444_s0 + $0x318] sm:$0xff] }
  0x89   :  { %863 = vmatmul.mubr.bf16.gmra.mxu0 %v2643_v55  ;;  %1063 = vmatmul.mubr.bf16.gmra.mxu1 %v2706_v56  ;;  %v2296_v55 = vcombine.low %v71_v51, %v72_v52  ;;  %v2346_v56 = vcombine.low %v121_v53, %v122_v54 }
  0x8a   :  { %870 = vmatprep.mubr.bf16.mxu0 %v2644_v57  ;;  %1070 = vmatprep.mubr.bf16.mxu1 %v2710_v58  ;;  %v3191_v57 = vld [vmem:[%s4445_s2] ss:$0 sm:$0xff] }
  0x91   :  { %871 = vmatmul.mubr.bf16.gmra.mxu0 %v2646_v59  ;;  %1071 = vmatmul.mubr.bf16.gmra.mxu1 %v2712_v60 }
  0x92   :  { %878 = vmatprep.mubr.bf16.mxu0 %v2647_v61  ;;  %1078 = vmatprep.mubr.bf16.mxu1 %v2716_v62 }
  0x99   :  { %879 = vmatmul.mubr.bf16.gmra.mxu0 %v2649_v63  ;;  %1079 = vmatmul.mubr.bf16.gmra.mxu1 %v2718_v0 }
  0x9a   :  { %886 = vmatprep.mubr.bf16.mxu0 %v2653_v1  ;;  %1086 = vmatprep.mubr.bf16.mxu1 %v2722_v2 }
  0xa1   :  { %887 = vmatmul.mubr.bf16.gmra.mxu0 %v2655_v3  ;;  %1087 = vmatmul.mubr.bf16.gmra.mxu1 %v2724_v4 }
  0xa2   :  { %894 = vmatprep.mubr.bf16.mxu0 %v2659_v5  ;;  %1094 = vmatprep.mubr.bf16.mxu1 %v2727_v6 }
  0xa9   :  { %895 = vmatmul.mubr.bf16.gmra.mxu0 %v2661_v7  ;;  %1095 = vmatmul.mubr.bf16.gmra.mxu1 %v2729_v8 }
  0xaa   :  { %902 = vmatprep.mubr.bf16.mxu0 %v2665_v9  ;;  %1102 = vmatprep.mubr.bf16.mxu1 %v2730_v10 }
  0xb1   :  { %903 = vmatmul.mubr.bf16.gmra.mxu0 %v2667_v11  ;;  %1103 = vmatmul.mubr.bf16.gmra.mxu1 %v2732_v12 }
  0xb2   :  { %910 = vmatprep.mubr.bf16.mxu0 %v2671_v13  ;;  %1110 = vmatprep.mubr.bf16.mxu1 %v2733_v14 }
  0xb9   :  { %911 = vmatmul.mubr.bf16.gmra.mxu0 %v2673_v15  ;;  %1111 = vmatmul.mubr.bf16.gmra.mxu1 %v2735_v16 }
  0xba   :  { %918 = vmatprep.mubr.bf16.mxu0 %v2677_v17  ;;  %1118 = vmatprep.mubr.bf16.mxu1 %v2736_v18 }
  0xc1   :  { %919 = vmatmul.mubr.bf16.gmra.mxu0 %v2679_v19  ;;  %1119 = vmatmul.mubr.bf16.gmra.mxu1 %v2738_v20 }
  0xc2   :  { %926 = vmatprep.mubr.bf16.mxu0 %v2683_v21  ;;  %1126 = vmatprep.mubr.bf16.mxu1 %v2739_v22 }
  0xc9   :  { %927 = vmatmul.mubr.bf16.gmra.mxu0 %v2685_v23  ;;  %1127 = vmatmul.mubr.bf16.gmra.mxu1 %v2741_v24 }
  0xca   :  { %934 = vmatprep.mubr.bf16.mxu0 %v2689_v25  ;;  %1134 = vmatprep.mubr.bf16.mxu1 %v2742_v26 }
  0xd1   :  { %935 = vmatmul.mubr.bf16.gmra.mxu0 %v2691_v27  ;;  %1135 = vmatmul.mubr.bf16.gmra.mxu1 %v2744_v28 }
  0xd2   :  { %942 = vmatprep.mubr.bf16.mxu0 %v2695_v29  ;;  %1142 = vmatprep.mubr.bf16.mxu1 %v2745_v30 }
  0xd9   :  { %943 = vmatmul.mubr.bf16.gmra.mxu0 %v2697_v31  ;;  %1143 = vmatmul.mubr.bf16.gmra.mxu1 %v2747_v32 }
  0xda   :  { %950 = vmatprep.mubr.bf16.mxu0 %v2701_v33  ;;  %1150 = vmatprep.mubr.bf16.mxu1 %v2748_v34 }
  0xe1   :  { %951 = vmatmul.mubr.bf16.gmra.mxu0 %v2703_v35  ;;  %1151 = vmatmul.mubr.bf16.gmra.mxu1 %v2750_v36 }
  0xe2   :  { %958 = vmatprep.mubr.bf16.mxu0 %v2707_v37  ;;  %1158 = vmatprep.mubr.bf16.mxu1 %v2751_v38 }
  0xe9   :  { %959 = vmatmul.mubr.bf16.gmra.mxu0 %v2709_v39  ;;  %1159 = vmatmul.mubr.bf16.gmra.mxu1 %v2753_v40 }
  0xea   :  { %966 = vmatprep.mubr.bf16.mxu0 %v2713_v41  ;;  %1166 = vmatprep.mubr.bf16.mxu1 %v2754_v42 }
  0xf1   :  { %967 = vmatmul.mubr.bf16.gmra.mxu0 %v2715_v43  ;;  %1167 = vmatmul.mubr.bf16.gmra.mxu1 %v2756_v44 }
  0xf2   :  { %974 = vmatprep.mubr.bf16.mxu0 %v2719_v45  ;;  %1174 = vmatprep.mubr.bf16.mxu1 %v2757_v46 }
  0xf9   :  { %975 = vmatmul.mubr.bf16.gmra.mxu0 %v2721_v47  ;;  %1175 = vmatmul.mubr.bf16.gmra.mxu1 %v2759_v48 }
  0xfa   :  { %982 = vmatprep.mubr.bf16.mxu0 %v2725_v49  ;;  %1182 = vmatprep.mubr.bf16.mxu1 %v2760_v50 }
 0x101   :  { %v792_v58 = vpop.f32.mrf.mxu0  ;;  %983 = vmatmul.mubr.bf16.gmra.mxu0 %v2296_v55  ;;  %v992_v59 = vpop.f32.mrf.mxu1  ;;  %1183 = vmatmul.mubr.bf16.gmra.mxu1 %v2346_v56 }
 0x102   :  { %v793_v60 = vadd.f32 %v3191_v57, %v792_v58  ;;  %v3195_v61 = vadd.f32 %v3191_v57, %v992_v59 }
 0x103   :  { %v794_v62 = vpop.f32.mrf.mxu0  ;;  %v994_v63 = vpop.f32.mrf.mxu1 }
 0x104   :  { %v2464_v0 = vpack.c.bf16 %v793_v60, %v793_v60  ;;  %v2514_v1 = vpack.c.bf16 %v3195_v61, %v3195_v61  ;;  %v1898_v4 = vmul.f32 %v793_v60, %v793_v60  ;;  %v1693_v7 = vsel %vm1692_vm1, %v793_v60, 0.0 }
 0x105   :  { %v795_v2 = vpop.f32.mrf.mxu0  ;;  %v995_v3 = vpop.f32.mrf.mxu1 }
 0x106   :  { %1592 = vst.msk [vmem:[%s4446_s5] sm:$0xf] %vm1591_vm0, %v2464_v0  ;;  %v796_v5 = vadd.f32 %v3191_v57, %v795_v2  ;;  %1642 = vst.msk [vmem:[%s4446_s5 + $0xc8] sm:$0xf] %vm1591_vm0, %v2514_v1  ;;  %v3209_v6 = vadd.f32 %v3191_v57, %v995_v3  ;;  %v1998_v17 = vsel %vm1692_vm1, %v1898_v4, 0.0 }
 0x107   :  { %v797_v8 = vpop.f32.mrf.mxu0  ;;  %v997_v9 = vpop.f32.mrf.mxu1 }
 0x108   :  { %v2465_v10 = vpack.c.bf16 %v796_v5, %v796_v5  ;;  %v1694_v11 = vsel %vm1692_vm1, %v796_v5, 0.0  ;;  %v1899_v12 = vmul.f32 %v796_v5, %v796_v5  ;;  %v2515_v13 = vpack.c.bf16 %v3209_v6, %v3209_v6 }
 0x109   :  { %v1695_v14 = vadd.f32 %v1694_v11, %v1693_v7  ;;  %v800_v15 = vpop.f32.mrf.mxu0  ;;  %v1000_v16 = vpop.f32.mrf.mxu1 }
 0x10a   :  { %1593 = vst.msk [vmem:[%s4446_s5 + $0x4] sm:$0xf] %vm1591_vm0, %v2465_v10  ;;  %v1999_v18 = vsel %vm1692_vm1, %v1899_v12, 0.0  ;;  %v801_v19 = vadd.f32 %v3191_v57, %v800_v15  ;;  %1643 = vst.msk [vmem:[%s4446_s5 + $0xcc] sm:$0xf] %vm1591_vm0, %v2515_v13  ;;  %v3227_v20 = vadd.f32 %v3191_v57, %v1000_v16 }
 0x10b   :  { %v2000_v21 = vadd.f32 %v1999_v18, %v1998_v17  ;;  %v802_v22 = vpop.f32.mrf.mxu0  ;;  %v1002_v23 = vpop.f32.mrf.mxu1 }
 0x10c   :  { %v2466_v24 = vpack.c.bf16 %v801_v19, %v801_v19  ;;  %v1696_v25 = vsel %vm1692_vm1, %v801_v19, 0.0  ;;  %v1900_v26 = vmul.f32 %v801_v19, %v801_v19  ;;  %v2516_v27 = vpack.c.bf16 %v3227_v20, %v3227_v20 }
 0x10d   :  { %v1697_v28 = vadd.f32 %v1696_v25, %v1695_v14  ;;  %v803_v29 = vpop.f32.mrf.mxu0  ;;  %v1003_v30 = vpop.f32.mrf.mxu1 }
 0x10e   :  { %1594 = vst.msk [vmem:[%s4446_s5 + $0x8] sm:$0xf] %vm1591_vm0, %v2466_v24  ;;  %v2001_v31 = vsel %vm1692_vm1, %v1900_v26, 0.0  ;;  %v804_v32 = vadd.f32 %v3191_v57, %v803_v29  ;;  %1644 = vst.msk [vmem:[%s4446_s5 + $0xd0] sm:$0xf] %vm1591_vm0, %v2516_v27  ;;  %v3243_v33 = vadd.f32 %v3191_v57, %v1003_v30 }
 0x10f   :  { %v2002_v34 = vadd.f32 %v2001_v31, %v2000_v21  ;;  %v805_v35 = vpop.f32.mrf.mxu0  ;;  %v1005_v36 = vpop.f32.mrf.mxu1 }
 0x110   :  { %v2467_v37 = vpack.c.bf16 %v804_v32, %v804_v32  ;;  %v1698_v38 = vsel %vm1692_vm1, %v804_v32, 0.0  ;;  %v1901_v39 = vmul.f32 %v804_v32, %v804_v32  ;;  %v2517_v40 = vpack.c.bf16 %v3243_v33, %v3243_v33 }
 0x111   :  { %v1699_v41 = vadd.f32 %v1698_v38, %v1697_v28  ;;  %v808_v42 = vpop.f32.mrf.mxu0  ;;  %v1008_v43 = vpop.f32.mrf.mxu1 }
 0x112   :  { %1595 = vst.msk [vmem:[%s4446_s5 + $0xc] sm:$0xf] %vm1591_vm0, %v2467_v37  ;;  %v2003_v44 = vsel %vm1692_vm1, %v1901_v39, 0.0  ;;  %v809_v45 = vadd.f32 %v3191_v57, %v808_v42  ;;  %1645 = vst.msk [vmem:[%s4446_s5 + $0xd4] sm:$0xf] %vm1591_vm0, %v2517_v40  ;;  %v3259_v46 = vadd.f32 %v3191_v57, %v1008_v43 }
 0x113   :  { %v2004_v47 = vadd.f32 %v2003_v44, %v2002_v34  ;;  %v810_v48 = vpop.f32.mrf.mxu0  ;;  %v1010_v49 = vpop.f32.mrf.mxu1 }
 0x114   :  { %v2468_v50 = vpack.c.bf16 %v809_v45, %v809_v45  ;;  %v1700_v51 = vsel %vm1692_vm1, %v809_v45, 0.0  ;;  %v1902_v52 = vmul.f32 %v809_v45, %v809_v45  ;;  %v2518_v53 = vpack.c.bf16 %v3259_v46, %v3259_v46 }
 0x115   :  { %v1701_v54 = vadd.f32 %v1700_v51, %v1699_v41  ;;  %v811_v55 = vpop.f32.mrf.mxu0  ;;  %v1011_v56 = vpop.f32.mrf.mxu1 }
 0x116   :  { %1596 = vst.msk [vmem:[%s4446_s5 + $0x10] sm:$0xf] %vm1591_vm0, %v2468_v50  ;;  %v2005_v58 = vsel %vm1692_vm1, %v1902_v52, 0.0  ;;  %v812_v59 = vadd.f32 %v3191_v57, %v811_v55  ;;  %1646 = vst.msk [vmem:[%s4446_s5 + $0xd8] sm:$0xf] %vm1591_vm0, %v2518_v53  ;;  %v3275_v60 = vadd.f32 %v3191_v57, %v1011_v56 }
 0x117   :  { %v2006_v62 = vadd.f32 %v2005_v58, %v2004_v47  ;;  %v813_v63 = vpop.f32.mrf.mxu0  ;;  %v1013_v0 = vpop.f32.mrf.mxu1 }
 0x118   :  { %v2469_v1 = vpack.c.bf16 %v812_v59, %v812_v59  ;;  %v1702_v2 = vsel %vm1692_vm1, %v812_v59, 0.0  ;;  %v1903_v3 = vmul.f32 %v812_v59, %v812_v59  ;;  %v2519_v4 = vpack.c.bf16 %v3275_v60, %v3275_v60 }
 0x119   :  { %v1703_v5 = vadd.f32 %v1702_v2, %v1701_v54  ;;  %v816_v7 = vpop.f32.mrf.mxu0  ;;  %v1016_v8 = vpop.f32.mrf.mxu1 }
 0x11a   :  { %1597 = vst.msk [vmem:[%s4446_s5 + $0x14] sm:$0xf] %vm1591_vm0, %v2469_v1  ;;  %v2007_v9 = vsel %vm1692_vm1, %v1903_v3, 0.0  ;;  %v817_v10 = vadd.f32 %v3191_v57, %v816_v7  ;;  %1647 = vst.msk [vmem:[%s4446_s5 + $0xdc] sm:$0xf] %vm1591_vm0, %v2519_v4  ;;  %v3291_v11 = vadd.f32 %v3191_v57, %v1016_v8 }
 0x11b   :  { %v2008_v12 = vadd.f32 %v2007_v9, %v2006_v62  ;;  %v818_v13 = vpop.f32.mrf.mxu0  ;;  %v1018_v14 = vpop.f32.mrf.mxu1 }
 0x11c   :  { %v2470_v15 = vpack.c.bf16 %v817_v10, %v817_v10  ;;  %v1704_v16 = vsel %vm1692_vm1, %v817_v10, 0.0  ;;  %v1904_v17 = vmul.f32 %v817_v10, %v817_v10  ;;  %v2520_v18 = vpack.c.bf16 %v3291_v11, %v3291_v11 }
 0x11d   :  { %v1705_v19 = vadd.f32 %v1704_v16, %v1703_v5  ;;  %v819_v21 = vpop.f32.mrf.mxu0  ;;  %v1019_v22 = vpop.f32.mrf.mxu1 }
 0x11e   :  { %1598 = vst.msk [vmem:[%s4446_s5 + $0x18] sm:$0xf] %vm1591_vm0, %v2470_v15  ;;  %v2009_v23 = vsel %vm1692_vm1, %v1904_v17, 0.0  ;;  %v820_v24 = vadd.f32 %v3191_v57, %v819_v21  ;;  %1648 = vst.msk [vmem:[%s4446_s5 + $0xe0] sm:$0xf] %vm1591_vm0, %v2520_v18  ;;  %v3307_v25 = vadd.f32 %v3191_v57, %v1019_v22 }
 0x11f   :  { %v2010_v26 = vadd.f32 %v2009_v23, %v2008_v12  ;;  %v821_v27 = vpop.f32.mrf.mxu0  ;;  %v1021_v28 = vpop.f32.mrf.mxu1 }
 0x120   :  { %v2471_v29 = vpack.c.bf16 %v820_v24, %v820_v24  ;;  %v1706_v30 = vsel %vm1692_vm1, %v820_v24, 0.0  ;;  %v1905_v31 = vmul.f32 %v820_v24, %v820_v24  ;;  %v2521_v32 = vpack.c.bf16 %v3307_v25, %v3307_v25 }
 0x121   :  { %v1707_v34 = vadd.f32 %v1706_v30, %v1705_v19  ;;  %v824_v35 = vpop.f32.mrf.mxu0  ;;  %v1024_v36 = vpop.f32.mrf.mxu1 }
 0x122   :  { %1599 = vst.msk [vmem:[%s4446_s5 + $0x1c] sm:$0xf] %vm1591_vm0, %v2471_v29  ;;  %v2011_v37 = vsel %vm1692_vm1, %v1905_v31, 0.0  ;;  %v825_v38 = vadd.f32 %v3191_v57, %v824_v35  ;;  %1649 = vst.msk [vmem:[%s4446_s5 + $0xe4] sm:$0xf] %vm1591_vm0, %v2521_v32  ;;  %v3323_v39 = vadd.f32 %v3191_v57, %v1024_v36 }
 0x123   :  { %v2012_v40 = vadd.f32 %v2011_v37, %v2010_v26  ;;  %v826_v41 = vpop.f32.mrf.mxu0  ;;  %v1026_v42 = vpop.f32.mrf.mxu1 }
 0x124   :  { %v2472_v43 = vpack.c.bf16 %v825_v38, %v825_v38  ;;  %v1708_v44 = vsel %vm1692_vm1, %v825_v38, 0.0  ;;  %v1906_v45 = vmul.f32 %v825_v38, %v825_v38  ;;  %v2522_v47 = vpack.c.bf16 %v3323_v39, %v3323_v39 }
 0x125   :  { %v1709_v48 = vadd.f32 %v1708_v44, %v1707_v34  ;;  %v827_v49 = vpop.f32.mrf.mxu0  ;;  %v1027_v50 = vpop.f32.mrf.mxu1 }
 0x126   :  { %1600 = vst.msk [vmem:[%s4446_s5 + $0x20] sm:$0xf] %vm1591_vm0, %v2472_v43  ;;  %v2013_v51 = vsel %vm1692_vm1, %v1906_v45, 0.0  ;;  %v828_v52 = vadd.f32 %v3191_v57, %v827_v49  ;;  %1650 = vst.msk [vmem:[%s4446_s5 + $0xe8] sm:$0xf] %vm1591_vm0, %v2522_v47  ;;  %v3339_v53 = vadd.f32 %v3191_v57, %v1027_v50 }
 0x127   :  { %v2014_v54 = vadd.f32 %v2013_v51, %v2012_v40  ;;  %v829_v55 = vpop.f32.mrf.mxu0  ;;  %v1029_v56 = vpop.f32.mrf.mxu1 }
 0x128   :  { %v2473_v58 = vpack.c.bf16 %v828_v52, %v828_v52  ;;  %v1710_v59 = vsel %vm1692_vm1, %v828_v52, 0.0  ;;  %v1907_v62 = vmul.f32 %v828_v52, %v828_v52  ;;  %v2523_v63 = vpack.c.bf16 %v3339_v53, %v3339_v53 }
 0x129   :  { %v1711_v0 = vadd.f32 %v1710_v59, %v1709_v48  ;;  %v832_v1 = vpop.f32.mrf.mxu0  ;;  %v1032_v2 = vpop.f32.mrf.mxu1 }
 0x12a   :  { %1601 = vst.msk [vmem:[%s4446_s5 + $0x24] sm:$0xf] %vm1591_vm0, %v2473_v58  ;;  %v2015_v3 = vsel %vm1692_vm1, %v1907_v62, 0.0  ;;  %v833_v4 = vadd.f32 %v3191_v57, %v832_v1  ;;  %1651 = vst.msk [vmem:[%s4446_s5 + $0xec] sm:$0xf] %vm1591_vm0, %v2523_v63  ;;  %v3355_v5 = vadd.f32 %v3191_v57, %v1032_v2 }
 0x12b   :  { %v2016_v7 = vadd.f32 %v2015_v3, %v2014_v54  ;;  %v834_v8 = vpop.f32.mrf.mxu0  ;;  %v1034_v9 = vpop.f32.mrf.mxu1 }
 0x12c   :  { %v2474_v10 = vpack.c.bf16 %v833_v4, %v833_v4  ;;  %v1712_v12 = vsel %vm1692_vm1, %v833_v4, 0.0  ;;  %v1908_v13 = vmul.f32 %v833_v4, %v833_v4  ;;  %v2524_v14 = vpack.c.bf16 %v3355_v5, %v3355_v5 }
 0x12d   :  { %v1713_v15 = vadd.f32 %v1712_v12, %v1711_v0  ;;  %v835_v16 = vpop.f32.mrf.mxu0  ;;  %v1035_v17 = vpop.f32.mrf.mxu1 }
 0x12e   :  { %1602 = vst.msk [vmem:[%s4446_s5 + $0x28] sm:$0xf] %vm1591_vm0, %v2474_v10  ;;  %v2017_v18 = vsel %vm1692_vm1, %v1908_v13, 0.0  ;;  %v836_v19 = vadd.f32 %v3191_v57, %v835_v16  ;;  %1652 = vst.msk [vmem:[%s4446_s5 + $0xf0] sm:$0xf] %vm1591_vm0, %v2524_v14  ;;  %v3371_v21 = vadd.f32 %v3191_v57, %v1035_v17 }
 0x12f   :  { %v2018_v22 = vadd.f32 %v2017_v18, %v2016_v7  ;;  %v837_v23 = vpop.f32.mrf.mxu0  ;;  %v1037_v24 = vpop.f32.mrf.mxu1 }
 0x130   :  { %v2475_v26 = vpack.c.bf16 %v836_v19, %v836_v19  ;;  %v1714_v27 = vsel %vm1692_vm1, %v836_v19, 0.0  ;;  %v1909_v28 = vmul.f32 %v836_v19, %v836_v19  ;;  %v2525_v29 = vpack.c.bf16 %v3371_v21, %v3371_v21 }
 0x131   :  { %v1715_v30 = vadd.f32 %v1714_v27, %v1713_v15  ;;  %v840_v31 = vpop.f32.mrf.mxu0  ;;  %v1040_v32 = vpop.f32.mrf.mxu1 }
 0x132   :  { %1603 = vst.msk [vmem:[%s4446_s5 + $0x2c] sm:$0xf] %vm1591_vm0, %v2475_v26  ;;  %v2019_v34 = vsel %vm1692_vm1, %v1909_v28, 0.0  ;;  %v841_v35 = vadd.f32 %v3191_v57, %v840_v31  ;;  %1653 = vst.msk [vmem:[%s4446_s5 + $0xf4] sm:$0xf] %vm1591_vm0, %v2525_v29  ;;  %v3387_v36 = vadd.f32 %v3191_v57, %v1040_v32 }
 0x133   :  { %v2020_v37 = vadd.f32 %v2019_v34, %v2018_v22  ;;  %v842_v38 = vpop.f32.mrf.mxu0  ;;  %v1042_v40 = vpop.f32.mrf.mxu1 }
 0x134   :  { %v2476_v41 = vpack.c.bf16 %v841_v35, %v841_v35  ;;  %v1716_v42 = vsel %vm1692_vm1, %v841_v35, 0.0  ;;  %v1910_v43 = vmul.f32 %v841_v35, %v841_v35  ;;  %v2526_v44 = vpack.c.bf16 %v3387_v36, %v3387_v36 }
 0x135   :  { %v1717_v45 = vadd.f32 %v1716_v42, %v1715_v30  ;;  %v843_v47 = vpop.f32.mrf.mxu0  ;;  %v1043_v48 = vpop.f32.mrf.mxu1 }
 0x136   :  { %1604 = vst.msk [vmem:[%s4446_s5 + $0x30] sm:$0xf] %vm1591_vm0, %v2476_v41  ;;  %v2021_v49 = vsel %vm1692_vm1, %v1910_v43, 0.0  ;;  %v844_v50 = vadd.f32 %v3191_v57, %v843_v47  ;;  %1654 = vst.msk [vmem:[%s4446_s5 + $0xf8] sm:$0xf] %vm1591_vm0, %v2526_v44  ;;  %v3403_v51 = vadd.f32 %v3191_v57, %v1043_v48 }
 0x137   :  { %v2022_v52 = vadd.f32 %v2021_v49, %v2020_v37  ;;  %v845_v54 = vpop.f32.mrf.mxu0  ;;  %v1045_v55 = vpop.f32.mrf.mxu1 }
 0x138   :  { %v2477_v56 = vpack.c.bf16 %v844_v50, %v844_v50  ;;  %v1718_v58 = vsel %vm1692_vm1, %v844_v50, 0.0  ;;  %v1911_v59 = vmul.f32 %v844_v50, %v844_v50  ;;  %v2527_v62 = vpack.c.bf16 %v3403_v51, %v3403_v51 }
 0x139   :  { %v1719_v63 = vadd.f32 %v1718_v58, %v1717_v45  ;;  %v848_v0 = vpop.f32.mrf.mxu0  ;;  %v1048_v1 = vpop.f32.mrf.mxu1 }
 0x13a   :  { %1605 = vst.msk [vmem:[%s4446_s5 + $0x34] sm:$0xf] %vm1591_vm0, %v2477_v56  ;;  %v2023_v2 = vsel %vm1692_vm1, %v1911_v59, 0.0  ;;  %v849_v3 = vadd.f32 %v3191_v57, %v848_v0  ;;  %1655 = vst.msk [vmem:[%s4446_s5 + $0xfc] sm:$0xf] %vm1591_vm0, %v2527_v62  ;;  %v3419_v4 = vadd.f32 %v3191_v57, %v1048_v1 }
 0x13b   :  { %v2024_v7 = vadd.f32 %v2023_v2, %v2022_v52  ;;  %v850_v8 = vpop.f32.mrf.mxu0  ;;  %v1050_v9 = vpop.f32.mrf.mxu1 }
 0x13c   :  { %v2478_v10 = vpack.c.bf16 %v849_v3, %v849_v3  ;;  %v1720_v12 = vsel %vm1692_vm1, %v849_v3, 0.0  ;;  %v1912_v13 = vmul.f32 %v849_v3, %v849_v3  ;;  %v2528_v14 = vpack.c.bf16 %v3419_v4, %v3419_v4 }
 0x13d   :  { %v1721_v15 = vadd.f32 %v1720_v12, %v1719_v63  ;;  %v851_v16 = vpop.f32.mrf.mxu0  ;;  %v1051_v17 = vpop.f32.mrf.mxu1 }
 0x13e   :  { %1606 = vst.msk [vmem:[%s4446_s5 + $0x38] sm:$0xf] %vm1591_vm0, %v2478_v10  ;;  %v2025_v18 = vsel %vm1692_vm1, %v1912_v13, 0.0  ;;  %v852_v19 = vadd.f32 %v3191_v57, %v851_v16  ;;  %1656 = vst.msk [vmem:[%s4446_s5 + $0x100] sm:$0xf] %vm1591_vm0, %v2528_v14  ;;  %v3435_v22 = vadd.f32 %v3191_v57, %v1051_v17 }
 0x13f   :  { %v2026_v23 = vadd.f32 %v2025_v18, %v2024_v7  ;;  %v853_v24 = vpop.f32.mrf.mxu0  ;;  %v1053_v26 = vpop.f32.mrf.mxu1 }
 0x140   :  { %v2479_v27 = vpack.c.bf16 %v852_v19, %v852_v19  ;;  %v1722_v28 = vsel %vm1692_vm1, %v852_v19, 0.0  ;;  %v1913_v29 = vmul.f32 %v852_v19, %v852_v19  ;;  %v2529_v30 = vpack.c.bf16 %v3435_v22, %v3435_v22 }
 0x141   :  { %v1723_v31 = vadd.f32 %v1722_v28, %v1721_v15  ;;  %v856_v32 = vpop.f32.mrf.mxu0  ;;  %v1056_v34 = vpop.f32.mrf.mxu1 }
 0x142   :  { %1607 = vst.msk [vmem:[%s4446_s5 + $0x3c] sm:$0xf] %vm1591_vm0, %v2479_v27  ;;  %v2027_v35 = vsel %vm1692_vm1, %v1913_v29, 0.0  ;;  %v857_v37 = vadd.f32 %v3191_v57, %v856_v32  ;;  %1657 = vst.msk [vmem:[%s4446_s5 + $0x104] sm:$0xf] %vm1591_vm0, %v2529_v30  ;;  %v3451_v38 = vadd.f32 %v3191_v57, %v1056_v34 }
 0x143   :  { %v2028_v40 = vadd.f32 %v2027_v35, %v2026_v23  ;;  %v858_v41 = vpop.f32.mrf.mxu0  ;;  %v1058_v42 = vpop.f32.mrf.mxu1 }
 0x144   :  { %v2480_v43 = vpack.c.bf16 %v857_v37, %v857_v37  ;;  %v1724_v44 = vsel %vm1692_vm1, %v857_v37, 0.0  ;;  %v1914_v45 = vmul.f32 %v857_v37, %v857_v37  ;;  %v2530_v47 = vpack.c.bf16 %v3451_v38, %v3451_v38 }
 0x145   :  { %v1725_v48 = vadd.f32 %v1724_v44, %v1723_v31  ;;  %v859_v49 = vpop.f32.mrf.mxu0  ;;  %v1059_v50 = vpop.f32.mrf.mxu1 }
 0x146   :  { %1608 = vst.msk [vmem:[%s4446_s5 + $0x40] sm:$0xf] %vm1591_vm0, %v2480_v43  ;;  %v2029_v52 = vsel %vm1692_vm1, %v1914_v45, 0.0  ;;  %v860_v54 = vadd.f32 %v3191_v57, %v859_v49  ;;  %1658 = vst.msk [vmem:[%s4446_s5 + $0x108] sm:$0xf] %vm1591_vm0, %v2530_v47  ;;  %v3467_v55 = vadd.f32 %v3191_v57, %v1059_v50 }
 0x147   :  { %v2030_v56 = vadd.f32 %v2029_v52, %v2028_v40  ;;  %v861_v58 = vpop.f32.mrf.mxu0  ;;  %v1061_v59 = vpop.f32.mrf.mxu1 }
 0x148   :  { %v2481_v62 = vpack.c.bf16 %v860_v54, %v860_v54  ;;  %v1726_v63 = vsel %vm1692_vm1, %v860_v54, 0.0  ;;  %v1915_v0 = vmul.f32 %v860_v54, %v860_v54  ;;  %v2531_v1 = vpack.c.bf16 %v3467_v55, %v3467_v55 }
 0x149   :  { %v1727_v2 = vadd.f32 %v1726_v63, %v1725_v48  ;;  %v864_v3 = vpop.f32.mrf.mxu0  ;;  %v1064_v7 = vpop.f32.mrf.mxu1 }
 0x14a   :  { %1609 = vst.msk [vmem:[%s4446_s5 + $0x44] sm:$0xf] %vm1591_vm0, %v2481_v62  ;;  %v2031_v8 = vsel %vm1692_vm1, %v1915_v0, 0.0  ;;  %v3478_v9 = vadd.f32 %v3191_v57, %v864_v3  ;;  %1659 = vst.msk [vmem:[%s4446_s5 + $0x10c] sm:$0xf] %vm1591_vm0, %v2531_v1  ;;  %v3485_v10 = vadd.f32 %v3191_v57, %v1064_v7 }
 0x14b   :  { %v3487_v12 = vadd.f32 %v2031_v8, %v2030_v56  ;;  %v866_v13 = vpop.f32.mrf.mxu0  ;;  %v1066_v14 = vpop.f32.mrf.mxu1 }
 0x14c   :  { %v2482_v15 = vpack.c.bf16 %v3478_v9, %v3478_v9  ;;  %v1728_v16 = vsel %vm1692_vm1, %v3478_v9, 0.0  ;;  %v2532_v17 = vpack.c.bf16 %v3485_v10, %v3485_v10 }
 0x14d   :  { %v3495_v18 = vadd.f32 %v1728_v16, %v1727_v2  ;;  %v867_v19 = vpop.f32.mrf.mxu0  ;;  %v1067_v23 = vpop.f32.mrf.mxu1 }
 0x14e   :  { %1610 = vst.msk [vmem:[%s4446_s5 + $0x48] sm:$0xf] %vm1591_vm0, %v2482_v15  ;;  %v3502_v24 = vadd.f32 %v3191_v57, %v867_v19  ;;  %1660 = vst.msk [vmem:[%s4446_s5 + $0x110] sm:$0xf] %vm1591_vm0, %v2532_v17  ;;  %v3509_v26 = vadd.f32 %v3191_v57, %v1067_v23 }
 0x14f   :  { %v869_v27 = vpop.f32.mrf.mxu0  ;;  %v1069_v28 = vpop.f32.mrf.mxu1 }
 0x150   :  { %v2483_v29 = vpack.c.bf16 %v3502_v24, %v3502_v24  ;;  %v2533_v30 = vpack.c.bf16 %v3509_v26, %v3509_v26 }
 0x151   :  { %v872_v31 = vpop.f32.mrf.mxu0  ;;  %v1072_v32 = vpop.f32.mrf.mxu1 }
 0x152   :  { %1611 = vst.msk [vmem:[%s4446_s5 + $0x4c] sm:$0xf] %vm1591_vm0, %v2483_v29  ;;  %v3520_v34 = vadd.f32 %v3191_v57, %v872_v31  ;;  %1661 = vst.msk [vmem:[%s4446_s5 + $0x114] sm:$0xf] %vm1591_vm0, %v2533_v30  ;;  %v3527_v35 = vadd.f32 %v3191_v57, %v1072_v32 }
 0x153   :  { %v874_v37 = vpop.f32.mrf.mxu0  ;;  %v1074_v40 = vpop.f32.mrf.mxu1 }
 0x154   :  { %v2484_v41 = vpack.c.bf16 %v3520_v34, %v3520_v34  ;;  %v2534_v42 = vpack.c.bf16 %v3527_v35, %v3527_v35 }
 0x155   :  { %v875_v43 = vpop.f32.mrf.mxu0  ;;  %v1075_v44 = vpop.f32.mrf.mxu1 }
 0x156   :  { %1612 = vst.msk [vmem:[%s4446_s5 + $0x50] sm:$0xf] %vm1591_vm0, %v2484_v41  ;;  %v3538_v45 = vadd.f32 %v3191_v57, %v875_v43  ;;  %1662 = vst.msk [vmem:[%s4446_s5 + $0x118] sm:$0xf] %vm1591_vm0, %v2534_v42  ;;  %v3545_v47 = vadd.f32 %v3191_v57, %v1075_v44 }
 0x157   :  { %v877_v48 = vpop.f32.mrf.mxu0  ;;  %v1077_v49 = vpop.f32.mrf.mxu1 }
 0x158   :  { %v2485_v50 = vpack.c.bf16 %v3538_v45, %v3538_v45  ;;  %v2535_v52 = vpack.c.bf16 %v3545_v47, %v3545_v47 }
 0x159   :  { %v880_v54 = vpop.f32.mrf.mxu0  ;;  %v1080_v56 = vpop.f32.mrf.mxu1 }
 0x15a   :  { %1613 = vst.msk [vmem:[%s4446_s5 + $0x54] sm:$0xf] %vm1591_vm0, %v2485_v50  ;;  %v3556_v58 = vadd.f32 %v3191_v57, %v880_v54  ;;  %1663 = vst.msk [vmem:[%s4446_s5 + $0x11c] sm:$0xf] %vm1591_vm0, %v2535_v52  ;;  %v3563_v59 = vadd.f32 %v3191_v57, %v1080_v56 }
 0x15b   :  { %v882_v62 = vpop.f32.mrf.mxu0  ;;  %v1082_v63 = vpop.f32.mrf.mxu1 }
 0x15c   :  { %v2486_v0 = vpack.c.bf16 %v3556_v58, %v3556_v58  ;;  %v2536_v1 = vpack.c.bf16 %v3563_v59, %v3563_v59 }
 0x15d   :  { %v883_v2 = vpop.f32.mrf.mxu0  ;;  %v1083_v3 = vpop.f32.mrf.mxu1 }
 0x15e   :  { %1614 = vst.msk [vmem:[%s4446_s5 + $0x58] sm:$0xf] %vm1591_vm0, %v2486_v0  ;;  %v3574_v7 = vadd.f32 %v3191_v57, %v883_v2  ;;  %1664 = vst.msk [vmem:[%s4446_s5 + $0x120] sm:$0xf] %vm1591_vm0, %v2536_v1  ;;  %v3581_v8 = vadd.f32 %v3191_v57, %v1083_v3 }
 0x15f   :  { %v885_v13 = vpop.f32.mrf.mxu0  ;;  %v1085_v14 = vpop.f32.mrf.mxu1 }
 0x160   :  { %v2487_v15 = vpack.c.bf16 %v3574_v7, %v3574_v7  ;;  %v2537_v16 = vpack.c.bf16 %v3581_v8, %v3581_v8 }
 0x161   :  { %v888_v17 = vpop.f32.mrf.mxu0  ;;  %v1088_v19 = vpop.f32.mrf.mxu1 }
 0x162   :  { %1615 = vst.msk [vmem:[%s4446_s5 + $0x5c] sm:$0xf] %vm1591_vm0, %v2487_v15  ;;  %v3592_v23 = vadd.f32 %v3191_v57, %v888_v17  ;;  %1665 = vst.msk [vmem:[%s4446_s5 + $0x124] sm:$0xf] %vm1591_vm0, %v2537_v16  ;;  %v3599_v27 = vadd.f32 %v3191_v57, %v1088_v19 }
 0x163   :  { %v890_v28 = vpop.f32.mrf.mxu0  ;;  %v1090_v29 = vpop.f32.mrf.mxu1 }
 0x164   :  { %v2488_v30 = vpack.c.bf16 %v3592_v23, %v3592_v23  ;;  %v2538_v31 = vpack.c.bf16 %v3599_v27, %v3599_v27 }
 0x165   :  { %v891_v32 = vpop.f32.mrf.mxu0  ;;  %v1091_v37 = vpop.f32.mrf.mxu1 }
 0x166   :  { %1616 = vst.msk [vmem:[%s4446_s5 + $0x60] sm:$0xf] %vm1591_vm0, %v2488_v30  ;;  %v3610_v40 = vadd.f32 %v3191_v57, %v891_v32  ;;  %1666 = vst.msk [vmem:[%s4446_s5 + $0x128] sm:$0xf] %vm1591_vm0, %v2538_v31  ;;  %v3617_v41 = vadd.f32 %v3191_v57, %v1091_v37 }
 0x167   :  { %v893_v42 = vpop.f32.mrf.mxu0  ;;  %v1093_v43 = vpop.f32.mrf.mxu1 }
 0x168   :  { %v2489_v44 = vpack.c.bf16 %v3610_v40, %v3610_v40  ;;  %v2539_v48 = vpack.c.bf16 %v3617_v41, %v3617_v41 }
 0x169   :  { %v896_v49 = vpop.f32.mrf.mxu0  ;;  %v1096_v50 = vpop.f32.mrf.mxu1 }
 0x16a   :  { %1617 = vst.msk [vmem:[%s4446_s5 + $0x64] sm:$0xf] %vm1591_vm0, %v2489_v44  ;;  %v3628_v52 = vadd.f32 %v3191_v57, %v896_v49  ;;  %1667 = vst.msk [vmem:[%s4446_s5 + $0x12c] sm:$0xf] %vm1591_vm0, %v2539_v48  ;;  %v3635_v54 = vadd.f32 %v3191_v57, %v1096_v50 }
 0x16b   :  { %v898_v56 = vpop.f32.mrf.mxu0  ;;  %v1098_v62 = vpop.f32.mrf.mxu1 }
 0x16c   :  { %v2490_v63 = vpack.c.bf16 %v3628_v52, %v3628_v52  ;;  %v2540_v0 = vpack.c.bf16 %v3635_v54, %v3635_v54 }
 0x16d   :  { %v899_v1 = vpop.f32.mrf.mxu0  ;;  %v1099_v2 = vpop.f32.mrf.mxu1 }
 0x16e   :  { %1618 = vst.msk [vmem:[%s4446_s5 + $0x68] sm:$0xf] %vm1591_vm0, %v2490_v63  ;;  %v3646_v3 = vadd.f32 %v3191_v57, %v899_v1  ;;  %1668 = vst.msk [vmem:[%s4446_s5 + $0x130] sm:$0xf] %vm1591_vm0, %v2540_v0  ;;  %v3653_v13 = vadd.f32 %v3191_v57, %v1099_v2 }
 0x16f   :  { %v901_v14 = vpop.f32.mrf.mxu0  ;;  %v1101_v15 = vpop.f32.mrf.mxu1 }
 0x170   :  { %v2491_v16 = vpack.c.bf16 %v3646_v3, %v3646_v3  ;;  %v2541_v17 = vpack.c.bf16 %v3653_v13, %v3653_v13 }
 0x171   :  { %v904_v19 = vpop.f32.mrf.mxu0  ;;  %v1104_v28 = vpop.f32.mrf.mxu1 }
 0x172   :  { %1619 = vst.msk [vmem:[%s4446_s5 + $0x6c] sm:$0xf] %vm1591_vm0, %v2491_v16  ;;  %v3664_v29 = vadd.f32 %v3191_v57, %v904_v19  ;;  %1669 = vst.msk [vmem:[%s4446_s5 + $0x134] sm:$0xf] %vm1591_vm0, %v2541_v17  ;;  %v3671_v30 = vadd.f32 %v3191_v57, %v1104_v28 }
 0x173   :  { %v906_v31 = vpop.f32.mrf.mxu0  ;;  %v1106_v32 = vpop.f32.mrf.mxu1 }
 0x174   :  { %v2492_v37 = vpack.c.bf16 %v3664_v29, %v3664_v29  ;;  %v2542_v42 = vpack.c.bf16 %v3671_v30, %v3671_v30 }
 0x175   :  { %v907_v43 = vpop.f32.mrf.mxu0  ;;  %v1107_v44 = vpop.f32.mrf.mxu1 }
 0x176   :  { %1620 = vst.msk [vmem:[%s4446_s5 + $0x70] sm:$0xf] %vm1591_vm0, %v2492_v37  ;;  %v3682_v48 = vadd.f32 %v3191_v57, %v907_v43  ;;  %1670 = vst.msk [vmem:[%s4446_s5 + $0x138] sm:$0xf] %vm1591_vm0, %v2542_v42  ;;  %v3689_v49 = vadd.f32 %v3191_v57, %v1107_v44 }
 0x177   :  { %v909_v50 = vpop.f32.mrf.mxu0  ;;  %v1109_v56 = vpop.f32.mrf.mxu1 }
 0x178   :  { %4468 = vst [vmem:[#allocation3_spill] sm:$0xff] %v3689_v49  ;;  %v2493_v62 = vpack.c.bf16 %v3682_v48, %v3682_v48  ;;  %v2543_v63 = vpack.c.bf16 %v3689_v49, %v3689_v49 }
 0x179   :  { %v912_v0 = vpop.f32.mrf.mxu0  ;;  %v1112_v1 = vpop.f32.mrf.mxu1 }
 0x17a   :  { %1621 = vst.msk [vmem:[%s4446_s5 + $0x74] sm:$0xf] %vm1591_vm0, %v2493_v62  ;;  %v3700_v2 = vadd.f32 %v3191_v57, %v912_v0  ;;  %1671 = vst.msk [vmem:[%s4446_s5 + $0x13c] sm:$0xf] %vm1591_vm0, %v2543_v63  ;;  %v3707_v14 = vadd.f32 %v3191_v57, %v1112_v1 }
 0x17b   :  { %v914_v15 = vpop.f32.mrf.mxu0  ;;  %v1114_v16 = vpop.f32.mrf.mxu1 }
 0x17c   :  { %4469 = vst [vmem:[#allocation4_spill] sm:$0xff] %v3707_v14  ;;  %v2494_v17 = vpack.c.bf16 %v3700_v2, %v3700_v2  ;;  %v2544_v19 = vpack.c.bf16 %v3707_v14, %v3707_v14  ;;  %v1916_v16 = vmul.f32 %v3478_v9, %v3478_v9 }
 0x17d   :  { %v915_v28 = vpop.f32.mrf.mxu0  ;;  %v1115_v31 = vpop.f32.mrf.mxu1 }
 0x17e   :  { %1622 = vst.msk [vmem:[%s4446_s5 + $0x78] sm:$0xf] %vm1591_vm0, %v2494_v17  ;;  %v3718_v32 = vadd.f32 %v3191_v57, %v915_v28  ;;  %1672 = vst.msk [vmem:[%s4446_s5 + $0x140] sm:$0xf] %vm1591_vm0, %v2544_v19  ;;  %v3725_v37 = vadd.f32 %v3191_v57, %v1115_v31 }
 0x17f   :  { %v917_v42 = vpop.f32.mrf.mxu0  ;;  %v1117_v43 = vpop.f32.mrf.mxu1 }
 0x180   :  { %4470 = vst [vmem:[#allocation5_spill] sm:$0xff] %v3725_v37  ;;  %v2495_v44 = vpack.c.bf16 %v3718_v32, %v3718_v32  ;;  %v2545_v50 = vpack.c.bf16 %v3725_v37, %v3725_v37  ;;  %v1917_v42 = vmul.f32 %v3502_v24, %v3502_v24 }
 0x181   :  { %v920_v56 = vpop.f32.mrf.mxu0  ;;  %v1120_v62 = vpop.f32.mrf.mxu1 }
 0x182   :  { %1623 = vst.msk [vmem:[%s4446_s5 + $0x7c] sm:$0xf] %vm1591_vm0, %v2495_v44  ;;  %v3736_v63 = vadd.f32 %v3191_v57, %v920_v56  ;;  %1673 = vst.msk [vmem:[%s4446_s5 + $0x144] sm:$0xf] %vm1591_vm0, %v2545_v50  ;;  %v3743_v0 = vadd.f32 %v3191_v57, %v1120_v62  ;;  %v2033_v56 = vsel %vm1692_vm1, %v1916_v16, 0.0  ;;  %v1918_v62 = vmul.f32 %v3520_v34, %v3520_v34 }
 0x183   :  { %v922_v1 = vpop.f32.mrf.mxu0  ;;  %v1122_v15 = vpop.f32.mrf.mxu1 }
 0x184   :  { %4471 = vst [vmem:[#allocation6_spill] sm:$0xff] %v3743_v0  ;;  %v2496_v17 = vpack.c.bf16 %v3736_v63, %v3736_v63  ;;  %v2546_v19 = vpack.c.bf16 %v3743_v0, %v3743_v0 }
 0x185   :  { %v923_v28 = vpop.f32.mrf.mxu0  ;;  %v1123_v31 = vpop.f32.mrf.mxu1 }
 0x186   :  { %1624 = vst.msk [vmem:[%s4446_s5 + $0x80] sm:$0xf] %vm1591_vm0, %v2496_v17  ;;  %v3758_v43 = vadd.f32 %v3191_v57, %v923_v28  ;;  %1674 = vst.msk [vmem:[%s4446_s5 + $0x148] sm:$0xf] %vm1591_vm0, %v2546_v19  ;;  %v3765_v9 = vadd.f32 %v3191_v57, %v1123_v31  ;;  %v1730_v17 = vsel %vm1692_vm1, %v3502_v24, 0.0  ;;  %v2035_v31 = vsel %vm1692_vm1, %v1917_v42, 0.0 }
 0x187   :  { %v925_v44 = vpop.f32.mrf.mxu0  ;;  %v1125_v50 = vpop.f32.mrf.mxu1  ;;  %v2034_v42 = vadd.f32 %v2033_v56, %v3487_v12  ;;  %v1734_v12 = vsel %vm1692_vm1, %v3538_v45, 0.0  ;;  %v1921_v56 = vmul.f32 %v3574_v7, %v3574_v7 }
 0x188   :  { %4472 = vst [vmem:[#allocation7_spill] sm:$0xff] %v3765_v9  ;;  %v2497_v1 = vpack.c.bf16 %v3758_v43, %v3758_v43  ;;  %v2547_v15 = vpack.c.bf16 %v3765_v9, %v3765_v9  ;;  %v1919_v44 = vmul.f32 %v3538_v45, %v3538_v45  ;;  %v1732_v50 = vsel %vm1692_vm1, %v3520_v34, 0.0 }
 0x189   :  { %v928_v19 = vpop.f32.mrf.mxu0  ;;  %v1128_v28 = vpop.f32.mrf.mxu1  ;;  %v2036_v14 = vadd.f32 %v2035_v31, %v2034_v42  ;;  %v1736_v31 = vsel %vm1692_vm1, %v3556_v58, 0.0 }
 0x18a   :  { %1625 = vst.msk [vmem:[%s4446_s5 + $0x84] sm:$0xf] %vm1591_vm0, %v2497_v1  ;;  %v3784_v16 = vadd.f32 %v3191_v57, %v928_v19  ;;  %1675 = vst.msk [vmem:[%s4446_s5 + $0x14c] sm:$0xf] %vm1591_vm0, %v2547_v15  ;;  %v3791_v24 = vadd.f32 %v3191_v57, %v1128_v28  ;;  %v2037_v1 = vsel %vm1692_vm1, %v1918_v62, 0.0  ;;  %v1920_v19 = vmul.f32 %v3556_v58, %v3556_v58 }
 0x18b   :  { %v930_v9 = vpop.f32.mrf.mxu0  ;;  %v1130_v0 = vpop.f32.mrf.mxu1  ;;  %v1731_v28 = vadd.f32 %v1730_v17, %v3495_v18  ;;  %v2038_v17 = vadd.f32 %v2037_v1, %v2036_v14  ;;  %v1738_v14 = vsel %vm1692_vm1, %v3574_v7, 0.0  ;;  %v2043_v1 = vsel %vm1692_vm1, %v1921_v56, 0.0 }
 0x18c   :  { %4473 = vst [vmem:[#allocation8_spill] sm:$0xff] %v3791_v24  ;;  %v2498_v37 = vpack.c.bf16 %v3784_v16, %v3784_v16  ;;  %v2548_v15 = vpack.c.bf16 %v3791_v24, %v3791_v24  ;;  %v2039_v0 = vsel %vm1692_vm1, %v1919_v44, 0.0  ;;  %v1740_v56 = vsel %vm1692_vm1, %v3592_v23, 0.0 }
 0x18d   :  { %v931_v34 = vpop.f32.mrf.mxu0  ;;  %v1131_v9 = vpop.f32.mrf.mxu1  ;;  %v1733_v45 = vadd.f32 %v1732_v50, %v1731_v28  ;;  %v2040_v49 = vadd.f32 %v2039_v0, %v2038_v17 }
 0x18e   :  { %1626 = vst.msk [vmem:[%s4446_s5 + $0x88] sm:$0xf] %vm1591_vm0, %v2498_v37  ;;  %v3814_v62 = vadd.f32 %v3191_v57, %v931_v34  ;;  %1676 = vst.msk [vmem:[%s4446_s5 + $0x150] sm:$0xf] %vm1591_vm0, %v2548_v15  ;;  %v3821_v18 = vadd.f32 %v3191_v57, %v1131_v9  ;;  %v2041_v37 = vsel %vm1692_vm1, %v1920_v19, 0.0  ;;  %v1922_v34 = vmul.f32 %v3592_v23, %v3592_v23 }
 0x18f   :  { %v933_v44 = vpop.f32.mrf.mxu0  ;;  %v1133_v42 = vpop.f32.mrf.mxu1  ;;  %v1735_v9 = vadd.f32 %v1734_v12, %v1733_v45  ;;  %v1923_v19 = vmul.f32 %v3610_v40, %v3610_v40  ;;  %v2042_v0 = vadd.f32 %v2041_v37, %v2040_v49  ;;  %v1742_v49 = vsel %vm1692_vm1, %v3610_v40, 0.0 }
 0x190   :  { %v2499_v24 = vpack.c.bf16 %v3814_v62, %v3814_v62  ;;  %v2549_v15 = vpack.c.bf16 %v3821_v18, %v3821_v18  ;;  %v1924_v44 = vmul.f32 %v3628_v52, %v3628_v52 }
 0x191   :  { %v936_v50 = vpop.f32.mrf.mxu0  ;;  %v1136_v58 = vpop.f32.mrf.mxu1  ;;  %v1737_v12 = vadd.f32 %v1736_v31, %v1735_v9  ;;  %v2047_v37 = vsel %vm1692_vm1, %v1923_v19, 0.0  ;;  %v1744_v19 = vsel %vm1692_vm1, %v3628_v52, 0.0 }
 0x192   :  { %1627 = vst.msk [vmem:[%s4446_s5 + $0x8c] sm:$0xf] %vm1591_vm0, %v2499_v24  ;;  %v3842_v28 = vadd.f32 %v3191_v57, %v936_v50  ;;  %1677 = vst.msk [vmem:[%s4446_s5 + $0x154] sm:$0xf] %vm1591_vm0, %v2549_v15  ;;  %v3849_v7 = vadd.f32 %v3191_v57, %v1136_v58  ;;  %v2045_v24 = vsel %vm1692_vm1, %v1922_v34, 0.0  ;;  %v2044_v58 = vadd.f32 %v2043_v1, %v2042_v0 }
 0x193   :  { %v938_v45 = vpop.f32.mrf.mxu0  ;;  %v1138_v17 = vpop.f32.mrf.mxu1  ;;  %v1739_v50 = vadd.f32 %v1738_v14, %v1737_v12  ;;  %v1925_v34 = vmul.f32 %v3646_v3, %v3646_v3 }
 0x194   :  { %v2500_v42 = vpack.c.bf16 %v3842_v28, %v3842_v28  ;;  %v2550_v15 = vpack.c.bf16 %v3849_v7, %v3849_v7  ;;  %v2046_v1 = vadd.f32 %v2045_v24, %v2044_v58  ;;  %v2049_v45 = vsel %vm1692_vm1, %v1924_v44, 0.0  ;;  %v3900_v58 = vld [vmem:[%s4445_s2] ss:$0 sm:$0xff] }
 0x195   :  { %v939_v31 = vpop.f32.mrf.mxu0  ;;  %v1139_v23 = vpop.f32.mrf.mxu1  ;;  %v1741_v14 = vadd.f32 %v1740_v56, %v1739_v50  ;;  %v1926_v17 = vmul.f32 %v3664_v29, %v3664_v29  ;;  %v1746_v56 = vsel %vm1692_vm1, %v3646_v3, 0.0  ;;  %v2051_v50 = vsel %vm1692_vm1, %v1925_v34, 0.0 }
 0x196   :  { %1628 = vst.msk [vmem:[%s4446_s5 + $0x90] sm:$0xf] %vm1591_vm0, %v2500_v42  ;;  %v3870_v9 = vadd.f32 %v3191_v57, %v939_v31  ;;  %1678 = vst.msk [vmem:[%s4446_s5 + $0x158] sm:$0xf] %vm1591_vm0, %v2550_v15  ;;  %v3877_v40 = vadd.f32 %v3191_v57, %v1139_v23  ;;  %v2048_v31 = vadd.f32 %v2047_v37, %v2046_v1  ;;  %v1748_v34 = vsel %vm1692_vm1, %v3664_v29, 0.0 }
 0x197   :  { %v941_v12 = vpop.f32.mrf.mxu0  ;;  %v1141_v0 = vpop.f32.mrf.mxu1  ;;  %v1743_v57 = vadd.f32 %v1742_v49, %v1741_v14  ;;  %v1927_v44 = vmul.f32 %v3682_v48, %v3682_v48 }
 0x198   :  { %v2501_v42 = vpack.c.bf16 %v3870_v9, %v3870_v9  ;;  %v2551_v15 = vpack.c.bf16 %v3877_v40, %v3877_v40  ;;  %v2050_v37 = vadd.f32 %v2049_v45, %v2048_v31  ;;  %v2053_v12 = vsel %vm1692_vm1, %v1926_v17, 0.0 }
 0x199   :  { %v944_v24 = vpop.f32.mrf.mxu0  ;;  %v1144_v52 = vpop.f32.mrf.mxu1  ;;  %v1745_v23 = vadd.f32 %v1744_v19, %v1743_v57  ;;  %v1928_v0 = vmul.f32 %v3700_v2, %v3700_v2  ;;  %v1750_v19 = vsel %vm1692_vm1, %v3682_v48, 0.0  ;;  %v2055_v57 = vsel %vm1692_vm1, %v1927_v44, 0.0 }
 0x19a   :  { %1629 = vst.msk [vmem:[%s4446_s5 + $0x94] sm:$0xf] %vm1591_vm0, %v2501_v42  ;;  %v3903_v49 = vadd.f32 %v3900_v58, %v944_v24  ;;  %1679 = vst.msk [vmem:[%s4446_s5 + $0x15c] sm:$0xf] %vm1591_vm0, %v2551_v15  ;;  %v3910_v3 = vadd.f32 %v3900_v58, %v1144_v52  ;;  %v2052_v52 = vadd.f32 %v2051_v50, %v2050_v37  ;;  %v1752_v44 = vsel %vm1692_vm1, %v3700_v2, 0.0 }
 0x19b   :  { %v946_v14 = vpop.f32.mrf.mxu0  ;;  %v1146_v1 = vpop.f32.mrf.mxu1  ;;  %v1747_v24 = vadd.f32 %v1746_v56, %v1745_v23  ;;  %v1929_v17 = vmul.f32 %v3718_v32, %v3718_v32 }
 0x19c   :  { %v2502_v42 = vpack.c.bf16 %v3903_v49, %v3903_v49  ;;  %v2552_v15 = vpack.c.bf16 %v3910_v3, %v3910_v3  ;;  %v2054_v50 = vadd.f32 %v2053_v12, %v2052_v52  ;;  %v2057_v14 = vsel %vm1692_vm1, %v1928_v0, 0.0 }
 0x19d   :  { %v947_v45 = vpop.f32.mrf.mxu0  ;;  %v1147_v29 = vpop.f32.mrf.mxu1  ;;  %v1749_v56 = vadd.f32 %v1748_v34, %v1747_v24  ;;  %v1930_v1 = vmul.f32 %v3736_v63, %v3736_v63  ;;  %v1754_v34 = vsel %vm1692_vm1, %v3718_v32, 0.0  ;;  %v2059_v24 = vsel %vm1692_vm1, %v1929_v17, 0.0 }
 0x19e   :  { %1630 = vst.msk [vmem:[%s4446_s5 + $0x98] sm:$0xf] %vm1591_vm0, %v2502_v42  ;;  %v3931_v31 = vadd.f32 %v3900_v58, %v947_v45  ;;  %1680 = vst.msk [vmem:[%s4446_s5 + $0x160] sm:$0xf] %vm1591_vm0, %v2552_v15  ;;  %v3938_v48 = vadd.f32 %v3900_v58, %v1147_v29  ;;  %v2056_v29 = vadd.f32 %v2055_v57, %v2054_v50  ;;  %v1756_v17 = vsel %vm1692_vm1, %v3736_v63, 0.0 }
 0x19f   :  { %v949_v23 = vpop.f32.mrf.mxu0  ;;  %v1149_v37 = vpop.f32.mrf.mxu1  ;;  %v1751_v45 = vadd.f32 %v1750_v19, %v1749_v56  ;;  %v1931_v0 = vmul.f32 %v3758_v43, %v3758_v43 }
 0x1a0   :  { %v2503_v42 = vpack.c.bf16 %v3931_v31, %v3931_v31  ;;  %v2553_v15 = vpack.c.bf16 %v3938_v48, %v3938_v48  ;;  %v2058_v57 = vadd.f32 %v2057_v14, %v2056_v29  ;;  %v2061_v23 = vsel %vm1692_vm1, %v1930_v1, 0.0 }
 0x1a1   :  { %v952_v12 = vpop.f32.mrf.mxu0  ;;  %v1152_v2 = vpop.f32.mrf.mxu1  ;;  %v1753_v19 = vadd.f32 %v1752_v44, %v1751_v45  ;;  %v1932_v37 = vmul.f32 %v3784_v16, %v3784_v16  ;;  %v1758_v44 = vsel %vm1692_vm1, %v3758_v43, 0.0  ;;  %v2063_v45 = vsel %vm1692_vm1, %v1931_v0, 0.0 }
 0x1a2   :  { %1631 = vst.msk [vmem:[%s4446_s5 + $0x9c] sm:$0xf] %vm1591_vm0, %v2503_v42  ;;  %v3959_v52 = vadd.f32 %v3900_v58, %v952_v12  ;;  %1681 = vst.msk [vmem:[%s4446_s5 + $0x164] sm:$0xf] %vm1591_vm0, %v2553_v15  ;;  %v3966_v32 = vadd.f32 %v3900_v58, %v1152_v2  ;;  %v2060_v2 = vadd.f32 %v2059_v24, %v2058_v57  ;;  %v1760_v0 = vsel %vm1692_vm1, %v3784_v16, 0.0 }
 0x1a3   :  { %v954_v56 = vpop.f32.mrf.mxu0  ;;  %v1154_v50 = vpop.f32.mrf.mxu1  ;;  %v1755_v12 = vadd.f32 %v1754_v34, %v1753_v19  ;;  %v1933_v1 = vmul.f32 %v3814_v62, %v3814_v62 }
 0x1a4   :  { %v2504_v42 = vpack.c.bf16 %v3959_v52, %v3959_v52  ;;  %v2554_v15 = vpack.c.bf16 %v3966_v32, %v3966_v32  ;;  %v2062_v24 = vadd.f32 %v2061_v23, %v2060_v2  ;;  %v2065_v56 = vsel %vm1692_vm1, %v1932_v37, 0.0 }
 0x1a5   :  { %v955_v14 = vpop.f32.mrf.mxu0  ;;  %v1155_v63 = vpop.f32.mrf.mxu1  ;;  %v1757_v34 = vadd.f32 %v1756_v17, %v1755_v12  ;;  %v1934_v50 = vmul.f32 %v3842_v28, %v3842_v28  ;;  %v1762_v17 = vsel %vm1692_vm1, %v3814_v62, 0.0  ;;  %v2067_v12 = vsel %vm1692_vm1, %v1933_v1, 0.0 }
 0x1a6   :  { %1632 = vst.msk [vmem:[%s4446_s5 + $0xa0] sm:$0xf] %vm1591_vm0, %v2504_v42  ;;  %v3987_v29 = vadd.f32 %v3900_v58, %v955_v14  ;;  %1682 = vst.msk [vmem:[%s4446_s5 + $0x168] sm:$0xf] %vm1591_vm0, %v2554_v15  ;;  %v3994_v43 = vadd.f32 %v3900_v58, %v1155_v63  ;;  %v2064_v63 = vadd.f32 %v2063_v45, %v2062_v24  ;;  %v1764_v1 = vsel %vm1692_vm1, %v3842_v28, 0.0 }
 0x1a7   :  { %v957_v19 = vpop.f32.mrf.mxu0  ;;  %v1157_v57 = vpop.f32.mrf.mxu1  ;;  %v1759_v14 = vadd.f32 %v1758_v44, %v1757_v34  ;;  %v1935_v37 = vmul.f32 %v3870_v9, %v3870_v9  ;;  %v1766_v28 = vsel %vm1692_vm1, %v3870_v9, 0.0  ;;  %v1768_v9 = vsel %vm1692_vm1, %v3903_v49, 0.0 }
 0x1a8   :  { %v2505_v42 = vpack.c.bf16 %v3987_v29, %v3987_v29  ;;  %v2555_v15 = vpack.c.bf16 %v3994_v43, %v3994_v43  ;;  %v2066_v45 = vadd.f32 %v2065_v56, %v2064_v63  ;;  %v2069_v19 = vsel %vm1692_vm1, %v1934_v50, 0.0 }
 0x1a9   :  { %v960_v23 = vpop.f32.mrf.mxu0  ;;  %v1160_v16 = vpop.f32.mrf.mxu1  ;;  %v1761_v44 = vadd.f32 %v1760_v0, %v1759_v14  ;;  %v1936_v57 = vmul.f32 %v3903_v49, %v3903_v49  ;;  %v2071_v14 = vsel %vm1692_vm1, %v1935_v37, 0.0  ;;  %v1770_v49 = vsel %vm1692_vm1, %v3931_v31, 0.0 }
 0x1aa   :  { %1633 = vst.msk [vmem:[%s4446_s5 + $0xa4] sm:$0xf] %vm1591_vm0, %v2505_v42  ;;  %v4015_v2 = vadd.f32 %v3900_v58, %v960_v23  ;;  %1683 = vst.msk [vmem:[%s4446_s5 + $0x16c] sm:$0xf] %vm1591_vm0, %v2555_v15  ;;  %v4022_v62 = vadd.f32 %v3900_v58, %v1160_v16  ;;  %v2068_v16 = vadd.f32 %v2067_v12, %v2066_v45 }
 0x1ab   :  { %v962_v34 = vpop.f32.mrf.mxu0  ;;  %v1162_v24 = vpop.f32.mrf.mxu1  ;;  %v1763_v23 = vadd.f32 %v1762_v17, %v1761_v44  ;;  %v2073_v45 = vsel %vm1692_vm1, %v1936_v57, 0.0 }
 0x1ac   :  { %v2506_v42 = vpack.c.bf16 %v4015_v2, %v4015_v2  ;;  %v2556_v15 = vpack.c.bf16 %v4022_v62, %v4022_v62  ;;  %v2070_v12 = vadd.f32 %v2069_v19, %v2068_v16  ;;  %v1937_v34 = vmul.f32 %v3931_v31, %v3931_v31 }
 0x1ad   :  { %v963_v0 = vpop.f32.mrf.mxu0  ;;  %v1163_v56 = vpop.f32.mrf.mxu1  ;;  %v1765_v17 = vadd.f32 %v1764_v1, %v1763_v23  ;;  %v1938_v1 = vmul.f32 %v3959_v52, %v3959_v52  ;;  %v1939_v31 = vmul.f32 %v3987_v29, %v3987_v29 }
 0x1ae   :  { %1634 = vst.msk [vmem:[%s4446_s5 + $0xa8] sm:$0xf] %vm1591_vm0, %v2506_v42  ;;  %v964_v50 = vadd.f32 %v3900_v58, %v963_v0  ;;  %1684 = vst.msk [vmem:[%s4446_s5 + $0x170] sm:$0xf] %vm1591_vm0, %v2556_v15  ;;  %v4046_v63 = vadd.f32 %v3900_v58, %v1163_v56  ;;  %v2072_v0 = vadd.f32 %v2071_v14, %v2070_v12  ;;  %v2075_v12 = vsel %vm1692_vm1, %v1937_v34, 0.0 }
 0x1af   :  { %v965_v37 = vpop.f32.mrf.mxu0  ;;  %v1165_v44 = vpop.f32.mrf.mxu1  ;;  %v1767_v15 = vadd.f32 %v1766_v28, %v1765_v17 }
 0x1b0   :  { %4474 = vst [vmem:[#allocation9_spill] sm:$0xff] %v4046_v63  ;;  %v2507_v24 = vpack.c.bf16 %v964_v50, %v964_v50  ;;  %v2557_v42 = vpack.c.bf16 %v4046_v63, %v4046_v63  ;;  %v2074_v28 = vadd.f32 %v2073_v45, %v2072_v0  ;;  %v1772_v37 = vsel %vm1692_vm1, %v3959_v52, 0.0 }
 0x1b1   :  { %v968_v19 = vpop.f32.mrf.mxu0  ;;  %v1168_v23 = vpop.f32.mrf.mxu1  ;;  %v1769_v56 = vadd.f32 %v1768_v9, %v1767_v15  ;;  %v1774_v9 = vsel %vm1692_vm1, %v3987_v29, 0.0  ;;  %v1940_v0 = vmul.f32 %v4015_v2, %v4015_v2 }
 0x1b2   :  { %1635 = vst.msk [vmem:[%s4446_s5 + $0xac] sm:$0xf] %vm1591_vm0, %v2507_v24  ;;  %v969_v57 = vadd.f32 %v3900_v58, %v968_v19  ;;  %1685 = vst.msk [vmem:[%s4446_s5 + $0x174] sm:$0xf] %vm1591_vm0, %v2557_v42  ;;  %v4069_v16 = vadd.f32 %v3900_v58, %v1168_v23  ;;  %v2077_v19 = vsel %vm1692_vm1, %v1938_v1, 0.0  ;;  %v2076_v34 = vadd.f32 %v2075_v12, %v2074_v28 }
 0x1b3   :  { %v970_v14 = vpop.f32.mrf.mxu0  ;;  %v1170_v17 = vpop.f32.mrf.mxu1  ;;  %v1771_v42 = vadd.f32 %v1770_v49, %v1769_v56  ;;  %v2079_v23 = vsel %vm1692_vm1, %v1939_v31, 0.0  ;;  %v2081_v31 = vsel %vm1692_vm1, %v1940_v0, 0.0 }
 0x1b4   :  { %4475 = vst [vmem:[#allocation10_spill] sm:$0xff] %v4069_v16  ;;  %v2508_v44 = vpack.c.bf16 %v969_v57, %v969_v57  ;;  %v2558_v24 = vpack.c.bf16 %v4069_v16, %v4069_v16  ;;  %v2766_v14 = vmov 0.0   ;;  %v1776_v17 = vsel %vm1692_vm1, %v4015_v2, 0.0 }
 0x1b5   :  { %v971_v45 = vpop.f32.mrf.mxu0  ;;  %v1171_v15 = vpop.f32.mrf.mxu1  ;;  %v1773_v1 = vadd.f32 %v1772_v37, %v1771_v42  ;;  %2210 = vst.msk [vmem:[#allocation2] sm:$0x3] %vm2209_vm2, %v2766_v14  ;;  %v2078_v16 = vadd.f32 %v2077_v19, %v2076_v34  ;;  %v1942_v63 = vmul.f32 %v969_v57, %v969_v57  ;;  %v1778_v37 = vsel %vm1692_vm1, %v964_v50, 0.0 }
 0x1b6   :  { %1636 = vst.msk [vmem:[%s4446_s5 + $0xb0] sm:$0xf] %vm1591_vm0, %v2508_v44  ;;  %v972_v52 = vadd.f32 %v3900_v58, %v971_v45  ;;  %1686 = vst.msk [vmem:[%s4446_s5 + $0x178] sm:$0xf] %vm1591_vm0, %v2558_v24  ;;  %v4093_v29 = vadd.f32 %v3900_v58, %v1171_v15  ;;  %v1941_v44 = vmul.f32 %v964_v50, %v964_v50 }
 0x1b7   :  { %v973_v49 = vpop.f32.mrf.mxu0  ;;  %v1173_v56 = vpop.f32.mrf.mxu1  ;;  %v1775_v15 = vadd.f32 %v1774_v9, %v1773_v1  ;;  %v2080_v19 = vadd.f32 %v2079_v23, %v2078_v16 }
 0x1b8   :  { %4476 = vst [vmem:[#allocation11_spill] sm:$0xff] %v4093_v29  ;;  %v2509_v45 = vpack.c.bf16 %v972_v52, %v972_v52  ;;  %v2559_v24 = vpack.c.bf16 %v4093_v29, %v4093_v29  ;;  %v1943_v0 = vmul.f32 %v972_v52, %v972_v52  ;;  %v2083_v1 = vsel %vm1692_vm1, %v1941_v44, 0.0 }
 0x1b9   :  { %v976_v28 = vpop.f32.mrf.mxu0  ;;  %v1176_v12 = vpop.f32.mrf.mxu1  ;;  %v1777_v9 = vadd.f32 %v1776_v17, %v1775_v15  ;;  %v1780_v49 = vsel %vm1692_vm1, %v969_v57, 0.0  ;;  %v1782_v16 = vsel %vm1692_vm1, %v972_v52, 0.0 }
 0x1ba   :  { %1637 = vst.msk [vmem:[%s4446_s5 + $0xb4] sm:$0xf] %vm1591_vm0, %v2509_v45  ;;  %v977_v2 = vadd.f32 %v3900_v58, %v976_v28  ;;  %1687 = vst.msk [vmem:[%s4446_s5 + $0x17c] sm:$0xf] %vm1591_vm0, %v2559_v24  ;;  %v4113_v42 = vadd.f32 %v3900_v58, %v1176_v12  ;;  %v2082_v45 = vadd.f32 %v2081_v31, %v2080_v19  ;;  %v2085_v24 = vsel %vm1692_vm1, %v1942_v63, 0.0 }
 0x1bb   :  { %v978_v34 = vpop.f32.mrf.mxu0  ;;  %v1178_v50 = vpop.f32.mrf.mxu1  ;;  %v1779_v28 = vadd.f32 %v1778_v37, %v1777_v9  ;;  %v2087_v52 = vsel %vm1692_vm1, %v1943_v0, 0.0 }
 0x1bc   :  { %v2510_v56 = vpack.c.bf16 %v977_v2, %v977_v2  ;;  %v2560_v14 = vpack.c.bf16 %v4113_v42, %v4113_v42  ;;  %v1944_v23 = vmul.f32 %v977_v2, %v977_v2  ;;  %v2084_v63 = vadd.f32 %v2083_v1, %v2082_v45 }
 0x1bd   :  { %v979_v29 = vpop.f32.mrf.mxu0  ;;  %v1179_v12 = vpop.f32.mrf.mxu1  ;;  %v1781_v44 = vadd.f32 %v1780_v49, %v1779_v28  ;;  %v1784_v37 = vsel %vm1692_vm1, %v977_v2, 0.0 }
 0x1be   :  { %1638 = vst.msk [vmem:[%s4446_s5 + $0xb8] sm:$0xf] %vm1591_vm0, %v2510_v56  ;;  %v980_v57 = vadd.f32 %v3900_v58, %v979_v29  ;;  %1688 = vst.msk [vmem:[%s4446_s5 + $0x180] sm:$0xf] %vm1591_vm0, %v2560_v14  ;;  %v4131_v17 = vadd.f32 %v3900_v58, %v1179_v12  ;;  %v2086_v34 = vadd.f32 %v2085_v24, %v2084_v63  ;;  %v2089_v12 = vsel %vm1692_vm1, %v1944_v23, 0.0 }
 0x1bf   :  { %v981_v15 = vpop.f32.mrf.mxu0  ;;  %v1181_v31 = vpop.f32.mrf.mxu1  ;;  %v1783_v50 = vadd.f32 %v1782_v16, %v1781_v44 }
 0x1c0   :  { %v2511_v19 = vpack.c.bf16 %v980_v57, %v980_v57  ;;  %v1945_v9 = vmul.f32 %v980_v57, %v980_v57  ;;  %v2561_v29 = vpack.c.bf16 %v4131_v17, %v4131_v17  ;;  %v1786_v0 = vsel %vm1692_vm1, %v980_v57, 0.0 }
 0x1c1   :  { %v984_v56 = vpop.f32.mrf.mxu0  ;;  %v1184_v14 = vpop.f32.mrf.mxu1  ;;  %v2088_v49 = vadd.f32 %v2087_v52, %v2086_v34  ;;  %v1785_v45 = vadd.f32 %v1784_v37, %v1783_v50  ;;  %v1948_v34 = vmul.f32 %v3195_v61, %v3195_v61 }
 0x1c2   :  { %1639 = vst.msk [vmem:[%s4446_s5 + $0xbc] sm:$0xf] %vm1591_vm0, %v2511_v19  ;;  %v985_v2 = vadd.f32 %v3900_v58, %v984_v56  ;;  %1689 = vst.msk [vmem:[%s4446_s5 + $0x184] sm:$0xf] %vm1591_vm0, %v2561_v29  ;;  %v4149_v1 = vadd.f32 %v3900_v58, %v1184_v14  ;;  %v2091_v28 = vsel %vm1692_vm1, %v1945_v9, 0.0 }
 0x1c3   :  { %v986_v24 = vpop.f32.mrf.mxu0  ;;  %v1186_v16 = vpop.f32.mrf.mxu1  ;;  %v2090_v15 = vadd.f32 %v2089_v12, %v2088_v49  ;;  %v1787_v31 = vadd.f32 %v1786_v0, %v1785_v45 }
 0x1c4   :  { %v2512_v23 = vpack.c.bf16 %v985_v2, %v985_v2  ;;  %v1788_v63 = vsel %vm1692_vm1, %v985_v2, 0.0  ;;  %v1946_v57 = vmul.f32 %v985_v2, %v985_v2  ;;  %v2562_v44 = vpack.c.bf16 %v4149_v1, %v4149_v1 }
 0x1c5   :  { %v987_v19 = vpop.f32.mrf.mxu0  ;;  %v1187_v29 = vpop.f32.mrf.mxu1  ;;  %v2092_v50 = vadd.f32 %v2091_v28, %v2090_v15  ;;  %v1789_v56 = vadd.f32 %v1788_v63, %v1787_v31  ;;  %v1950_v15 = vmul.f32 %v3227_v20, %v3227_v20 }
 0x1c6   :  { %1640 = vst.msk [vmem:[%s4446_s5 + $0xc0] sm:$0xf] %vm1591_vm0, %v2512_v23  ;;  %v2093_v52 = vsel %vm1692_vm1, %v1946_v57, 0.0  ;;  %v988_v37 = vadd.f32 %v3900_v58, %v987_v19  ;;  %1690 = vst.msk [vmem:[%s4446_s5 + $0x188] sm:$0xf] %vm1591_vm0, %v2562_v44  ;;  %v4166_v9 = vadd.f32 %v3900_v58, %v1187_v29  ;;  %v1792_v58 = vsel %vm1692_vm1, %v3195_v61, 0.0 }
 0x1c7   :  { %v989_v14 = vpop.f32.mrf.mxu0  ;;  %v1189_v12 = vpop.f32.mrf.mxu1  ;;  %v2094_v24 = vadd.f32 %v2093_v52, %v2092_v50  ;;  %v1949_v23 = vmul.f32 %v3209_v6, %v3209_v6  ;;  %v2097_v44 = vsel %vm1692_vm1, %v1948_v34, 0.0  ;;  %v1794_v61 = vsel %vm1692_vm1, %v3209_v6, 0.0 }
 0x1c8   :  { %v2513_v0 = vpack.c.bf16 %v988_v37, %v988_v37  ;;  %v1790_v2 = vsel %vm1692_vm1, %v988_v37, 0.0  ;;  %v1947_v49 = vmul.f32 %v988_v37, %v988_v37  ;;  %v2563_v45 = vpack.c.bf16 %v4166_v9, %v4166_v9 }
 0x1c9   :  { %v1791_v16 = vadd.f32 %v1790_v2, %v1789_v56  ;;  %v2099_v29 = vsel %vm1692_vm1, %v1949_v23, 0.0  ;;  %v1796_v52 = vsel %vm1692_vm1, %v3227_v20, 0.0  ;;  %v1951_v37 = vmul.f32 %v3243_v33, %v3243_v33 }
 0x1ca   :  { %1641 = vst.msk [vmem:[%s4446_s5 + $0xc4] sm:$0xf] %vm1591_vm0, %v2513_v0  ;;  %v2095_v28 = vsel %vm1692_vm1, %v1947_v49, 0.0  ;;  %1691 = vst.msk [vmem:[%s4446_s5 + $0x18c] sm:$0xf] %vm1591_vm0, %v2563_v45  ;;  %v2101_v34 = vsel %vm1692_vm1, %v1950_v15, 0.0  ;;  %v1952_v14 = vmul.f32 %v3259_v46, %v3259_v46  ;;  %v1953_v49 = vmul.f32 %v3275_v60, %v3275_v60 }
 0x1cb   :  { %v1793_v63 = vadd.f32 %v1792_v58, %v1791_v16  ;;  %v2096_v57 = vadd.f32 %v2095_v28, %v2094_v24  ;;  %v1798_v6 = vsel %vm1692_vm1, %v3243_v33, 0.0  ;;  %v2103_v2 = vsel %vm1692_vm1, %v1951_v37, 0.0 }
 0x1cc   :  { %v1800_v20 = vsel %vm1692_vm1, %v3259_v46, 0.0  ;;  %v2105_v16 = vsel %vm1692_vm1, %v1952_v14, 0.0  ;;  %v1802_v33 = vsel %vm1692_vm1, %v3275_v60, 0.0  ;;  %v1954_v58 = vmul.f32 %v3291_v11, %v3291_v11 }
 0x1cd   :  { %v1795_v31 = vadd.f32 %v1794_v61, %v1793_v63  ;;  %v2098_v19 = vadd.f32 %v2097_v44, %v2096_v57  ;;  %v2107_v63 = vsel %vm1692_vm1, %v1953_v49, 0.0  ;;  %v1804_v46 = vsel %vm1692_vm1, %v3291_v11, 0.0 }
 0x1ce   :  { %v1955_v57 = vmul.f32 %v3307_v25, %v3307_v25  ;;  %v2109_v15 = vsel %vm1692_vm1, %v1954_v58, 0.0  ;;  %v1806_v60 = vsel %vm1692_vm1, %v3307_v25, 0.0  ;;  %v1808_v11 = vsel %vm1692_vm1, %v3323_v39, 0.0 }
 0x1cf   :  { %v1797_v50 = vadd.f32 %v1796_v52, %v1795_v31  ;;  %v2100_v56 = vadd.f32 %v2099_v29, %v2098_v19  ;;  %v1956_v31 = vmul.f32 %v3323_v39, %v3323_v39  ;;  %v1957_v37 = vmul.f32 %v3339_v53, %v3339_v53 }
 0x1d0   :  { %v2111_v52 = vsel %vm1692_vm1, %v1955_v57, 0.0  ;;  %v1810_v25 = vsel %vm1692_vm1, %v3339_v53, 0.0  ;;  %v1812_v39 = vsel %vm1692_vm1, %v3355_v5, 0.0  ;;  %v1814_v53 = vsel %vm1692_vm1, %v3371_v21, 0.0 }
 0x1d1   :  { %v1799_v12 = vadd.f32 %v1798_v6, %v1797_v50  ;;  %v2102_v0 = vadd.f32 %v2101_v34, %v2100_v56  ;;  %v2113_v34 = vsel %vm1692_vm1, %v1956_v31, 0.0  ;;  %v1958_v6 = vmul.f32 %v3355_v5, %v3355_v5 }
 0x1d2   :  { %v1816_v5 = vsel %vm1692_vm1, %v3387_v36, 0.0  ;;  %v1962_v57 = vmul.f32 %v3419_v4, %v3419_v4 }
 0x1d3   :  { %v1801_v45 = vadd.f32 %v1800_v20, %v1799_v12  ;;  %v2104_v24 = vadd.f32 %v2103_v2, %v2102_v0  ;;  %v2115_v0 = vsel %vm1692_vm1, %v1957_v37, 0.0  ;;  %v1959_v2 = vmul.f32 %v3371_v21, %v3371_v21 }
 0x1d4   :  { %v1818_v21 = vsel %vm1692_vm1, %v3403_v51, 0.0 }
 0x1d5   :  { %v1803_v23 = vadd.f32 %v1802_v33, %v1801_v45  ;;  %v2106_v28 = vadd.f32 %v2105_v16, %v2104_v24  ;;  %v2117_v45 = vsel %vm1692_vm1, %v1958_v6, 0.0  ;;  %v1960_v24 = vmul.f32 %v3387_v36, %v3387_v36 }
 0x1d6   :  { %v2119_v58 = vsel %vm1692_vm1, %v1959_v2, 0.0  ;;  %v1820_v36 = vsel %vm1692_vm1, %v3419_v4, 0.0  ;;  %v1824_v4 = vsel %vm1692_vm1, %v3451_v38, 0.0  ;;  %v1967_v2 = vmul.f32 %v3509_v26, %v3509_v26 }
 0x1d7   :  { %v1805_v44 = vadd.f32 %v1804_v46, %v1803_v23  ;;  %v2108_v61 = vadd.f32 %v2107_v63, %v2106_v28  ;;  %v1961_v23 = vmul.f32 %v3403_v51, %v3403_v51  ;;  %v2121_v46 = vsel %vm1692_vm1, %v1960_v24, 0.0 }
 0x1d8   :  { %v1822_v51 = vsel %vm1692_vm1, %v3435_v22, 0.0 }
 0x1d9   :  { %v1807_v19 = vadd.f32 %v1806_v60, %v1805_v44  ;;  %v2110_v29 = vadd.f32 %v2109_v15, %v2108_v61  ;;  %v2123_v15 = vsel %vm1692_vm1, %v1961_v23, 0.0  ;;  %v1963_v60 = vmul.f32 %v3435_v22, %v3435_v22 }
 0x1da   :  { %v1826_v22 = vsel %vm1692_vm1, %v3467_v55, 0.0 }
 0x1db   :  { %v1809_v50 = vadd.f32 %v1808_v11, %v1807_v19  ;;  %v2112_v56 = vadd.f32 %v2111_v52, %v2110_v29  ;;  %v2125_v29 = vsel %vm1692_vm1, %v1962_v57, 0.0  ;;  %v1964_v52 = vmul.f32 %v3451_v38, %v3451_v38 }
 0x1dc   :  { %v1828_v38 = vsel %vm1692_vm1, %v3485_v10, 0.0 }
 0x1dd   :  { %v1811_v14 = vadd.f32 %v1810_v25, %v1809_v50  ;;  %v2114_v12 = vadd.f32 %v2113_v34, %v2112_v56  ;;  %v2127_v50 = vsel %vm1692_vm1, %v1963_v60, 0.0  ;;  %v1965_v56 = vmul.f32 %v3467_v55, %v3467_v55 }
 0x1de   :  { %v2129_v6 = vsel %vm1692_vm1, %v1964_v52, 0.0  ;;  %v1830_v55 = vsel %vm1692_vm1, %v3509_v26, 0.0  ;;  %v1834_v26 = vsel %vm1692_vm1, %v3545_v47, 0.0  ;;  %v1972_v60 = vmul.f32 %v3599_v27, %v3599_v27 }
 0x1df   :  { %v1813_v20 = vadd.f32 %v1812_v39, %v1811_v14  ;;  %v2116_v49 = vadd.f32 %v2115_v0, %v2114_v12  ;;  %v1966_v14 = vmul.f32 %v3485_v10, %v3485_v10  ;;  %v2131_v39 = vsel %vm1692_vm1, %v1965_v56, 0.0 }
 0x1e0   :  { %v1832_v10 = vsel %vm1692_vm1, %v3527_v35, 0.0 }
 0x1e1   :  { %v1815_v16 = vadd.f32 %v1814_v53, %v1813_v20  ;;  %v2118_v33 = vadd.f32 %v2117_v45, %v2116_v49  ;;  %v2133_v45 = vsel %vm1692_vm1, %v1966_v14, 0.0  ;;  %v1968_v53 = vmul.f32 %v3527_v35, %v3527_v35 }
 0x1e2   :  { %v1836_v35 = vsel %vm1692_vm1, %v3563_v59, 0.0 }
 0x1e3   :  { %v1817_v28 = vadd.f32 %v1816_v5, %v1815_v16  ;;  %v2120_v63 = vadd.f32 %v2119_v58, %v2118_v33  ;;  %v2135_v33 = vsel %vm1692_vm1, %v1967_v2, 0.0  ;;  %v1969_v58 = vmul.f32 %v3545_v47, %v3545_v47  ;;  %v4477_v2 = vld [vmem:[#allocation3_spill] sm:$0xff] }
 0x1e4   :  { %v1838_v47 = vsel %vm1692_vm1, %v3581_v8, 0.0 }
 0x1e5   :  { %v2122_v44 = vadd.f32 %v2121_v46, %v2120_v63  ;;  %v1819_v61 = vadd.f32 %v1818_v21, %v1817_v28  ;;  %v2137_v28 = vsel %vm1692_vm1, %v1968_v53, 0.0  ;;  %v1970_v63 = vmul.f32 %v3563_v59, %v3563_v59  ;;  %v4478_v53 = vld [vmem:[#allocation4_spill] sm:$0xff] }
 0x1e6   :  { %v2139_v57 = vsel %vm1692_vm1, %v1969_v58, 0.0  ;;  %v1840_v59 = vsel %vm1692_vm1, %v3599_v27, 0.0  ;;  %v1844_v27 = vsel %vm1692_vm1, %v3635_v54, 0.0  ;;  %v4479_v58 = vld [vmem:[#allocation5_spill] sm:$0xff] }
 0x1e7   :  { %v1821_v31 = vadd.f32 %v1820_v36, %v1819_v61  ;;  %v2124_v19 = vadd.f32 %v2123_v15, %v2122_v44  ;;  %v1971_v44 = vmul.f32 %v3581_v8, %v3581_v8  ;;  %v2141_v36 = vsel %vm1692_vm1, %v1970_v63, 0.0 }
 0x1e8   :  { %v1842_v8 = vsel %vm1692_vm1, %v3617_v41, 0.0  ;;  %v1854_v63 = vsel %vm1692_vm1, %v4479_v58, 0.0 }
 0x1e9   :  { %v1823_v11 = vadd.f32 %v1822_v51, %v1821_v31  ;;  %v2126_v37 = vadd.f32 %v2125_v29, %v2124_v19  ;;  %v2143_v29 = vsel %vm1692_vm1, %v1971_v44, 0.0  ;;  %v1973_v51 = vmul.f32 %v3617_v41, %v3617_v41 }
 0x1ea   :  { %v1846_v41 = vsel %vm1692_vm1, %v3653_v13, 0.0 }
 0x1eb   :  { %v1825_v34 = vadd.f32 %v1824_v4, %v1823_v11  ;;  %v2128_v25 = vadd.f32 %v2127_v50, %v2126_v37  ;;  %v2145_v37 = vsel %vm1692_vm1, %v1972_v60, 0.0  ;;  %v1974_v50 = vmul.f32 %v3635_v54, %v3635_v54 }
 0x1ec   :  { %v1848_v54 = vsel %vm1692_vm1, %v3671_v30, 0.0 }
 0x1ed   :  { %v1827_v12 = vadd.f32 %v1826_v22, %v1825_v34  ;;  %v2130_v0 = vadd.f32 %v2129_v6, %v2128_v25  ;;  %v2147_v34 = vsel %vm1692_vm1, %v1973_v51, 0.0  ;;  %v1975_v25 = vmul.f32 %v3653_v13, %v3653_v13 }
 0x1ee   :  { %v2149_v14 = vsel %vm1692_vm1, %v1974_v50, 0.0  ;;  %v1850_v13 = vsel %vm1692_vm1, %v4477_v2, 0.0 }
 0x1ef   :  { %v1829_v20 = vadd.f32 %v1828_v38, %v1827_v12  ;;  %v2132_v49 = vadd.f32 %v2131_v39, %v2130_v0  ;;  %v1976_v12 = vmul.f32 %v3671_v30, %v3671_v30  ;;  %v2151_v38 = vsel %vm1692_vm1, %v1975_v25, 0.0 }
 0x1f0   :  { %v1852_v30 = vsel %vm1692_vm1, %v4478_v53, 0.0 }
 0x1f1   :  { %v1831_v24 = vadd.f32 %v1830_v55, %v1829_v20  ;;  %v2134_v16 = vadd.f32 %v2133_v45, %v2132_v49  ;;  %v1977_v20 = vmul.f32 %v4477_v2, %v4477_v2  ;;  %v2153_v55 = vsel %vm1692_vm1, %v1976_v12, 0.0 }
 0x1f3   :  { %v1833_v5 = vadd.f32 %v1832_v10, %v1831_v24  ;;  %v2136_v23 = vadd.f32 %v2135_v33, %v2134_v16  ;;  %v1978_v24 = vmul.f32 %v4478_v53, %v4478_v53  ;;  %v2155_v10 = vsel %vm1692_vm1, %v1977_v20, 0.0 }
 0x1f4   :  { %v1988_v53 = vmul.f32 %v3966_v32, %v3966_v32 }
 0x1f5   :  { %v1835_v46 = vadd.f32 %v1834_v26, %v1833_v5  ;;  %v2138_v21 = vadd.f32 %v2137_v28, %v2136_v23  ;;  %v1979_v5 = vmul.f32 %v4479_v58, %v4479_v58  ;;  %v2157_v26 = vsel %vm1692_vm1, %v1978_v24, 0.0 }
 0x1f7   :  { %v1837_v61 = vadd.f32 %v1836_v35, %v1835_v46  ;;  %v2140_v15 = vadd.f32 %v2139_v57, %v2138_v21  ;;  %v4480_v46 = vld [vmem:[#allocation6_spill] sm:$0xff]  ;;  %v2159_v44 = vsel %vm1692_vm1, %v1979_v5, 0.0  ;;  %v2177_v5 = vsel %vm1692_vm1, %v1988_v53, 0.0 }
 0x1f8   :  { %v1980_v21 = vmul.f32 %v4480_v46, %v4480_v46 }
 0x1f9   :  { %v1839_v31 = vadd.f32 %v1838_v47, %v1837_v61  ;;  %v2142_v19 = vadd.f32 %v2141_v36, %v2140_v15  ;;  %v1856_v61 = vsel %vm1692_vm1, %v4480_v46, 0.0  ;;  %v4481_v15 = vld [vmem:[#allocation7_spill] sm:$0xff]  ;;  %v4483_v46 = vld [vmem:[#allocation9_spill] sm:$0xff] }
 0x1fa   :  { %v1981_v36 = vmul.f32 %v4481_v15, %v4481_v15 }
 0x1fb   :  { %v1841_v52 = vadd.f32 %v1840_v59, %v1839_v31  ;;  %v2144_v11 = vadd.f32 %v2143_v29, %v2142_v19  ;;  %v2161_v31 = vsel %vm1692_vm1, %v1980_v21, 0.0  ;;  %v1858_v19 = vsel %vm1692_vm1, %v4481_v15, 0.0  ;;  %v4482_v29 = vld [vmem:[#allocation8_spill] sm:$0xff] }
 0x1fc   :  { %v1982_v59 = vmul.f32 %v4482_v29, %v4482_v29  ;;  %v1991_v21 = vmul.f32 %v4483_v46, %v4483_v46 }
 0x1fd   :  { %v1843_v4 = vadd.f32 %v1842_v8, %v1841_v52  ;;  %v2146_v56 = vadd.f32 %v2145_v37, %v2144_v11  ;;  %v2163_v11 = vsel %vm1692_vm1, %v1981_v36, 0.0  ;;  %v1860_v37 = vsel %vm1692_vm1, %v4482_v29, 0.0 }
 0x1fe   :  { %v1983_v8 = vmul.f32 %v3821_v18, %v3821_v18 }
 0x1ff   :  { %v1845_v6 = vadd.f32 %v1844_v27, %v1843_v4  ;;  %v2148_v22 = vadd.f32 %v2147_v34, %v2146_v56  ;;  %v2165_v56 = vsel %vm1692_vm1, %v1982_v59, 0.0  ;;  %v1862_v34 = vsel %vm1692_vm1, %v3821_v18, 0.0 }
 0x200   :  { %v1984_v27 = vmul.f32 %v3849_v7, %v3849_v7  ;;  %v1866_v18 = vsel %vm1692_vm1, %v3877_v40, 0.0 }
 0x201   :  { %v2150_v0 = vadd.f32 %v2149_v14, %v2148_v22  ;;  %v1847_v39 = vadd.f32 %v1846_v41, %v1845_v6  ;;  %v2167_v22 = vsel %vm1692_vm1, %v1983_v8, 0.0  ;;  %v1864_v14 = vsel %vm1692_vm1, %v3849_v7, 0.0 }
 0x202   :  { %v1985_v41 = vmul.f32 %v3877_v40, %v3877_v40  ;;  %v1868_v7 = vsel %vm1692_vm1, %v3910_v3, 0.0  ;;  %v1870_v40 = vsel %vm1692_vm1, %v3938_v48, 0.0 }
 0x203   :  { %v2152_v49 = vadd.f32 %v2151_v38, %v2150_v0  ;;  %v1849_v45 = vadd.f32 %v1848_v54, %v1847_v39  ;;  %v2169_v39 = vsel %vm1692_vm1, %v1984_v27, 0.0  ;;  %v1986_v38 = vmul.f32 %v3910_v3, %v3910_v3 }
 0x204   :  { %v2171_v20 = vsel %vm1692_vm1, %v1985_v41, 0.0  ;;  %v1872_v3 = vsel %vm1692_vm1, %v3966_v32, 0.0  ;;  %v1876_v32 = vsel %vm1692_vm1, %v4022_v62, 0.0 }
 0x205   :  { %v2154_v16 = vadd.f32 %v2153_v55, %v2152_v49  ;;  %v1851_v33 = vadd.f32 %v1850_v13, %v1849_v45  ;;  %v1987_v49 = vmul.f32 %v3938_v48, %v3938_v48  ;;  %v2173_v13 = vsel %vm1692_vm1, %v1986_v38, 0.0 }
 0x206   :  { %v1874_v48 = vsel %vm1692_vm1, %v3994_v43, 0.0 }
 0x207   :  { %v2156_v23 = vadd.f32 %v2155_v10, %v2154_v16  ;;  %v1853_v28 = vadd.f32 %v1852_v30, %v1851_v33  ;;  %v2175_v33 = vsel %vm1692_vm1, %v1987_v49, 0.0  ;;  %v1989_v10 = vmul.f32 %v3994_v43, %v3994_v43 }
 0x208   :  { %v1878_v43 = vsel %vm1692_vm1, %v4483_v46, 0.0  ;;  %v2232_v46 = vlaneseq }
 0x209   :  { %v2158_v57 = vadd.f32 %v2157_v26, %v2156_v23  ;;  %v1855_v35 = vadd.f32 %v1854_v63, %v1853_v28  ;;  %v1990_v23 = vmul.f32 %v4022_v62, %v4022_v62  ;;  %v2179_v63 = vsel %vm1692_vm1, %v1989_v10, 0.0 }
 0x20b   :  { %v2160_v47 = vadd.f32 %v2159_v44, %v2158_v57  ;;  %v1857_v60 = vadd.f32 %v1856_v61, %v1855_v35  ;;  %v2181_v44 = vsel %vm1692_vm1, %v1990_v23, 0.0  ;;  %v4484_v61 = vld [vmem:[#allocation10_spill] sm:$0xff] }
 0x20c   :  { %v1992_v15 = vmul.f32 %v4484_v61, %v4484_v61  ;;  %v1880_v62 = vsel %vm1692_vm1, %v4484_v61, 0.0 }
 0x20d   :  { %v2162_v51 = vadd.f32 %v2161_v31, %v2160_v47  ;;  %v1859_v52 = vadd.f32 %v1858_v19, %v1857_v60  ;;  %v2183_v60 = vsel %vm1692_vm1, %v1991_v21, 0.0  ;;  %v4485_v31 = vld [vmem:[#allocation11_spill] sm:$0xff]  ;;  %v2224_v21 = vld [vmem:[%s4447_s3] sm:$0x1] }
 0x20e   :  { %v1993_v19 = vmul.f32 %v4485_v31, %v4485_v31 }
 0x20f   :  { %v2164_v50 = vadd.f32 %v2163_v11, %v2162_v51  ;;  %v1861_v4 = vadd.f32 %v1860_v37, %v1859_v52  ;;  %v2185_v51 = vsel %vm1692_vm1, %v1992_v15, 0.0  ;;  %v1882_v52 = vsel %vm1692_vm1, %v4485_v31, 0.0 }
 0x210   :  { %v1994_v11 = vmul.f32 %v4113_v42, %v4113_v42 }
 0x211   :  { %v2166_v25 = vadd.f32 %v2165_v56, %v2164_v50  ;;  %v1863_v6 = vadd.f32 %v1862_v34, %v1861_v4  ;;  %v2187_v50 = vsel %vm1692_vm1, %v1993_v19, 0.0  ;;  %v1884_v4 = vsel %vm1692_vm1, %v4113_v42, 0.0 }
 0x212   :  { %v1995_v56 = vmul.f32 %v4131_v17, %v4131_v17  ;;  %v1888_v42 = vsel %vm1692_vm1, %v4149_v1, 0.0 }
 0x213   :  { %v2168_v12 = vadd.f32 %v2167_v22, %v2166_v25  ;;  %v1865_v0 = vadd.f32 %v1864_v14, %v1863_v6  ;;  %v2189_v25 = vsel %vm1692_vm1, %v1994_v11, 0.0  ;;  %v1886_v6 = vsel %vm1692_vm1, %v4131_v17, 0.0 }
 0x214   :  { %v1996_v22 = vmul.f32 %v4149_v1, %v4149_v1  ;;  %v1890_v17 = vsel %vm1692_vm1, %v4166_v9, 0.0 }
 0x215   :  { %v2170_v54 = vadd.f32 %v2169_v39, %v2168_v12  ;;  %v1867_v2 = vadd.f32 %v1866_v18, %v1865_v0  ;;  %v2191_v12 = vsel %vm1692_vm1, %v1995_v56, 0.0  ;;  %v1997_v0 = vmul.f32 %v4166_v9, %v4166_v9 }
 0x216   :  { %v2193_v38 = vsel %vm1692_vm1, %v1996_v22, 0.0 }
 0x217   :  { %v2172_v45 = vadd.f32 %v2171_v20, %v2170_v54  ;;  %v1869_v55 = vadd.f32 %v1868_v7, %v1867_v2  ;;  %v2195_v20 = vsel %vm1692_vm1, %v1997_v0, 0.0 }
 0x219   :  { %v2174_v24 = vadd.f32 %v2173_v13, %v2172_v45  ;;  %v1871_v16 = vadd.f32 %v1870_v40, %v1869_v55 }
 0x21b   :  { %v2176_v30 = vadd.f32 %v2175_v33, %v2174_v24  ;;  %v1873_v58 = vadd.f32 %v1872_v3, %v1871_v16 }
 0x21d   :  { %v2178_v28 = vadd.f32 %v2177_v5, %v2176_v30  ;;  %v1875_v26 = vadd.f32 %v1874_v48, %v1873_v58  ;;  %v2211_v30 = vld [vmem:[#allocation2] sm:$0x3] }
 0x21f   :  { %v2180_v57 = vadd.f32 %v2179_v63, %v2178_v28  ;;  %v1877_v35 = vadd.f32 %v1876_v32, %v1875_v26 }
 0x221   :  { %v2182_v36 = vadd.f32 %v2181_v44, %v2180_v57  ;;  %v1879_v47 = vadd.f32 %v1878_v43, %v1877_v35  ;;  %v2233_v57 = vshrl.u32 %v2232_v46, 7  ;;  %v2228_v43 = vld [vmem:[%s4448_s4] sm:$0x1] }
 0x223   :  { %v2184_v29 = vadd.f32 %v2183_v60, %v2182_v36  ;;  %v1881_v59 = vadd.f32 %v1880_v62, %v1879_v47  ;;  %v2234_v15 = vsub.s32 0, %v2233_v57 }
 0x225   :  { %v2186_v37 = vadd.f32 %v2185_v51, %v2184_v29  ;;  %v1883_v8 = vadd.f32 %v1882_v52, %v1881_v59 }
 0x227   :  { %v2188_v34 = vadd.f32 %v2187_v50, %v2186_v37  ;;  %v1885_v27 = vadd.f32 %v1884_v4, %v1883_v8 }
 0x229   :  { %v2190_v14 = vadd.f32 %v2189_v25, %v2188_v34  ;;  %v1887_v41 = vadd.f32 %v1886_v6, %v1885_v27 }
 0x22b   :  { %v2192_v39 = vadd.f32 %v2191_v12, %v2190_v14  ;;  %v1889_v18 = vadd.f32 %v1888_v42, %v1887_v41 }
 0x22d   :  { %v2194_v54 = vadd.f32 %v2193_v38, %v2192_v39  ;;  %v1891_v2 = vadd.f32 %v1890_v17, %v1889_v18 }
 0x22f   :  { %v1892_v7 = vrot.slane %v1891_v2, 4  ;;  %v2196_v49 = vadd.f32 %v2195_v20, %v2194_v54 }
 0x231   :  { %v1893_v45 = vadd.f32 %v1892_v7, %v1891_v2  ;;  %v2197_v55 = vrot.slane %v2196_v49, 4 }
 0x233   :  { %v1894_v13 = vrot.slane %v1893_v45, 2  ;;  %v2198_v1 = vadd.f32 %v2197_v55, %v2196_v49 }
 0x235   :  { %v1895_v40 = vadd.f32 %v1894_v13, %v1893_v45  ;;  %v2199_v53 = vrot.slane %v2198_v1, 2 }
 0x237   :  { %v1896_v24 = vrot.slane %v1895_v40, 1  ;;  %v2200_v16 = vadd.f32 %v2199_v53, %v2198_v1 }
 0x239   :  { %v2201_v33 = vrot.slane %v2200_v16, 1  ;;  %v1897_v3 = vadd.f32 %v1896_v24, %v1895_v40 }
 0x23b   :  { %v2202_v10 = vadd.f32 %v2201_v33, %v2200_v16 }
 0x23d   :  { %v2204_v9 = vsel %vm2203_vm3, %v1897_v3, %v2202_v10 }
 0x23e   :  { %v2212_v58 = vadd.f32 %v2211_v30, %v2204_v9 }
 0x240   :  { %2214 = vst.msk [vmem:[#allocation2] sm:$0x3] %vm2209_vm2, %v2212_v58 }
 0x247   :  { %v2218_v5 = vld [vmem:[#allocation2] sm:$0x1]  ;;  %v2220_v48 = vld [vmem:[#allocation2 + $0x1] sm:$0x1] }
 0x248   :  { %v2219_v23 = vmul.f32 0.00125, %v2218_v5  ;;  %v2221_v28 = vmul.f32 0.00125, %v2220_v48 }
 0x24a   :  { %v2222_v26 = vmul.f32 %v2219_v23, %v2219_v23 }
 0x24c   :  { %v2223_v63 = vsub.f32 %v2221_v28, %v2222_v26 }
 0x24e   :  { %v2225_v32 = vadd.f32 1e-05, %v2223_v63 }
 0x250   :  { %2762 = vrsqrt.f32 %v2225_v32 }
 0x25d   :  { %v2763_v35 = vpop.eup %2762 }
 0x25e   :  { %v2227_v44 = vmul.f32 %v2763_v35, %v2224_v21 }
 0x260   :  { %v2229_v61 = vmul.f32 %v2227_v44, %v2219_v23 }
 0x262   :  { %v2230_v36 = vsub.f32 %v2228_v43, %v2229_v61 }
 0x264   :  { %v2235_v47 = vrot.slane %v2230_v36, %v2234_v15 }
 0x266   :  { %v2237_v60 = vsel %vm2203_vm3, %v2227_v44, %v2235_v47 }
 0x267   :  { %2238 = vst.msk [vmem:[%s4449_s6] sm:$0x3] %vm2209_vm2, %v2237_v60 }

// kernel: tile.19
= control target key start
LH: loop header
LB: loop body
LE: loop exit
PB: predicated region body
PF: predicated region fallthrough
CT: control target
= control target key end

     0   :  { %s8_s6 = smov 3  ;;  %s11_s7 = smov 12  ;;  %vm13_vm0 = vcmask 1043458   ;;  %vm18_vm1 = vcmask 1045508   ;;  %vm23_vm2 = vcmask 1047558   ;;  %vm3_vm3 = vcmask 261120   ;;  %s212_s0 = inlined_call_operand.vmem [shape: f32[2,16,32], index: 0, kind: input, shape index: {}]   ;;  %s213_s1 = inlined_call_operand.vmem [shape: f32[2,512], index: 1, kind: output, shape index: {}]  }
   0x1   :  { %v121_v0 = vld [vmem:[%s212_s0 + $0x3] ss:$16 sm:%s8_s6]   ;;  %v122_v1 = vld [vmem:[%s212_s0 - $0x19] ss:$16 sm:%s11_s7]   ;;  %s16_s12 = smov 48  ;;  %s21_s13 = smov 192 }
   0x2   :  { %v14_v2 = vsel %vm13_vm0, %v122_v1, %v121_v0  ;;  %v123_v3 = vld [vmem:[%s212_s0 - $0x35] ss:$16 sm:%s16_s12]   ;;  %v124_v4 = vld [vmem:[%s212_s0 - $0x51] ss:$16 sm:%s21_s13]   ;;  %s36_s18 = smov 3  ;;  %s39_s21 = smov 12 }
   0x3   :  { %v19_v5 = vsel %vm18_vm1, %v123_v3, %v14_v2  ;;  %v125_v6 = vld [vmem:[%s212_s0 + $0x2] ss:$16 sm:%s36_s18]   ;;  %s44_s22 = smov 48  ;;  %v2_v7 = vld [vmem:[%s212_s0] ss:$4 sm:$0xff]   ;;  %s49_s29 = smov 192 }
   0x4   :  { %v24_v8 = vsel %vm23_vm2, %v124_v4, %v19_v5  ;;  %v126_v9 = vld [vmem:[%s212_s0 - $0x1a] ss:$16 sm:%s39_s21]   ;;  %v127_v10 = vld [vmem:[%s212_s0 - $0x36] ss:$16 sm:%s44_s22]   ;;  %s139_s30 = smov 96   ;;  %s64_s4 = smov 3 }
   0x5   :  { %25 = vrot.lane.b32.xlu0 %v24_v8, %s139_s30  ;;  %v42_v11 = vsel %vm13_vm0, %v126_v9, %v125_v6  ;;  %v128_v12 = vld [vmem:[%s212_s0 - $0x52] ss:$16 sm:%s49_s29]   ;;  %s67_s5 = smov 12  ;;  %s72_s10 = smov 48  ;;  %vm27_vm4 = vcmask 1048320   ;;  %vm55_vm5 = vcmask 785920  }
   0x6   :  { %v47_v13 = vsel %vm18_vm1, %v127_v10, %v42_v11  ;;  %v129_v14 = vld [vmem:[%s212_s0 + $0x1] ss:$16 sm:%s64_s4]   ;;  %v130_v15 = vld [vmem:[%s212_s0 - $0x1b] ss:$16 sm:%s67_s5]   ;;  %s77_s11 = smov 192  ;;  %s141_s16 = smov 32  }
   0x7   :  { %4 = vst.msk [vmem:[#allocation0] ss:$8 sm:$0xf] %vm3_vm3, %v2_v7   ;;  %6 = vst.msk [vmem:[#allocation0 - $0x1f] ss:$8 sm:$0xf0] %vm3_vm3, %v2_v7   ;;  %v52_v16 = vsel %vm23_vm2, %v128_v12, %v47_v13  ;;  %v70_v17 = vsel %vm13_vm0, %v130_v15, %v129_v14 }
   0x8   :  { %v131_v18 = vld [vmem:[%s212_s0 - $0x37] ss:$16 sm:%s72_s10]   ;;  %v132_v19 = vld [vmem:[%s212_s0 - $0x53] ss:$16 sm:%s77_s11]   ;;  %s140_s0 = smov 64   ;;  %vm83_vm6 = vcmask 523520  }
   0x9   :  { %v75_v20 = vsel %vm18_vm1, %v131_v18, %v70_v17  ;;  %53 = vrot.lane.b32.xlu0 %v52_v16, %s140_s0 }
   0xa   :  { %v80_v21 = vsel %vm23_vm2, %v132_v19, %v75_v20 }
   0xb   :  { %81 = vrot.lane.b32.xlu1 %v80_v21, %s141_s16 }
  0x77   :  { %v26_v22 = vpop.permute.xlu0 %25  }
  0x78   :  { %28 = vst.msk [vmem:[#allocation0] sm:$0x3] %vm27_vm4, %v26_v22   ;;  %30 = vst.msk [vmem:[#allocation0 + $0x6] sm:$0xc] %vm27_vm4, %v26_v22  }
  0x79   :  { %32 = vst.msk [vmem:[#allocation0 + $0xc] sm:$0x30] %vm27_vm4, %v26_v22   ;;  %34 = vst.msk [vmem:[#allocation0 + $0x12] sm:$0xc0] %vm27_vm4, %v26_v22  }
  0x7b   :  { %v54_v23 = vpop.permute.xlu0 %53  }
  0x7c   :  { %56 = vst.msk [vmem:[#allocation0] sm:$0x3] %vm55_vm5, %v54_v23   ;;  %58 = vst.msk [vmem:[#allocation0 + $0x6] sm:$0xc] %vm55_vm5, %v54_v23  }
  0x7d   :  { %60 = vst.msk [vmem:[#allocation0 + $0xc] sm:$0x30] %vm55_vm5, %v54_v23   ;;  %62 = vst.msk [vmem:[#allocation0 + $0x12] sm:$0xc0] %vm55_vm5, %v54_v23   ;;  %v82_v24 = vpop.permute.xlu1 %81  }
  0x7e   :  { %84 = vst.msk [vmem:[#allocation0] sm:$0x3] %vm83_vm6, %v82_v24   ;;  %86 = vst.msk [vmem:[#allocation0 + $0x6] sm:$0xc] %vm83_vm6, %v82_v24  }
  0x7f   :  { %88 = vst.msk [vmem:[#allocation0 + $0xc] sm:$0x30] %vm83_vm6, %v82_v24   ;;  %90 = vst.msk [vmem:[#allocation0 + $0x12] sm:$0xc0] %vm83_vm6, %v82_v24  }
  0x85   :  { %v95_v25 = vld [vmem:[#allocation0] sm:$0x3]  ;;  %v100_v26 = vld [vmem:[#allocation0 + $0x8] sm:$0x3] }
  0x86   :  { %v106_v27 = vld [vmem:[#allocation0 + $0x10] sm:$0x3]  ;;  %98 = vst [vmem:[%s213_s1] sm:$0x3] %v95_v25  ;;  %133 = vst [vmem:[%s213_s1 + $0x2] sm:$0x3] %v100_v26 }
  0x87   :  { %134 = vst [vmem:[%s213_s1 + $0x4] sm:$0x3] %v106_v27  ;;  %v113_v28 = vld [vmem:[#allocation0 + $0x18] sm:$0x3] }
  0x88   :  { %135 = vst [vmem:[%s213_s1 + $0x6] sm:$0x3] %v113_v28 }

// kernel: dqn_forward.5
= control target key start
LH: loop header
LB: loop body
LE: loop exit
PB: predicated region body
PF: predicated region fallthrough
CT: control target
= control target key end

     0   :  { %v154_v22 = vlaneseq  ;;  %vm1144_vm0 = vcmask 517120   ;;  %vm1081_vm1 = vcmask 519168   ;;  %vm1104_vm2 = vcmask 523264   ;;  %s2266_s2 = inlined_call_operand.vmem [shape: bf16[512,64], index: 2, kind: input, shape index: {}]   ;;  %s2267_s0 = inlined_call_operand.vmem [shape: bf16[162,512], index: 0, kind: input, shape index: {}]   ;;  %s2268_s1 = inlined_call_operand.vmem [shape: f32[2,512], index: 1, kind: input, shape index: {}]   ;;  %s2269_s3 = inlined_call_operand.vmem [shape: f32[1,64], index: 3, kind: input, shape index: {}]   ;;  %s2270_s6 = inlined_call_operand.vmem [shape: bf16[162,64], index: 6, kind: output, shape index: {0}]   ;;  %s2271_s4 = inlined_call_operand.vmem [shape: f32[1,64], index: 4, kind: input, shape index: {}]   ;;  %s2272_s5 = inlined_call_operand.vmem [shape: f32[1,64], index: 5, kind: input, shape index: {}]   ;;  %s2273_s7 = inlined_call_operand.vmem [shape: f32[2,64], index: 7, kind: output, shape index: {1}]  }
   0x1   :  { %v1504_v0 = vld [vmem:[%s2266_s2 + $0x78] sm:$0xff]   ;;  %v1508_v4 = vld [vmem:[%s2266_s2 + $0x70] sm:$0xff]   ;;  %v1512_v8 = vld [vmem:[%s2266_s2 + $0x68] sm:$0xff]   ;;  %vm1102_vm3 = vcmask 516096   ;;  %vm1221_vm4 = vcmask 1040384  }
   0x2   :  { %v1505_v1 = vld [vmem:[%s2266_s2 + $0xf8] sm:$0xff]   ;;  %1339 = vmatprep.subr.bf16.mxu0 %v1504_v0  ;;  %v1509_v5 = vld [vmem:[%s2266_s2 + $0xf0] sm:$0xff]   ;;  %v1513_v9 = vld [vmem:[%s2266_s2 + $0xe8] sm:$0xff]   ;;  %v155_v27 = vshrl.u32 %v154_v22, 7 }
   0x3   :  { %v1506_v2 = vld [vmem:[%s2266_s2 + $0x38] sm:$0xff]   ;;  %1421 = vmatprep.subr.bf16.mxu1 %v1505_v1  ;;  %v1510_v6 = vld [vmem:[%s2266_s2 + $0x30] sm:$0xff]   ;;  %v1514_v10 = vld [vmem:[%s2266_s2 + $0x28] sm:$0xff]  }
   0x4   :  { %v1507_v3 = vld [vmem:[%s2266_s2 + $0xb8] sm:$0xff]   ;;  %1340 = vmatpush3.bf16.msra.mxu0 %v1506_v2  ;;  %v1511_v7 = vld [vmem:[%s2266_s2 + $0xb0] sm:$0xff]   ;;  %v1515_v11 = vld [vmem:[%s2266_s2 + $0xa8] sm:$0xff]   ;;  %v160_v32 = vsub.s32 1, %v155_v27  ;;  %v168_v34 = vsub.s32 3, %v155_v27  ;;  %v1675_v36 = vsub.s32 0, %v155_v27 }
   0x5   :  { %1422 = vmatpush3.bf16.msra.mxu1 %v1507_v3  ;;  %1341 = vmatprep.subr.bf16.mxu0 %v1508_v4  ;;  %v1516_v12 = vld [vmem:[%s2266_s2 + $0x60] sm:$0xff]   ;;  %v1520_v16 = vld [vmem:[%s2266_s2 + $0x58] sm:$0xff]   ;;  %v1524_v20 = vld [vmem:[%s2266_s2 + $0x50] sm:$0xff]   ;;  %v164_v40 = vsub.s32 2, %v155_v27 }
   0x6   :  { %1423 = vmatprep.subr.bf16.mxu1 %v1509_v5  ;;  %v1517_v13 = vld [vmem:[%s2266_s2 + $0xe0] sm:$0xff]   ;;  %v1521_v17 = vld [vmem:[%s2266_s2 + $0xd8] sm:$0xff]   ;;  %v1525_v21 = vld [vmem:[%s2266_s2 + $0xd0] sm:$0xff]  }
   0x7   :  { %v1518_v14 = vld [vmem:[%s2266_s2 + $0x20] sm:$0xff]   ;;  %v1522_v18 = vld [vmem:[%s2266_s2 + $0x18] sm:$0xff]   ;;  %v1526_v23 = vld [vmem:[%s2266_s2 + $0x10] sm:$0xff]  }
   0x8   :  { %1342 = vmatpush3.bf16.msra.mxu0 %v1510_v6  ;;  %v1519_v15 = vld [vmem:[%s2266_s2 + $0xa0] sm:$0xff]   ;;  %v1523_v19 = vld [vmem:[%s2266_s2 + $0x98] sm:$0xff]   ;;  %v1527_v24 = vld [vmem:[%s2266_s2 + $0x90] sm:$0xff]  }
   0x9   :  { %1424 = vmatpush3.bf16.msra.mxu1 %v1511_v7  ;;  %1343 = vmatprep.subr.bf16.mxu0 %v1512_v8  ;;  %v1528_v25 = vld [vmem:[%s2266_s2 + $0x48] sm:$0xff]   ;;  %v1532_v30 = vld [vmem:[%s2266_s2 + $0x40] sm:$0xff]   ;;  %v28_v38 = vld [vmem:[%s2267_s0 + $0x10] sm:$0xff] }
   0xa   :  { %1425 = vmatprep.subr.bf16.mxu1 %v1513_v9  ;;  %v1529_v26 = vld [vmem:[%s2266_s2 + $0xc8] sm:$0xff]   ;;  %v1533_v31 = vld [vmem:[%s2266_s2 + $0xc0] sm:$0xff]   ;;  %v72_v43 = vunpack.c.l.bf16 %v28_v38  ;;  %v73_v44 = vunpack.c.h.bf16 %v28_v38  ;;  %v29_v47 = vld [vmem:[%s2267_s0 + $0x18] sm:$0xff] }
   0xb   :  { %v1530_v28 = vld [vmem:[%s2266_s2 + $0x8] sm:$0xff]   ;;  %v1534_v33 = vld [vmem:[%s2266_s2] sm:$0xff]   ;;  %v74_v52 = vunpack.c.l.bf16 %v29_v47  ;;  %v75_v53 = vunpack.c.h.bf16 %v29_v47 }
   0xc   :  { %1344 = vmatpush3.bf16.msra.mxu0 %v1514_v10  ;;  %v1531_v29 = vld [vmem:[%s2266_s2 + $0x88] sm:$0xff]   ;;  %v1535_v35 = vld [vmem:[%s2266_s2 + $0x80] sm:$0xff]  }
   0xd   :  { %1426 = vmatpush3.bf16.msra.mxu1 %v1515_v11  ;;  %1345 = vmatprep.subr.bf16.mxu0 %v1516_v12  ;;  %v26_v37 = vld [vmem:[%s2267_s0] sm:$0xff]  ;;  %v27_v46 = vld [vmem:[%s2267_s0 + $0x8] sm:$0xff] }
   0xe   :  { %1427 = vmatprep.subr.bf16.mxu1 %v1517_v13  ;;  %v152_v39 = vld [vmem:[%s2268_s1] ss:$2 sm:$0xf]  ;;  %v68_v41 = vunpack.c.l.bf16 %v26_v37  ;;  %v69_v42 = vunpack.c.h.bf16 %v26_v37  ;;  %v1263_v45 = vld [vmem:[%s2268_s1 + $0x1] ss:$2 sm:$0xf]  ;;  %v70_v50 = vunpack.c.l.bf16 %v27_v46  ;;  %v71_v51 = vunpack.c.h.bf16 %v27_v46 }
   0xf   :  { %v1695_v48 = vrot.slane %v152_v39, %v160_v32  ;;  %v1697_v49 = vrot.slane %v1263_v45, %v160_v32  ;;  %v1699_v54 = vrot.slane %v152_v39, %v168_v34  ;;  %v1701_v55 = vrot.slane %v1263_v45, %v168_v34  ;;  %v30_v8 = vld [vmem:[%s2267_s0 + $0x20] sm:$0xff]  ;;  %v32_v13 = vld [vmem:[%s2267_s0 + $0x30] sm:$0xff] }
  0x10   :  { %1346 = vmatpush3.bf16.msra.mxu0 %v1518_v14  ;;  %v1706_v58 = vrot.slane %v152_v39, %v1675_v36  ;;  %v1709_v59 = vrot.slane %v1263_v45, %v1675_v36  ;;  %v1713_v62 = vrot.slane %v152_v39, %v164_v40  ;;  %v1715_v63 = vrot.slane %v1263_v45, %v164_v40  ;;  %v34_v45 = vld [vmem:[%s2267_s0 + $0x40] sm:$0xff] }
  0x11   :  { %1428 = vmatpush3.bf16.msra.mxu1 %v1519_v15  ;;  %1347 = vmatprep.subr.bf16.mxu0 %v1520_v16  ;;  %v175_v56 = vmul.f32 %v1695_v48, %v69_v42  ;;  %v179_v57 = vmul.f32 %v1695_v48, %v73_v44  ;;  %v177_v60 = vmul.f32 %v1699_v54, %v71_v51  ;;  %v81_v27 = vunpack.c.h.bf16 %v32_v13 }
  0x12   :  { %1429 = vmatprep.subr.bf16.mxu1 %v1521_v17  ;;  %v181_v61 = vmul.f32 %v1699_v54, %v75_v53  ;;  %v174_v2 = vmul.f32 %v1706_v58, %v68_v41  ;;  %v178_v3 = vmul.f32 %v1706_v58, %v72_v43  ;;  %v176_v6 = vmul.f32 %v1713_v62, %v70_v50 }
  0x13   :  { %v282_v0 = vadd.f32 %v1697_v49, %v175_v56  ;;  %v286_v1 = vadd.f32 %v1697_v49, %v179_v57  ;;  %v284_v4 = vadd.f32 %v1701_v55, %v177_v60  ;;  %v180_v7 = vmul.f32 %v1713_v62, %v74_v52  ;;  %v36_v60 = vld [vmem:[%s2267_s0 + $0x50] sm:$0xff] }
  0x14   :  { %1348 = vmatpush3.bf16.msra.mxu0 %v1522_v18  ;;  %v288_v5 = vadd.f32 %v1701_v55, %v181_v61  ;;  %v281_v11 = vadd.f32 %v1709_v59, %v174_v2  ;;  %v285_v12 = vadd.f32 %v1709_v59, %v178_v3  ;;  %v283_v16 = vadd.f32 %v1715_v63, %v176_v6  ;;  %v31_v18 = vld [vmem:[%s2267_s0 + $0x28] sm:$0xff] }
  0x15   :  { %1430 = vmatpush3.bf16.msra.mxu1 %v1523_v19  ;;  %1349 = vmatprep.subr.bf16.mxu0 %v1524_v20  ;;  %v366_v9 = vmax.f32 %v282_v0, 0.0  ;;  %v370_v10 = vmax.f32 %v286_v1, 0.0  ;;  %v368_v14 = vmax.f32 %v284_v4, 0.0  ;;  %v287_v17 = vadd.f32 %v1715_v63, %v180_v7  ;;  %v33_v19 = vld [vmem:[%s2267_s0 + $0x38] sm:$0xff]  ;;  %v35_v3 = vld [vmem:[%s2267_s0 + $0x48] sm:$0xff] }
  0x16   :  { %1431 = vmatprep.subr.bf16.mxu1 %v1525_v21  ;;  %v372_v15 = vmax.f32 %v288_v5, 0.0  ;;  %v365_v21 = vmax.f32 %v281_v11, 0.0  ;;  %v369_v22 = vmax.f32 %v285_v12, 0.0  ;;  %v76_v34 = vunpack.c.l.bf16 %v30_v8  ;;  %v37_v4 = vld [vmem:[%s2267_s0 + $0x58] sm:$0xff] }
  0x17   :  { %v450_v20 = vpack.c.bf16 %v370_v10, %v366_v9  ;;  %v78_v40 = vunpack.c.l.bf16 %v31_v18  ;;  %v82_v44 = vunpack.c.l.bf16 %v33_v19  ;;  %v85_v2 = vunpack.c.h.bf16 %v34_v45 }
  0x18   :  { %1350 = vmatpush3.bf16.msra.mxu0 %v1526_v23  ;;  %v77_v23 = vunpack.c.h.bf16 %v30_v8  ;;  %v182_v42 = vmul.f32 %v1706_v58, %v76_v34  ;;  %v89_v11 = vunpack.c.h.bf16 %v36_v60  ;;  %v40_v34 = vld [vmem:[%s2267_s0 + $0x70] sm:$0xff] }
  0x19   :  { %1432 = vmatpush3.bf16.msra.mxu1 %v1527_v24  ;;  %1351 = vmatprep.subr.bf16.mxu0 %v1528_v25  ;;  %v452_v24 = vpack.c.bf16 %v372_v15, %v368_v14  ;;  %v367_v25 = vmax.f32 %v283_v16, 0.0  ;;  %v184_v51 = vmul.f32 %v1713_v62, %v78_v40  ;;  %v188_v57 = vmul.f32 %v1713_v62, %v82_v44  ;;  %v39_v44 = vld [vmem:[%s2267_s0 + $0x68] sm:$0xff] }
  0x1a   :  { %1433 = vmatprep.subr.bf16.mxu1 %v1529_v26  ;;  %v371_v26 = vmax.f32 %v287_v17, 0.0  ;;  %788 = vmatprep.mubr.bf16.mxu0 %v450_v20  ;;  %v289_v53 = vadd.f32 %v1709_v59, %v182_v42  ;;  %v191_v12 = vmul.f32 %v1695_v48, %v85_v2  ;;  %v87_v15 = vunpack.c.h.bf16 %v35_v3 }
  0x1b   :  { %908 = vmatprep.mubr.bf16.mxu1 %v452_v24  ;;  %v291_v1 = vadd.f32 %v1715_v63, %v184_v51  ;;  %v295_v8 = vadd.f32 %v1715_v63, %v188_v57  ;;  %v91_v16 = vunpack.c.h.bf16 %v37_v4  ;;  %v195_v17 = vmul.f32 %v1695_v48, %v89_v11 }
  0x1c   :  { %1352 = vmatpush3.bf16.msra.mxu0 %v1530_v28  ;;  %v449_v28 = vpack.c.bf16 %v369_v22, %v365_v21  ;;  %v451_v32 = vpack.c.bf16 %v371_v26, %v367_v25  ;;  %v373_v6 = vmax.f32 %v289_v53, 0.0  ;;  %v88_v20 = vunpack.c.l.bf16 %v36_v60  ;;  %v38_v25 = vld [vmem:[%s2267_s0 + $0x60] sm:$0xff] }
  0x1d   :  { %1434 = vmatpush3.bf16.msra.mxu1 %v1531_v29  ;;  %1353 = vmatprep.subr.bf16.mxu0 %v1532_v30  ;;  %v183_v29 = vmul.f32 %v1695_v48, %v77_v23  ;;  %v79_v30 = vunpack.c.h.bf16 %v31_v18  ;;  %v375_v10 = vmax.f32 %v291_v1, 0.0  ;;  %v379_v14 = vmax.f32 %v295_v8, 0.0 }
  0x1e   :  { %1435 = vmatprep.subr.bf16.mxu1 %v1533_v31  ;;  %v83_v31 = vunpack.c.h.bf16 %v33_v19  ;;  %v298_v18 = vadd.f32 %v1697_v49, %v191_v12  ;;  %v84_v19 = vunpack.c.l.bf16 %v34_v45  ;;  %v193_v22 = vmul.f32 %v1699_v54, %v87_v15  ;;  %v41_v45 = vld [vmem:[%s2267_s0 + $0x78] sm:$0xff] }
  0x1f   :  { %v290_v37 = vadd.f32 %v1697_v49, %v183_v29  ;;  %v185_v38 = vmul.f32 %v1699_v54, %v79_v30  ;;  %v455_v21 = vpack.c.bf16 %v379_v14, %v375_v10  ;;  %v197_v23 = vmul.f32 %v1699_v54, %v91_v16  ;;  %v42_v10 = vld [vmem:[%s2267_s0 + $0x80] sm:$0xff] }
  0x20   :  { %1354 = vmatpush3.bf16.msra.mxu0 %v1534_v33  ;;  %v187_v33 = vmul.f32 %v1695_v48, %v81_v27  ;;  %v189_v39 = vmul.f32 %v1699_v54, %v83_v31  ;;  %v86_v24 = vunpack.c.l.bf16 %v35_v3  ;;  %v302_v26 = vadd.f32 %v1697_v49, %v195_v17 }
  0x21   :  { %1436 = vmatpush3.bf16.msra.mxu1 %v1535_v35  ;;  %v80_v35 = vunpack.c.l.bf16 %v32_v13  ;;  %v374_v46 = vmax.f32 %v290_v37, 0.0  ;;  %v292_v47 = vadd.f32 %v1701_v55, %v185_v38  ;;  %v382_v27 = vmax.f32 %v298_v18, 0.0 }
  0x22   :  { %v294_v41 = vadd.f32 %v1697_v49, %v187_v33  ;;  %v296_v50 = vadd.f32 %v1701_v55, %v189_v39  ;;  %v194_v29 = vmul.f32 %v1706_v58, %v88_v20  ;;  %v300_v30 = vadd.f32 %v1701_v55, %v193_v22 }
  0x23   :  { %789 = vmatmul.mubr.bf16.vlgmr.msra.gmra.mxu0 %v449_v28  ;;  %v186_v43 = vmul.f32 %v1706_v58, %v80_v35  ;;  %v376_v61 = vmax.f32 %v292_v47, 0.0  ;;  %v190_v28 = vmul.f32 %v1706_v58, %v84_v19  ;;  %v304_v31 = vadd.f32 %v1701_v55, %v197_v23  ;;  %v44_v19 = vld [vmem:[%s2267_s0 + $0x90] sm:$0xff] }
  0x24   :  { %909 = vmatmul.mubr.bf16.vlgmr.msra.gmra.mxu1 %v451_v32  ;;  %v378_v52 = vmax.f32 %v294_v41, 0.0  ;;  %v380_v0 = vmax.f32 %v296_v50, 0.0  ;;  %v90_v32 = vunpack.c.l.bf16 %v37_v4  ;;  %v192_v33 = vmul.f32 %v1713_v62, %v86_v24  ;;  %v43_v24 = vld [vmem:[%s2267_s0 + $0x88] sm:$0xff] }
  0x25   :  { %v293_v56 = vadd.f32 %v1709_v59, %v186_v43  ;;  %v386_v35 = vmax.f32 %v302_v26, 0.0  ;;  %v297_v37 = vadd.f32 %v1709_v59, %v190_v28  ;;  %v301_v38 = vadd.f32 %v1709_v59, %v194_v29  ;;  %v45_v29 = vld [vmem:[%s2267_s0 + $0x98] sm:$0xff] }
  0x26   :  { %v454_v5 = vpack.c.bf16 %v378_v52, %v374_v46  ;;  %v456_v9 = vpack.c.bf16 %v380_v0, %v376_v61  ;;  %v93_v39 = vunpack.c.h.bf16 %v38_v25  ;;  %v384_v40 = vmax.f32 %v300_v30, 0.0 }
  0x27   :  { %v377_v7 = vmax.f32 %v293_v56, 0.0  ;;  %v388_v41 = vmax.f32 %v304_v31, 0.0  ;;  %v196_v42 = vmul.f32 %v1713_v62, %v90_v32  ;;  %v299_v43 = vadd.f32 %v1715_v63, %v192_v33 }
  0x28   :  { %796 = vmatprep.mubr.bf16.mxu0 %v454_v5  ;;  %916 = vmatprep.mubr.bf16.mxu1 %v456_v9  ;;  %v458_v46 = vpack.c.bf16 %v386_v35, %v382_v27  ;;  %v381_v47 = vmax.f32 %v297_v37, 0.0  ;;  %v385_v50 = vmax.f32 %v301_v38, 0.0  ;;  %v97_v51 = vunpack.c.h.bf16 %v40_v34 }
  0x29   :  { %v453_v13 = vpack.c.bf16 %v377_v7, %v373_v6  ;;  %v460_v52 = vpack.c.bf16 %v388_v41, %v384_v40  ;;  %v303_v53 = vadd.f32 %v1715_v63, %v196_v42  ;;  %v383_v56 = vmax.f32 %v299_v43, 0.0 }
  0x2a   :  { %v199_v57 = vmul.f32 %v1695_v48, %v93_v39  ;;  %v457_v60 = vpack.c.bf16 %v385_v50, %v381_v47  ;;  %v203_v61 = vmul.f32 %v1695_v48, %v97_v51  ;;  %v95_v0 = vunpack.c.h.bf16 %v39_v44 }
  0x2b   :  { %797 = vmatmul.mubr.bf16.gmra.mxu0 %v453_v13  ;;  %v99_v1 = vunpack.c.h.bf16 %v41_v45  ;;  %v387_v2 = vmax.f32 %v303_v53, 0.0  ;;  %v92_v4 = vunpack.c.l.bf16 %v38_v25  ;;  %v96_v5 = vunpack.c.l.bf16 %v40_v34  ;;  %v46_v53 = vld [vmem:[%s2267_s0 + $0xa0] sm:$0xff] }
  0x2c   :  { %917 = vmatmul.mubr.bf16.gmra.mxu1 %v455_v21  ;;  %804 = vmatprep.mubr.bf16.mxu0 %v458_v46  ;;  %v306_v3 = vadd.f32 %v1697_v49, %v199_v57  ;;  %v310_v6 = vadd.f32 %v1697_v49, %v203_v61  ;;  %v201_v7 = vmul.f32 %v1699_v54, %v95_v0  ;;  %v94_v9 = vunpack.c.l.bf16 %v39_v44 }
  0x2d   :  { %924 = vmatprep.mubr.bf16.mxu1 %v460_v52  ;;  %v205_v8 = vmul.f32 %v1699_v54, %v99_v1  ;;  %v459_v11 = vpack.c.bf16 %v387_v2, %v383_v56  ;;  %v198_v13 = vmul.f32 %v1706_v58, %v92_v4  ;;  %v202_v14 = vmul.f32 %v1706_v58, %v96_v5  ;;  %v48_v4 = vld [vmem:[%s2267_s0 + $0xb0] sm:$0xff] }
  0x2e   :  { %v390_v12 = vmax.f32 %v306_v3, 0.0  ;;  %v394_v15 = vmax.f32 %v310_v6, 0.0  ;;  %v308_v16 = vadd.f32 %v1701_v55, %v201_v7  ;;  %v98_v18 = vunpack.c.l.bf16 %v41_v45 }
  0x2f   :  { %v312_v17 = vadd.f32 %v1701_v55, %v205_v8  ;;  %v305_v20 = vadd.f32 %v1709_v59, %v198_v13  ;;  %v309_v21 = vadd.f32 %v1709_v59, %v202_v14  ;;  %v200_v22 = vmul.f32 %v1713_v62, %v94_v9  ;;  %v47_v9 = vld [vmem:[%s2267_s0 + $0xa8] sm:$0xff]  ;;  %v49_v14 = vld [vmem:[%s2267_s0 + $0xb8] sm:$0xff] }
  0x30   :  { %v101_v23 = vunpack.c.h.bf16 %v42_v10  ;;  %v462_v25 = vpack.c.bf16 %v394_v15, %v390_v12  ;;  %v392_v26 = vmax.f32 %v308_v16, 0.0  ;;  %v204_v28 = vmul.f32 %v1713_v62, %v98_v18 }
  0x31   :  { %v396_v27 = vmax.f32 %v312_v17, 0.0  ;;  %v389_v30 = vmax.f32 %v305_v20, 0.0  ;;  %v393_v31 = vmax.f32 %v309_v21, 0.0  ;;  %v307_v32 = vadd.f32 %v1715_v63, %v200_v22 }
  0x32   :  { %v105_v33 = vunpack.c.h.bf16 %v44_v19  ;;  %v311_v35 = vadd.f32 %v1715_v63, %v204_v28  ;;  %v207_v37 = vmul.f32 %v1695_v48, %v101_v23  ;;  %v103_v38 = vunpack.c.h.bf16 %v43_v24 }
  0x33   :  { %805 = vmatmul.mubr.bf16.gmra.mxu0 %v457_v60  ;;  %v464_v34 = vpack.c.bf16 %v396_v27, %v392_v26  ;;  %v461_v39 = vpack.c.bf16 %v393_v31, %v389_v30  ;;  %v391_v40 = vmax.f32 %v307_v32, 0.0  ;;  %v107_v42 = vunpack.c.h.bf16 %v45_v29 }
  0x34   :  { %925 = vmatmul.mubr.bf16.gmra.mxu1 %v459_v11  ;;  %812 = vmatprep.mubr.bf16.mxu0 %v462_v25  ;;  %v211_v41 = vmul.f32 %v1695_v48, %v105_v33  ;;  %v395_v43 = vmax.f32 %v311_v35, 0.0  ;;  %v314_v44 = vadd.f32 %v1697_v49, %v207_v37  ;;  %v209_v45 = vmul.f32 %v1699_v54, %v103_v38  ;;  %v50_v35 = vld [vmem:[%s2267_s0 + $0xc0] sm:$0xff] }
  0x35   :  { %932 = vmatprep.mubr.bf16.mxu1 %v464_v34  ;;  %v100_v46 = vunpack.c.l.bf16 %v42_v10  ;;  %v213_v50 = vmul.f32 %v1699_v54, %v107_v42  ;;  %v104_v51 = vunpack.c.l.bf16 %v44_v19  ;;  %v102_v52 = vunpack.c.l.bf16 %v43_v24 }
  0x36   :  { %v318_v47 = vadd.f32 %v1697_v49, %v211_v41  ;;  %v463_v56 = vpack.c.bf16 %v395_v43, %v391_v40  ;;  %v398_v57 = vmax.f32 %v314_v44, 0.0  ;;  %v316_v60 = vadd.f32 %v1701_v55, %v209_v45  ;;  %v52_v45 = vld [vmem:[%s2267_s0 + $0xd0] sm:$0xff] }
  0x37   :  { %v206_v61 = vmul.f32 %v1706_v58, %v100_v46  ;;  %v320_v1 = vadd.f32 %v1701_v55, %v213_v50  ;;  %v210_v2 = vmul.f32 %v1706_v58, %v104_v51  ;;  %v106_v3 = vunpack.c.l.bf16 %v45_v29 }
  0x38   :  { %v402_v0 = vmax.f32 %v318_v47, 0.0  ;;  %v400_v5 = vmax.f32 %v316_v60, 0.0  ;;  %v208_v7 = vmul.f32 %v1713_v62, %v102_v52  ;;  %v109_v8 = vunpack.c.h.bf16 %v46_v53  ;;  %v51_v52 = vld [vmem:[%s2267_s0 + $0xc8] sm:$0xff] }
  0x39   :  { %v313_v6 = vadd.f32 %v1709_v59, %v206_v61  ;;  %v404_v11 = vmax.f32 %v320_v1, 0.0  ;;  %v317_v12 = vadd.f32 %v1709_v59, %v210_v2  ;;  %v212_v13 = vmul.f32 %v1713_v62, %v106_v3  ;;  %v53_v61 = vld [vmem:[%s2267_s0 + $0xd8] sm:$0xff] }
  0x3a   :  { %v466_v10 = vpack.c.bf16 %v402_v0, %v398_v57  ;;  %v315_v16 = vadd.f32 %v1715_v63, %v208_v7  ;;  %v113_v17 = vunpack.c.h.bf16 %v48_v4  ;;  %v215_v18 = vmul.f32 %v1695_v48, %v109_v8 }
  0x3b   :  { %813 = vmatmul.mubr.bf16.gmra.mxu0 %v461_v39  ;;  %v397_v15 = vmax.f32 %v313_v6, 0.0  ;;  %v468_v19 = vpack.c.bf16 %v404_v11, %v400_v5  ;;  %v401_v20 = vmax.f32 %v317_v12, 0.0  ;;  %v319_v21 = vadd.f32 %v1715_v63, %v212_v13 }
  0x3c   :  { %933 = vmatmul.mubr.bf16.gmra.mxu1 %v463_v56  ;;  %820 = vmatprep.mubr.bf16.mxu0 %v466_v10  ;;  %v111_v22 = vunpack.c.h.bf16 %v47_v9  ;;  %v399_v23 = vmax.f32 %v315_v16, 0.0  ;;  %v219_v24 = vmul.f32 %v1695_v48, %v113_v17  ;;  %v322_v25 = vadd.f32 %v1697_v49, %v215_v18 }
  0x3d   :  { %v115_v26 = vunpack.c.h.bf16 %v49_v14  ;;  %940 = vmatprep.mubr.bf16.mxu1 %v468_v19  ;;  %v465_v27 = vpack.c.bf16 %v401_v20, %v397_v15  ;;  %v403_v28 = vmax.f32 %v319_v21, 0.0  ;;  %v108_v30 = vunpack.c.l.bf16 %v46_v53  ;;  %v54_v20 = vld [vmem:[%s2267_s0 + $0xe0] sm:$0xff] }
  0x3e   :  { %v217_v29 = vmul.f32 %v1699_v54, %v111_v22  ;;  %v326_v31 = vadd.f32 %v1697_v49, %v219_v24  ;;  %v406_v32 = vmax.f32 %v322_v25, 0.0  ;;  %v112_v34 = vunpack.c.l.bf16 %v48_v4 }
  0x3f   :  { %v221_v33 = vmul.f32 %v1699_v54, %v115_v26  ;;  %v467_v37 = vpack.c.bf16 %v403_v28, %v399_v23  ;;  %v214_v39 = vmul.f32 %v1706_v58, %v108_v30  ;;  %v110_v40 = vunpack.c.l.bf16 %v47_v9 }
  0x40   :  { %v324_v38 = vadd.f32 %v1701_v55, %v217_v29  ;;  %v410_v41 = vmax.f32 %v326_v31, 0.0  ;;  %v218_v43 = vmul.f32 %v1706_v58, %v112_v34  ;;  %v114_v44 = vunpack.c.l.bf16 %v49_v14  ;;  %v56_v29 = vld [vmem:[%s2267_s0 + $0xf0] sm:$0xff]  ;;  %v55_v34 = vld [vmem:[%s2267_s0 + $0xe8] sm:$0xff] }
  0x41   :  { %v328_v42 = vadd.f32 %v1701_v55, %v221_v33  ;;  %v321_v47 = vadd.f32 %v1709_v59, %v214_v39  ;;  %v216_v50 = vmul.f32 %v1713_v62, %v110_v40  ;;  %v117_v51 = vunpack.c.h.bf16 %v50_v35  ;;  %v57_v40 = vld [vmem:[%s2267_s0 + $0xf8] sm:$0xff] }
  0x42   :  { %v408_v46 = vmax.f32 %v324_v38, 0.0  ;;  %v470_v53 = vpack.c.bf16 %v410_v41, %v406_v32  ;;  %v325_v57 = vadd.f32 %v1709_v59, %v218_v43  ;;  %v220_v60 = vmul.f32 %v1713_v62, %v114_v44 }
  0x43   :  { %821 = vmatmul.mubr.bf16.gmra.mxu0 %v465_v27  ;;  %v412_v56 = vmax.f32 %v328_v42, 0.0  ;;  %v405_v0 = vmax.f32 %v321_v47, 0.0  ;;  %v323_v1 = vadd.f32 %v1715_v63, %v216_v50  ;;  %v121_v2 = vunpack.c.h.bf16 %v52_v45 }
  0x44   :  { %941 = vmatmul.mubr.bf16.gmra.mxu1 %v467_v37  ;;  %v223_v3 = vmul.f32 %v1695_v48, %v117_v51  ;;  %828 = vmatprep.mubr.bf16.mxu0 %v470_v53  ;;  %v409_v5 = vmax.f32 %v325_v57, 0.0  ;;  %v327_v6 = vadd.f32 %v1715_v63, %v220_v60  ;;  %v119_v7 = vunpack.c.h.bf16 %v51_v52 }
  0x45   :  { %v472_v4 = vpack.c.bf16 %v412_v56, %v408_v46  ;;  %v407_v8 = vmax.f32 %v323_v1, 0.0  ;;  %v227_v9 = vmul.f32 %v1695_v48, %v121_v2  ;;  %v123_v11 = vunpack.c.h.bf16 %v53_v61 }
  0x46   :  { %v330_v10 = vadd.f32 %v1697_v49, %v223_v3  ;;  %v469_v12 = vpack.c.bf16 %v409_v5, %v405_v0  ;;  %v411_v13 = vmax.f32 %v327_v6, 0.0  ;;  %v225_v14 = vmul.f32 %v1699_v54, %v119_v7  ;;  %v58_v5 = vld [vmem:[%s2267_s0 + $0x100] sm:$0xff] }
  0x47   :  { %948 = vmatprep.mubr.bf16.mxu1 %v472_v4  ;;  %v116_v15 = vunpack.c.l.bf16 %v50_v35  ;;  %v334_v16 = vadd.f32 %v1697_v49, %v227_v9  ;;  %v229_v18 = vmul.f32 %v1699_v54, %v123_v11  ;;  %v120_v19 = vunpack.c.l.bf16 %v52_v45 }
  0x48   :  { %v414_v17 = vmax.f32 %v330_v10, 0.0  ;;  %v471_v21 = vpack.c.bf16 %v411_v13, %v407_v8  ;;  %v332_v22 = vadd.f32 %v1701_v55, %v225_v14  ;;  %v118_v24 = vunpack.c.l.bf16 %v51_v52  ;;  %v60_v14 = vld [vmem:[%s2267_s0 + $0x110] sm:$0xff] }
  0x49   :  { %v222_v23 = vmul.f32 %v1706_v58, %v116_v15  ;;  %v418_v25 = vmax.f32 %v334_v16, 0.0  ;;  %v336_v26 = vadd.f32 %v1701_v55, %v229_v18  ;;  %v226_v27 = vmul.f32 %v1706_v58, %v120_v19  ;;  %v59_v19 = vld [vmem:[%s2267_s0 + $0x108] sm:$0xff] }
  0x4a   :  { %v122_v28 = vunpack.c.l.bf16 %v53_v61  ;;  %v416_v30 = vmax.f32 %v332_v22, 0.0  ;;  %v224_v32 = vmul.f32 %v1713_v62, %v118_v24  ;;  %v125_v33 = vunpack.c.h.bf16 %v54_v20  ;;  %v61_v24 = vld [vmem:[%s2267_s0 + $0x118] sm:$0xff] }
  0x4b   :  { %829 = vmatmul.mubr.bf16.gmra.mxu0 %v469_v12  ;;  %v329_v31 = vadd.f32 %v1709_v59, %v222_v23  ;;  %v474_v35 = vpack.c.bf16 %v418_v25, %v414_v17  ;;  %v420_v37 = vmax.f32 %v336_v26, 0.0  ;;  %v333_v38 = vadd.f32 %v1709_v59, %v226_v27 }
  0x4c   :  { %949 = vmatmul.mubr.bf16.gmra.mxu1 %v471_v21  ;;  %v228_v39 = vmul.f32 %v1713_v62, %v122_v28  ;;  %v331_v42 = vadd.f32 %v1715_v63, %v224_v32  ;;  %v129_v43 = vunpack.c.h.bf16 %v56_v29  ;;  %v231_v44 = vmul.f32 %v1695_v48, %v125_v33 }
  0x4d   :  { %v413_v41 = vmax.f32 %v329_v31, 0.0  ;;  %836 = vmatprep.mubr.bf16.mxu0 %v474_v35  ;;  %v476_v45 = vpack.c.bf16 %v420_v37, %v416_v30  ;;  %v417_v46 = vmax.f32 %v333_v38, 0.0  ;;  %v127_v50 = vunpack.c.h.bf16 %v55_v34 }
  0x4e   :  { %v335_v47 = vadd.f32 %v1715_v63, %v228_v39  ;;  %v415_v51 = vmax.f32 %v331_v42, 0.0  ;;  %v235_v52 = vmul.f32 %v1695_v48, %v129_v43  ;;  %v338_v53 = vadd.f32 %v1697_v49, %v231_v44 }
  0x4f   :  { %v131_v56 = vunpack.c.h.bf16 %v57_v40  ;;  %956 = vmatprep.mubr.bf16.mxu1 %v476_v45  ;;  %v473_v57 = vpack.c.bf16 %v417_v46, %v413_v41  ;;  %v233_v61 = vmul.f32 %v1699_v54, %v127_v50  ;;  %v124_v0 = vunpack.c.l.bf16 %v54_v20  ;;  %v62_v46 = vld [vmem:[%s2267_s0 + $0x120] sm:$0xff] }
  0x50   :  { %v419_v60 = vmax.f32 %v335_v47, 0.0  ;;  %v342_v1 = vadd.f32 %v1697_v49, %v235_v52  ;;  %v422_v2 = vmax.f32 %v338_v53, 0.0  ;;  %v128_v4 = vunpack.c.l.bf16 %v56_v29 }
  0x51   :  { %v237_v3 = vmul.f32 %v1699_v54, %v131_v56  ;;  %v340_v7 = vadd.f32 %v1701_v55, %v233_v61  ;;  %v230_v8 = vmul.f32 %v1706_v58, %v124_v0  ;;  %v126_v9 = vunpack.c.l.bf16 %v55_v34  ;;  %v64_v61 = vld [vmem:[%s2267_s0 + $0x130] sm:$0xff] }
  0x52   :  { %v475_v6 = vpack.c.bf16 %v419_v60, %v415_v51  ;;  %v426_v10 = vmax.f32 %v342_v1, 0.0  ;;  %v234_v12 = vmul.f32 %v1706_v58, %v128_v4  ;;  %v130_v13 = vunpack.c.l.bf16 %v57_v40  ;;  %v63_v4 = vld [vmem:[%s2267_s0 + $0x128] sm:$0xff] }
  0x53   :  { %837 = vmatmul.mubr.bf16.gmra.mxu0 %v473_v57  ;;  %v344_v11 = vadd.f32 %v1701_v55, %v237_v3  ;;  %v424_v15 = vmax.f32 %v340_v7, 0.0  ;;  %v337_v16 = vadd.f32 %v1709_v59, %v230_v8  ;;  %v232_v17 = vmul.f32 %v1713_v62, %v126_v9  ;;  %v65_v9 = vld [vmem:[%s2267_s0 + $0x138] sm:$0xff] }
  0x54   :  { %957 = vmatmul.mubr.bf16.gmra.mxu1 %v475_v6  ;;  %v133_v18 = vunpack.c.h.bf16 %v58_v5  ;;  %v478_v20 = vpack.c.bf16 %v426_v10, %v422_v2  ;;  %v341_v22 = vadd.f32 %v1709_v59, %v234_v12  ;;  %v236_v23 = vmul.f32 %v1713_v62, %v130_v13 }
  0x55   :  { %v428_v21 = vmax.f32 %v344_v11, 0.0  ;;  %v421_v25 = vmax.f32 %v337_v16, 0.0  ;;  %v339_v26 = vadd.f32 %v1715_v63, %v232_v17  ;;  %v137_v27 = vunpack.c.h.bf16 %v60_v14 }
  0x56   :  { %v239_v28 = vmul.f32 %v1695_v48, %v133_v18  ;;  %844 = vmatprep.mubr.bf16.mxu0 %v478_v20  ;;  %v425_v30 = vmax.f32 %v341_v22, 0.0  ;;  %v343_v31 = vadd.f32 %v1715_v63, %v236_v23  ;;  %v135_v32 = vunpack.c.h.bf16 %v59_v19 }
  0x57   :  { %v480_v29 = vpack.c.bf16 %v428_v21, %v424_v15  ;;  %v423_v33 = vmax.f32 %v339_v26, 0.0  ;;  %v243_v34 = vmul.f32 %v1695_v48, %v137_v27  ;;  %v139_v37 = vunpack.c.h.bf16 %v61_v24 }
  0x58   :  { %v346_v35 = vadd.f32 %v1697_v49, %v239_v28  ;;  %v477_v38 = vpack.c.bf16 %v425_v30, %v421_v25  ;;  %v427_v39 = vmax.f32 %v343_v31, 0.0  ;;  %v241_v40 = vmul.f32 %v1699_v54, %v135_v32  ;;  %v66_v30 = vld [vmem:[%s2267_s0 + $0x140] sm:$0x11] }
  0x59   :  { %964 = vmatprep.mubr.bf16.mxu1 %v480_v29  ;;  %v132_v41 = vunpack.c.l.bf16 %v58_v5  ;;  %v350_v42 = vadd.f32 %v1697_v49, %v243_v34  ;;  %v245_v44 = vmul.f32 %v1699_v54, %v139_v37  ;;  %v136_v45 = vunpack.c.l.bf16 %v60_v14 }
  0x5a   :  { %v430_v43 = vmax.f32 %v346_v35, 0.0  ;;  %v479_v47 = vpack.c.bf16 %v427_v39, %v423_v33  ;;  %v348_v50 = vadd.f32 %v1701_v55, %v241_v40  ;;  %v134_v52 = vunpack.c.l.bf16 %v59_v19  ;;  %v67_v40 = vld [vmem:[%s2267_s0 + $0x148] sm:$0x11] }
  0x5b   :  { %845 = vmatmul.mubr.bf16.gmra.mxu0 %v477_v38  ;;  %v238_v51 = vmul.f32 %v1706_v58, %v132_v41  ;;  %v434_v53 = vmax.f32 %v350_v42, 0.0  ;;  %v352_v56 = vadd.f32 %v1701_v55, %v245_v44  ;;  %v242_v57 = vmul.f32 %v1706_v58, %v136_v45 }
  0x5c   :  { %v138_v60 = vunpack.c.l.bf16 %v61_v24  ;;  %965 = vmatmul.mubr.bf16.gmra.mxu1 %v479_v47  ;;  %v432_v0 = vmax.f32 %v348_v50, 0.0  ;;  %v240_v2 = vmul.f32 %v1713_v62, %v134_v52  ;;  %v141_v3 = vunpack.c.h.bf16 %v62_v46 }
  0x5d   :  { %v345_v1 = vadd.f32 %v1709_v59, %v238_v51  ;;  %v482_v5 = vpack.c.bf16 %v434_v53, %v430_v43  ;;  %v436_v6 = vmax.f32 %v352_v56, 0.0  ;;  %v349_v7 = vadd.f32 %v1709_v59, %v242_v57 }
  0x5e   :  { %v244_v8 = vmul.f32 %v1713_v62, %v138_v60  ;;  %v347_v11 = vadd.f32 %v1715_v63, %v240_v2  ;;  %v145_v12 = vunpack.c.h.bf16 %v64_v61  ;;  %v247_v13 = vmul.f32 %v1695_v48, %v141_v3 }
  0x5f   :  { %v429_v10 = vmax.f32 %v345_v1, 0.0  ;;  %852 = vmatprep.mubr.bf16.mxu0 %v482_v5  ;;  %v484_v14 = vpack.c.bf16 %v436_v6, %v432_v0  ;;  %v433_v15 = vmax.f32 %v349_v7, 0.0  ;;  %v143_v17 = vunpack.c.h.bf16 %v63_v4 }
  0x60   :  { %v351_v16 = vadd.f32 %v1715_v63, %v244_v8  ;;  %v431_v18 = vmax.f32 %v347_v11, 0.0  ;;  %v251_v19 = vmul.f32 %v1695_v48, %v145_v12  ;;  %v354_v20 = vadd.f32 %v1697_v49, %v247_v13 }
  0x61   :  { %v147_v21 = vunpack.c.h.bf16 %v65_v9  ;;  %972 = vmatprep.mubr.bf16.mxu1 %v484_v14  ;;  %v481_v22 = vpack.c.bf16 %v433_v15, %v429_v10  ;;  %v249_v24 = vmul.f32 %v1699_v54, %v143_v17  ;;  %v140_v25 = vunpack.c.l.bf16 %v62_v46 }
  0x62   :  { %v435_v23 = vmax.f32 %v351_v16, 0.0  ;;  %v358_v26 = vadd.f32 %v1697_v49, %v251_v19  ;;  %v438_v27 = vmax.f32 %v354_v20, 0.0  ;;  %v144_v29 = vunpack.c.l.bf16 %v64_v61 }
  0x63   :  { %v253_v28 = vmul.f32 %v1699_v54, %v147_v21  ;;  %853 = vmatmul.mubr.bf16.gmra.mxu0 %v481_v22  ;;  %v356_v32 = vadd.f32 %v1701_v55, %v249_v24  ;;  %v246_v33 = vmul.f32 %v1706_v58, %v140_v25  ;;  %v142_v34 = vunpack.c.l.bf16 %v63_v4 }
  0x64   :  { %v483_v31 = vpack.c.bf16 %v435_v23, %v431_v18  ;;  %v442_v35 = vmax.f32 %v358_v26, 0.0  ;;  %v250_v38 = vmul.f32 %v1706_v58, %v144_v29  ;;  %v146_v39 = vunpack.c.l.bf16 %v65_v9 }
  0x65   :  { %v360_v37 = vadd.f32 %v1701_v55, %v253_v28  ;;  %v440_v41 = vmax.f32 %v356_v32, 0.0  ;;  %v353_v42 = vadd.f32 %v1709_v59, %v246_v33  ;;  %v248_v43 = vmul.f32 %v1713_v62, %v142_v34 }
  0x66   :  { %973 = vmatmul.mubr.bf16.gmra.mxu1 %v483_v31  ;;  %v149_v44 = vunpack.c.h.bf16 %v66_v30  ;;  %v486_v45 = vpack.c.bf16 %v442_v35, %v438_v27  ;;  %v357_v47 = vadd.f32 %v1709_v59, %v250_v38  ;;  %v252_v50 = vmul.f32 %v1713_v62, %v146_v39 }
  0x67   :  { %v444_v46 = vmax.f32 %v360_v37, 0.0  ;;  %v437_v51 = vmax.f32 %v353_v42, 0.0  ;;  %v355_v52 = vadd.f32 %v1715_v63, %v248_v43  ;;  %v151_v56 = vunpack.c.h.bf16 %v67_v40 }
  0x68   :  { %v255_v53 = vmul.f32 %v1695_v48, %v149_v44  ;;  %860 = vmatprep.mubr.bf16.mxu0 %v486_v45  ;;  %v441_v60 = vmax.f32 %v357_v47, 0.0  ;;  %v359_v61 = vadd.f32 %v1715_v63, %v252_v50  ;;  %v148_v0 = vunpack.c.l.bf16 %v66_v30 }
  0x69   :  { %v488_v57 = vpack.c.bf16 %v444_v46, %v440_v41  ;;  %v439_v1 = vmax.f32 %v355_v52, 0.0  ;;  %v257_v3 = vmul.f32 %v1699_v54, %v151_v56  ;;  %v150_v4 = vunpack.c.l.bf16 %v67_v40 }
  0x6a   :  { %v362_v2 = vadd.f32 %v1697_v49, %v255_v53  ;;  %v485_v5 = vpack.c.bf16 %v441_v60, %v437_v51  ;;  %v443_v6 = vmax.f32 %v359_v61, 0.0  ;;  %v254_v7 = vmul.f32 %v1706_v58, %v148_v0 }
  0x6b   :  { %980 = vmatprep.mubr.bf16.mxu1 %v488_v57  ;;  %v364_v48 = vadd.f32 %v1701_v55, %v257_v3  ;;  %v256_v9 = vmul.f32 %v1713_v62, %v150_v4  ;;  %v1538_v55 = vmov 0.0  }
  0x6c   :  { %v446_v8 = vmax.f32 %v362_v2, 0.0  ;;  %861 = vmatmul.mubr.bf16.gmra.mxu0 %v485_v5  ;;  %v487_v10 = vpack.c.bf16 %v443_v6, %v439_v1  ;;  %v361_v11 = vadd.f32 %v1709_v59, %v254_v7  ;;  %1227 = vst.msk [vmem:[#allocation2] sm:$0x3] %vm1144_vm0, %v1538_v55 }
  0x6d   :  { %v448_v13 = vmax.f32 %v364_v48, 0.0  ;;  %v363_v49 = vadd.f32 %v1715_v63, %v256_v9  ;;  %v1999_v63 = vld [vmem:[%s2269_s3] ss:$0 sm:$0xff] }
  0x6e   :  { %v490_v12 = vpack.c.bf16 %v446_v8, %v446_v8  ;;  %981 = vmatmul.mubr.bf16.gmra.mxu1 %v487_v10  ;;  %v445_v54 = vmax.f32 %v361_v11, 0.0 }
  0x6f   :  { %v492_v14 = vpack.c.bf16 %v448_v13, %v448_v13  ;;  %v447_v15 = vmax.f32 %v363_v49, 0.0 }
  0x70   :  { %868 = vmatprep.mubr.bf16.mxu0 %v490_v12  ;;  %v489_v16 = vpack.c.bf16 %v445_v54, %v445_v54 }
  0x71   :  { %988 = vmatprep.mubr.bf16.mxu1 %v492_v14  ;;  %v491_v58 = vpack.c.bf16 %v447_v15, %v447_v15 }
  0x74   :  { %869 = vmatmul.mubr.bf16.gmra.mxu0 %v489_v16 }
  0x76   :  { %989 = vmatmul.mubr.bf16.gmra.mxu1 %v491_v58 }
  0xe3   :  { %v1355_v62 = vpop.f32.mrf.mxu0 }
  0xe4   :  { %v1437_v59 = vpop.f32.mrf.mxu1 }
  0xe5   :  { %v1356_v17 = vpop.f32.mrf.mxu0 }
  0xe6   :  { %v1357_v18 = vadd.f32 %v1356_v17, %v1355_v62  ;;  %v1438_v19 = vpop.f32.mrf.mxu1 }
  0xe7   :  { %v1358_v20 = vpop.f32.mrf.mxu0  ;;  %v1439_v22 = vadd.f32 %v1438_v19, %v1437_v59 }
  0xe8   :  { %v791_v21 = vadd.f32 %v1357_v18, %v1999_v63  ;;  %v1440_v23 = vpop.f32.mrf.mxu1 }
  0xe9   :  { %v1359_v24 = vpop.f32.mrf.mxu0 }
  0xea   :  { %v2002_v25 = vadd.f32 %v1439_v22, %v791_v21  ;;  %v1360_v26 = vadd.f32 %v1359_v24, %v1358_v20  ;;  %v1441_v27 = vpop.f32.mrf.mxu1 }
  0xeb   :  { %v1442_v30 = vadd.f32 %v1441_v27, %v1440_v23  ;;  %v1361_v31 = vpop.f32.mrf.mxu0 }
  0xec   :  { %v1318_v28 = vpack.c.bf16 %v2002_v25, %v2002_v25  ;;  %v794_v29 = vadd.f32 %v1360_v26, %v1999_v63  ;;  %v1443_v33 = vpop.f32.mrf.mxu1 }
  0xed   :  { %v1362_v34 = vpop.f32.mrf.mxu0 }
  0xee   :  { %1082 = vst.msk [vmem:[%s2270_s6] sm:$0xf] %vm1081_vm1, %v1318_v28  ;;  %v2011_v32 = vadd.f32 %v1442_v30, %v794_v29  ;;  %v1363_v35 = vadd.f32 %v1362_v34, %v1361_v31  ;;  %v1444_v38 = vpop.f32.mrf.mxu1 }
  0xef   :  { %v1364_v39 = vpop.f32.mrf.mxu0  ;;  %v1445_v41 = vadd.f32 %v1444_v38, %v1443_v33 }
  0xf0   :  { %v1319_v37 = vpack.c.bf16 %v2011_v32, %v2011_v32  ;;  %v799_v40 = vadd.f32 %v1363_v35, %v1999_v63  ;;  %v1446_v42 = vpop.f32.mrf.mxu1 }
  0xf1   :  { %v1365_v43 = vpop.f32.mrf.mxu0 }
  0xf2   :  { %1083 = vst.msk [vmem:[%s2270_s6 + $0x4] sm:$0xf] %vm1081_vm1, %v1319_v37  ;;  %v2020_v44 = vadd.f32 %v1445_v41, %v799_v40  ;;  %v1366_v45 = vadd.f32 %v1365_v43, %v1364_v39  ;;  %v1447_v46 = vpop.f32.mrf.mxu1 }
  0xf3   :  { %v1367_v51 = vpop.f32.mrf.mxu0  ;;  %v1448_v52 = vadd.f32 %v1447_v46, %v1446_v42 }
  0xf4   :  { %v1320_v47 = vpack.c.bf16 %v2020_v44, %v2020_v44  ;;  %v802_v50 = vadd.f32 %v1366_v45, %v1999_v63  ;;  %v1449_v57 = vpop.f32.mrf.mxu1 }
  0xf5   :  { %v1368_v53 = vpop.f32.mrf.mxu0 }
  0xf6   :  { %1084 = vst.msk [vmem:[%s2270_s6 + $0x8] sm:$0xf] %vm1081_vm1, %v1320_v47  ;;  %v2029_v56 = vadd.f32 %v1448_v52, %v802_v50  ;;  %v1369_v60 = vadd.f32 %v1368_v53, %v1367_v51  ;;  %v1450_v2 = vpop.f32.mrf.mxu1 }
  0xf7   :  { %v1370_v61 = vpop.f32.mrf.mxu0  ;;  %v1451_v3 = vadd.f32 %v1450_v2, %v1449_v57 }
  0xf8   :  { %v1321_v0 = vpack.c.bf16 %v2029_v56, %v2029_v56  ;;  %v807_v1 = vadd.f32 %v1369_v60, %v1999_v63  ;;  %v1452_v5 = vpop.f32.mrf.mxu1 }
  0xf9   :  { %v1371_v4 = vpop.f32.mrf.mxu0 }
  0xfa   :  { %1085 = vst.msk [vmem:[%s2270_s6 + $0xc] sm:$0xf] %vm1081_vm1, %v1321_v0  ;;  %v1372_v6 = vadd.f32 %v1371_v4, %v1370_v61  ;;  %v2038_v7 = vadd.f32 %v1451_v3, %v807_v1  ;;  %v1453_v48 = vpop.f32.mrf.mxu1 }
  0xfb   :  { %v1373_v9 = vpop.f32.mrf.mxu0  ;;  %v1454_v11 = vadd.f32 %v1453_v48, %v1452_v5 }
  0xfc   :  { %v810_v8 = vadd.f32 %v1372_v6, %v1999_v63  ;;  %v1322_v10 = vpack.c.bf16 %v2038_v7, %v2038_v7  ;;  %v1455_v49 = vpop.f32.mrf.mxu1 }
  0xfd   :  { %v1374_v12 = vpop.f32.mrf.mxu0 }
  0xfe   :  { %1086 = vst.msk [vmem:[%s2270_s6 + $0x10] sm:$0xf] %vm1081_vm1, %v1322_v10  ;;  %v2047_v13 = vadd.f32 %v1454_v11, %v810_v8  ;;  %v1375_v54 = vadd.f32 %v1374_v12, %v1373_v9  ;;  %v1456_v58 = vpop.f32.mrf.mxu1  ;;  %v1154_v9 = vmul.f32 %v2011_v32, %v2011_v32 }
  0xff   :  { %v1376_v14 = vpop.f32.mrf.mxu0  ;;  %v1457_v55 = vadd.f32 %v1456_v58, %v1455_v49 }
 0x100   :  { %v1323_v15 = vpack.c.bf16 %v2047_v13, %v2047_v13  ;;  %v815_v16 = vadd.f32 %v1375_v54, %v1999_v63  ;;  %v1458_v59 = vpop.f32.mrf.mxu1  ;;  %v1153_v54 = vmul.f32 %v2002_v25, %v2002_v25 }
 0x101   :  { %v1377_v62 = vpop.f32.mrf.mxu0 }
 0x102   :  { %1087 = vst.msk [vmem:[%s2270_s6 + $0x14] sm:$0xf] %vm1081_vm1, %v1323_v15  ;;  %v1378_v17 = vadd.f32 %v1377_v62, %v1376_v14  ;;  %v2056_v18 = vadd.f32 %v1457_v55, %v815_v16  ;;  %v1459_v20 = vpop.f32.mrf.mxu1  ;;  %v1155_v14 = vmul.f32 %v2020_v44, %v2020_v44  ;;  %v1106_v55 = vsel %vm1104_vm2, %v2011_v32, 0.0 }
 0x103   :  { %v1460_v22 = vadd.f32 %v1459_v20, %v1458_v59  ;;  %v1379_v23 = vpop.f32.mrf.mxu0  ;;  %v1156_v32 = vmul.f32 %v2029_v56, %v2029_v56 }
 0x104   :  { %v818_v19 = vadd.f32 %v1378_v17, %v1999_v63  ;;  %v1324_v21 = vpack.c.bf16 %v2056_v18, %v2056_v18  ;;  %v1461_v26 = vpop.f32.mrf.mxu1  ;;  %v1105_v17 = vsel %vm1104_vm2, %v2002_v25, 0.0  ;;  %v1174_v25 = vsel %vm1104_vm2, %v1153_v54, 0.0 }
 0x105   :  { %v1380_v27 = vpop.f32.mrf.mxu0 }
 0x106   :  { %1088 = vst.msk [vmem:[%s2270_s6 + $0x18] sm:$0xf] %vm1081_vm1, %v1324_v21  ;;  %v2065_v24 = vadd.f32 %v1460_v22, %v818_v19  ;;  %v1381_v28 = vadd.f32 %v1380_v27, %v1379_v23  ;;  %v1462_v30 = vpop.f32.mrf.mxu1  ;;  %v1175_v19 = vsel %vm1104_vm2, %v1154_v9, 0.0  ;;  %v1108_v22 = vsel %vm1104_vm2, %v2020_v44, 0.0 }
 0x107   :  { %v1382_v31 = vpop.f32.mrf.mxu0  ;;  %v1463_v34 = vadd.f32 %v1462_v30, %v1461_v26  ;;  %v1107_v27 = vadd.f32 %v1106_v55, %v1105_v17  ;;  %v1110_v30 = vsel %vm1104_vm2, %v2029_v56, 0.0  ;;  %v1158_v56 = vmul.f32 %v2047_v13, %v2047_v13 }
 0x108   :  { %v1325_v29 = vpack.c.bf16 %v2065_v24, %v2065_v24  ;;  %v823_v33 = vadd.f32 %v1381_v28, %v1999_v63  ;;  %v1464_v35 = vpop.f32.mrf.mxu1  ;;  %v1177_v28 = vsel %vm1104_vm2, %v1155_v14, 0.0  ;;  %v1118_v54 = vsel %vm1104_vm2, %v2065_v24, 0.0 }
 0x109   :  { %v1383_v37 = vpop.f32.mrf.mxu0 }
 0x10a   :  { %1089 = vst.msk [vmem:[%s2270_s6 + $0x1c] sm:$0xf] %vm1081_vm1, %v1325_v29  ;;  %v2074_v38 = vadd.f32 %v1463_v34, %v823_v33  ;;  %v1384_v39 = vadd.f32 %v1383_v37, %v1382_v31  ;;  %v1465_v40 = vpop.f32.mrf.mxu1  ;;  %v1157_v31 = vmul.f32 %v2038_v7, %v2038_v7  ;;  %v1109_v37 = vadd.f32 %v1108_v22, %v1107_v27 }
 0x10b   :  { %v1385_v43 = vpop.f32.mrf.mxu0  ;;  %v1466_v45 = vadd.f32 %v1465_v40, %v1464_v35  ;;  %v1176_v35 = vadd.f32 %v1175_v19, %v1174_v25  ;;  %v1179_v40 = vsel %vm1104_vm2, %v1156_v32, 0.0 }
 0x10c   :  { %v1326_v41 = vpack.c.bf16 %v2074_v38, %v2074_v38  ;;  %v826_v42 = vadd.f32 %v1384_v39, %v1999_v63  ;;  %v1467_v46 = vpop.f32.mrf.mxu1  ;;  %v1120_v19 = vsel %vm1104_vm2, %v2074_v38, 0.0 }
 0x10d   :  { %v1386_v47 = vpop.f32.mrf.mxu0 }
 0x10e   :  { %1090 = vst.msk [vmem:[%s2270_s6 + $0x20] sm:$0xf] %vm1081_vm1, %v1326_v41  ;;  %v2083_v50 = vadd.f32 %v1466_v45, %v826_v42  ;;  %v1387_v51 = vadd.f32 %v1386_v47, %v1385_v43  ;;  %v1468_v52 = vpop.f32.mrf.mxu1  ;;  %v1112_v41 = vsel %vm1104_vm2, %v2038_v7, 0.0  ;;  %v1178_v45 = vadd.f32 %v1177_v28, %v1176_v35 }
 0x10f   :  { %v1388_v53 = vpop.f32.mrf.mxu0  ;;  %v1469_v61 = vadd.f32 %v1468_v52, %v1467_v46  ;;  %v1111_v46 = vadd.f32 %v1110_v30, %v1109_v37  ;;  %v1181_v52 = vsel %vm1104_vm2, %v1157_v31, 0.0  ;;  %v1114_v7 = vsel %vm1104_vm2, %v2047_v13, 0.0 }
 0x110   :  { %v1327_v57 = vpack.c.bf16 %v2083_v50, %v2083_v50  ;;  %v831_v60 = vadd.f32 %v1387_v51, %v1999_v63  ;;  %v1470_v0 = vpop.f32.mrf.mxu1  ;;  %v1160_v13 = vmul.f32 %v2065_v24, %v2065_v24  ;;  %v1162_v24 = vmul.f32 %v2083_v50, %v2083_v50 }
 0x111   :  { %v1389_v1 = vpop.f32.mrf.mxu0 }
 0x112   :  { %1091 = vst.msk [vmem:[%s2270_s6 + $0x24] sm:$0xf] %vm1081_vm1, %v1327_v57  ;;  %v1390_v2 = vadd.f32 %v1389_v1, %v1388_v53  ;;  %v2092_v3 = vadd.f32 %v1469_v61, %v831_v60  ;;  %v1471_v4 = vpop.f32.mrf.mxu1  ;;  %v1159_v53 = vmul.f32 %v2056_v18, %v2056_v18  ;;  %v1180_v61 = vadd.f32 %v1179_v40, %v1178_v45 }
 0x113   :  { %v1472_v6 = vadd.f32 %v1471_v4, %v1470_v0  ;;  %v1391_v8 = vpop.f32.mrf.mxu0  ;;  %v1113_v0 = vadd.f32 %v1112_v41, %v1111_v46  ;;  %v1183_v4 = vsel %vm1104_vm2, %v1158_v56, 0.0  ;;  %v1187_v17 = vsel %vm1104_vm2, %v1160_v13, 0.0 }
 0x114   :  { %v834_v5 = vadd.f32 %v1390_v2, %v1999_v63  ;;  %v1328_v48 = vpack.c.bf16 %v2092_v3, %v2092_v3  ;;  %v1473_v11 = vpop.f32.mrf.mxu1  ;;  %v1182_v9 = vadd.f32 %v1181_v52, %v1180_v61  ;;  %v1163_v32 = vmul.f32 %v2092_v3, %v2092_v3 }
 0x115   :  { %v1392_v12 = vpop.f32.mrf.mxu0  ;;  %v1191_v37 = vsel %vm1104_vm2, %v1162_v24, 0.0 }
 0x116   :  { %v2099_v10 = vadd.f32 %v1472_v6, %v834_v5  ;;  %1092 = vst.msk [vmem:[%s2270_s6 + $0x28] sm:$0xf] %vm1081_vm1, %v1328_v48  ;;  %v1393_v49 = vadd.f32 %v1392_v12, %v1391_v8  ;;  %v1474_v16 = vpop.f32.mrf.mxu1  ;;  %v1116_v5 = vsel %vm1104_vm2, %v2056_v18, 0.0  ;;  %v1161_v18 = vmul.f32 %v2074_v38, %v2074_v38 }
 0x117   :  { %v1394_v58 = vpop.f32.mrf.mxu0  ;;  %v1475_v59 = vadd.f32 %v1474_v16, %v1473_v11  ;;  %v1115_v11 = vadd.f32 %v1114_v7, %v1113_v0  ;;  %v1184_v16 = vadd.f32 %v1183_v4, %v1182_v9 }
 0x118   :  { %v1329_v15 = vpack.c.bf16 %v2099_v10, %v2099_v10  ;;  %v839_v62 = vadd.f32 %v1393_v49, %v1999_v63  ;;  %v1476_v20 = vpop.f32.mrf.mxu1  ;;  %v1185_v49 = vsel %vm1104_vm2, %v1159_v53, 0.0  ;;  %v1189_v28 = vsel %vm1104_vm2, %v1161_v18, 0.0 }
 0x119   :  { %v1395_v21 = vpop.f32.mrf.mxu0  ;;  %v1126_v46 = vsel %vm1104_vm2, %v2099_v10, 0.0 }
 0x11a   :  { %1093 = vst.msk [vmem:[%s2270_s6 + $0x2c] sm:$0xf] %vm1081_vm1, %v1329_v15  ;;  %v2125_v23 = vadd.f32 %v1475_v59, %v839_v62  ;;  %v1396_v26 = vadd.f32 %v1395_v21, %v1394_v58  ;;  %v1477_v29 = vpop.f32.mrf.mxu1  ;;  %v1117_v58 = vadd.f32 %v1116_v5, %v1115_v11  ;;  %v1186_v21 = vadd.f32 %v1185_v49, %v1184_v16 }
 0x11b   :  { %v1397_v34 = vpop.f32.mrf.mxu0  ;;  %v1478_v39 = vadd.f32 %v1477_v29, %v1476_v20  ;;  %v1122_v29 = vsel %vm1104_vm2, %v2083_v50, 0.0 }
 0x11c   :  { %v1330_v44 = vpack.c.bf16 %v2125_v23, %v2125_v23  ;;  %v842_v33 = vadd.f32 %v1396_v26, %v1999_v63  ;;  %v1479_v42 = vpop.f32.mrf.mxu1  ;;  %v1119_v22 = vadd.f32 %v1118_v54, %v1117_v58  ;;  %v1188_v30 = vadd.f32 %v1187_v17, %v1186_v21 }
 0x11d   :  { %v1398_v43 = vpop.f32.mrf.mxu0  ;;  %v1128_v61 = vsel %vm1104_vm2, %v2125_v23, 0.0 }
 0x11e   :  { %1094 = vst.msk [vmem:[%s2270_s6 + $0x30] sm:$0xf] %vm1081_vm1, %v1330_v44  ;;  %v2145_v47 = vadd.f32 %v1478_v39, %v842_v33  ;;  %v1399_v51 = vadd.f32 %v1398_v43, %v1397_v34  ;;  %v1480_v57 = vpop.f32.mrf.mxu1  ;;  %v1121_v31 = vadd.f32 %v1120_v19, %v1119_v22  ;;  %v1164_v44 = vmul.f32 %v2099_v10, %v2099_v10 }
 0x11f   :  { %v1400_v60 = vpop.f32.mrf.mxu0  ;;  %v1481_v6 = vadd.f32 %v1480_v57, %v1479_v42  ;;  %v1124_v39 = vsel %vm1104_vm2, %v2092_v3, 0.0  ;;  %v1190_v41 = vadd.f32 %v1189_v28, %v1188_v30  ;;  %v1193_v42 = vsel %vm1104_vm2, %v1163_v32, 0.0 }
 0x120   :  { %v1331_v1 = vpack.c.bf16 %v2145_v47, %v2145_v47  ;;  %v847_v2 = vadd.f32 %v1399_v51, %v1999_v63  ;;  %v1482_v8 = vpop.f32.mrf.mxu1  ;;  %v1123_v56 = vadd.f32 %v1122_v29, %v1121_v31  ;;  %v1165_v3 = vmul.f32 %v2125_v23, %v2125_v23 }
 0x121   :  { %v1401_v48 = vpop.f32.mrf.mxu0  ;;  %v1192_v7 = vadd.f32 %v1191_v37, %v1190_v41  ;;  %v1195_v57 = vsel %vm1104_vm2, %v1164_v44, 0.0  ;;  %v1166_v0 = vmul.f32 %v2145_v47, %v2145_v47 }
 0x122   :  { %1095 = vst.msk [vmem:[%s2270_s6 + $0x34] sm:$0xf] %vm1081_vm1, %v1331_v1  ;;  %v1402_v12 = vadd.f32 %v1401_v48, %v1400_v60  ;;  %v2169_v14 = vadd.f32 %v1481_v6, %v847_v2  ;;  %v1483_v15 = vpop.f32.mrf.mxu1  ;;  %v1125_v53 = vadd.f32 %v1124_v39, %v1123_v56  ;;  %v1197_v6 = vsel %vm1104_vm2, %v1165_v3, 0.0 }
 0x123   :  { %v1484_v62 = vadd.f32 %v1483_v15, %v1482_v8  ;;  %v1403_v59 = vpop.f32.mrf.mxu0  ;;  %v1194_v4 = vadd.f32 %v1193_v42, %v1192_v7  ;;  %v1130_v8 = vsel %vm1104_vm2, %v2145_v47, 0.0  ;;  %v1199_v18 = vsel %vm1104_vm2, %v1166_v0, 0.0 }
 0x124   :  { %v850_v55 = vadd.f32 %v1402_v12, %v1999_v63  ;;  %v1332_v20 = vpack.c.bf16 %v2169_v14, %v2169_v14  ;;  %v1127_v5 = vadd.f32 %v1126_v46, %v1125_v53  ;;  %v1167_v48 = vmul.f32 %v2169_v14, %v2169_v14 }
 0x125   :  { %v1404_v27 = vpop.f32.mrf.mxu0  ;;  %v1196_v11 = vadd.f32 %v1195_v57, %v1194_v4  ;;  %v1132_v15 = vsel %vm1104_vm2, %v2169_v14, 0.0 }
 0x126   :  { %v970_v26 = vadd.f32 %v1484_v62, %v850_v55  ;;  %v1485_v25 = vpop.f32.mrf.mxu1  ;;  %1096 = vst.msk [vmem:[%s2270_s6 + $0x38] sm:$0xf] %vm1081_vm1, %v1332_v20  ;;  %v1405_v38 = vadd.f32 %v1404_v27, %v1403_v59  ;;  %v1129_v12 = vadd.f32 %v1128_v61, %v1127_v5  ;;  %v1201_v19 = vsel %vm1104_vm2, %v1167_v48, 0.0 }
 0x127   :  { %v1406_v35 = vpop.f32.mrf.mxu0  ;;  %v1198_v55 = vadd.f32 %v1197_v6, %v1196_v11 }
 0x128   :  { %v1333_v33 = vpack.c.bf16 %v970_v26, %v970_v26  ;;  %v1486_v34 = vpop.f32.mrf.mxu1  ;;  %v855_v50 = vadd.f32 %v1405_v38, %v1999_v63  ;;  %v1168_v47 = vmul.f32 %v970_v26, %v970_v26  ;;  %v1131_v62 = vadd.f32 %v1130_v8, %v1129_v12 }
 0x129   :  { %v1487_v40 = vadd.f32 %v1486_v34, %v1485_v25  ;;  %v1407_v45 = vpop.f32.mrf.mxu0  ;;  %v1134_v24 = vsel %vm1104_vm2, %v970_v26, 0.0  ;;  %v1200_v25 = vadd.f32 %v1199_v18, %v1198_v55 }
 0x12a   :  { %1097 = vst.msk [vmem:[%s2270_s6 + $0x3c] sm:$0xf] %vm1081_vm1, %v1333_v33  ;;  %v1488_v43 = vpop.f32.mrf.mxu1  ;;  %v1408_v52 = vadd.f32 %v1407_v45, %v1406_v35  ;;  %v1133_v27 = vadd.f32 %v1132_v15, %v1131_v62  ;;  %v1203_v28 = vsel %vm1104_vm2, %v1168_v47, 0.0 }
 0x12b   :  { %v975_v51 = vadd.f32 %v1487_v40, %v855_v50  ;;  %v1202_v44 = vadd.f32 %v1201_v19, %v1200_v25  ;;  %v1228_v25 = vld [vmem:[#allocation2] sm:$0x3] }
 0x12c   :  { %v1489_v60 = vpop.f32.mrf.mxu1  ;;  %v858_v2 = vadd.f32 %v1408_v52, %v1999_v63  ;;  %v1409_v10 = vpop.f32.mrf.mxu0  ;;  %v1135_v33 = vadd.f32 %v1134_v24, %v1133_v27 }
 0x12d   :  { %v1334_v1 = vpack.c.bf16 %v975_v51, %v975_v51  ;;  %v1490_v13 = vadd.f32 %v1489_v60, %v1488_v43  ;;  %v1169_v20 = vmul.f32 %v975_v51, %v975_v51  ;;  %v1136_v29 = vsel %vm1104_vm2, %v975_v51, 0.0 }
 0x12e   :  { %v1491_v23 = vpop.f32.mrf.mxu1  ;;  %v1410_v9 = vpop.f32.mrf.mxu0  ;;  %v1204_v42 = vadd.f32 %v1203_v28, %v1202_v44  ;;  %v1137_v43 = vadd.f32 %v1136_v29, %v1135_v33  ;;  %v1240_v33 = vld [vmem:[%s2271_s4] sm:$0x1] }
 0x12f   :  { %1098 = vst.msk [vmem:[%s2270_s6 + $0x40] sm:$0xf] %vm1081_vm1, %v1334_v1  ;;  %v978_v49 = vadd.f32 %v1490_v13, %v858_v2  ;;  %v1411_v54 = vadd.f32 %v1410_v9, %v1409_v10  ;;  %v1205_v37 = vsel %vm1104_vm2, %v1169_v20, 0.0 }
 0x130   :  { %v1492_v16 = vpop.f32.mrf.mxu1  ;;  %v1412_v58 = vpop.f32.mrf.mxu0  ;;  %v1206_v53 = vadd.f32 %v1205_v37, %v1204_v42  ;;  %v1244_v37 = vld [vmem:[%s2272_s5] sm:$0x1] }
 0x131   :  { %v1335_v59 = vpack.c.bf16 %v978_v49, %v978_v49  ;;  %v863_v17 = vadd.f32 %v1411_v54, %v1999_v63  ;;  %v1493_v21 = vadd.f32 %v1492_v16, %v1491_v23  ;;  %v1170_v38 = vmul.f32 %v978_v49, %v978_v49 }
 0x132   :  { %v1494_v22 = vpop.f32.mrf.mxu1  ;;  %v1413_v32 = vpop.f32.mrf.mxu0  ;;  %v1138_v39 = vsel %vm1104_vm2, %v978_v49, 0.0 }
 0x133   :  { %1099 = vst.msk [vmem:[%s2270_s6 + $0x44] sm:$0xf] %vm1081_vm1, %v1335_v59  ;;  %v1414_v14 = vadd.f32 %v1413_v32, %v1412_v58  ;;  %v983_v30 = vadd.f32 %v1493_v21, %v863_v17  ;;  %v1207_v3 = vsel %vm1104_vm2, %v1170_v38, 0.0  ;;  %v1139_v57 = vadd.f32 %v1138_v39, %v1137_v43 }
 0x134   :  { %v1495_v31 = vpop.f32.mrf.mxu1  ;;  %v1415_v26 = vpop.f32.mrf.mxu0  ;;  %v1208_v13 = vadd.f32 %v1207_v3, %v1206_v53 }
 0x135   :  { %v866_v34 = vadd.f32 %v1414_v14, %v1999_v63  ;;  %v1496_v35 = vadd.f32 %v1495_v31, %v1494_v22  ;;  %v1336_v50 = vpack.c.bf16 %v983_v30, %v983_v30  ;;  %v1171_v40 = vmul.f32 %v983_v30, %v983_v30 }
 0x136   :  { %v1497_v41 = vpop.f32.mrf.mxu1  ;;  %v1416_v56 = vpop.f32.mrf.mxu0  ;;  %v1140_v51 = vsel %vm1104_vm2, %v983_v30, 0.0 }
 0x137   :  { %v986_v45 = vadd.f32 %v1496_v35, %v866_v34  ;;  %v1417_v46 = vadd.f32 %v1416_v56, %v1415_v26  ;;  %1100 = vst.msk [vmem:[%s2270_s6 + $0x48] sm:$0xf] %vm1081_vm1, %v1336_v50  ;;  %v1209_v0 = vsel %vm1104_vm2, %v1171_v40, 0.0  ;;  %v1141_v6 = vadd.f32 %v1140_v51, %v1139_v57 }
 0x138   :  { %v1498_v52 = vpop.f32.mrf.mxu1  ;;  %v1418_v7 = vpop.f32.mrf.mxu0  ;;  %v1210_v9 = vadd.f32 %v1209_v0, %v1208_v13 }
 0x139   :  { %v1337_v60 = vpack.c.bf16 %v986_v45, %v986_v45  ;;  %v1172_v61 = vmul.f32 %v986_v45, %v986_v45  ;;  %v1142_v1 = vsel %vm1104_vm2, %v986_v45, 0.0  ;;  %v871_v2 = vadd.f32 %v1417_v46, %v1999_v63 }
 0x13a   :  { %v1499_v10 = vadd.f32 %v1498_v52, %v1497_v41  ;;  %v1500_v4 = vpop.f32.mrf.mxu1  ;;  %v1419_v5 = vpop.f32.mrf.mxu0  ;;  %v1143_v11 = vadd.f32 %v1142_v1, %v1141_v6 }
 0x13b   :  { %1101 = vst.msk [vmem:[%s2270_s6 + $0x4c] sm:$0xf] %vm1081_vm1, %v1337_v60  ;;  %v1211_v8 = vsel %vm1104_vm2, %v1172_v61, 0.0 }
 0x13c   :  { %v991_v48 = vadd.f32 %v1499_v10, %v871_v2  ;;  %v1501_v23 = vpop.f32.mrf.mxu1  ;;  %v1212_v54 = vadd.f32 %v1211_v8, %v1210_v9 }
 0x13e   :  { %v1338_v12 = vpack.c.bf16 %v991_v48, %v991_v48  ;;  %v1145_v63 = vsel %vm1144_vm0, %v991_v48, 0.0  ;;  %v1173_v49 = vmul.f32 %v991_v48, %v991_v48 }
 0x13f   :  { %v1146_v18 = vadd.f32 %v1145_v63, %v1143_v11 }
 0x140   :  { %1103 = vst.msk [vmem:[%s2270_s6 + $0x50] sm:$0x1] %vm1102_vm3, %v1338_v12  ;;  %v1213_v15 = vsel %vm1144_vm0, %v1173_v49, 0.0 }
 0x141   :  { %v1147_v47 = vrot.slane %v1146_v18, 4  ;;  %v1214_v16 = vadd.f32 %v1213_v15, %v1212_v54 }
 0x143   :  { %v1148_v58 = vadd.f32 %v1147_v47, %v1146_v18  ;;  %v1215_v55 = vrot.slane %v1214_v16, 4 }
 0x145   :  { %v1149_v62 = vrot.slane %v1148_v58, 2  ;;  %v1216_v59 = vadd.f32 %v1215_v55, %v1214_v16 }
 0x147   :  { %v1150_v17 = vadd.f32 %v1149_v62, %v1148_v58  ;;  %v1217_v19 = vrot.slane %v1216_v59, 2 }
 0x149   :  { %v1151_v24 = vrot.slane %v1150_v17, 1  ;;  %v1218_v20 = vadd.f32 %v1217_v19, %v1216_v59 }
 0x14b   :  { %v1219_v21 = vrot.slane %v1218_v20, 1  ;;  %v1152_v22 = vadd.f32 %v1151_v24, %v1150_v17 }
 0x14d   :  { %v1220_v32 = vadd.f32 %v1219_v21, %v1218_v20 }
 0x14f   :  { %v1222_v27 = vsel %vm1221_vm4, %v1152_v22, %v1220_v32 }
 0x150   :  { %v1229_v14 = vadd.f32 %v1228_v25, %v1222_v27 }
 0x152   :  { %1230 = vst.msk [vmem:[#allocation2] sm:$0x3] %vm1144_vm0, %v1229_v14 }
 0x159   :  { %v1234_v28 = vld [vmem:[#allocation2] sm:$0x1]  ;;  %v1236_v29 = vld [vmem:[#allocation2 + $0x1] sm:$0x1] }
 0x15a   :  { %v1235_v38 = vmul.f32 0.0061728396, %v1234_v28  ;;  %v1237_v30 = vmul.f32 0.0061728396, %v1236_v29 }
 0x15c   :  { %v1238_v31 = vmul.f32 %v1235_v38, %v1235_v38 }
 0x15e   :  { %v1239_v26 = vsub.f32 %v1237_v30, %v1238_v31 }
 0x160   :  { %v1241_v44 = vadd.f32 1e-05, %v1239_v26 }
 0x162   :  { %1536 = vrsqrt.f32 %v1241_v44 }
 0x16f   :  { %v1537_v34 = vpop.eup %1536 }
 0x170   :  { %v1243_v35 = vmul.f32 %v1537_v34, %v1240_v33 }
 0x172   :  { %v1245_v39 = vmul.f32 %v1243_v35, %v1235_v38 }
 0x174   :  { %v1246_v50 = vsub.f32 %v1244_v37, %v1245_v39 }
 0x176   :  { %v1251_v40 = vrot.slane %v1246_v50, %v1675_v36 }
 0x178   :  { %v1253_v41 = vsel %vm1221_vm4, %v1243_v35, %v1251_v40 }
 0x179   :  { %1254 = vst.msk [vmem:[%s2273_s7] sm:$0x3] %vm1144_vm0, %v1253_v41 }

// kernel: tile.24
= control target key start
LH: loop header
LB: loop body
LE: loop exit
PB: predicated region body
PF: predicated region fallthrough
CT: control target
= control target key end

     0   :  { %s15_s6 = smov 3  ;;  %s18_s7 = smov 12  ;;  %vm20_vm0 = vcmask 1043458   ;;  %vm25_vm1 = vcmask 1045508   ;;  %vm30_vm2 = vcmask 1047558   ;;  %vm3_vm3 = vcmask 523264   ;;  %s134_s0 = inlined_call_operand.vmem [shape: f32[2,9,64], index: 0, kind: input, shape index: {}]   ;;  %s135_s1 = inlined_call_operand.vmem [shape: f32[2,576], index: 1, kind: output, shape index: {}]  }
   0x1   :  { %v81_v0 = vld [vmem:[%s134_s0 + $0x1] ss:$16 sm:%s15_s6]   ;;  %v82_v1 = vld [vmem:[%s134_s0 - $0x1d] ss:$16 sm:%s18_s7]   ;;  %s23_s12 = smov 48  ;;  %s28_s13 = smov 192 }
   0x2   :  { %v21_v2 = vsel %vm20_vm0, %v82_v1, %v81_v0  ;;  %v83_v3 = vld [vmem:[%s134_s0 - $0x3b] ss:$16 sm:%s23_s12]   ;;  %v84_v4 = vld [vmem:[%s134_s0 - $0x59] ss:$16 sm:%s28_s13]   ;;  %vm34_vm4 = vcmask 1048064  }
   0x3   :  { %v26_v5 = vsel %vm25_vm1, %v83_v3, %v21_v2  ;;  %v2_v6 = vld [vmem:[%s134_s0] ss:$2 sm:$0x1f]   ;;  %v80_v7 = vld [vmem:[%s134_s0 + $0x10] ss:$2 sm:$0x1f]  }
   0x4   :  { %v31_v8 = vsel %vm30_vm2, %v84_v4, %v26_v5  ;;  %4 = vst.msk [vmem:[#allocation0] ss:$8 sm:$0xf] %vm3_vm3, %v2_v6   ;;  %6 = vst.msk [vmem:[#allocation0 + $0x1c] sm:$0x10] %vm3_vm3, %v2_v6   ;;  %s90_s0 = smov 64  }
   0x5   :  { %11 = vst.msk [vmem:[#allocation0 + $0x1] ss:$8 sm:$0xf] %vm3_vm3, %v80_v7   ;;  %13 = vst.msk [vmem:[#allocation0 + $0x1d] sm:$0x10] %vm3_vm3, %v80_v7   ;;  %32 = vrot.lane.b32.xlu0 %v31_v8, %s90_s0 }
   0xc   :  { %v71_v9 = vld [vmem:[#allocation0 + $0x20] sm:$0x3] }
   0xd   :  { %88 = vst [vmem:[%s135_s1 + $0x8] sm:$0x3] %v71_v9 }
  0x77   :  { %v33_v10 = vpop.permute.xlu0 %32  }
  0x78   :  { %35 = vst.msk [vmem:[#allocation0] sm:$0x3] %vm34_vm4, %v33_v10   ;;  %37 = vst.msk [vmem:[#allocation0 + $0x6] sm:$0xc] %vm34_vm4, %v33_v10  }
  0x79   :  { %39 = vst.msk [vmem:[#allocation0 + $0xc] sm:$0x30] %vm34_vm4, %v33_v10   ;;  %41 = vst.msk [vmem:[#allocation0 + $0x12] sm:$0xc0] %vm34_vm4, %v33_v10  }
  0x7f   :  { %v46_v11 = vld [vmem:[#allocation0] sm:$0x3]  ;;  %v51_v12 = vld [vmem:[#allocation0 + $0x8] sm:$0x3] }
  0x80   :  { %v57_v13 = vld [vmem:[#allocation0 + $0x10] sm:$0x3]  ;;  %49 = vst [vmem:[%s135_s1] sm:$0x3] %v46_v11  ;;  %85 = vst [vmem:[%s135_s1 + $0x2] sm:$0x3] %v51_v12 }
  0x81   :  { %86 = vst [vmem:[%s135_s1 + $0x4] sm:$0x3] %v57_v13  ;;  %v64_v14 = vld [vmem:[#allocation0 + $0x18] sm:$0x3] }
  0x82   :  { %87 = vst [vmem:[%s135_s1 + $0x6] sm:$0x3] %v64_v14 }

// kernel: tile.29
= control target key start
LH: loop header
LB: loop body
LE: loop exit
PB: predicated region body
PF: predicated region fallthrough
CT: control target
= control target key end

     0   :  { %vm53_vm0 = vcmask 1043458   ;;  %vm58_vm1 = vcmask 1045508   ;;  %s105_s6 = smov 3  ;;  %vm63_vm2 = vcmask 1047558   ;;  %s108_s9 = smov 12  ;;  %vm3_vm3 = vcmask 523264   ;;  %s713_s0 = inlined_call_operand.vmem [shape: f32[2,49,64], index: 0, kind: input, shape index: {}]   ;;  %s714_s1 = inlined_call_operand.vmem [shape: f32[2,3136], index: 1, kind: output, shape index: {}]  }
   0x1   :  { %v432_v0 = vld [vmem:[%s713_s0 + $0x11] ss:$56 sm:%s105_s6]   ;;  %s113_s10 = smov 48  ;;  %v433_v1 = vld [vmem:[%s713_s0 - $0x5d] ss:$56 sm:%s108_s9]   ;;  %s118_s15 = smov 192 }
   0x2   :  { %v434_v2 = vld [vmem:[%s713_s0 - $0xcb] ss:$56 sm:%s113_s10]   ;;  %s48_s16 = smov 3  ;;  %v111_v3 = vsel %vm53_vm0, %v433_v1, %v432_v0  ;;  %v435_v4 = vld [vmem:[%s713_s0 - $0x139] ss:$56 sm:%s118_s15]   ;;  %s51_s21 = smov 12 }
   0x3   :  { %v424_v5 = vld [vmem:[%s713_s0 + $0x1] ss:$56 sm:%s48_s16]   ;;  %s56_s22 = smov 48  ;;  %v116_v6 = vsel %vm58_vm1, %v434_v2, %v111_v3  ;;  %v425_v7 = vld [vmem:[%s713_s0 - $0x6d] ss:$56 sm:%s51_s21]   ;;  %s61_s27 = smov 192 }
   0x4   :  { %v426_v8 = vld [vmem:[%s713_s0 - $0xdb] ss:$56 sm:%s56_s22]   ;;  %s134_s28 = smov 3  ;;  %v121_v9 = vsel %vm63_vm2, %v435_v4, %v116_v6  ;;  %v54_v10 = vsel %vm53_vm0, %v425_v7, %v424_v5  ;;  %v427_v11 = vld [vmem:[%s713_s0 - $0x149] ss:$56 sm:%s61_s27]   ;;  %s137_s4 = smov 12 }
   0x5   :  { %v436_v12 = vld [vmem:[%s713_s0 + $0x19] ss:$56 sm:%s134_s28]   ;;  %s142_s5 = smov 48  ;;  %s473_s6 = smov 64   ;;  %v59_v13 = vsel %vm58_vm1, %v426_v8, %v54_v10  ;;  %v437_v14 = vld [vmem:[%s713_s0 - $0x55] ss:$56 sm:%s137_s4]  }
   0x6   :  { %122 = vrot.lane.b32.xlu1 %v121_v9, %s473_s6  ;;  %s147_s9 = smov 192  ;;  %s76_s10 = smov 3  ;;  %v418_v15 = vld [vmem:[%s713_s0 + $0x10] ss:$2 sm:$0xff]   ;;  %v64_v16 = vsel %vm63_vm2, %v427_v11, %v59_v13  ;;  %v140_v17 = vsel %vm53_vm0, %v437_v14, %v436_v12  ;;  %v438_v18 = vld [vmem:[%s713_s0 - $0xc3] ss:$56 sm:%s142_s5]  }
   0x7   :  { %v439_v19 = vld [vmem:[%s713_s0 - $0x131] ss:$56 sm:%s147_s9]   ;;  %s79_s17 = smov 12  ;;  %s84_s18 = smov 48  ;;  %65 = vrot.lane.b32.xlu0 %v64_v16, %s473_s6  ;;  %v145_v20 = vsel %vm58_vm1, %v438_v18, %v140_v17  ;;  %v421_v22 = vld [vmem:[%s713_s0 + $0x3a] ss:$2 sm:$0xff]  }
   0x8   :  { %10 = vst.msk [vmem:[#allocation0 + $0x40] ss:$8 sm:$0xf] %vm3_vm3, %v418_v15   ;;  %12 = vst.msk [vmem:[#allocation0 + $0x40] ss:$8 sm:$0xf0] %vm3_vm3, %v418_v15   ;;  %v150_v23 = vsel %vm63_vm2, %v439_v19, %v145_v20 }
   0x9   :  { %v428_v21 = vld [vmem:[%s713_s0 + $0x9] ss:$56 sm:%s76_s10]   ;;  %s89_s21 = smov 192  ;;  %s192_s22 = smov 3  ;;  %v429_v24 = vld [vmem:[%s713_s0 - $0x65] ss:$56 sm:%s79_s17]  }
   0xa   :  { %v430_v25 = vld [vmem:[%s713_s0 - $0xd3] ss:$56 sm:%s84_s18]   ;;  %s195_s29 = smov 12  ;;  %s200_s30 = smov 48  ;;  %151 = vrot.lane.b32.xlu1 %v150_v23, %s473_s6  ;;  %v82_v26 = vsel %vm53_vm0, %v429_v24, %v428_v21  ;;  %v422_v28 = vld [vmem:[%s713_s0 + $0x4a] ss:$2 sm:$0xff]  }
   0xb   :  { %32 = vst.msk [vmem:[#allocation0 + $0x9] ss:$8 sm:$0xf0] %vm3_vm3, %v421_v22   ;;  %30 = vst.msk [vmem:[#allocation0 + $0x9] ss:$8 sm:$0xf] %vm3_vm3, %v421_v22   ;;  %v87_v29 = vsel %vm58_vm1, %v430_v25, %v82_v26 }
   0xc   :  { %v431_v27 = vld [vmem:[%s713_s0 - $0x141] ss:$56 sm:%s89_s21]   ;;  %s205_s4 = smov 192  ;;  %s163_s5 = smov 3  ;;  %v444_v30 = vld [vmem:[%s713_s0 + $0x29] ss:$56 sm:%s192_s22]  }
   0xd   :  { %v445_v31 = vld [vmem:[%s713_s0 - $0x45] ss:$56 sm:%s195_s29]   ;;  %s166_s13 = smov 12  ;;  %s171_s14 = smov 48  ;;  %v92_v32 = vsel %vm63_vm2, %v431_v27, %v87_v29  ;;  %v446_v34 = vld [vmem:[%s713_s0 - $0xb3] ss:$56 sm:%s200_s30]  }
   0xe   :  { %37 = vst.msk [vmem:[#allocation0 + $0x49] ss:$8 sm:$0xf] %vm3_vm3, %v422_v28   ;;  %39 = vst.msk [vmem:[#allocation0 + $0x49] ss:$8 sm:$0xf0] %vm3_vm3, %v422_v28   ;;  %v198_v33 = vsel %vm53_vm0, %v445_v31, %v444_v30  ;;  %93 = vrot.lane.b32.xlu0 %v92_v32, %s473_s6 }
   0xf   :  { %v447_v35 = vld [vmem:[%s713_s0 - $0x121] ss:$56 sm:%s205_s4]   ;;  %s176_s19 = smov 192  ;;  %v203_v36 = vsel %vm58_vm1, %v446_v34, %v198_v33  ;;  %v440_v37 = vld [vmem:[%s713_s0 + $0x21] ss:$56 sm:%s163_s5]   ;;  %s21_s24 = smov 3 }
  0x10   :  { %v2_v38 = vld [vmem:[%s713_s0] ss:$2 sm:$0xff]   ;;  %v208_v39 = vsel %vm63_vm2, %v447_v35, %v203_v36  ;;  %v441_v40 = vld [vmem:[%s713_s0 - $0x4d] ss:$56 sm:%s166_s13]   ;;  %vm67_vm4 = vcmask 1048064  }
  0x11   :  { %v442_v41 = vld [vmem:[%s713_s0 - $0xbb] ss:$56 sm:%s171_s14]   ;;  %4 = vst.msk [vmem:[#allocation0] ss:$8 sm:$0xf] %vm3_vm3, %v2_v38   ;;  %209 = vrot.lane.b32.xlu1 %v208_v39, %s473_s6  ;;  %v169_v42 = vsel %vm53_vm0, %v441_v40, %v440_v37 }
  0x12   :  { %5 = vst.msk [vmem:[#allocation0] ss:$8 sm:$0xf0] %vm3_vm3, %v2_v38   ;;  %v443_v43 = vld [vmem:[%s713_s0 - $0x129] ss:$56 sm:%s176_s19]   ;;  %v174_v45 = vsel %vm58_vm1, %v442_v41, %v169_v42 }
  0x13   :  { %v423_v44 = vld [vmem:[%s713_s0 + $0x5a] ss:$2 sm:$0xff]   ;;  %v179_v48 = vsel %vm63_vm2, %v443_v43, %v174_v45 }
  0x14   :  { %v420_v46 = vld [vmem:[%s713_s0 + $0x30] ss:$8 sm:%s21_s24]   ;;  %46 = vst.msk [vmem:[#allocation0 + $0x89] ss:$8 sm:$0xf0] %vm3_vm3, %v423_v44   ;;  %180 = vrot.lane.b32.xlu0 %v179_v48, %s473_s6 }
  0x15   :  { %44 = vst.msk [vmem:[#allocation0 + $0x89] ss:$8 sm:$0xf] %vm3_vm3, %v423_v44   ;;  %v419_v47 = vld [vmem:[%s713_s0 + $0x20] ss:$2 sm:$0xff]  }
  0x16   :  { %25 = vst.msk [vmem:[#allocation0 + $0xc0] ss:$-191 sm:$0x3] %vm3_vm3, %v420_v46   ;;  %19 = vst.msk [vmem:[#allocation0 + $0x80] ss:$8 sm:$0xf0] %vm3_vm3, %v419_v47  }
  0x17   :  { %17 = vst.msk [vmem:[#allocation0 + $0x80] ss:$8 sm:$0xf] %vm3_vm3, %v419_v47  }
  0x1d   :  { %v389_v49 = vld [vmem:[#allocation0 + $0xc0] sm:$0x3] }
  0x1e   :  { %471 = vst [vmem:[%s714_s1 + $0x30] sm:$0x3] %v389_v49 }
  0x78   :  { %v123_v50 = vpop.permute.xlu1 %122  }
  0x79   :  { %126 = vst.msk [vmem:[#allocation0 + $0x40] sm:$0x3] %vm67_vm4, %v123_v50   ;;  %128 = vst.msk [vmem:[#allocation0 + $0x46] sm:$0xc] %vm67_vm4, %v123_v50   ;;  %v66_v51 = vpop.permute.xlu0 %65  }
  0x7a   :  { %130 = vst.msk [vmem:[#allocation0 + $0x4c] sm:$0x30] %vm67_vm4, %v123_v50   ;;  %132 = vst.msk [vmem:[#allocation0 + $0x52] sm:$0xc0] %vm67_vm4, %v123_v50  }
  0x7b   :  { %68 = vst.msk [vmem:[#allocation0] sm:$0x3] %vm67_vm4, %v66_v51   ;;  %70 = vst.msk [vmem:[#allocation0 + $0x6] sm:$0xc] %vm67_vm4, %v66_v51  }
  0x7c   :  { %72 = vst.msk [vmem:[#allocation0 + $0xc] sm:$0x30] %vm67_vm4, %v66_v51   ;;  %74 = vst.msk [vmem:[#allocation0 + $0x12] sm:$0xc0] %vm67_vm4, %v66_v51   ;;  %v152_v52 = vpop.permute.xlu1 %151  }
  0x7d   :  { %155 = vst.msk [vmem:[#allocation0 + $0x60] sm:$0x3] %vm67_vm4, %v152_v52   ;;  %157 = vst.msk [vmem:[#allocation0 + $0x66] sm:$0xc] %vm67_vm4, %v152_v52  }
  0x7e   :  { %159 = vst.msk [vmem:[#allocation0 + $0x6c] sm:$0x30] %vm67_vm4, %v152_v52   ;;  %161 = vst.msk [vmem:[#allocation0 + $0x72] sm:$0xc0] %vm67_vm4, %v152_v52  }
  0x80   :  { %v94_v53 = vpop.permute.xlu0 %93   ;;  %v277_v54 = vld [vmem:[#allocation0 + $0x40] sm:$0x3]  ;;  %v284_v55 = vld [vmem:[#allocation0 + $0x48] sm:$0x3] }
  0x81   :  { %v291_v56 = vld [vmem:[#allocation0 + $0x50] sm:$0x3]  ;;  %97 = vst.msk [vmem:[#allocation0 + $0x20] sm:$0x3] %vm67_vm4, %v94_v53   ;;  %99 = vst.msk [vmem:[#allocation0 + $0x26] sm:$0xc] %vm67_vm4, %v94_v53  }
  0x82   :  { %101 = vst.msk [vmem:[#allocation0 + $0x2c] sm:$0x30] %vm67_vm4, %v94_v53   ;;  %103 = vst.msk [vmem:[#allocation0 + $0x32] sm:$0xc0] %vm67_vm4, %v94_v53   ;;  %v298_v57 = vld [vmem:[#allocation0 + $0x58] sm:$0x3] }
  0x83   :  { %455 = vst [vmem:[%s714_s1 + $0x10] sm:$0x3] %v277_v54  ;;  %456 = vst [vmem:[%s714_s1 + $0x12] sm:$0x3] %v284_v55  ;;  %v210_v58 = vpop.permute.xlu1 %209   ;;  %v224_v59 = vld [vmem:[#allocation0] sm:$0x3] }
  0x84   :  { %457 = vst [vmem:[%s714_s1 + $0x14] sm:$0x3] %v291_v56  ;;  %458 = vst [vmem:[%s714_s1 + $0x16] sm:$0x3] %v298_v57  ;;  %v229_v60 = vld [vmem:[#allocation0 + $0x8] sm:$0x3] }
  0x85   :  { %v235_v61 = vld [vmem:[#allocation0 + $0x10] sm:$0x3]  ;;  %213 = vst.msk [vmem:[#allocation0 + $0xa0] sm:$0x3] %vm67_vm4, %v210_v58   ;;  %215 = vst.msk [vmem:[#allocation0 + $0xa6] sm:$0xc] %vm67_vm4, %v210_v58  }
  0x86   :  { %217 = vst.msk [vmem:[#allocation0 + $0xac] sm:$0x30] %vm67_vm4, %v210_v58   ;;  %219 = vst.msk [vmem:[#allocation0 + $0xb2] sm:$0xc0] %vm67_vm4, %v210_v58   ;;  %v242_v62 = vld [vmem:[#allocation0 + $0x18] sm:$0x3]  ;;  %v181_v2 = vpop.permute.xlu0 %180  }
  0x87   :  { %227 = vst [vmem:[%s714_s1] sm:$0x3] %v224_v59  ;;  %448 = vst [vmem:[%s714_s1 + $0x2] sm:$0x3] %v229_v60  ;;  %v305_v63 = vld [vmem:[#allocation0 + $0x60] sm:$0x3] }
  0x88   :  { %449 = vst [vmem:[%s714_s1 + $0x4] sm:$0x3] %v235_v61  ;;  %450 = vst [vmem:[%s714_s1 + $0x6] sm:$0x3] %v242_v62  ;;  %v312_v0 = vld [vmem:[#allocation0 + $0x68] sm:$0x3] }
  0x89   :  { %v319_v1 = vld [vmem:[#allocation0 + $0x70] sm:$0x3]  ;;  %459 = vst [vmem:[%s714_s1 + $0x18] sm:$0x3] %v305_v63  ;;  %460 = vst [vmem:[%s714_s1 + $0x1a] sm:$0x3] %v312_v0 }
  0x8a   :  { %461 = vst [vmem:[%s714_s1 + $0x1c] sm:$0x3] %v319_v1  ;;  %v326_v3 = vld [vmem:[#allocation0 + $0x78] sm:$0x3]  ;;  %184 = vst.msk [vmem:[#allocation0 + $0x80] sm:$0x3] %vm67_vm4, %v181_v2  }
  0x8b   :  { %186 = vst.msk [vmem:[#allocation0 + $0x86] sm:$0xc] %vm67_vm4, %v181_v2   ;;  %188 = vst.msk [vmem:[#allocation0 + $0x8c] sm:$0x30] %vm67_vm4, %v181_v2   ;;  %v249_v4 = vld [vmem:[#allocation0 + $0x20] sm:$0x3] }
  0x8c   :  { %190 = vst.msk [vmem:[#allocation0 + $0x92] sm:$0xc0] %vm67_vm4, %v181_v2   ;;  %462 = vst [vmem:[%s714_s1 + $0x1e] sm:$0x3] %v326_v3  ;;  %v256_v5 = vld [vmem:[#allocation0 + $0x28] sm:$0x3] }
  0x8d   :  { %v263_v6 = vld [vmem:[#allocation0 + $0x30] sm:$0x3]  ;;  %451 = vst [vmem:[%s714_s1 + $0x8] sm:$0x3] %v249_v4  ;;  %452 = vst [vmem:[%s714_s1 + $0xa] sm:$0x3] %v256_v5 }
  0x8e   :  { %453 = vst [vmem:[%s714_s1 + $0xc] sm:$0x3] %v263_v6  ;;  %v270_v7 = vld [vmem:[#allocation0 + $0x38] sm:$0x3]  ;;  %v361_v8 = vld [vmem:[#allocation0 + $0xa0] sm:$0x3] }
  0x8f   :  { %454 = vst [vmem:[%s714_s1 + $0xe] sm:$0x3] %v270_v7  ;;  %v368_v9 = vld [vmem:[#allocation0 + $0xa8] sm:$0x3]  ;;  %v375_v10 = vld [vmem:[#allocation0 + $0xb0] sm:$0x3] }
  0x90   :  { %467 = vst [vmem:[%s714_s1 + $0x28] sm:$0x3] %v361_v8  ;;  %468 = vst [vmem:[%s714_s1 + $0x2a] sm:$0x3] %v368_v9  ;;  %v382_v11 = vld [vmem:[#allocation0 + $0xb8] sm:$0x3] }
  0x91   :  { %469 = vst [vmem:[%s714_s1 + $0x2c] sm:$0x3] %v375_v10  ;;  %470 = vst [vmem:[%s714_s1 + $0x2e] sm:$0x3] %v382_v11  ;;  %v333_v12 = vld [vmem:[#allocation0 + $0x80] sm:$0x3] }
  0x92   :  { %v340_v13 = vld [vmem:[#allocation0 + $0x88] sm:$0x3]  ;;  %v347_v14 = vld [vmem:[#allocation0 + $0x90] sm:$0x3]  ;;  %463 = vst [vmem:[%s714_s1 + $0x20] sm:$0x3] %v333_v12 }
  0x93   :  { %464 = vst [vmem:[%s714_s1 + $0x22] sm:$0x3] %v340_v13  ;;  %465 = vst [vmem:[%s714_s1 + $0x24] sm:$0x3] %v347_v14  ;;  %v354_v15 = vld [vmem:[#allocation0 + $0x98] sm:$0x3] }
  0x94   :  { %466 = vst [vmem:[%s714_s1 + $0x26] sm:$0x3] %v354_v15 }

// kernel: dqn_forward.6
= control target key start
LH: loop header
LB: loop body
LE: loop exit
PB: predicated region body
PF: predicated region fallthrough
CT: control target
= control target key end

     0   :  { %v132_v5 = vlaneseq  ;;  %vm1497_vm0 = vmmov 0   ;;  %vm1098_vm1 = vcmask 517120   ;;  %vm1059_vm2 = vcmask 519168   ;;  %s2126_s2 = inlined_call_operand.vmem [shape: bf16[640,64], index: 2, kind: input, shape index: {}]   ;;  %s2127_s0 = inlined_call_operand.vmem [shape: bf16[98,640], index: 0, kind: input, shape index: {}]   ;;  %s2128_s1 = inlined_call_operand.vmem [shape: f32[2,640], index: 1, kind: input, shape index: {}]   ;;  %s2129_s3 = inlined_call_operand.vmem [shape: f32[1,64], index: 3, kind: input, shape index: {}]   ;;  %s2130_s6 = inlined_call_operand.vmem [shape: bf16[98,64], index: 6, kind: output, shape index: {0}]   ;;  %s2131_s4 = inlined_call_operand.vmem [shape: f32[1,64], index: 4, kind: input, shape index: {}]   ;;  %s2132_s5 = inlined_call_operand.vmem [shape: f32[1,64], index: 5, kind: input, shape index: {}]   ;;  %s2133_s7 = inlined_call_operand.vmem [shape: f32[2,64], index: 7, kind: output, shape index: {1}]  }
   0x1   :  { %v1454_v0 = vld [vmem:[%s2126_s2 + $0x78] sm:$0xff]   ;;  %v1456_v2 = vld [vmem:[%s2126_s2 + $0x70] sm:$0xff]   ;;  %v1458_v4 = vld [vmem:[%s2126_s2 + $0x68] sm:$0xff]   ;;  %vm1074_vm3 = vcmask 523264   ;;  %vm1072_vm4 = vcmask 516096   ;;  %vm1151_vm5 = vcmask 1040384  }
   0x2   :  { %v1455_v1 = vld [vmem:[%s2126_s2 + $0x38] sm:$0xff]   ;;  %1261 = vmatprep.subr.bf16.mxu0 %v1454_v0  ;;  %1436 = vmatprep.subr.bf16.mxu1 %v1454_v0  ;;  %v1457_v3 = vld [vmem:[%s2126_s2 + $0x30] sm:$0xff]   ;;  %v1459_v6 = vld [vmem:[%s2126_s2 + $0x28] sm:$0xff]   ;;  %v1559_v8 = vshrl.u32 %v132_v5, 7 }
   0x3   :  { %1262 = vmatpush3.bf16.msra.mxu0 %v1455_v1  ;;  %1444 = vmatpush3.bf16.msra.mxu1 %v1455_v1  ;;  %v1460_v7 = vld [vmem:[%s2126_s2 + $0x60] sm:$0xff]   ;;  %v1462_v10 = vld [vmem:[%s2126_s2 + $0x58] sm:$0xff]   ;;  %v1464_v13 = vld [vmem:[%s2126_s2 + $0x50] sm:$0xff]  }
   0x4   :  { %1263 = vmatprep.subr.bf16.mxu0 %v1456_v2  ;;  %1437 = vmatprep.subr.bf16.mxu1 %v1456_v2  ;;  %v1461_v9 = vld [vmem:[%s2126_s2 + $0x20] sm:$0xff]   ;;  %v1463_v11 = vld [vmem:[%s2126_s2 + $0x18] sm:$0xff]   ;;  %v138_v12 = vsub.s32 1, %v1559_v8  ;;  %v1575_v14 = vsub.s32 0, %v1559_v8  ;;  %v1465_v29 = vld [vmem:[%s2126_s2 + $0x10] sm:$0xff]   ;;  %v142_v38 = vsub.s32 2, %v1559_v8 }
   0x5   :  { %v26_v15 = vld [vmem:[%s2127_s0] sm:$0xff]  ;;  %v29_v16 = vld [vmem:[%s2127_s0 + $0x14] sm:$0xff]  ;;  %v1466_v34 = vld [vmem:[%s2126_s2 + $0x48] sm:$0xff]   ;;  %v146_v51 = vsub.s32 3, %v1559_v8 }
   0x6   :  { %v1586_v17 = vld [vmem:[%s2128_s1] ss:$2 sm:$0x1f]  ;;  %v65_v18 = vunpack.c.l.bf16 %v26_v15  ;;  %v66_v19 = vunpack.c.h.bf16 %v26_v15  ;;  %v70_v20 = vunpack.c.l.bf16 %v29_v16  ;;  %v71_v21 = vunpack.c.h.bf16 %v29_v16  ;;  %v1591_v22 = vld [vmem:[%s2128_s1 + $0x1] ss:$2 sm:$0x1f] }
   0x7   :  { %1264 = vmatpush3.bf16.msra.mxu0 %v1457_v3  ;;  %1445 = vmatpush3.bf16.msra.mxu1 %v1457_v3  ;;  %v50_v23 = vld [vmem:[%s2127_s0 + $0xa0] sm:$0xff]  ;;  %v53_v24 = vld [vmem:[%s2127_s0 + $0xb4] sm:$0xff]  ;;  %v1600_v25 = vrot.slane %v1586_v17, %v138_v12  ;;  %v1603_v26 = vrot.slane %v1591_v22, %v138_v12  ;;  %v1610_v32 = vrot.slane %v1586_v17, %v1575_v14  ;;  %v1467_v47 = vld [vmem:[%s2126_s2 + $0x8] sm:$0xff]  }
   0x8   :  { %1265 = vmatprep.subr.bf16.mxu0 %v1458_v4  ;;  %1438 = vmatprep.subr.bf16.mxu1 %v1458_v4  ;;  %v105_v27 = vunpack.c.l.bf16 %v50_v23  ;;  %v106_v28 = vunpack.c.h.bf16 %v50_v23  ;;  %v110_v30 = vunpack.c.l.bf16 %v53_v24  ;;  %v111_v31 = vunpack.c.h.bf16 %v53_v24  ;;  %v1468_v52 = vld [vmem:[%s2126_s2 + $0x40] sm:$0xff]   ;;  %v32_v57 = vld [vmem:[%s2127_s0 + $0x28] sm:$0xff]  ;;  %v1471_v23 = vld [vmem:[%s2126_s2 + $0xb8] sm:$0xff]  }
   0x9   :  { %v1614_v33 = vrot.slane %v1591_v22, %v1575_v14  ;;  %v158_v35 = vmul.f32 %v1600_v25, %v66_v19  ;;  %v163_v36 = vmul.f32 %v1600_v25, %v71_v21  ;;  %v157_v40 = vmul.f32 %v1610_v32, %v65_v18  ;;  %v35_v58 = vld [vmem:[%s2127_s0 + $0x3c] sm:$0xff]  ;;  %v56_v63 = vld [vmem:[%s2127_s0 + $0xc8] sm:$0xff] }
   0xa   :  { %v198_v37 = vmul.f32 %v1600_v25, %v106_v28  ;;  %v203_v39 = vmul.f32 %v1600_v25, %v111_v31  ;;  %v162_v41 = vmul.f32 %v1610_v32, %v70_v20  ;;  %v197_v42 = vmul.f32 %v1610_v32, %v105_v27  ;;  %v59_v4 = vld [vmem:[%s2127_s0 + $0xdc] sm:$0xff] }
   0xb   :  { %1266 = vmatpush3.bf16.msra.mxu0 %v1459_v6  ;;  %1446 = vmatpush3.bf16.msra.mxu1 %v1459_v6  ;;  %v251_v43 = vadd.f32 %v1603_v26, %v158_v35  ;;  %v256_v44 = vadd.f32 %v1603_v26, %v163_v36  ;;  %v202_v46 = vmul.f32 %v1610_v32, %v110_v30  ;;  %v76_v2 = vunpack.c.h.bf16 %v32_v57  ;;  %v1469_v5 = vld [vmem:[%s2126_s2] sm:$0xff]   ;;  %v1472_v30 = vld [vmem:[%s2126_s2 + $0x138] sm:$0xff]  }
   0xc   :  { %1267 = vmatprep.subr.bf16.mxu0 %v1460_v7  ;;  %1439 = vmatprep.subr.bf16.mxu1 %v1460_v7  ;;  %v291_v45 = vadd.f32 %v1603_v26, %v198_v37  ;;  %v296_v48 = vadd.f32 %v1603_v26, %v203_v39  ;;  %v250_v49 = vadd.f32 %v1614_v33, %v157_v40  ;;  %v81_v3 = vunpack.c.h.bf16 %v35_v58  ;;  %v38_v37 = vld [vmem:[%s2127_s0 + $0x50] sm:$0xff] }
   0xd   :  { %v255_v50 = vadd.f32 %v1614_v33, %v162_v41  ;;  %v316_v53 = vmax.f32 %v251_v43, 0.0  ;;  %v321_v54 = vmax.f32 %v256_v44, 0.0  ;;  %v290_v56 = vadd.f32 %v1614_v33, %v197_v42  ;;  %v1473_v40 = vld [vmem:[%s2126_s2 + $0xf0] sm:$0xff]  }
   0xe   :  { %v356_v55 = vmax.f32 %v291_v45, 0.0  ;;  %v361_v59 = vmax.f32 %v296_v48, 0.0  ;;  %v315_v60 = vmax.f32 %v250_v49, 0.0  ;;  %v295_v62 = vadd.f32 %v1614_v33, %v202_v46  ;;  %v41_v45 = vld [vmem:[%s2127_s0 + $0x64] sm:$0xff]  ;;  %v1474_v46 = vld [vmem:[%s2126_s2 + $0xb0] sm:$0xff]  }
   0xf   :  { %1268 = vmatpush3.bf16.msra.mxu0 %v1461_v9  ;;  %1447 = vmatpush3.bf16.msra.mxu1 %v1461_v9  ;;  %v320_v61 = vmax.f32 %v255_v50, 0.0  ;;  %v381_v0 = vpack.c.bf16 %v321_v54, %v316_v53  ;;  %v355_v1 = vmax.f32 %v290_v56, 0.0  ;;  %v168_v12 = vmul.f32 %v1600_v25, %v76_v2  ;;  %v62_v53 = vld [vmem:[%s2127_s0 + $0xf0] sm:$0x11] }
  0x10   :  { %1269 = vmatprep.subr.bf16.mxu0 %v1462_v10  ;;  %1440 = vmatprep.subr.bf16.mxu1 %v1462_v10  ;;  %v401_v6 = vpack.c.bf16 %v361_v59, %v356_v55  ;;  %v360_v9 = vmax.f32 %v295_v62, 0.0  ;;  %v75_v10 = vunpack.c.l.bf16 %v32_v57  ;;  %v80_v15 = vunpack.c.l.bf16 %v35_v58 }
  0x11   :  { %v380_v7 = vpack.c.bf16 %v320_v61, %v315_v60  ;;  %v116_v16 = vunpack.c.h.bf16 %v56_v63  ;;  %774 = vmatprep.mubr.bf16.mxu0 %v381_v0  ;;  %v121_v20 = vunpack.c.h.bf16 %v59_v4  ;;  %v115_v21 = vunpack.c.l.bf16 %v56_v63  ;;  %v1476_v63 = vld [vmem:[%s2126_s2 + $0xe8] sm:$0xff]  }
  0x12   :  { %806 = vmatprep.mubr.bf16.mxu1 %v401_v6  ;;  %v400_v18 = vpack.c.bf16 %v360_v9, %v355_v1  ;;  %v167_v19 = vmul.f32 %v1610_v32, %v75_v10  ;;  %v261_v24 = vadd.f32 %v1603_v26, %v168_v12  ;;  %v172_v28 = vmul.f32 %v1610_v32, %v80_v15 }
  0x13   :  { %1270 = vmatpush3.bf16.msra.mxu0 %v1463_v11  ;;  %1448 = vmatpush3.bf16.msra.mxu1 %v1463_v11  ;;  %v1470_v11 = vld [vmem:[%s2126_s2 + $0xf8] sm:$0xff]   ;;  %v120_v35 = vunpack.c.l.bf16 %v59_v4  ;;  %v207_v36 = vmul.f32 %v1610_v32, %v115_v21  ;;  %v1496_v39 = vmov 0.0   ;;  %v86_v57 = vunpack.c.h.bf16 %v38_v37 }
  0x14   :  { %1271 = vmatprep.subr.bf16.mxu0 %v1464_v13  ;;  %1441 = vmatprep.subr.bf16.mxu1 %v1464_v13  ;;  %v173_v13 = vmul.f32 %v1600_v25, %v81_v3  ;;  %v260_v31 = vadd.f32 %v1614_v33, %v167_v19  ;;  %v326_v41 = vmax.f32 %v261_v24, 0.0  ;;  %v265_v43 = vadd.f32 %v1614_v33, %v172_v28  ;;  %v44_v19 = vld [vmem:[%s2127_s0 + $0x78] sm:$0xff] }
  0x15   :  { %v212_v50 = vmul.f32 %v1610_v32, %v120_v35  ;;  %v91_v61 = vunpack.c.h.bf16 %v41_v45  ;;  %v178_v0 = vmul.f32 %v1600_v25, %v86_v57  ;;  %v85_v1 = vunpack.c.l.bf16 %v38_v37  ;;  %1157 = vst.msk [vmem:[#allocation2] sm:$0x3] %vm1098_vm1, %v1496_v39 }
  0x16   :  { %v266_v27 = vadd.f32 %v1603_v26, %v173_v13  ;;  %v325_v48 = vmax.f32 %v260_v31, 0.0  ;;  %v330_v55 = vmax.f32 %v265_v43, 0.0  ;;  %v90_v2 = vunpack.c.l.bf16 %v41_v45  ;;  %v1478_v13 = vld [vmem:[%s2126_s2 + $0x128] sm:$0xff]   ;;  %v1481_v43 = vld [vmem:[%s2126_s2 + $0x120] sm:$0xff]  }
  0x17   :  { %1272 = vmatpush3.bf16.msra.mxu0 %v1465_v29  ;;  %1449 = vmatpush3.bf16.msra.mxu1 %v1465_v29  ;;  %v208_v29 = vmul.f32 %v1600_v25, %v116_v16  ;;  %v305_v59 = vadd.f32 %v1614_v33, %v212_v50  ;;  %v126_v6 = vunpack.c.h.bf16 %v62_v53  ;;  %v271_v9 = vadd.f32 %v1603_v26, %v178_v0 }
  0x18   :  { %1273 = vmatprep.subr.bf16.mxu0 %v1466_v34  ;;  %1442 = vmatprep.subr.bf16.mxu1 %v1466_v34  ;;  %v213_v34 = vmul.f32 %v1600_v25, %v121_v20  ;;  %v331_v42 = vmax.f32 %v266_v27, 0.0  ;;  %v385_v62 = vpack.c.bf16 %v330_v55, %v325_v48  ;;  %v177_v10 = vmul.f32 %v1610_v32, %v85_v1  ;;  %v47_v20 = vld [vmem:[%s2127_s0 + $0x8c] sm:$0xff] }
  0x19   :  { %v301_v44 = vadd.f32 %v1603_v26, %v208_v29  ;;  %v370_v4 = vmax.f32 %v305_v59, 0.0  ;;  %v125_v12 = vunpack.c.l.bf16 %v62_v53  ;;  %v150_v21 = vsub.s32 4, %v1559_v8  ;;  %v1491_v8 = vld [vmem:[%s2126_s2 + $0xc0] sm:$0xff]  }
  0x1a   :  { %v306_v49 = vadd.f32 %v1603_v26, %v213_v34  ;;  %v386_v54 = vpack.c.bf16 %v331_v42, %v326_v41  ;;  %v336_v24 = vmax.f32 %v271_v9, 0.0  ;;  %v270_v27 = vadd.f32 %v1614_v33, %v177_v10  ;;  %v28_v9 = vld [vmem:[%s2127_s0 + $0x10] ss:$20 sps:$4 sm:$0xff]  }
  0x1b   :  { %1274 = vmatpush3.bf16.msra.mxu0 %v1467_v47  ;;  %1450 = vmatpush3.bf16.msra.mxu1 %v1467_v47  ;;  %v1475_v47 = vld [vmem:[%s2126_s2 + $0x130] sm:$0xff]   ;;  %v366_v56 = vmax.f32 %v301_v44, 0.0  ;;  %v217_v29 = vmul.f32 %v1610_v32, %v125_v12  ;;  %v96_v35 = vunpack.c.h.bf16 %v44_v19  ;;  %v95_v42 = vunpack.c.l.bf16 %v44_v19 }
  0x1c   :  { %1275 = vmatprep.subr.bf16.mxu0 %v1468_v52  ;;  %1443 = vmatprep.subr.bf16.mxu1 %v1468_v52  ;;  %v300_v52 = vadd.f32 %v1614_v33, %v207_v36  ;;  %v371_v58 = vmax.f32 %v306_v49, 0.0  ;;  %v101_v36 = vunpack.c.h.bf16 %v47_v20  ;;  %v335_v37 = vmax.f32 %v270_v27, 0.0  ;;  %v1482_v49 = vld [vmem:[%s2126_s2 + $0xd8] sm:$0xff]  }
  0x1d   :  { %v310_v41 = vadd.f32 %v1614_v33, %v217_v29  ;;  %v187_v53 = vmul.f32 %v1610_v32, %v95_v42  ;;  %v1797_v19 = vrot.slane %v1591_v22, %v142_v38  ;;  %v74_v27 = vunpack.c.h.bf16 %v28_v9  ;;  %v1488_v29 = vld [vmem:[%s2126_s2 + $0xc8] sm:$0xff]  }
  0x1e   :  { %v365_v60 = vmax.f32 %v300_v52, 0.0  ;;  %v406_v3 = vpack.c.bf16 %v371_v58, %v366_v56  ;;  %v100_v52 = vunpack.c.l.bf16 %v47_v20  ;;  %v1487_v20 = vld [vmem:[%s2126_s2 + $0x110] sm:$0xff]  }
  0x1f   :  { %1276 = vmatpush3.bf16.msra.mxu0 %v1469_v5  ;;  %1451 = vmatpush3.bf16.msra.mxu1 %v1469_v5  ;;  %v183_v5 = vmul.f32 %v1600_v25, %v91_v61  ;;  %v375_v50 = vmax.f32 %v310_v41, 0.0  ;;  %v280_v59 = vadd.f32 %v1614_v33, %v187_v53  ;;  %v30_v61 = vld [vmem:[%s2127_s0 + $0x1c] sm:$0xff] }
  0x20   :  { %1319 = vmatprep.subr.bf16.mxu1 %v1470_v11  ;;  %1392 = vmatprep.subr.bf16.mxu0 %v1496_v39  ;;  %v182_v11 = vmul.f32 %v1610_v32, %v90_v2  ;;  %v405_v15 = vpack.c.bf16 %v370_v4, %v365_v60  ;;  %v192_v58 = vmul.f32 %v1610_v32, %v100_v52  ;;  %v27_v60 = vld [vmem:[%s2127_s0 + $0x8] sm:$0xff]  ;;  %v1483_v32 = vld [vmem:[%s2126_s2 + $0x98] sm:$0xff]  }
  0x21   :  { %v276_v16 = vadd.f32 %v1603_v26, %v183_v5  ;;  %v410_v57 = vpack.c.bf16 %v375_v50, %v375_v50  ;;  %v67_v1 = vunpack.c.l.bf16 %v27_v60  ;;  %v68_v2 = vunpack.c.h.bf16 %v27_v60 }
  0x22   :  { %775 = vmatmul.mubr.bf16.vlgmr.msra.gmra.mxu0 %v380_v7  ;;  %807 = vmatmul.mubr.bf16.vlgmr.msra.gmra.mxu1 %v400_v18  ;;  %v1477_v7 = vld [vmem:[%s2126_s2 + $0xa8] sm:$0xff]   ;;  %v218_v18 = vmul.f32 %v1600_v25, %v126_v6  ;;  %v275_v28 = vadd.f32 %v1614_v33, %v182_v11  ;;  %v285_v4 = vadd.f32 %v1614_v33, %v192_v58  ;;  %v345_v5 = vmax.f32 %v280_v59, 0.0  ;;  %v33_v33 = vld [vmem:[%s2127_s0 + $0x30] sm:$0xff]  ;;  %v39_v58 = vld [vmem:[%s2127_s0 + $0x58] sm:$0xff] }
  0x23   :  { %1320 = vmatpush3.bf16.msra.mxu1 %v1471_v23  ;;  %1393 = vmatpush3.bf16.msra.mxu0 %v1472_v30  ;;  %v1479_v23 = vld [vmem:[%s2126_s2 + $0xe0] sm:$0xff]   ;;  %v341_v31 = vmax.f32 %v276_v16, 0.0  ;;  %v72_v6 = vunpack.c.l.bf16 %v30_v61 }
  0x24   :  { %1321 = vmatprep.subr.bf16.mxu1 %v1473_v40  ;;  %1394 = vmatprep.subr.bf16.mxu0 %v1496_v39  ;;  %v1480_v30 = vld [vmem:[%s2126_s2 + $0xa0] sm:$0xff]   ;;  %v311_v34 = vadd.f32 %v1603_v26, %v218_v18  ;;  %v340_v40 = vmax.f32 %v275_v28, 0.0  ;;  %v1809_v28 = vrot.slane %v1586_v17, %v150_v21 }
  0x25   :  { %782 = vmatprep.mubr.bf16.mxu0 %v386_v54  ;;  %814 = vmatprep.mubr.bf16.mxu1 %v406_v3  ;;  %v391_v44 = vpack.c.bf16 %v341_v31, %v336_v24  ;;  %v1485_v3 = vld [vmem:[%s2126_s2 + $0xd0] sm:$0xff]   ;;  %v69_v24 = vunpack.c.l.bf16 %v28_v9 }
  0x26   :  { %v376_v45 = vmax.f32 %v311_v34, 0.0  ;;  %v390_v48 = vpack.c.bf16 %v340_v40, %v335_v37  ;;  %v78_v34 = vunpack.c.h.bf16 %v33_v33  ;;  %v166_v37 = vmul.f32 %v1809_v28, %v74_v27  ;;  %v34_v40 = vld [vmem:[%s2127_s0 + $0x38] ss:$20 sps:$4 sm:$0xff]   ;;  %v45_v27 = vld [vmem:[%s2127_s0 + $0x80] sm:$0xff] }
  0x27   :  { %1322 = vmatpush3.bf16.msra.mxu1 %v1474_v46  ;;  %1395 = vmatpush3.bf16.msra.mxu0 %v1475_v47  ;;  %v188_v46 = vmul.f32 %v1600_v25, %v96_v35  ;;  %v193_v47 = vmul.f32 %v1600_v25, %v101_v36  ;;  %v1753_v25 = vrot.slane %v1586_v17, %v142_v38  ;;  %v36_v38 = vld [vmem:[%s2127_s0 + $0x44] sm:$0xff]  ;;  %v79_v53 = vunpack.c.l.bf16 %v34_v40 }
  0x28   :  { %1323 = vmatprep.subr.bf16.mxu1 %v1476_v63  ;;  %1396 = vmatprep.subr.bf16.mxu0 %v1496_v39  ;;  %v411_v54 = vpack.c.bf16 %v376_v45, %v376_v45  ;;  %v161_v36 = vmul.f32 %v1809_v28, %v69_v24  ;;  %v1489_v45 = vld [vmem:[%s2126_s2 + $0x88] sm:$0xff]   ;;  %v82_v50 = vunpack.c.l.bf16 %v36_v38 }
  0x29   :  { %v281_v55 = vadd.f32 %v1603_v26, %v188_v46  ;;  %v286_v56 = vadd.f32 %v1603_v26, %v193_v47  ;;  %v1766_v26 = vrot.slane %v1586_v17, %v146_v51  ;;  %v159_v11 = vmul.f32 %v1753_v25, %v67_v1  ;;  %v1490_v46 = vld [vmem:[%s2126_s2 + $0x108] sm:$0xff]  }
  0x2a   :  { %783 = vmatmul.mubr.bf16.gmra.mxu0 %v385_v62  ;;  %815 = vmatmul.mubr.bf16.gmra.mxu1 %v405_v15  ;;  %v1484_v62 = vld [vmem:[%s2126_s2 + $0x118] sm:$0xff]   ;;  %v350_v15 = vmax.f32 %v285_v4, 0.0  ;;  %v164_v16 = vmul.f32 %v1753_v25, %v72_v6 }
  0x2b   :  { %1324 = vmatpush3.bf16.msra.mxu1 %v1477_v7  ;;  %1397 = vmatpush3.bf16.msra.mxu0 %v1478_v13  ;;  %v346_v63 = vmax.f32 %v281_v55, 0.0  ;;  %v351_v0 = vmax.f32 %v286_v56, 0.0  ;;  %v73_v7 = vunpack.c.h.bf16 %v30_v61  ;;  %v160_v12 = vmul.f32 %v1766_v26, %v68_v2 }
  0x2c   :  { %1325 = vmatprep.subr.bf16.mxu1 %v1479_v23  ;;  %1398 = vmatprep.subr.bf16.mxu0 %v1496_v39  ;;  %v1787_v13 = vrot.slane %v1591_v22, %v146_v51  ;;  %v1486_v51 = vld [vmem:[%s2126_s2 + $0x90] sm:$0xff]   ;;  %v252_v31 = vadd.f32 %v1797_v19, %v159_v11  ;;  %v257_v17 = vadd.f32 %v1797_v19, %v164_v16 }
  0x2d   :  { %790 = vmatprep.mubr.bf16.mxu0 %v391_v44  ;;  %822 = vmatprep.mubr.bf16.mxu1 %v411_v54  ;;  %v396_v10 = vpack.c.bf16 %v351_v0, %v346_v63  ;;  %v165_v18 = vmul.f32 %v1766_v26, %v73_v7  ;;  %v395_v41 = vpack.c.bf16 %v350_v15, %v345_v5  ;;  %v83_v44 = vunpack.c.h.bf16 %v36_v38  ;;  %v1492_v63 = vld [vmem:[%s2126_s2 + $0x80] sm:$0xff]  }
  0x2e   :  { %v253_v23 = vadd.f32 %v1787_v13, %v160_v12  ;;  %v317_v47 = vmax.f32 %v252_v31, 0.0  ;;  %v322_v54 = vmax.f32 %v257_v17, 0.0  ;;  %v174_v61 = vmul.f32 %v1753_v25, %v82_v50  ;;  %v1493_v0 = vld [vmem:[%s2126_s2 + $0x100] sm:$0xff]  }
  0x2f   :  { %1326 = vmatpush3.bf16.msra.mxu1 %v1480_v30  ;;  %1399 = vmatpush3.bf16.msra.mxu0 %v1481_v43  ;;  %v258_v30 = vadd.f32 %v1787_v13, %v165_v18  ;;  %v1829_v43 = vrot.slane %v1591_v22, %v150_v21  ;;  %v175_v55 = vmul.f32 %v1766_v26, %v83_v44  ;;  %v88_v7 = vunpack.c.h.bf16 %v39_v58 }
  0x30   :  { %1327 = vmatprep.subr.bf16.mxu1 %v1482_v49  ;;  %1400 = vmatprep.subr.bf16.mxu0 %v1496_v39  ;;  %v318_v35 = vmax.f32 %v253_v23, 0.0  ;;  %v77_v49 = vunpack.c.l.bf16 %v33_v33  ;;  %v267_v5 = vadd.f32 %v1797_v19, %v174_v61  ;;  %v382_v9 = vpack.c.bf16 %v322_v54, %v317_v47 }
  0x31   :  { %v323_v42 = vmax.f32 %v258_v30, 0.0  ;;  %v254_v21 = vadd.f32 %v1829_v43, %v161_v36  ;;  %v259_v52 = vadd.f32 %v1829_v43, %v166_v37  ;;  %v268_v1 = vadd.f32 %v1787_v13, %v175_v55  ;;  %v48_v37 = vld [vmem:[%s2127_s0 + $0x94] sm:$0xff] }
  0x32   :  { %791 = vmatmul.mubr.bf16.gmra.mxu0 %v390_v48  ;;  %823 = vmatmul.mubr.bf16.gmra.mxu1 %v410_v57  ;;  %v170_v48 = vmul.f32 %v1766_v26, %v78_v34  ;;  %v169_v57 = vmul.f32 %v1753_v25, %v77_v49  ;;  %v180_v16 = vmul.f32 %v1766_v26, %v88_v7  ;;  %v87_v18 = vunpack.c.l.bf16 %v39_v58  ;;  %v51_v58 = vld [vmem:[%s2127_s0 + $0xa8] sm:$0xff] }
  0x33   :  { %1328 = vmatpush3.bf16.msra.mxu1 %v1483_v32  ;;  %1401 = vmatpush3.bf16.msra.mxu0 %v1484_v62  ;;  %v383_v22 = vpack.c.bf16 %v323_v42, %v318_v35  ;;  %v319_v59 = vmax.f32 %v254_v21, 0.0  ;;  %v324_v60 = vmax.f32 %v259_v52, 0.0  ;;  %v84_v32 = vunpack.c.h.bf16 %v34_v40  ;;  %v42_v62 = vld [vmem:[%s2127_s0 + $0x6c] sm:$0xff]  ;;  %v46_v21 = vld [vmem:[%s2127_s0 + $0x88] ss:$20 sps:$4 sm:$0xff]  }
  0x34   :  { %1329 = vmatprep.subr.bf16.mxu1 %v1485_v3  ;;  %1402 = vmatprep.subr.bf16.mxu0 %v1496_v39  ;;  %v263_v56 = vadd.f32 %v1787_v13, %v170_v48  ;;  %v171_v3 = vmul.f32 %v1809_v28, %v79_v53  ;;  %v262_v4 = vadd.f32 %v1797_v19, %v169_v57  ;;  %v333_v11 = vmax.f32 %v268_v1, 0.0 }
  0x35   :  { %798 = vmatprep.mubr.bf16.mxu0 %v396_v10  ;;  %862 = vmatprep.mubr.bf16.mxu1 %v383_v22  ;;  %v176_v6 = vmul.f32 %v1809_v28, %v84_v32  ;;  %v384_v10 = vpack.c.bf16 %v324_v60, %v319_v59  ;;  %v93_v12 = vunpack.c.h.bf16 %v42_v62  ;;  %v92_v24 = vunpack.c.l.bf16 %v42_v62  ;;  %v54_v32 = vld [vmem:[%s2127_s0 + $0xbc] sm:$0xff] }
  0x36   :  { %v328_v2 = vmax.f32 %v263_v56, 0.0  ;;  %v264_v33 = vadd.f32 %v1829_v43, %v171_v3  ;;  %v327_v38 = vmax.f32 %v262_v4, 0.0  ;;  %v273_v30 = vadd.f32 %v1787_v13, %v180_v16 }
  0x37   :  { %1330 = vmatpush3.bf16.msra.mxu1 %v1486_v51  ;;  %1403 = vmatpush3.bf16.msra.mxu0 %v1487_v20  ;;  %v269_v15 = vadd.f32 %v1829_v43, %v176_v6  ;;  %v40_v51 = vld [vmem:[%s2127_s0 + $0x60] ss:$20 sps:$4 sm:$0xff]   ;;  %v185_v23 = vmul.f32 %v1766_v26, %v93_v12  ;;  %v179_v31 = vmul.f32 %v1753_v25, %v87_v18  ;;  %v98_v44 = vunpack.c.h.bf16 %v45_v27 }
  0x38   :  { %1331 = vmatprep.subr.bf16.mxu1 %v1488_v29  ;;  %1404 = vmatprep.subr.bf16.mxu0 %v1496_v39  ;;  %v388_v20 = vpack.c.bf16 %v333_v11, %v328_v2  ;;  %v332_v29 = vmax.f32 %v267_v5, 0.0  ;;  %v184_v35 = vmul.f32 %v1753_v25, %v92_v24  ;;  %v89_v17 = vunpack.c.l.bf16 %v40_v51 }
  0x39   :  { %v278_v34 = vadd.f32 %v1787_v13, %v185_v23  ;;  %v94_v36 = vunpack.c.h.bf16 %v40_v51  ;;  %v329_v40 = vmax.f32 %v264_v33, 0.0  ;;  %v338_v42 = vmax.f32 %v273_v30, 0.0 }
  0x3a   :  { %799 = vmatmul.mubr.bf16.gmra.mxu0 %v395_v41  ;;  %v334_v41 = vmax.f32 %v269_v15, 0.0  ;;  %v181_v47 = vmul.f32 %v1809_v28, %v89_v17  ;;  %v277_v49 = vadd.f32 %v1797_v19, %v184_v35  ;;  %v103_v50 = vunpack.c.h.bf16 %v48_v37  ;;  %v52_v15 = vld [vmem:[%s2127_s0 + $0xb0] ss:$20 sps:$4 sm:$0xff]  }
  0x3b   :  { %1332 = vmatpush3.bf16.msra.mxu1 %v1489_v45  ;;  %1405 = vmatpush3.bf16.msra.mxu0 %v1490_v46  ;;  %v343_v45 = vmax.f32 %v278_v34, 0.0  ;;  %v272_v46 = vadd.f32 %v1797_v19, %v179_v31  ;;  %v186_v48 = vmul.f32 %v1809_v28, %v94_v36  ;;  %v97_v22 = vunpack.c.l.bf16 %v45_v27  ;;  %v57_v27 = vld [vmem:[%s2127_s0 + $0xd0] sm:$0xff]  ;;  %v60_v34 = vld [vmem:[%s2127_s0 + $0xe4] sm:$0xff] }
  0x3c   :  { %1333 = vmatprep.subr.bf16.mxu1 %v1491_v8  ;;  %1406 = vmatprep.subr.bf16.mxu0 %v1496_v39  ;;  %v190_v8 = vmul.f32 %v1766_v26, %v98_v44  ;;  %v274_v52 = vadd.f32 %v1829_v43, %v181_v47  ;;  %v387_v54 = vpack.c.bf16 %v332_v29, %v327_v38  ;;  %v102_v57 = vunpack.c.l.bf16 %v48_v37 }
  0x3d   :  { %1408 = vmatprep.mubr.msk.bf16.mxu0 %vm1497_vm0, %v1496_v39  ;;  %v279_v53 = vadd.f32 %v1829_v43, %v186_v48  ;;  %v389_v55 = vpack.c.bf16 %v334_v41, %v329_v40  ;;  %v195_v56 = vmul.f32 %v1766_v26, %v103_v50  ;;  %v393_v59 = vpack.c.bf16 %v343_v45, %v338_v42 }
  0x3e   :  { %v283_v60 = vadd.f32 %v1787_v13, %v190_v8  ;;  %v99_v61 = vunpack.c.l.bf16 %v46_v21  ;;  %v337_v62 = vmax.f32 %v272_v46, 0.0  ;;  %v189_v1 = vmul.f32 %v1753_v25, %v97_v22 }
  0x3f   :  { %1334 = vmatpush3.bf16.msra.mxu1 %v1492_v63  ;;  %1407 = vmatpush3.bf16.msra.mxu0 %v1493_v0  ;;  %v342_v63 = vmax.f32 %v277_v49, 0.0  ;;  %v288_v0 = vadd.f32 %v1787_v13, %v195_v56  ;;  %v339_v2 = vmax.f32 %v274_v52, 0.0  ;;  %v344_v3 = vmax.f32 %v279_v53, 0.0  ;;  %v58_v53 = vld [vmem:[%s2127_s0 + $0xd8] ss:$20 sps:$4 sm:$0xff]  }
  0x40   :  { %v104_v4 = vunpack.c.h.bf16 %v46_v21  ;;  %v108_v5 = vunpack.c.h.bf16 %v51_v58  ;;  %v194_v6 = vmul.f32 %v1753_v25, %v102_v57  ;;  %v191_v7 = vmul.f32 %v1809_v28, %v99_v61  ;;  %v63_v56 = vld [vmem:[%s2127_s0 + $0xf8] sm:$0x11] }
  0x41   :  { %v353_v11 = vmax.f32 %v288_v0, 0.0  ;;  %v107_v18 = vunpack.c.l.bf16 %v51_v58  ;;  %v112_v51 = vunpack.c.l.bf16 %v54_v32  ;;  %v394_v23 = vpack.c.bf16 %v344_v3, %v339_v2 }
  0x42   :  { %863 = vmatmul.mubr.bf16.vlgmr.msra.gmra.mxu1 %v382_v9  ;;  %1409 = vmatmul.mubr.bf16.vlgmr.msra.gmra.mxu0 %v384_v10  ;;  %v113_v9 = vunpack.c.h.bf16 %v54_v32  ;;  %v348_v10 = vmax.f32 %v283_v60, 0.0  ;;  %v196_v12 = vmul.f32 %v1809_v28, %v104_v4  ;;  %v200_v33 = vmul.f32 %v1766_v26, %v108_v5 }
  0x43   :  { %870 = vmatprep.mubr.bf16.mxu1 %v388_v20  ;;  %1412 = vmatprep.mubr.msk.bf16.mxu0 %vm1497_vm0, %v1496_v39  ;;  %v392_v20 = vpack.c.bf16 %v342_v63, %v337_v62  ;;  %v282_v24 = vadd.f32 %v1797_v19, %v189_v1  ;;  %v287_v38 = vadd.f32 %v1797_v19, %v194_v6  ;;  %v109_v31 = vunpack.c.l.bf16 %v52_v15 }
  0x44   :  { %v205_v16 = vmul.f32 %v1766_v26, %v113_v9  ;;  %v284_v29 = vadd.f32 %v1829_v43, %v191_v7  ;;  %v289_v30 = vadd.f32 %v1829_v43, %v196_v12  ;;  %v398_v35 = vpack.c.bf16 %v353_v11, %v348_v10 }
  0x45   :  { %v293_v17 = vadd.f32 %v1787_v13, %v200_v33  ;;  %v114_v37 = vunpack.c.h.bf16 %v52_v15  ;;  %v199_v40 = vmul.f32 %v1753_v25, %v107_v18  ;;  %v204_v41 = vmul.f32 %v1753_v25, %v112_v51  ;;  %v64_v18 = vld [vmem:[%s2127_s0 + $0x100] sm:$0x1] }
  0x46   :  { %v298_v36 = vadd.f32 %v1787_v13, %v205_v16  ;;  %v118_v42 = vunpack.c.h.bf16 %v57_v27  ;;  %v201_v44 = vmul.f32 %v1809_v28, %v109_v31  ;;  %v123_v46 = vunpack.c.h.bf16 %v60_v34 }
  0x47   :  { %v206_v45 = vmul.f32 %v1809_v28, %v114_v37  ;;  %v347_v47 = vmax.f32 %v282_v24, 0.0  ;;  %v352_v48 = vmax.f32 %v287_v38, 0.0  ;;  %v349_v49 = vmax.f32 %v284_v29, 0.0 }
  0x48   :  { %v354_v50 = vmax.f32 %v289_v30, 0.0  ;;  %v358_v8 = vmax.f32 %v293_v17, 0.0  ;;  %v363_v22 = vmax.f32 %v298_v36, 0.0  ;;  %v210_v21 = vmul.f32 %v1766_v26, %v118_v42 }
  0x49   :  { %v215_v52 = vmul.f32 %v1766_v26, %v123_v46  ;;  %v294_v57 = vadd.f32 %v1829_v43, %v201_v44  ;;  %v299_v58 = vadd.f32 %v1829_v43, %v206_v45  ;;  %v122_v60 = vunpack.c.l.bf16 %v60_v34 }
  0x4a   :  { %871 = vmatmul.mubr.bf16.gmra.mxu1 %v387_v54  ;;  %1413 = vmatmul.mubr.bf16.gmra.mxu0 %v389_v55  ;;  %v292_v54 = vadd.f32 %v1797_v19, %v199_v40  ;;  %v297_v55 = vadd.f32 %v1797_v19, %v204_v41  ;;  %v397_v61 = vpack.c.bf16 %v352_v48, %v347_v47  ;;  %v119_v62 = vunpack.c.l.bf16 %v58_v53 }
  0x4b   :  { %878 = vmatprep.mubr.bf16.mxu1 %v393_v59  ;;  %1416 = vmatprep.mubr.msk.bf16.mxu0 %vm1497_vm0, %v1496_v39  ;;  %v117_v59 = vunpack.c.l.bf16 %v57_v27  ;;  %v399_v32 = vpack.c.bf16 %v354_v50, %v349_v49  ;;  %v124_v63 = vunpack.c.h.bf16 %v58_v53  ;;  %v403_v0 = vpack.c.bf16 %v363_v22, %v358_v8 }
  0x4c   :  { %v303_v1 = vadd.f32 %v1787_v13, %v210_v21  ;;  %v308_v2 = vadd.f32 %v1787_v13, %v215_v52  ;;  %v128_v3 = vunpack.c.h.bf16 %v63_v56  ;;  %v357_v4 = vmax.f32 %v292_v54, 0.0 }
  0x4d   :  { %v362_v5 = vmax.f32 %v297_v55, 0.0  ;;  %v359_v6 = vmax.f32 %v294_v57, 0.0  ;;  %v364_v7 = vmax.f32 %v299_v58, 0.0  ;;  %v209_v9 = vmul.f32 %v1753_v25, %v117_v59 }
  0x4e   :  { %v214_v10 = vmul.f32 %v1753_v25, %v122_v60  ;;  %v211_v11 = vmul.f32 %v1809_v28, %v119_v62  ;;  %v216_v12 = vmul.f32 %v1809_v28, %v124_v63  ;;  %v368_v33 = vmax.f32 %v303_v1, 0.0 }
  0x4f   :  { %v373_v15 = vmax.f32 %v308_v2, 0.0  ;;  %v220_v16 = vmul.f32 %v1766_v26, %v128_v3  ;;  %v402_v51 = vpack.c.bf16 %v362_v5, %v357_v4  ;;  %v127_v29 = vunpack.c.l.bf16 %v63_v56 }
  0x50   :  { %v307_v24 = vadd.f32 %v1797_v19, %v214_v10  ;;  %v304_v27 = vadd.f32 %v1829_v43, %v211_v11  ;;  %v309_v38 = vadd.f32 %v1829_v43, %v216_v12  ;;  %v129_v30 = vunpack.c.l.bf16 %v64_v18  ;;  %v2001_v11 = vld [vmem:[%s2129_s3] ss:$0 sm:$0xff] }
  0x51   :  { %v408_v31 = vpack.c.bf16 %v373_v15, %v368_v33  ;;  %v313_v34 = vadd.f32 %v1787_v13, %v220_v16  ;;  %v219_v37 = vmul.f32 %v1753_v25, %v127_v29 }
  0x52   :  { %879 = vmatmul.mubr.bf16.gmra.mxu1 %v392_v20  ;;  %1417 = vmatmul.mubr.bf16.gmra.mxu0 %v394_v23  ;;  %v404_v20 = vpack.c.bf16 %v364_v7, %v359_v6  ;;  %v302_v23 = vadd.f32 %v1797_v19, %v209_v9  ;;  %v369_v17 = vmax.f32 %v304_v27, 0.0  ;;  %v374_v36 = vmax.f32 %v309_v38, 0.0 }
  0x53   :  { %886 = vmatprep.mubr.bf16.mxu1 %v398_v35  ;;  %1420 = vmatprep.mubr.msk.bf16.mxu0 %vm1497_vm0, %v1496_v39  ;;  %v372_v35 = vmax.f32 %v307_v24, 0.0  ;;  %v221_v40 = vmul.f32 %v1809_v28, %v129_v30  ;;  %v378_v41 = vmax.f32 %v313_v34, 0.0  ;;  %v312_v45 = vadd.f32 %v1797_v19, %v219_v37 }
  0x54   :  { %v367_v26 = vmax.f32 %v302_v23, 0.0  ;;  %v409_v44 = vpack.c.bf16 %v374_v36, %v369_v17 }
  0x55   :  { %v314_v13 = vadd.f32 %v1829_v43, %v221_v40  ;;  %v413_v46 = vpack.c.bf16 %v378_v41, %v378_v41  ;;  %v377_v47 = vmax.f32 %v312_v45, 0.0 }
  0x56   :  { %v407_v42 = vpack.c.bf16 %v372_v35, %v367_v26 }
  0x57   :  { %v379_v48 = vmax.f32 %v314_v13, 0.0  ;;  %v412_v25 = vpack.c.bf16 %v377_v47, %v377_v47 }
  0x59   :  { %v414_v28 = vpack.c.bf16 %v379_v48, %v379_v48 }
  0x5a   :  { %887 = vmatmul.mubr.bf16.gmra.mxu1 %v397_v61  ;;  %1421 = vmatmul.mubr.bf16.gmra.mxu0 %v399_v32 }
  0x5b   :  { %894 = vmatprep.mubr.bf16.mxu1 %v403_v0  ;;  %1424 = vmatprep.mubr.msk.bf16.mxu0 %vm1497_vm0, %v1496_v39 }
  0x62   :  { %895 = vmatmul.mubr.bf16.gmra.mxu1 %v402_v51  ;;  %1425 = vmatmul.mubr.bf16.gmra.mxu0 %v404_v20 }
  0x63   :  { %902 = vmatprep.mubr.bf16.mxu1 %v408_v31  ;;  %1428 = vmatprep.mubr.msk.bf16.mxu0 %vm1497_vm0, %v1496_v39 }
  0x6a   :  { %903 = vmatmul.mubr.bf16.gmra.mxu1 %v407_v42  ;;  %1429 = vmatmul.mubr.bf16.gmra.mxu0 %v409_v44 }
  0x6b   :  { %910 = vmatprep.mubr.bf16.mxu1 %v413_v46  ;;  %1432 = vmatprep.mubr.msk.bf16.mxu0 %vm1497_vm0, %v1496_v39 }
  0x72   :  { %911 = vmatmul.mubr.bf16.gmra.mxu1 %v412_v25  ;;  %1433 = vmatmul.mubr.bf16.gmra.mxu0 %v414_v28 }
  0xe2   :  { %v1277_v19 = vpop.f32.mrf.mxu0  ;;  %v1974_v49 = vpop.f32.mrf.mxu1 }
  0xe4   :  { %v1278_v43 = vpop.f32.mrf.mxu0  ;;  %v1976_v50 = vpop.f32.mrf.mxu1 }
  0xe5   :  { %v1279_v7 = vadd.f32 %v1278_v43, %v1277_v19 }
  0xe6   :  { %v1280_v8 = vpop.f32.mrf.mxu0  ;;  %v1978_v22 = vpop.f32.mrf.mxu1 }
  0xe7   :  { %v777_v15 = vadd.f32 %v1279_v7, %v2001_v11 }
  0xe8   :  { %v1281_v21 = vpop.f32.mrf.mxu0  ;;  %v1980_v52 = vpop.f32.mrf.mxu1 }
  0xe9   :  { %v1282_v16 = vadd.f32 %v1281_v21, %v1280_v8 }
  0xea   :  { %v1283_v53 = vpop.f32.mrf.mxu0  ;;  %v1982_v54 = vpop.f32.mrf.mxu1 }
  0xeb   :  { %v780_v38 = vadd.f32 %v1282_v16, %v2001_v11 }
  0xec   :  { %v1284_v55 = vpop.f32.mrf.mxu0  ;;  %v1984_v56 = vpop.f32.mrf.mxu1 }
  0xed   :  { %v1285_v29 = vadd.f32 %v1284_v55, %v1283_v53 }
  0xee   :  { %v1286_v57 = vpop.f32.mrf.mxu0  ;;  %v1986_v39 = vpop.f32.mrf.mxu1 }
  0xef   :  { %v785_v40 = vadd.f32 %v1285_v29, %v2001_v11 }
  0xf0   :  { %v1287_v58 = vpop.f32.mrf.mxu0  ;;  %v1988_v59 = vpop.f32.mrf.mxu1 }
  0xf1   :  { %v1288_v41 = vadd.f32 %v1287_v58, %v1286_v57 }
  0xf2   :  { %v1289_v60 = vpop.f32.mrf.mxu0  ;;  %v1990_v61 = vpop.f32.mrf.mxu1 }
  0xf3   :  { %v788_v28 = vadd.f32 %v1288_v41, %v2001_v11 }
  0xf4   :  { %v1290_v32 = vpop.f32.mrf.mxu0  ;;  %v1992_v62 = vpop.f32.mrf.mxu1 }
  0xf5   :  { %v1291_v19 = vadd.f32 %v1290_v32, %v1289_v60 }
  0xf6   :  { %v1292_v63 = vpop.f32.mrf.mxu0  ;;  %v1316_v0 = vpop.f32.mrf.mxu1 }
  0xf8   :  { %v1293_v1 = vpop.f32.mrf.mxu0  ;;  %v1317_v2 = vpop.f32.mrf.mxu1 }
  0xf9   :  { %v793_v2 = vadd.f32 %v1291_v19, %v2001_v11  ;;  %v1294_v7 = vadd.f32 %v1293_v1, %v1292_v63 }
  0xfa   :  { %v1295_v3 = vpop.f32.mrf.mxu0 }
  0xfc   :  { %v1296_v4 = vpop.f32.mrf.mxu0 }
  0xfe   :  { %v1994_v5 = vpop.f32.mrf.mxu0 }
 0x100   :  { %v1996_v6 = vpop.f32.mrf.mxu0 }
 0x102   :  { %v1335_v9 = vpop.f32.mrf.mxu1  ;;  %v952_v10 = vpop.f32.mrf.mxu0 }
 0x104   :  { %v1336_v12 = vpop.f32.mrf.mxu1  ;;  %v1410_v33 = vpop.f32.mrf.mxu0 }
 0x105   :  { %v1337_v18 = vadd.f32 %v1336_v12, %v1335_v9 }
 0x106   :  { %v1338_v51 = vpop.f32.mrf.mxu1  ;;  %v955_v20 = vpop.f32.mrf.mxu0 }
 0x107   :  { %v865_v23 = vadd.f32 %v1337_v18, %v777_v15  ;;  %v1297_v15 = vadd.f32 %v1296_v4, %v1295_v3  ;;  %v1300_v3 = vadd.f32 %v1996_v6, %v1994_v5 }
 0x108   :  { %v1339_v24 = vpop.f32.mrf.mxu1  ;;  %v1411_v27 = vpop.f32.mrf.mxu0 }
 0x109   :  { %v2005_v30 = vadd.f32 %v952_v10, %v865_v23  ;;  %v1340_v31 = vadd.f32 %v1339_v24, %v1338_v51  ;;  %v796_v51 = vadd.f32 %v1294_v7, %v2001_v11  ;;  %v801_v29 = vadd.f32 %v1297_v15, %v2001_v11 }
 0x10a   :  { %v1341_v34 = vpop.f32.mrf.mxu1  ;;  %v960_v26 = vpop.f32.mrf.mxu0 }
 0x10b   :  { %v1248_v35 = vpack.c.bf16 %v2005_v30, %v2005_v30  ;;  %v868_v17 = vadd.f32 %v1340_v31, %v780_v38  ;;  %v1107_v4 = vmul.f32 %v2005_v30, %v2005_v30  ;;  %v1075_v5 = vsel %vm1074_vm3, %v2005_v30, 0.0 }
 0x10c   :  { %v1342_v36 = vpop.f32.mrf.mxu1  ;;  %v1414_v37 = vpop.f32.mrf.mxu0 }
 0x10d   :  { %1060 = vst.msk [vmem:[%s2130_s6] sm:$0xf] %vm1059_vm2, %v1248_v35  ;;  %v956_v42 = vadd.f32 %v955_v20, %v868_v17  ;;  %v1343_v44 = vadd.f32 %v1342_v36, %v1341_v34  ;;  %v1303_v37 = vadd.f32 %v1976_v50, %v1974_v49 }
 0x10e   :  { %v1344_v45 = vpop.f32.mrf.mxu1  ;;  %v963_v13 = vpop.f32.mrf.mxu0 }
 0x10f   :  { %v1249_v46 = vpack.c.bf16 %v956_v42, %v956_v42  ;;  %v873_v47 = vadd.f32 %v1343_v44, %v785_v40  ;;  %v1108_v20 = vmul.f32 %v956_v42, %v956_v42 }
 0x110   :  { %v1345_v48 = vpop.f32.mrf.mxu1  ;;  %v1415_v25 = vpop.f32.mrf.mxu0 }
 0x111   :  { %1061 = vst.msk [vmem:[%s2130_s6 + $0x4] sm:$0xf] %vm1059_vm2, %v1249_v46  ;;  %v961_v43 = vadd.f32 %v960_v26, %v873_v47  ;;  %v1346_v8 = vadd.f32 %v1345_v48, %v1344_v45  ;;  %v1076_v26 = vsel %vm1074_vm3, %v956_v42, 0.0  ;;  %v1121_v6 = vsel %vm1074_vm3, %v1108_v20, 0.0 }
 0x112   :  { %v1347_v21 = vpop.f32.mrf.mxu1  ;;  %v968_v53 = vpop.f32.mrf.mxu0  ;;  %v804_v46 = vadd.f32 %v1300_v3, %v2001_v11  ;;  %v1120_v47 = vsel %vm1074_vm3, %v1107_v4, 0.0  ;;  %v1077_v48 = vadd.f32 %v1076_v26, %v1075_v5  ;;  %v1309_v4 = vadd.f32 %v1984_v56, %v1982_v54 }
 0x113   :  { %v1250_v55 = vpack.c.bf16 %v961_v43, %v961_v43  ;;  %v876_v57 = vadd.f32 %v1346_v8, %v788_v28  ;;  %v1109_v35 = vmul.f32 %v961_v43, %v961_v43  ;;  %v1078_v42 = vsel %vm1074_vm3, %v961_v43, 0.0 }
 0x114   :  { %v1348_v58 = vpop.f32.mrf.mxu1  ;;  %v1418_v0 = vpop.f32.mrf.mxu0  ;;  %v809_v8 = vadd.f32 %v1303_v37, %v2001_v11 }
 0x115   :  { %1062 = vst.msk [vmem:[%s2130_s6 + $0x8] sm:$0xf] %vm1059_vm2, %v1250_v55  ;;  %v964_v60 = vadd.f32 %v963_v13, %v876_v57  ;;  %v1349_v32 = vadd.f32 %v1348_v58, %v1347_v21  ;;  %v1123_v50 = vsel %vm1074_vm3, %v1109_v35, 0.0  ;;  %v1122_v21 = vadd.f32 %v1121_v6, %v1120_v47 }
 0x116   :  { %v1350_v9 = vpop.f32.mrf.mxu1  ;;  %v971_v10 = vpop.f32.mrf.mxu0 }
 0x117   :  { %v1251_v12 = vpack.c.bf16 %v964_v60, %v964_v60  ;;  %v881_v33 = vadd.f32 %v1349_v32, %v793_v2  ;;  %v1110_v44 = vmul.f32 %v964_v60, %v964_v60  ;;  %v1080_v30 = vsel %vm1074_vm3, %v964_v60, 0.0 }
 0x118   :  { %v1351_v16 = vpop.f32.mrf.mxu1  ;;  %v1419_v18 = vpop.f32.mrf.mxu0  ;;  %v1306_v32 = vadd.f32 %v1980_v52, %v1978_v22 }
 0x119   :  { %1063 = vst.msk [vmem:[%s2130_s6 + $0xc] sm:$0xf] %vm1059_vm2, %v1251_v12  ;;  %v969_v63 = vadd.f32 %v968_v53, %v881_v33  ;;  %v1352_v1 = vadd.f32 %v1351_v16, %v1350_v9  ;;  %v1079_v53 = vadd.f32 %v1078_v42, %v1077_v48  ;;  %v1125_v0 = vsel %vm1074_vm3, %v1110_v44, 0.0 }
 0x11a   :  { %v1353_v23 = vpop.f32.mrf.mxu1  ;;  %v976_v24 = vpop.f32.mrf.mxu0  ;;  %v1124_v9 = vadd.f32 %v1123_v50, %v1122_v21  ;;  %v812_v3 = vadd.f32 %v1306_v32, %v2001_v11  ;;  %v1315_v32 = vadd.f32 %v1992_v62, %v1990_v61 }
 0x11b   :  { %v1252_v27 = vpack.c.bf16 %v969_v63, %v969_v63  ;;  %v884_v38 = vadd.f32 %v1352_v1, %v796_v51  ;;  %v1111_v25 = vmul.f32 %v969_v63, %v969_v63  ;;  %v1082_v2 = vsel %vm1074_vm3, %v969_v63, 0.0 }
 0x11c   :  { %v1354_v31 = vpop.f32.mrf.mxu1  ;;  %v1422_v34 = vpop.f32.mrf.mxu0  ;;  %v1126_v1 = vadd.f32 %v1125_v0, %v1124_v9  ;;  %v825_v62 = vadd.f32 %v1315_v32, %v2001_v11 }
 0x11d   :  { %1064 = vst.msk [vmem:[%s2130_s6 + $0x10] sm:$0xf] %vm1059_vm2, %v1252_v27  ;;  %v972_v17 = vadd.f32 %v971_v10, %v884_v38  ;;  %v1355_v36 = vadd.f32 %v1354_v31, %v1353_v23  ;;  %v1081_v10 = vadd.f32 %v1080_v30, %v1079_v53  ;;  %v1127_v12 = vsel %vm1074_vm3, %v1111_v25, 0.0 }
 0x11e   :  { %v1356_v40 = vpop.f32.mrf.mxu1  ;;  %v979_v41 = vpop.f32.mrf.mxu0  ;;  %v1128_v31 = vadd.f32 %v1127_v12, %v1126_v1 }
 0x11f   :  { %v1253_v45 = vpack.c.bf16 %v972_v17, %v972_v17  ;;  %v889_v13 = vadd.f32 %v1355_v36, %v801_v29  ;;  %v1112_v55 = vmul.f32 %v972_v17, %v972_v17  ;;  %v1084_v16 = vsel %vm1074_vm3, %v972_v17, 0.0 }
 0x120   :  { %v1357_v28 = vpop.f32.mrf.mxu1  ;;  %v1423_v49 = vpop.f32.mrf.mxu0  ;;  %v1083_v20 = vadd.f32 %v1082_v2, %v1081_v10 }
 0x121   :  { %1065 = vst.msk [vmem:[%s2130_s6 + $0x14] sm:$0xf] %vm1059_vm2, %v1253_v45  ;;  %v977_v19 = vadd.f32 %v976_v24, %v889_v13  ;;  %v1358_v43 = vadd.f32 %v1357_v28, %v1356_v40  ;;  %v1129_v22 = vsel %vm1074_vm3, %v1112_v55, 0.0  ;;  %v817_v49 = vadd.f32 %v1309_v4, %v2001_v11 }
 0x122   :  { %v1359_v57 = vpop.f32.mrf.mxu1  ;;  %v984_v58 = vpop.f32.mrf.mxu0  ;;  %v1085_v34 = vadd.f32 %v1084_v16, %v1083_v20  ;;  %v1130_v6 = vadd.f32 %v1129_v22, %v1128_v31 }
 0x123   :  { %v1254_v7 = vpack.c.bf16 %v977_v19, %v977_v19  ;;  %v892_v60 = vadd.f32 %v1358_v43, %v804_v46  ;;  %v1113_v18 = vmul.f32 %v977_v19, %v977_v19  ;;  %v1086_v24 = vsel %vm1074_vm3, %v977_v19, 0.0 }
 0x124   :  { %v1360_v33 = vpop.f32.mrf.mxu1  ;;  %v1426_v15 = vpop.f32.mrf.mxu0  ;;  %v1087_v40 = vadd.f32 %v1086_v24, %v1085_v34  ;;  %v1312_v46 = vadd.f32 %v1988_v59, %v1986_v39 }
 0x125   :  { %1066 = vst.msk [vmem:[%s2130_s6 + $0x18] sm:$0xf] %vm1059_vm2, %v1254_v7  ;;  %v980_v51 = vadd.f32 %v979_v41, %v892_v60  ;;  %v1361_v63 = vadd.f32 %v1360_v33, %v1359_v57  ;;  %v1131_v17 = vsel %vm1074_vm3, %v1113_v18, 0.0 }
 0x126   :  { %v1362_v52 = vpop.f32.mrf.mxu1  ;;  %v987_v23 = vpop.f32.mrf.mxu0  ;;  %v1132_v47 = vadd.f32 %v1131_v17, %v1130_v6 }
 0x127   :  { %v1255_v27 = vpack.c.bf16 %v980_v51, %v980_v51  ;;  %v1114_v38 = vmul.f32 %v980_v51, %v980_v51  ;;  %v897_v29 = vadd.f32 %v1361_v63, %v809_v8  ;;  %v1088_v36 = vsel %vm1074_vm3, %v980_v51, 0.0 }
 0x128   :  { %v1363_v26 = vpop.f32.mrf.mxu1  ;;  %v1427_v35 = vpop.f32.mrf.mxu0  ;;  %v1089_v48 = vadd.f32 %v1088_v36, %v1087_v40 }
 0x129   :  { %1067 = vst.msk [vmem:[%s2130_s6 + $0x1c] sm:$0xf] %vm1059_vm2, %v1255_v27  ;;  %v985_v37 = vadd.f32 %v984_v58, %v897_v29  ;;  %v1364_v5 = vadd.f32 %v1363_v26, %v1362_v52  ;;  %v1133_v41 = vsel %vm1074_vm3, %v1114_v38, 0.0  ;;  %v820_v58 = vadd.f32 %v1312_v46, %v2001_v11 }
 0x12a   :  { %v1365_v54 = vpop.f32.mrf.mxu1  ;;  %v992_v56 = vpop.f32.mrf.mxu0  ;;  %v1134_v43 = vadd.f32 %v1133_v41, %v1132_v47 }
 0x12b   :  { %v1256_v42 = vpack.c.bf16 %v985_v37, %v985_v37  ;;  %v1090_v44 = vsel %vm1074_vm3, %v985_v37, 0.0  ;;  %v1115_v45 = vmul.f32 %v985_v37, %v985_v37  ;;  %v900_v13 = vadd.f32 %v1364_v5, %v812_v3 }
 0x12c   :  { %v1366_v25 = vpop.f32.mrf.mxu1  ;;  %v1430_v28 = vpop.f32.mrf.mxu0  ;;  %v1091_v8 = vadd.f32 %v1090_v44, %v1089_v48 }
 0x12d   :  { %1068 = vst.msk [vmem:[%s2130_s6 + $0x20] sm:$0xf] %vm1059_vm2, %v1256_v42  ;;  %v1135_v50 = vsel %vm1074_vm3, %v1115_v45, 0.0  ;;  %v988_v30 = vadd.f32 %v987_v23, %v900_v13  ;;  %v1367_v19 = vadd.f32 %v1366_v25, %v1365_v54 }
 0x12e   :  { %v1368_v21 = vpop.f32.mrf.mxu1  ;;  %v995_v53 = vpop.f32.mrf.mxu0  ;;  %v1136_v0 = vadd.f32 %v1135_v50, %v1134_v43 }
 0x12f   :  { %v1257_v39 = vpack.c.bf16 %v988_v30, %v988_v30  ;;  %v1092_v59 = vsel %vm1074_vm3, %v988_v30, 0.0  ;;  %v1116_v55 = vmul.f32 %v988_v30, %v988_v30  ;;  %v905_v57 = vadd.f32 %v1367_v19, %v817_v49  ;;  %v1158_v19 = vld [vmem:[#allocation2] sm:$0x3] }
 0x130   :  { %v1093_v2 = vadd.f32 %v1092_v59, %v1091_v8  ;;  %v1369_v7 = vpop.f32.mrf.mxu1  ;;  %v1431_v60 = vpop.f32.mrf.mxu0 }
 0x131   :  { %1069 = vst.msk [vmem:[%s2130_s6 + $0x24] sm:$0xf] %vm1059_vm2, %v1257_v39  ;;  %v1137_v9 = vsel %vm1074_vm3, %v1116_v55, 0.0  ;;  %v993_v10 = vadd.f32 %v992_v56, %v905_v57  ;;  %v1370_v12 = vadd.f32 %v1369_v7, %v1368_v21  ;;  %v1174_v60 = vld [vmem:[%s2132_s5] sm:$0x1] }
 0x132   :  { %v1138_v33 = vadd.f32 %v1137_v9, %v1136_v0  ;;  %v1371_v15 = vpop.f32.mrf.mxu1  ;;  %v1000_v16 = vpop.f32.mrf.mxu0  ;;  %v1170_v0 = vld [vmem:[%s2131_s4] sm:$0x1] }
 0x133   :  { %v1258_v18 = vpack.c.bf16 %v993_v10, %v993_v10  ;;  %v1094_v51 = vsel %vm1074_vm3, %v993_v10, 0.0  ;;  %v1117_v63 = vmul.f32 %v993_v10, %v993_v10  ;;  %v908_v1 = vadd.f32 %v1370_v12, %v820_v58 }
 0x134   :  { %v1095_v20 = vadd.f32 %v1094_v51, %v1093_v2  ;;  %v1372_v22 = vpop.f32.mrf.mxu1  ;;  %v1434_v61 = vpop.f32.mrf.mxu0 }
 0x135   :  { %1070 = vst.msk [vmem:[%s2130_s6 + $0x28] sm:$0xf] %vm1059_vm2, %v1258_v18  ;;  %v1139_v52 = vsel %vm1074_vm3, %v1117_v63, 0.0  ;;  %v996_v23 = vadd.f32 %v995_v53, %v908_v1  ;;  %v1373_v24 = vadd.f32 %v1372_v22, %v1371_v15 }
 0x136   :  { %v1140_v27 = vadd.f32 %v1139_v52, %v1138_v33  ;;  %v1374_v38 = vpop.f32.mrf.mxu1  ;;  %v1003_v29 = vpop.f32.mrf.mxu0 }
 0x137   :  { %v1259_v3 = vpack.c.bf16 %v996_v23, %v996_v23  ;;  %v1096_v4 = vsel %vm1074_vm3, %v996_v23, 0.0  ;;  %v1118_v31 = vmul.f32 %v996_v23, %v996_v23  ;;  %v913_v34 = vadd.f32 %v1373_v24, %v825_v62 }
 0x138   :  { %v1097_v26 = vadd.f32 %v1096_v4, %v1095_v20  ;;  %v1375_v35 = vpop.f32.mrf.mxu1  ;;  %v1435_v11 = vpop.f32.mrf.mxu0 }
 0x139   :  { %1071 = vst.msk [vmem:[%s2130_s6 + $0x2c] sm:$0xf] %vm1059_vm2, %v1259_v3  ;;  %v1141_v17 = vsel %vm1074_vm3, %v1118_v31, 0.0  ;;  %v1001_v36 = vadd.f32 %v1000_v16, %v913_v34 }
 0x13a   :  { %v1142_v37 = vadd.f32 %v1141_v17, %v1140_v27 }
 0x13b   :  { %v1260_v5 = vpack.c.bf16 %v1001_v36, %v1001_v36  ;;  %v1099_v6 = vsel %vm1098_vm1, %v1001_v36, 0.0  ;;  %v1119_v40 = vmul.f32 %v1001_v36, %v1001_v36 }
 0x13c   :  { %v1100_v41 = vadd.f32 %v1099_v6, %v1097_v26 }
 0x13d   :  { %1073 = vst.msk [vmem:[%s2130_s6 + $0x30] sm:$0x1] %vm1072_vm4, %v1260_v5  ;;  %v1143_v54 = vsel %vm1098_vm1, %v1119_v40, 0.0 }
 0x13e   :  { %v1101_v56 = vrot.slane %v1100_v41, 4  ;;  %v1144_v42 = vadd.f32 %v1143_v54, %v1142_v37 }
 0x140   :  { %v1102_v44 = vadd.f32 %v1101_v56, %v1100_v41  ;;  %v1145_v45 = vrot.slane %v1144_v42, 4 }
 0x142   :  { %v1103_v13 = vrot.slane %v1102_v44, 2  ;;  %v1146_v46 = vadd.f32 %v1145_v45, %v1144_v42 }
 0x144   :  { %v1104_v47 = vadd.f32 %v1103_v13, %v1102_v44  ;;  %v1147_v48 = vrot.slane %v1146_v46, 2 }
 0x146   :  { %v1105_v25 = vrot.slane %v1104_v47, 1  ;;  %v1148_v28 = vadd.f32 %v1147_v48, %v1146_v46 }
 0x148   :  { %v1149_v49 = vrot.slane %v1148_v28, 1  ;;  %v1106_v50 = vadd.f32 %v1105_v25, %v1104_v47 }
 0x14a   :  { %v1150_v30 = vadd.f32 %v1149_v49, %v1148_v28 }
 0x14c   :  { %v1152_v43 = vsel %vm1151_vm5, %v1106_v50, %v1150_v30 }
 0x14d   :  { %v1159_v8 = vadd.f32 %v1158_v19, %v1152_v43 }
 0x14f   :  { %1160 = vst.msk [vmem:[#allocation2] sm:$0x3] %vm1098_vm1, %v1159_v8 }
 0x156   :  { %v1164_v21 = vld [vmem:[#allocation2] sm:$0x1]  ;;  %v1166_v53 = vld [vmem:[#allocation2 + $0x1] sm:$0x1] }
 0x157   :  { %v1165_v39 = vmul.f32 0.010204081, %v1164_v21  ;;  %v1167_v59 = vmul.f32 0.010204081, %v1166_v53 }
 0x159   :  { %v1168_v55 = vmul.f32 %v1165_v39, %v1165_v39 }
 0x15b   :  { %v1169_v57 = vsub.f32 %v1167_v59, %v1168_v55 }
 0x15d   :  { %v1171_v58 = vadd.f32 1e-05, %v1169_v57 }
 0x15f   :  { %1494 = vrsqrt.f32 %v1171_v58 }
 0x16c   :  { %v1495_v2 = vpop.eup %1494 }
 0x16d   :  { %v1173_v7 = vmul.f32 %v1495_v2, %v1170_v0 }
 0x16f   :  { %v1175_v32 = vmul.f32 %v1173_v7, %v1165_v39 }
 0x171   :  { %v1176_v9 = vsub.f32 %v1174_v60, %v1175_v32 }
 0x173   :  { %v1181_v10 = vrot.slane %v1176_v9, %v1575_v14 }
 0x175   :  { %v1183_v12 = vsel %vm1151_vm5, %v1173_v7, %v1181_v10 }
 0x176   :  { %1184 = vst.msk [vmem:[%s2133_s7] sm:$0x3] %vm1098_vm1, %v1183_v12 }

// kernel: dqn_forward.7
= control target key start
LH: loop header
LB: loop body
LE: loop exit
PB: predicated region body
PF: predicated region fallthrough
CT: control target
= control target key end

     0   :  { %11 = vsyncpa [#allocation4], 0  ;;  %s5220_s21 = smov 0   ;;  %s6750_s0 = inlined_call_operand.vmem [shape: bf16[2,3136], index: 0, kind: input, shape index: {}]   ;;  %s6751_s1 = inlined_call_operand.vmem [shape: f32[2,3136], index: 1, kind: input, shape index: {}]   ;;  %s6752_s2 = inlined_call_operand.vmem [shape: bf16[3136,256], index: 2, kind: input, shape index: {}]   ;;  %s6753_s3 = inlined_call_operand.vmem [shape: f32[1,256], index: 3, kind: input, shape index: {}]   ;;  %s6754_s4 = inlined_call_operand.vmem [shape: bf16[256,5], index: 4, kind: input, shape index: {}]   ;;  %s6755_s5 = inlined_call_operand.vmem [shape: f32[1,5], index: 5, kind: input, shape index: {}]   ;;  %s6756_s6 = inlined_call_operand.hbm [shape: f32[2,4], index: 6, kind: output, shape index: {}]  }
   0x1 LB: > { %s5226_s22 = sadd.s32 4294967295, %s5179_s21   ;;  %p4070_p0 = scmp.ge.s32.totalorder %s5179_s21, 1  ;;  %s5179_s21 = sphi %s5220_s21, %s17_s21  }
   0x2   : > { %p215_p1 = scmp.lt.s32.totalorder %s5179_s21, 3 }
   0x4   : > { %p216_p2 = pnand %p4070_p0, %p215_p1 }
   0x5   : > { %p241_p3 = scmp.lt.s32.totalorder (!%p216_p2), %s5226_s22, 0  ;;  %p4074_p4 = scmp.ge.s32.totalorder (!%p216_p2), %s5226_s22, 1 }
   0x6   : > { %219 = sbr.rel (%p216_p2) target bundleno = 1053 (0x41d), region = 44 }
   0xb   : > { %s242_s23 = scalar_select %p241_p3, %s5226_s22, 0 }
   0xc   : > { %253 = sbr.rel (%p4074_p4) target bundleno = 821 (0x335), region = 48 }
   0xd   : > { %s6758_s23 = smov (!%p241_p3, %s242_s23), 0 }
   0xe   : > { %s4519_s24 = smul.u32 25, %s6758_s23 }
  0x10   : > { %s5235_s27 = scalar_lea.vmem %s6750_s0, %s4519_s24 }
  0x11   : > { %v4540_v0 = vld [vmem:[%s6752_s2 + $0x74] ss:$8 sps:$4 sm:$0xff]   ;;  %v4542_v1 = vld [vmem:[%s6752_s2 + $0x70] ss:$8 sps:$4 sm:$0xff]   ;;  %v4546_v4 = vld [vmem:[%s6752_s2 + $0x64] ss:$8 sps:$4 sm:$0xff]   ;;  %v276_v35 = vlaneseq }
  0x12   : > { %3275 = vmatprep.subr.bf16.mxu0 %v4540_v0  ;;  %v4543_v2 = vld [vmem:[%s6752_s2 + $0x174] ss:$8 sps:$4 sm:$0xff]   ;;  %v4545_v3 = vld [vmem:[%s6752_s2 + $0x170] ss:$8 sps:$4 sm:$0xff]   ;;  %v4548_v5 = vld [vmem:[%s6752_s2 + $0x60] ss:$8 sps:$4 sm:$0xff]  }
  0x13   : > { %3276 = vmatpush1.bf16.msra.mxu0 %v4542_v1  ;;  %3316 = vmatprep.subr.bf16.mxu1 %v4543_v2  ;;  %v4549_v6 = vld [vmem:[%s6752_s2 + $0x164] ss:$8 sps:$4 sm:$0xff]   ;;  %v4551_v7 = vld [vmem:[%s6752_s2 + $0x160] ss:$8 sps:$4 sm:$0xff]   ;;  %v4552_v8 = vld [vmem:[%s6752_s2 + $0x54] ss:$8 sps:$4 sm:$0xff]  }
  0x14   : > { %3317 = vmatpush1.bf16.msra.mxu1 %v4545_v3  ;;  %3277 = vmatprep.subr.bf16.mxu0 %v4546_v4  ;;  %v4554_v9 = vld [vmem:[%s6752_s2 + $0x50] ss:$8 sps:$4 sm:$0xff]   ;;  %v4555_v10 = vld [vmem:[%s6752_s2 + $0x154] ss:$8 sps:$4 sm:$0xff]   ;;  %v4558_v11 = vld [vmem:[%s6752_s2 + $0x44] ss:$8 sps:$4 sm:$0xff]  }
  0x15   : > { %3318 = vmatprep.subr.bf16.mxu1 %v4549_v6  ;;  %v4557_v12 = vld [vmem:[%s6752_s2 + $0x150] ss:$8 sps:$4 sm:$0xff]   ;;  %v4561_v13 = vld [vmem:[%s6752_s2 + $0x144] ss:$8 sps:$4 sm:$0xff]   ;;  %v4560_v14 = vld [vmem:[%s6752_s2 + $0x40] ss:$8 sps:$4 sm:$0xff]  }
  0x16   : > { %v4564_v15 = vld [vmem:[%s6752_s2 + $0x34] ss:$8 sps:$4 sm:$0xff]   ;;  %v4563_v16 = vld [vmem:[%s6752_s2 + $0x140] ss:$8 sps:$4 sm:$0xff]   ;;  %v4566_v18 = vld [vmem:[%s6752_s2 + $0x30] ss:$8 sps:$4 sm:$0xff]  }
  0x17   : > { %3278 = vmatpush1.bf16.msra.mxu0 %v4548_v5  ;;  %v4567_v17 = vld [vmem:[%s6752_s2 + $0x134] ss:$8 sps:$4 sm:$0xff]   ;;  %v4570_v19 = vld [vmem:[%s6752_s2 + $0x24] ss:$8 sps:$4 sm:$0xff]   ;;  %v4569_v20 = vld [vmem:[%s6752_s2 + $0x130] ss:$8 sps:$4 sm:$0xff]  }
  0x18   : > { %3279 = vmatprep.subr.bf16.mxu0 %v4552_v8  ;;  %3319 = vmatpush1.bf16.msra.mxu1 %v4551_v7  ;;  %v4573_v21 = vld [vmem:[%s6752_s2 + $0x124] ss:$8 sps:$4 sm:$0xff]   ;;  %v4572_v22 = vld [vmem:[%s6752_s2 + $0x20] ss:$8 sps:$4 sm:$0xff]   ;;  %v4576_v23 = vld [vmem:[%s6752_s2 + $0x14] ss:$8 sps:$4 sm:$0xff]  }
  0x19   : > { %3320 = vmatprep.subr.bf16.mxu1 %v4555_v10  ;;  %v4575_v24 = vld [vmem:[%s6752_s2 + $0x120] ss:$8 sps:$4 sm:$0xff]   ;;  %v4579_v25 = vld [vmem:[%s6752_s2 + $0x114] ss:$8 sps:$4 sm:$0xff]   ;;  %v4578_v26 = vld [vmem:[%s6752_s2 + $0x10] ss:$8 sps:$4 sm:$0xff]  }
  0x1a   : > { %v4582_v27 = vld [vmem:[%s6752_s2 + $0x4] ss:$8 sps:$4 sm:$0xff]   ;;  %v4581_v28 = vld [vmem:[%s6752_s2 + $0x110] ss:$8 sps:$4 sm:$0xff]   ;;  %v4584_v30 = vld [vmem:[%s6752_s2] ss:$8 sps:$4 sm:$0xff]  }
  0x1b   : > { %3280 = vmatpush1.bf16.msra.mxu0 %v4554_v9  ;;  %v4585_v29 = vld [vmem:[%s6752_s2 + $0x104] ss:$8 sps:$4 sm:$0xff]   ;;  %v4588_v31 = vld [vmem:[%s6752_s2 + $0xf4] ss:$8 sps:$4 sm:$0xff]   ;;  %v4587_v32 = vld [vmem:[%s6752_s2 + $0x100] ss:$8 sps:$4 sm:$0xff]  }
  0x1c   : > { %3281 = vmatprep.subr.bf16.mxu0 %v4558_v11  ;;  %3321 = vmatpush1.bf16.msra.mxu1 %v4557_v12  ;;  %v4591_v33 = vld [vmem:[%s6752_s2 + $0x1f4] ss:$8 sps:$4 sm:$0xff]   ;;  %v4590_v34 = vld [vmem:[%s6752_s2 + $0xf0] ss:$8 sps:$4 sm:$0xff]   ;;  %v4594_v36 = vld [vmem:[%s6752_s2 + $0xe4] ss:$8 sps:$4 sm:$0xff]  }
  0x1d   : > { %3322 = vmatprep.subr.bf16.mxu1 %v4561_v13  ;;  %v4593_v37 = vld [vmem:[%s6752_s2 + $0x1f0] ss:$8 sps:$4 sm:$0xff]   ;;  %v4597_v38 = vld [vmem:[%s6752_s2 + $0x1e4] ss:$8 sps:$4 sm:$0xff]   ;;  %v5181_v39 = vmov 1983009808  }
  0x1e   : > { %v379_v40 = vunpack.c.l.s4 %v5181_v39  ;;  %v4596_v41 = vld [vmem:[%s6752_s2 + $0xe0] ss:$8 sps:$4 sm:$0xff]   ;;  %v277_v42 = vshrl.u32 %v276_v35, 7  ;;  %v4600_v43 = vld [vmem:[%s6752_s2 + $0xd4] ss:$8 sps:$4 sm:$0xff]   ;;  %vm3271_vm0 = vcmask 523264  }
  0x1f   : > { %3282 = vmatpush1.bf16.msra.mxu0 %v4560_v14  ;;  %v4599_v44 = vld [vmem:[%s6752_s2 + $0x1e0] ss:$8 sps:$4 sm:$0xff]   ;;  %v4603_v45 = vld [vmem:[%s6752_s2 + $0x1d4] ss:$8 sps:$4 sm:$0xff]   ;;  %v4602_v47 = vld [vmem:[%s6752_s2 + $0xd0] ss:$8 sps:$4 sm:$0xff]  }
  0x20   : > { %3283 = vmatprep.subr.bf16.mxu0 %v4564_v15  ;;  %3323 = vmatpush1.bf16.msra.mxu1 %v4563_v16  ;;  %v380_v46 = vunpack.c.0.s8 %v379_v40  ;;  %v5367_v48 = vsub.s32 0, %v277_v42  ;;  %v5369_v49 = vsub.s32 1, %v277_v42  ;;  %v4606_v50 = vld [vmem:[%s6752_s2 + $0xc4] ss:$8 sps:$4 sm:$0xff]   ;;  %v5374_v51 = vsub.s32 2, %v277_v42 }
  0x21   : > { %3324 = vmatprep.subr.bf16.mxu1 %v4567_v17  ;;  %v5376_v52 = vsub.s32 3, %v277_v42  ;;  %v4605_v53 = vld [vmem:[%s6752_s2 + $0x1d0] ss:$8 sps:$4 sm:$0xff]   ;;  %v5381_v54 = vsub.s32 4, %v277_v42  ;;  %v5383_v55 = vsub.s32 5, %v277_v42  ;;  %v5389_v57 = vld [vmem:[%s5235_s27] sm:$0xff] }
  0x22   : > { %v4609_v56 = vld [vmem:[%s6752_s2 + $0x1c4] ss:$8 sps:$4 sm:$0xff]   ;;  %v5394_v59 = vsub.s32 %v380_v46, %v277_v42  ;;  %v5396_v60 = vsub.s32 6, %v277_v42  ;;  %v4608_v61 = vld [vmem:[%s6752_s2 + $0xc0] ss:$8 sps:$4 sm:$0xff]   ;;  %v258_v62 = vunpack.c.l.bf16 %v5389_v57  ;;  %v5407_v2 = vsub.s32 7, %v277_v42 }
  0x23   : > { %3284 = vmatpush1.bf16.msra.mxu0 %v4566_v18  ;;  %v265_v58 = vld [vmem:[%s6751_s1] ss:$2 sm:$0xff]  ;;  %v4078_v1 = vld [vmem:[%s6751_s1 + $0x1] ss:$2 sm:$0xff]  ;;  %v4612_v3 = vld [vmem:[%s6752_s2 + $0xb4] ss:$8 sps:$4 sm:$0xff]  }
  0x24   : > { %3285 = vmatprep.subr.bf16.mxu0 %v4570_v19  ;;  %3325 = vmatpush1.bf16.msra.mxu1 %v4569_v20  ;;  %v279_v63 = vrot.slane %v265_v58, %v5367_v48  ;;  %v283_v0 = vrot.slane %v265_v58, %v5369_v49  ;;  %v287_v4 = vrot.slane %v265_v58, %v5374_v51  ;;  %v4611_v8 = vld [vmem:[%s6752_s2 + $0x1c0] ss:$8 sps:$4 sm:$0xff]   ;;  %v4615_v13 = vld [vmem:[%s6752_s2 + $0x1b4] ss:$8 sps:$4 sm:$0xff]   ;;  %v4614_v18 = vld [vmem:[%s6752_s2 + $0xb0] ss:$8 sps:$4 sm:$0xff]  }
  0x25   : > { %3326 = vmatprep.subr.bf16.mxu1 %v4573_v21  ;;  %v291_v5 = vrot.slane %v265_v58, %v5376_v52  ;;  %v514_v6 = vrot.slane %v4078_v1, %v5367_v48  ;;  %v518_v7 = vrot.slane %v4078_v1, %v5369_v49  ;;  %v522_v10 = vrot.slane %v4078_v1, %v5374_v51  ;;  %v4624_v42 = vld [vmem:[%s6752_s2 + $0x94] ss:$8 sps:$4 sm:$0xff]  }
  0x26   : > { %v376_v9 = vcombine.low %v279_v63, %v283_v0  ;;  %v526_v11 = vrot.slane %v4078_v1, %v5376_v52  ;;  %v295_v12 = vrot.slane %v265_v58, %v5381_v54  ;;  %v299_v16 = vrot.slane %v265_v58, %v5383_v55  ;;  %v4629_v63 = vld [vmem:[%s6752_s2 + $0x190] ss:$8 sps:$4 sm:$0xff]  }
  0x27   : > { %3286 = vmatpush1.bf16.msra.mxu0 %v4572_v22  ;;  %v377_v14 = vcombine.low %v287_v4, %v291_v5  ;;  %v611_v15 = vcombine.low %v514_v6, %v518_v7  ;;  %v303_v17 = vrot.slane %v265_v58, %v5396_v60  ;;  %v307_v21 = vrot.slane %v265_v58, %v5407_v2  ;;  %v4632_v5 = vld [vmem:[%s6752_s2 + $0x80] ss:$8 sps:$4 sm:$0xff]  }
  0x28   : > { %3287 = vmatprep.subr.bf16.mxu0 %v4576_v23  ;;  %3327 = vmatpush1.bf16.msra.mxu1 %v4575_v24  ;;  %v384_v19 = vrot.slane %v376_v9, %v5394_v59  ;;  %v612_v20 = vcombine.low %v522_v10, %v526_v11  ;;  %v530_v22 = vrot.slane %v4078_v1, %v5381_v54  ;;  %v4618_v23 = vld [vmem:[%s6752_s2 + $0xa4] ss:$8 sps:$4 sm:$0xff]   ;;  %v4635_v10 = vld [vmem:[%s6752_s2 + $0x180] ss:$8 sps:$4 sm:$0xff]   ;;  %vm3991_vm3 = vcmask 33792  }
  0x29   : > { %3328 = vmatprep.subr.bf16.mxu1 %v4579_v25  ;;  %v391_v24 = vrot.slane %v377_v14, %v5394_v59  ;;  %v619_v25 = vrot.slane %v611_v15, %v5394_v59 }
  0x2b   : > { %3288 = vmatpush1.bf16.msra.mxu0 %v4578_v26  ;;  %v393_v26 = vcombine.low %v295_v12, %v299_v16  ;;  %v4636_v16 = vld [vmem:[%s6752_s2 + $0x270] ss:$8 sps:$4 sm:$0xff]  }
  0x2c   : > { %3289 = vmatprep.subr.bf16.mxu0 %v4582_v27  ;;  %3329 = vmatpush1.bf16.msra.mxu1 %v4581_v28  ;;  %v534_v27 = vrot.slane %v4078_v1, %v5383_v55  ;;  %v4617_v28 = vld [vmem:[%s6752_s2 + $0x1b0] ss:$8 sps:$4 sm:$0xff]  }
  0x2d   : > { %3330 = vmatprep.subr.bf16.mxu1 %v4585_v29  ;;  %v626_v29 = vrot.slane %v612_v20, %v5394_v59  ;;  %v401_v35 = vrot.slane %v393_v26, %v5394_v59  ;;  %v4647_v26 = vld [vmem:[%s6752_s2 + $0x364] ss:$8 sps:$4 sm:$0xff]  }
  0x2f   : > { %3290 = vmatpush1.bf16.msra.mxu0 %v4584_v30  ;;  %v394_v30 = vcombine.low %v303_v17, %v307_v21  ;;  %v627_v39 = vcombine.low %v619_v25, %v626_v29  ;;  %v4641_v17 = vld [vmem:[%s6752_s2 + $0x374] ss:$8 sps:$4 sm:$0xff]  }
  0x30   : > { %3291 = vmatprep.subr.bf16.mxu0 %v4588_v31  ;;  %3331 = vmatpush1.bf16.msra.mxu1 %v4587_v32  ;;  %v538_v31 = vrot.slane %v4078_v1, %v5396_v60  ;;  %v542_v32 = vrot.slane %v4078_v1, %v5407_v2  ;;  %v4633_v1 = vld [vmem:[%s6752_s2 + $0x184] ss:$8 sps:$4 sm:$0xff]   ;;  %v4650_v29 = vld [vmem:[%s6752_s2 + $0x254] ss:$8 sps:$4 sm:$0xff]  }
  0x31   : > { %3332 = vmatprep.subr.bf16.mxu1 %v4591_v33  ;;  %v4621_v33 = vld [vmem:[%s6752_s2 + $0x1a4] ss:$8 sps:$4 sm:$0xff]   ;;  %v408_v40 = vrot.slane %v394_v30, %v5394_v59  ;;  %v4645_v30 = vld [vmem:[%s6752_s2 + $0x360] ss:$8 sps:$4 sm:$0xff]  }
  0x33   : > { %3292 = vmatpush2.bf16.msra.mxu0 %v4590_v34  ;;  %v392_v34 = vcombine.low %v384_v19, %v391_v24  ;;  %v409_v46 = vcombine.low %v401_v35, %v408_v40  ;;  %v4659_v35 = vld [vmem:[%s6752_s2 + $0x344] ss:$8 sps:$4 sm:$0xff]   ;;  %v4660_v40 = vld [vmem:[%s6752_s2 + $0x230] ss:$8 sps:$4 sm:$0xff]  }
  0x34   : > { %3293 = vmatprep.subr.bf16.mxu0 %v4594_v36  ;;  %3333 = vmatpush2.bf16.msra.mxu1 %v4593_v37  ;;  %v628_v36 = vcombine.low %v530_v22, %v534_v27  ;;  %v4620_v37 = vld [vmem:[%s6752_s2 + $0xa0] ss:$8 sps:$4 sm:$0xff]   ;;  %v4644_v22 = vld [vmem:[%s6752_s2 + $0x264] ss:$8 sps:$4 sm:$0xff]  }
  0x35   : > { %3334 = vmatprep.subr.bf16.mxu1 %v4597_v38  ;;  %v259_v38 = vunpack.c.h.bf16 %v5389_v57  ;;  %v4642_v27 = vld [vmem:[%s6752_s2 + $0x260] ss:$8 sps:$4 sm:$0xff]  }
  0x37   : > { %3294 = vmatpush2.bf16.msra.mxu0 %v4596_v41  ;;  %v629_v41 = vcombine.low %v538_v31, %v542_v32  ;;  %v493_v57 = vmul.f32 %v409_v46, %v259_v38  ;;  %v4653_v31 = vld [vmem:[%s6752_s2 + $0x354] ss:$8 sps:$4 sm:$0xff]   ;;  %v4648_v32 = vld [vmem:[%s6752_s2 + $0x250] ss:$8 sps:$4 sm:$0xff]   ;;  %v4657_v38 = vld [vmem:[%s6752_s2 + $0x340] ss:$8 sps:$4 sm:$0xff]  }
  0x38   : > { %3295 = vmatprep.subr.bf16.mxu0 %v4600_v43  ;;  %3335 = vmatpush2.bf16.msra.mxu1 %v4599_v44  ;;  %v492_v43 = vmul.f32 %v392_v34, %v258_v62  ;;  %v636_v44 = vrot.slane %v628_v36, %v5394_v59  ;;  %v4651_v34 = vld [vmem:[%s6752_s2 + $0x350] ss:$8 sps:$4 sm:$0xff]   ;;  %v4654_v36 = vld [vmem:[%s6752_s2 + $0x240] ss:$8 sps:$4 sm:$0xff]  }
  0x39   : > { %3336 = vmatprep.subr.bf16.mxu1 %v4603_v45  ;;  %v4623_v45 = vld [vmem:[%s6752_s2 + $0x1a0] ss:$8 sps:$4 sm:$0xff]  }
  0x3a   : > { %v4669_v46 = vld [vmem:[%s6752_s2 + $0x320] ss:$8 sps:$4 sm:$0xff]  }
  0x3b   : > { %3296 = vmatpush2.bf16.msra.mxu0 %v4602_v47  ;;  %v643_v47 = vrot.slane %v629_v41, %v5394_v59  ;;  %v4668_v41 = vld [vmem:[%s6752_s2 + $0x224] ss:$8 sps:$4 sm:$0xff]  }
  0x3c   : > { %3297 = vmatprep.subr.bf16.mxu0 %v4606_v50  ;;  %3337 = vmatpush2.bf16.msra.mxu1 %v4605_v53  ;;  %v4627_v50 = vld [vmem:[%s6752_s2 + $0x194] ss:$8 sps:$4 sm:$0xff]   ;;  %v727_v53 = vadd.f32 %v627_v39, %v492_v43  ;;  %v4671_v43 = vld [vmem:[%s6752_s2 + $0x324] ss:$8 sps:$4 sm:$0xff]  }
  0x3d   : > { %3338 = vmatprep.subr.bf16.mxu1 %v4609_v56  ;;  %v4626_v56 = vld [vmem:[%s6752_s2 + $0x90] ss:$8 sps:$4 sm:$0xff]   ;;  %v644_v58 = vcombine.low %v636_v44, %v643_v47  ;;  %v4665_v39 = vld [vmem:[%s6752_s2 + $0x334] ss:$8 sps:$4 sm:$0xff]   ;;  %v4666_v44 = vld [vmem:[%s6752_s2 + $0x220] ss:$8 sps:$4 sm:$0xff]  }
  0x3e   : > { %v734_v62 = vmax.f32 %v727_v53, 0.0  ;;  %v4677_v47 = vld [vmem:[%s6752_s2 + $0x314] ss:$8 sps:$4 sm:$0xff]   ;;  %v4680_v53 = vld [vmem:[%s6752_s2 + $0x204] ss:$8 sps:$4 sm:$0xff]  }
  0x3f   : > { %3298 = vmatpush2.bf16.msra.mxu0 %v4608_v61  ;;  %v4630_v61 = vld [vmem:[%s6752_s2 + $0x84] ss:$8 sps:$4 sm:$0xff]   ;;  %v728_v0 = vadd.f32 %v644_v58, %v493_v57  ;;  %v4678_v58 = vld [vmem:[%s6752_s2 + $0x200] ss:$8 sps:$4 sm:$0xff]  }
  0x40   : > { %3299 = vmatprep.subr.bf16.mxu0 %v4612_v3  ;;  %3339 = vmatpush2.bf16.msra.mxu1 %v4611_v8  ;;  %v755_v3 = vrot.slane %v734_v62, %v5394_v59  ;;  %v748_v4 = vcombine.high %v734_v62, %v734_v62  ;;  %v4638_v8 = vld [vmem:[%s6752_s2 + $0x274] ss:$8 sps:$4 sm:$0xff]   ;;  %v4683_v57 = vld [vmem:[%s6752_s2 + $0x304] ss:$8 sps:$4 sm:$0xff]   ;;  %v4681_v62 = vld [vmem:[%s6752_s2 + $0x300] ss:$8 sps:$4 sm:$0xff]  }
  0x41   : > { %3340 = vmatprep.subr.bf16.mxu1 %v4615_v13  ;;  %v735_v6 = vmax.f32 %v728_v0, 0.0  ;;  %v4684_v0 = vld [vmem:[%s6752_s2 + $0x2f0] ss:$8 sps:$4 sm:$0xff]  }
  0x42   : > { %v763_v7 = vcombine.high %v755_v3, %v755_v3  ;;  %v762_v9 = vrot.slane %v748_v4, %v5394_v59  ;;  %v882_v14 = vpack.c.bf16 %v755_v3, %v755_v3  ;;  %v4687_v3 = vld [vmem:[%s6752_s2 + $0x3f0] ss:$8 sps:$4 sm:$0xff]   ;;  %v4695_v4 = vld [vmem:[%s6752_s2 + $0x3e4] ss:$8 sps:$4 sm:$0xff]  }
  0x43   : > { %3300 = vmatpush2.bf16.msra.mxu0 %v4614_v18  ;;  %v5489_v11 = vrot.slane %v735_v6, %v5394_v59  ;;  %v765_v12 = vcombine.high %v735_v6, %v735_v6  ;;  %v4698_v6 = vld [vmem:[%s6752_s2 + $0x2d4] ss:$8 sps:$4 sm:$0xff]  }
  0x44   : > { %3301 = vmatprep.subr.bf16.mxu0 %v4618_v23  ;;  %3341 = vmatpush2.bf16.msra.mxu1 %v4617_v28  ;;  %v883_v13 = vpack.c.bf16 %v763_v7, %v763_v7  ;;  %v764_v15 = vcombine.high %v762_v9, %v762_v9  ;;  %v884_v21 = vpack.c.bf16 %v762_v9, %v762_v9  ;;  %v4639_v23 = vld [vmem:[%s6752_s2 + $0x370] ss:$8 sps:$4 sm:$0xff]   ;;  %v4693_v7 = vld [vmem:[%s6752_s2 + $0x3e0] ss:$8 sps:$4 sm:$0xff]  }
  0x45   : > { %3342 = vmatprep.subr.bf16.mxu1 %v4621_v33  ;;  %v780_v18 = vcombine.high %v5489_v11, %v5489_v11  ;;  %v5500_v19 = vrot.slane %v765_v12, %v5394_v59  ;;  %v4656_v33 = vld [vmem:[%s6752_s2 + $0x244] ss:$8 sps:$4 sm:$0xff]   ;;  %v4696_v9 = vld [vmem:[%s6752_s2 + $0x2d0] ss:$8 sps:$4 sm:$0xff]  }
  0x46   : > { %3307 = vmatprep.mubr.bf16.mxu0 %v883_v13  ;;  %v885_v20 = vpack.c.bf16 %v764_v15, %v764_v15  ;;  %v4699_v12 = vld [vmem:[%s6752_s2 + $0x3d0] ss:$8 sps:$4 sm:$0xff]   ;;  %v4707_v13 = vld [vmem:[%s6752_s2 + $0x3c4] ss:$8 sps:$4 sm:$0xff]   ;;  %v4710_v15 = vld [vmem:[%s6752_s2 + $0x2b4] ss:$8 sps:$4 sm:$0xff]  }
  0x47   : > { %3302 = vmatpush2.bf16.msra.mxu0 %v4620_v37  ;;  %v887_v24 = vpack.c.bf16 %v780_v18, %v780_v18  ;;  %v781_v25 = vcombine.high %v5500_v19, %v5500_v19  ;;  %v4662_v37 = vld [vmem:[%s6752_s2 + $0x234] ss:$8 sps:$4 sm:$0xff]   ;;  %v4708_v18 = vld [vmem:[%s6752_s2 + $0x2b0] ss:$8 sps:$4 sm:$0xff]  }
  0x48   : > { %3303 = vmatprep.subr.bf16.mxu0 %v4624_v42  ;;  %3343 = vmatpush2.bf16.msra.mxu1 %v4623_v45  ;;  %v4663_v42 = vld [vmem:[%s6752_s2 + $0x330] ss:$8 sps:$4 sm:$0xff]   ;;  %v4674_v45 = vld [vmem:[%s6752_s2 + $0x214] ss:$8 sps:$4 sm:$0xff]  }
  0x49   : > { %3344 = vmatprep.subr.bf16.mxu1 %v4627_v50  ;;  %3348 = vmatprep.mubr.bf16.mxu1 %v885_v20  ;;  %v889_v28 = vpack.c.bf16 %v781_v25, %v781_v25  ;;  %v4672_v50 = vld [vmem:[%s6752_s2 + $0x210] ss:$8 sps:$4 sm:$0xff]   ;;  %v4716_v20 = vld [vmem:[%s6752_s2 + $0x2a4] ss:$8 sps:$4 sm:$0xff]   ;;  %v4717_v25 = vld [vmem:[%s6752_s2 + $0x3a0] ss:$8 sps:$4 sm:$0xff]  }
  0x4b   : > { %3304 = vmatpush2.bf16.msra.mxu0 %v4626_v56  ;;  %v4675_v56 = vld [vmem:[%s6752_s2 + $0x310] ss:$8 sps:$4 sm:$0xff]  }
  0x4c   : > { %3305 = vmatprep.subr.bf16.mxu0 %v4630_v61  ;;  %3345 = vmatpush2.bf16.msra.mxu1 %v4629_v63  ;;  %v4686_v61 = vld [vmem:[%s6752_s2 + $0x2f4] ss:$8 sps:$4 sm:$0xff]  }
  0x4d   : > { %3346 = vmatprep.subr.bf16.mxu1 %v4633_v1  ;;  %v4689_v63 = vld [vmem:[%s6752_s2 + $0x3f4] ss:$8 sps:$4 sm:$0xff]   ;;  %v4692_v1 = vld [vmem:[%s6752_s2 + $0x2e4] ss:$8 sps:$4 sm:$0xff]  }
  0x4f   : > { %3306 = vmatpush2.bf16.msra.mxu0 %v4632_v5  ;;  %v4690_v5 = vld [vmem:[%s6752_s2 + $0x2e0] ss:$8 sps:$4 sm:$0xff]  }
  0x50   : > { %3357 = vmatprep.subr.bf16.mxu0 %v4638_v8  ;;  %3347 = vmatpush2.bf16.msra.mxu1 %v4635_v10  ;;  %v4701_v8 = vld [vmem:[%s6752_s2 + $0x3d4] ss:$8 sps:$4 sm:$0xff]   ;;  %v4704_v10 = vld [vmem:[%s6752_s2 + $0x2c4] ss:$8 sps:$4 sm:$0xff]  }
  0x51   : > { %3398 = vmatprep.subr.bf16.mxu1 %v4641_v17  ;;  %v4713_v17 = vld [vmem:[%s6752_s2 + $0x3b4] ss:$8 sps:$4 sm:$0xff]  }
  0x52   : > { %3308 = vmatmul.mubr.bf16.vlgmr.msra.gmra.mxu0 %v882_v14  ;;  %v4702_v14 = vld [vmem:[%s6752_s2 + $0x2c0] ss:$8 sps:$4 sm:$0xff]  }
  0x53   : > { %3358 = vmatpush1.bf16.msra.mxu0 %v4636_v16  ;;  %3349 = vmatmul.mubr.bf16.vlgmr.msra.gmra.mxu1 %v884_v21  ;;  %v4705_v16 = vld [vmem:[%s6752_s2 + $0x3c0] ss:$8 sps:$4 sm:$0xff]   ;;  %v4711_v21 = vld [vmem:[%s6752_s2 + $0x3b0] ss:$8 sps:$4 sm:$0xff]  }
  0x54   : > { %3359 = vmatprep.subr.bf16.mxu0 %v4644_v22  ;;  %3399 = vmatpush1.bf16.msra.mxu1 %v4639_v23  ;;  %v4719_v22 = vld [vmem:[%s6752_s2 + $0x3a4] ss:$8 sps:$4 sm:$0xff]   ;;  %v4714_v23 = vld [vmem:[%s6752_s2 + $0x2a0] ss:$8 sps:$4 sm:$0xff]  }
  0x55   : > { %3389 = vmatprep.mubr.bf16.mxu0 %v887_v24  ;;  %3400 = vmatprep.subr.bf16.mxu1 %v4647_v26  ;;  %v4722_v24 = vld [vmem:[%s6752_s2 + $0x294] ss:$8 sps:$4 sm:$0xff]  }
  0x56   : > { %3430 = vmatprep.mubr.bf16.mxu1 %v889_v28  ;;  %v4725_v26 = vld [vmem:[%s6752_s2 + $0x394] ss:$8 sps:$4 sm:$0xff]   ;;  %v4728_v28 = vld [vmem:[%s6752_s2 + $0x284] ss:$8 sps:$4 sm:$0xff]  }
  0x57   : > { %3360 = vmatpush1.bf16.msra.mxu0 %v4642_v27  ;;  %v4720_v27 = vld [vmem:[%s6752_s2 + $0x290] ss:$8 sps:$4 sm:$0xff]  }
  0x58   : > { %3361 = vmatprep.subr.bf16.mxu0 %v4650_v29  ;;  %3401 = vmatpush1.bf16.msra.mxu1 %v4645_v30  ;;  %v4723_v29 = vld [vmem:[%s6752_s2 + $0x390] ss:$8 sps:$4 sm:$0xff]   ;;  %v4731_v30 = vld [vmem:[%s6752_s2 + $0x384] ss:$8 sps:$4 sm:$0xff]  }
  0x59   : > { %3402 = vmatprep.subr.bf16.mxu1 %v4653_v31  ;;  %v4726_v31 = vld [vmem:[%s6752_s2 + $0x280] ss:$8 sps:$4 sm:$0xff]  }
  0x5b   : > { %3362 = vmatpush1.bf16.msra.mxu0 %v4648_v32  ;;  %v4734_v32 = vld [vmem:[%s6752_s2 + $0x474] ss:$8 sps:$4 sm:$0xff]  }
  0x5c   : > { %3363 = vmatprep.subr.bf16.mxu0 %v4656_v33  ;;  %3403 = vmatpush1.bf16.msra.mxu1 %v4651_v34  ;;  %v4729_v33 = vld [vmem:[%s6752_s2 + $0x380] ss:$8 sps:$4 sm:$0xff]   ;;  %v886_v34 = vpack.c.bf16 %v5489_v11, %v5489_v11  ;;  %v4735_v11 = vld [vmem:[%s6752_s2 + $0x570] ss:$8 sps:$4 sm:$0xff]  }
  0x5d   : > { %3404 = vmatprep.subr.bf16.mxu1 %v4659_v35  ;;  %v4737_v35 = vld [vmem:[%s6752_s2 + $0x574] ss:$8 sps:$4 sm:$0xff]  }
  0x5f   : > { %3364 = vmatpush1.bf16.msra.mxu0 %v4654_v36  ;;  %v4732_v36 = vld [vmem:[%s6752_s2 + $0x470] ss:$8 sps:$4 sm:$0xff]  }
  0x60   : > { %3365 = vmatprep.subr.bf16.mxu0 %v4662_v37  ;;  %3405 = vmatpush1.bf16.msra.mxu1 %v4657_v38  ;;  %v888_v37 = vpack.c.bf16 %v5500_v19, %v5500_v19  ;;  %v4740_v38 = vld [vmem:[%s6752_s2 + $0x464] ss:$8 sps:$4 sm:$0xff]  }
  0x61   : > { %3406 = vmatprep.subr.bf16.mxu1 %v4665_v39  ;;  %v5709_v39 = vld [vmem:[%s6751_s1 + $0x10] ss:$2 sm:$0xff]  ;;  %v4743_v19 = vld [vmem:[%s6752_s2 + $0x564] ss:$8 sps:$4 sm:$0xff]  }
  0x63   : > { %3366 = vmatpush1.bf16.msra.mxu0 %v4660_v40  ;;  %v5714_v40 = vld [vmem:[%s6751_s1 + $0x11] ss:$2 sm:$0xff] }
  0x64   : > { %3367 = vmatprep.subr.bf16.mxu0 %v4668_v41  ;;  %3407 = vmatpush1.bf16.msra.mxu1 %v4663_v42  ;;  %v311_v41 = vrot.slane %v5709_v39, %v5367_v48  ;;  %v315_v42 = vrot.slane %v5709_v39, %v5369_v49 }
  0x65   : > { %3408 = vmatprep.subr.bf16.mxu1 %v4671_v43  ;;  %v319_v43 = vrot.slane %v5709_v39, %v5374_v51 }
  0x67   : > { %3368 = vmatpush1.bf16.msra.mxu0 %v4666_v44  ;;  %v4738_v44 = vld [vmem:[%s6752_s2 + $0x460] ss:$8 sps:$4 sm:$0xff]  }
  0x68   : > { %3369 = vmatprep.subr.bf16.mxu0 %v4674_v45  ;;  %3409 = vmatpush1.bf16.msra.mxu1 %v4669_v46  ;;  %v323_v45 = vrot.slane %v5709_v39, %v5376_v52  ;;  %v546_v46 = vrot.slane %v5714_v40, %v5367_v48 }
  0x69   : > { %3410 = vmatprep.subr.bf16.mxu1 %v4677_v47  ;;  %v550_v47 = vrot.slane %v5714_v40, %v5369_v49 }
  0x6b   : > { %3370 = vmatpush1.bf16.msra.mxu0 %v4672_v50  ;;  %v554_v50 = vrot.slane %v5714_v40, %v5374_v51 }
  0x6c   : > { %3371 = vmatprep.subr.bf16.mxu0 %v4680_v53  ;;  %3411 = vmatpush1.bf16.msra.mxu1 %v4675_v56  ;;  %v4746_v53 = vld [vmem:[%s6752_s2 + $0x454] ss:$8 sps:$4 sm:$0xff]   ;;  %v5740_v56 = vld [vmem:[%s5235_s27 + $0x8] sm:$0xff] }
  0x6d   : > { %3412 = vmatprep.subr.bf16.mxu1 %v4683_v57  ;;  %v410_v57 = vcombine.low %v311_v41, %v315_v42  ;;  %v331_v41 = vrot.slane %v5709_v39, %v5383_v55  ;;  %v4771_v42 = vld [vmem:[%s6752_s2 + $0x510] ss:$8 sps:$4 sm:$0xff]  }
  0x6f   : > { %3372 = vmatpush1.bf16.msra.mxu0 %v4678_v58  ;;  %v558_v58 = vrot.slane %v5714_v40, %v5376_v52 }
  0x70   : > { %3373 = vmatprep.subr.bf16.mxu0 %v4686_v61  ;;  %3413 = vmatpush1.bf16.msra.mxu1 %v4681_v62  ;;  %v4741_v61 = vld [vmem:[%s6752_s2 + $0x560] ss:$8 sps:$4 sm:$0xff]   ;;  %v411_v62 = vcombine.low %v319_v43, %v323_v45  ;;  %v335_v43 = vrot.slane %v5709_v39, %v5396_v60  ;;  %v4779_v45 = vld [vmem:[%s6752_s2 + $0x504] ss:$8 sps:$4 sm:$0xff]  }
  0x71   : > { %3414 = vmatprep.subr.bf16.mxu1 %v4689_v63  ;;  %v645_v63 = vcombine.low %v546_v46, %v550_v47  ;;  %v4774_v46 = vld [vmem:[%s6752_s2 + $0x400] ss:$8 sps:$4 sm:$0xff]   ;;  %v4782_v47 = vld [vmem:[%s6752_s2 + $0x4f4] ss:$8 sps:$4 sm:$0xff]  }
  0x73   : > { %3374 = vmatpush2.bf16.msra.mxu0 %v4684_v0  ;;  %v4749_v0 = vld [vmem:[%s6752_s2 + $0x554] ss:$8 sps:$4 sm:$0xff]  }
  0x74   : > { %3375 = vmatprep.subr.bf16.mxu0 %v4692_v1  ;;  %3415 = vmatpush2.bf16.msra.mxu1 %v4687_v3  ;;  %v418_v1 = vrot.slane %v410_v57, %v5394_v59  ;;  %v646_v3 = vcombine.low %v554_v50, %v558_v58  ;;  %v566_v58 = vrot.slane %v5714_v40, %v5383_v55 }
  0x75   : > { %3416 = vmatprep.subr.bf16.mxu1 %v4695_v4  ;;  %v4744_v4 = vld [vmem:[%s6752_s2 + $0x450] ss:$8 sps:$4 sm:$0xff]  }
  0x77   : > { %3376 = vmatpush2.bf16.msra.mxu0 %v4690_v5  ;;  %v260_v5 = vunpack.c.l.bf16 %v5740_v56 }
  0x78   : > { %3377 = vmatprep.subr.bf16.mxu0 %v4698_v6  ;;  %3417 = vmatpush2.bf16.msra.mxu1 %v4693_v7  ;;  %v425_v6 = vrot.slane %v411_v62, %v5394_v59  ;;  %v653_v7 = vrot.slane %v645_v63, %v5394_v59  ;;  %v574_v62 = vrot.slane %v5714_v40, %v5407_v2  ;;  %v4785_v63 = vld [vmem:[%s6752_s2 + $0x5f4] ss:$8 sps:$4 sm:$0xff]  }
  0x79   : > { %3418 = vmatprep.subr.bf16.mxu1 %v4701_v8  ;;  %v4752_v8 = vld [vmem:[%s6752_s2 + $0x444] ss:$8 sps:$4 sm:$0xff]  }
  0x7b   : > { %3378 = vmatpush2.bf16.msra.mxu0 %v4696_v9  ;;  %v660_v9 = vrot.slane %v646_v3, %v5394_v59 }
  0x7c   : > { %3379 = vmatprep.subr.bf16.mxu0 %v4704_v10  ;;  %3419 = vmatpush2.bf16.msra.mxu1 %v4699_v12  ;;  %v4747_v10 = vld [vmem:[%s6752_s2 + $0x550] ss:$8 sps:$4 sm:$0xff]   ;;  %v426_v12 = vcombine.low %v418_v1, %v425_v6  ;;  %v4788_v1 = vld [vmem:[%s6752_s2 + $0x4e4] ss:$8 sps:$4 sm:$0xff]  }
  0x7d   : > { %3420 = vmatprep.subr.bf16.mxu1 %v4707_v13  ;;  %v4755_v13 = vld [vmem:[%s6752_s2 + $0x544] ss:$8 sps:$4 sm:$0xff]  }
  0x7f   : > { %3380 = vmatpush2.bf16.msra.mxu0 %v4702_v14  ;;  %v661_v14 = vcombine.low %v653_v7, %v660_v9  ;;  %v4791_v7 = vld [vmem:[%s6752_s2 + $0x5e4] ss:$8 sps:$4 sm:$0xff]   ;;  %v4794_v9 = vld [vmem:[%s6752_s2 + $0x4d4] ss:$8 sps:$4 sm:$0xff]  }
  0x80   : > { %3381 = vmatprep.subr.bf16.mxu0 %v4710_v15  ;;  %3421 = vmatpush2.bf16.msra.mxu1 %v4705_v16  ;;  %v4750_v15 = vld [vmem:[%s6752_s2 + $0x440] ss:$8 sps:$4 sm:$0xff]   ;;  %v494_v16 = vmul.f32 %v426_v12, %v260_v5  ;;  %v261_v12 = vunpack.c.h.bf16 %v5740_v56  ;;  %v4800_v56 = vld [vmem:[%s6752_s2 + $0x4c4] ss:$8 sps:$4 sm:$0xff]  }
  0x81   : > { %3422 = vmatprep.subr.bf16.mxu1 %v4713_v17  ;;  %v4758_v17 = vld [vmem:[%s6752_s2 + $0x434] ss:$8 sps:$4 sm:$0xff]  }
  0x83   : > { %3382 = vmatpush2.bf16.msra.mxu0 %v4708_v18  ;;  %v4753_v18 = vld [vmem:[%s6752_s2 + $0x540] ss:$8 sps:$4 sm:$0xff]  }
  0x84   : > { %3383 = vmatprep.subr.bf16.mxu0 %v4716_v20  ;;  %3423 = vmatpush2.bf16.msra.mxu1 %v4711_v21  ;;  %v729_v20 = vadd.f32 %v661_v14, %v494_v16  ;;  %v4761_v21 = vld [vmem:[%s6752_s2 + $0x534] ss:$8 sps:$4 sm:$0xff]  }
  0x85   : > { %3424 = vmatprep.subr.bf16.mxu1 %v4719_v22  ;;  %v4756_v22 = vld [vmem:[%s6752_s2 + $0x430] ss:$8 sps:$4 sm:$0xff]   ;;  %v4797_v16 = vld [vmem:[%s6752_s2 + $0x5d4] ss:$8 sps:$4 sm:$0xff]  }
  0x87   : > { %3384 = vmatpush2.bf16.msra.mxu0 %v4714_v23  ;;  %v736_v23 = vmax.f32 %v729_v20, 0.0 }
  0x88   : > { %3385 = vmatprep.subr.bf16.mxu0 %v4722_v24  ;;  %3425 = vmatpush2.bf16.msra.mxu1 %v4717_v25  ;;  %v4764_v24 = vld [vmem:[%s6752_s2 + $0x424] ss:$8 sps:$4 sm:$0xff]   ;;  %v4759_v25 = vld [vmem:[%s6752_s2 + $0x530] ss:$8 sps:$4 sm:$0xff]  }
  0x89   : > { %3426 = vmatprep.subr.bf16.mxu1 %v4725_v26  ;;  %v5789_v26 = vrot.slane %v736_v23, %v5394_v59 }
  0x8b   : > { %3386 = vmatpush2.bf16.msra.mxu0 %v4720_v27  ;;  %v782_v27 = vcombine.high %v736_v23, %v736_v23  ;;  %v4798_v23 = vld [vmem:[%s6752_s2 + $0x4c0] ss:$8 sps:$4 sm:$0xff]  }
  0x8c   : > { %3387 = vmatprep.subr.bf16.mxu0 %v4728_v28  ;;  %3427 = vmatpush2.bf16.msra.mxu1 %v4723_v29  ;;  %v4767_v28 = vld [vmem:[%s6752_s2 + $0x524] ss:$8 sps:$4 sm:$0xff]   ;;  %v4762_v29 = vld [vmem:[%s6752_s2 + $0x420] ss:$8 sps:$4 sm:$0xff]  }
  0x8d   : > { %3428 = vmatprep.subr.bf16.mxu1 %v4731_v30  ;;  %v797_v30 = vcombine.high %v5789_v26, %v5789_v26 }
  0x8f   : > { %3388 = vmatpush2.bf16.msra.mxu0 %v4726_v31  ;;  %v5800_v31 = vrot.slane %v782_v27, %v5394_v59 }
  0x90   : > { %3439 = vmatprep.subr.bf16.mxu0 %v4734_v32  ;;  %3429 = vmatpush2.bf16.msra.mxu1 %v4729_v33  ;;  %v4770_v32 = vld [vmem:[%s6752_s2 + $0x414] ss:$8 sps:$4 sm:$0xff]   ;;  %v4765_v33 = vld [vmem:[%s6752_s2 + $0x520] ss:$8 sps:$4 sm:$0xff]  }
  0x91   : > { %3480 = vmatprep.subr.bf16.mxu1 %v4737_v35  ;;  %v798_v35 = vcombine.high %v5800_v31, %v5800_v31 }
  0x92   : > { %3390 = vmatmul.mubr.bf16.vlgmr.msra.gmra.mxu0 %v886_v34  ;;  %v891_v34 = vpack.c.bf16 %v797_v30, %v797_v30  ;;  %v4812_v30 = vld [vmem:[%s6752_s2 + $0x4a4] ss:$8 sps:$4 sm:$0xff]  }
  0x93   : > { %3440 = vmatpush1.bf16.msra.mxu0 %v4732_v36  ;;  %3431 = vmatmul.mubr.bf16.vlgmr.msra.gmra.mxu1 %v888_v37  ;;  %v4773_v36 = vld [vmem:[%s6752_s2 + $0x514] ss:$8 sps:$4 sm:$0xff]   ;;  %v4768_v37 = vld [vmem:[%s6752_s2 + $0x410] ss:$8 sps:$4 sm:$0xff]  }
  0x94   : > { %3441 = vmatprep.subr.bf16.mxu0 %v4740_v38  ;;  %3481 = vmatpush1.bf16.msra.mxu1 %v4735_v11  ;;  %v893_v38 = vpack.c.bf16 %v798_v35, %v798_v35  ;;  %v4776_v11 = vld [vmem:[%s6752_s2 + $0x404] ss:$8 sps:$4 sm:$0xff]   ;;  %v4810_v35 = vld [vmem:[%s6752_s2 + $0x4a0] ss:$8 sps:$4 sm:$0xff]  }
  0x95   : > { %3482 = vmatprep.subr.bf16.mxu1 %v4743_v19  ;;  %3471 = vmatprep.mubr.bf16.mxu0 %v891_v34  ;;  %v327_v19 = vrot.slane %v5709_v39, %v5381_v54  ;;  %v4815_v34 = vld [vmem:[%s6752_s2 + $0x5a4] ss:$8 sps:$4 sm:$0xff]  }
  0x96   : > { %3512 = vmatprep.mubr.bf16.mxu1 %v893_v38 }
  0x97   : > { %3442 = vmatpush1.bf16.msra.mxu0 %v4738_v44  ;;  %v339_v44 = vrot.slane %v5709_v39, %v5407_v2  ;;  %v427_v50 = vcombine.low %v327_v19, %v331_v41  ;;  %v4777_v39 = vld [vmem:[%s6752_s2 + $0x500] ss:$8 sps:$4 sm:$0xff]   ;;  %v4816_v19 = vld [vmem:[%s6752_s2 + $0x490] ss:$8 sps:$4 sm:$0xff]  }
  0x98   : > { %3443 = vmatprep.subr.bf16.mxu0 %v4746_v53  ;;  %3483 = vmatpush1.bf16.msra.mxu1 %v4741_v61  ;;  %v562_v53 = vrot.slane %v5714_v40, %v5381_v54  ;;  %v570_v61 = vrot.slane %v5714_v40, %v5396_v60  ;;  %v4783_v40 = vld [vmem:[%s6752_s2 + $0x5f0] ss:$8 sps:$4 sm:$0xff]  }
  0x99   : > { %3484 = vmatprep.subr.bf16.mxu1 %v4749_v0  ;;  %v428_v57 = vcombine.low %v335_v43, %v339_v44  ;;  %v4780_v0 = vld [vmem:[%s6752_s2 + $0x4f0] ss:$8 sps:$4 sm:$0xff]   ;;  %v435_v3 = vrot.slane %v427_v50, %v5394_v59  ;;  %v4830_v50 = vld [vmem:[%s6752_s2 + $0x674] ss:$8 sps:$4 sm:$0xff]  }
  0x9a   : > { %v662_v5 = vcombine.low %v562_v53, %v566_v58  ;;  %v663_v6 = vcombine.low %v570_v61, %v574_v62  ;;  %v4819_v43 = vld [vmem:[%s6752_s2 + $0x590] ss:$8 sps:$4 sm:$0xff]   ;;  %v4825_v53 = vld [vmem:[%s6752_s2 + $0x580] ss:$8 sps:$4 sm:$0xff]   ;;  %v4833_v58 = vld [vmem:[%s6752_s2 + $0x774] ss:$8 sps:$4 sm:$0xff]  }
  0x9b   : > { %3444 = vmatpush1.bf16.msra.mxu0 %v4744_v4  ;;  %v442_v4 = vrot.slane %v428_v57, %v5394_v59  ;;  %v890_v57 = vpack.c.bf16 %v5789_v26, %v5789_v26  ;;  %v4828_v61 = vld [vmem:[%s6752_s2 + $0x670] ss:$8 sps:$4 sm:$0xff]  }
  0x9c   : > { %3445 = vmatprep.subr.bf16.mxu0 %v4752_v8  ;;  %3485 = vmatpush1.bf16.msra.mxu1 %v4747_v10  ;;  %v4786_v8 = vld [vmem:[%s6752_s2 + $0x4e0] ss:$8 sps:$4 sm:$0xff]   ;;  %v670_v14 = vrot.slane %v662_v5, %v5394_v59  ;;  %v4831_v26 = vld [vmem:[%s6752_s2 + $0x770] ss:$8 sps:$4 sm:$0xff]   ;;  %v4845_v5 = vld [vmem:[%s6752_s2 + $0x754] ss:$8 sps:$4 sm:$0xff]  }
  0x9d   : > { %3486 = vmatprep.subr.bf16.mxu1 %v4755_v13  ;;  %v4789_v10 = vld [vmem:[%s6752_s2 + $0x5e0] ss:$8 sps:$4 sm:$0xff]   ;;  %v443_v13 = vcombine.low %v435_v3, %v442_v4  ;;  %v4842_v3 = vld [vmem:[%s6752_s2 + $0x654] ss:$8 sps:$4 sm:$0xff]  }
  0x9e   : > { %v4837_v4 = vld [vmem:[%s6752_s2 + $0x760] ss:$8 sps:$4 sm:$0xff]  }
  0x9f   : > { %3446 = vmatpush1.bf16.msra.mxu0 %v4750_v15  ;;  %v677_v15 = vrot.slane %v663_v6, %v5394_v59  ;;  %v495_v20 = vmul.f32 %v443_v13, %v261_v12  ;;  %v4840_v6 = vld [vmem:[%s6752_s2 + $0x650] ss:$8 sps:$4 sm:$0xff]   ;;  %v4854_v12 = vld [vmem:[%s6752_s2 + $0x634] ss:$8 sps:$4 sm:$0xff]   ;;  %v4849_v13 = vld [vmem:[%s6752_s2 + $0x740] ss:$8 sps:$4 sm:$0xff]  }
  0xa0   : > { %3447 = vmatprep.subr.bf16.mxu0 %v4758_v17  ;;  %3487 = vmatpush1.bf16.msra.mxu1 %v4753_v18  ;;  %v4792_v17 = vld [vmem:[%s6752_s2 + $0x4d0] ss:$8 sps:$4 sm:$0xff]  }
  0xa1   : > { %3488 = vmatprep.subr.bf16.mxu1 %v4761_v21  ;;  %v4795_v18 = vld [vmem:[%s6752_s2 + $0x5d0] ss:$8 sps:$4 sm:$0xff]   ;;  %v678_v21 = vcombine.low %v670_v14, %v677_v15  ;;  %v4857_v14 = vld [vmem:[%s6752_s2 + $0x734] ss:$8 sps:$4 sm:$0xff]  }
  0xa2   : > { %v4852_v15 = vld [vmem:[%s6752_s2 + $0x630] ss:$8 sps:$4 sm:$0xff]  }
  0xa3   : > { %3448 = vmatpush1.bf16.msra.mxu0 %v4756_v22  ;;  %v4803_v22 = vld [vmem:[%s6752_s2 + $0x5c4] ss:$8 sps:$4 sm:$0xff]   ;;  %v730_v27 = vadd.f32 %v678_v21, %v495_v20  ;;  %v4866_v20 = vld [vmem:[%s6752_s2 + $0x614] ss:$8 sps:$4 sm:$0xff]   ;;  %v4861_v21 = vld [vmem:[%s6752_s2 + $0x720] ss:$8 sps:$4 sm:$0xff]  }
  0xa4   : > { %3449 = vmatprep.subr.bf16.mxu0 %v4764_v24  ;;  %3489 = vmatpush1.bf16.msra.mxu1 %v4759_v25  ;;  %v4806_v24 = vld [vmem:[%s6752_s2 + $0x4b4] ss:$8 sps:$4 sm:$0xff]   ;;  %v4801_v25 = vld [vmem:[%s6752_s2 + $0x5c0] ss:$8 sps:$4 sm:$0xff]  }
  0xa5   : > { %3490 = vmatprep.subr.bf16.mxu1 %v4767_v28  ;;  %v4809_v28 = vld [vmem:[%s6752_s2 + $0x5b4] ss:$8 sps:$4 sm:$0xff]  }
  0xa7   : > { %3450 = vmatpush1.bf16.msra.mxu0 %v4762_v29  ;;  %v4804_v29 = vld [vmem:[%s6752_s2 + $0x4b0] ss:$8 sps:$4 sm:$0xff]  }
  0xa8   : > { %3451 = vmatprep.subr.bf16.mxu0 %v4770_v32  ;;  %3491 = vmatpush1.bf16.msra.mxu1 %v4765_v33  ;;  %v4807_v32 = vld [vmem:[%s6752_s2 + $0x5b0] ss:$8 sps:$4 sm:$0xff]   ;;  %v737_v33 = vmax.f32 %v730_v27, 0.0 }
  0xa9   : > { %3492 = vmatprep.subr.bf16.mxu1 %v4773_v36  ;;  %v4818_v36 = vld [vmem:[%s6752_s2 + $0x494] ss:$8 sps:$4 sm:$0xff]   ;;  %v4867_v27 = vld [vmem:[%s6752_s2 + $0x710] ss:$8 sps:$4 sm:$0xff]  }
  0xaa   : > { %v799_v38 = vcombine.high %v737_v33, %v737_v33  ;;  %v5934_v41 = vrot.slane %v737_v33, %v5394_v59  ;;  %v6065_v33 = vld [vmem:[%s6751_s1 + $0x21] ss:$2 sm:$0xff] }
  0xab   : > { %3452 = vmatpush1.bf16.msra.mxu0 %v4768_v37  ;;  %v4813_v37 = vld [vmem:[%s6752_s2 + $0x5a0] ss:$8 sps:$4 sm:$0xff]  }
  0xac   : > { %3453 = vmatprep.subr.bf16.mxu0 %v4776_v11  ;;  %3493 = vmatpush1.bf16.msra.mxu1 %v4771_v42  ;;  %v4821_v11 = vld [vmem:[%s6752_s2 + $0x594] ss:$8 sps:$4 sm:$0xff]   ;;  %v4824_v42 = vld [vmem:[%s6752_s2 + $0x484] ss:$8 sps:$4 sm:$0xff]   ;;  %v5943_v44 = vrot.slane %v799_v38, %v5394_v59  ;;  %v582_v38 = vrot.slane %v6065_v33, %v5369_v49 }
  0xad   : > { %3494 = vmatprep.subr.bf16.mxu1 %v4779_v45  ;;  %v4827_v45 = vld [vmem:[%s6752_s2 + $0x584] ss:$8 sps:$4 sm:$0xff]  }
  0xaf   : > { %3454 = vmatpush1.bf16.msra.mxu0 %v4774_v46  ;;  %v4822_v46 = vld [vmem:[%s6752_s2 + $0x480] ss:$8 sps:$4 sm:$0xff]  }
  0xb0   : > { %3455 = vmatprep.subr.bf16.mxu0 %v4782_v47  ;;  %3495 = vmatpush1.bf16.msra.mxu1 %v4777_v39  ;;  %v814_v47 = vcombine.high %v5934_v41, %v5934_v41  ;;  %v815_v39 = vcombine.high %v5943_v44, %v5943_v44 }
  0xb1   : > { %3496 = vmatprep.subr.bf16.mxu1 %v4785_v63  ;;  %v892_v63 = vpack.c.bf16 %v5800_v31, %v5800_v31  ;;  %v4834_v31 = vld [vmem:[%s6752_s2 + $0x660] ss:$8 sps:$4 sm:$0xff]  }
  0xb2   : > { %v895_v62 = vpack.c.bf16 %v814_v47, %v814_v47  ;;  %v4876_v47 = vld [vmem:[%s6752_s2 + $0x6f0] ss:$8 sps:$4 sm:$0xff]  }
  0xb3   : > { %3456 = vmatpush2.bf16.msra.mxu0 %v4780_v0  ;;  %v4836_v0 = vld [vmem:[%s6752_s2 + $0x664] ss:$8 sps:$4 sm:$0xff]  }
  0xb4   : > { %3457 = vmatprep.subr.bf16.mxu0 %v4788_v1  ;;  %3497 = vmatpush2.bf16.msra.mxu1 %v4783_v40  ;;  %v897_v1 = vpack.c.bf16 %v815_v39, %v815_v39  ;;  %v4839_v40 = vld [vmem:[%s6752_s2 + $0x764] ss:$8 sps:$4 sm:$0xff]  }
  0xb5   : > { %3498 = vmatprep.subr.bf16.mxu1 %v4791_v7  ;;  %v4848_v7 = vld [vmem:[%s6752_s2 + $0x644] ss:$8 sps:$4 sm:$0xff]  }
  0xb7   : > { %3458 = vmatpush2.bf16.msra.mxu0 %v4786_v8  ;;  %v4843_v8 = vld [vmem:[%s6752_s2 + $0x750] ss:$8 sps:$4 sm:$0xff]  }
  0xb8   : > { %3459 = vmatprep.subr.bf16.mxu0 %v4794_v9  ;;  %3499 = vmatpush2.bf16.msra.mxu1 %v4789_v10  ;;  %v4851_v9 = vld [vmem:[%s6752_s2 + $0x744] ss:$8 sps:$4 sm:$0xff]   ;;  %v4846_v10 = vld [vmem:[%s6752_s2 + $0x640] ss:$8 sps:$4 sm:$0xff]  }
  0xb9   : > { %3500 = vmatprep.subr.bf16.mxu1 %v4797_v16  ;;  %v4860_v16 = vld [vmem:[%s6752_s2 + $0x624] ss:$8 sps:$4 sm:$0xff]  }
  0xbb   : > { %3460 = vmatpush2.bf16.msra.mxu0 %v4792_v17  ;;  %v4855_v17 = vld [vmem:[%s6752_s2 + $0x730] ss:$8 sps:$4 sm:$0xff]  }
  0xbc   : > { %3461 = vmatprep.subr.bf16.mxu0 %v4800_v56  ;;  %3501 = vmatpush2.bf16.msra.mxu1 %v4795_v18  ;;  %v4863_v56 = vld [vmem:[%s6752_s2 + $0x724] ss:$8 sps:$4 sm:$0xff]   ;;  %v4858_v18 = vld [vmem:[%s6752_s2 + $0x620] ss:$8 sps:$4 sm:$0xff]  }
  0xbd   : > { %3502 = vmatprep.subr.bf16.mxu1 %v4803_v22  ;;  %v4869_v22 = vld [vmem:[%s6752_s2 + $0x714] ss:$8 sps:$4 sm:$0xff]  }
  0xbf   : > { %3462 = vmatpush2.bf16.msra.mxu0 %v4798_v23  ;;  %v4864_v23 = vld [vmem:[%s6752_s2 + $0x610] ss:$8 sps:$4 sm:$0xff]  }
  0xc0   : > { %3463 = vmatprep.subr.bf16.mxu0 %v4806_v24  ;;  %3503 = vmatpush2.bf16.msra.mxu1 %v4801_v25  ;;  %v4872_v24 = vld [vmem:[%s6752_s2 + $0x604] ss:$8 sps:$4 sm:$0xff]  }
  0xc1   : > { %3504 = vmatprep.subr.bf16.mxu1 %v4809_v28  ;;  %v6049_v25 = vld [vmem:[%s6751_s1 + $0x20] ss:$2 sm:$0xff] }
  0xc2   : > { %v343_v28 = vrot.slane %v6049_v25, %v5367_v48 }
  0xc3   : > { %3464 = vmatpush2.bf16.msra.mxu0 %v4804_v29  ;;  %v347_v29 = vrot.slane %v6049_v25, %v5369_v49 }
  0xc4   : > { %3465 = vmatprep.subr.bf16.mxu0 %v4812_v30  ;;  %3505 = vmatpush2.bf16.msra.mxu1 %v4807_v32  ;;  %v351_v30 = vrot.slane %v6049_v25, %v5374_v51  ;;  %v355_v32 = vrot.slane %v6049_v25, %v5376_v52 }
  0xc5   : > { %3506 = vmatprep.subr.bf16.mxu1 %v4815_v34  ;;  %v4875_v34 = vld [vmem:[%s6752_s2 + $0x704] ss:$8 sps:$4 sm:$0xff]  }
  0xc7   : > { %3466 = vmatpush2.bf16.msra.mxu0 %v4810_v35  ;;  %v4870_v35 = vld [vmem:[%s6752_s2 + $0x600] ss:$8 sps:$4 sm:$0xff]  }
  0xc8   : > { %3467 = vmatprep.subr.bf16.mxu0 %v4818_v36  ;;  %3507 = vmatpush2.bf16.msra.mxu1 %v4813_v37  ;;  %v4878_v36 = vld [vmem:[%s6752_s2 + $0x6f4] ss:$8 sps:$4 sm:$0xff]   ;;  %v578_v37 = vrot.slane %v6065_v33, %v5367_v48 }
  0xc9   : > { %3508 = vmatprep.subr.bf16.mxu1 %v4821_v11  ;;  %v4873_v11 = vld [vmem:[%s6752_s2 + $0x700] ss:$8 sps:$4 sm:$0xff]  }
  0xcb   : > { %3468 = vmatpush2.bf16.msra.mxu0 %v4816_v19  ;;  %v444_v19 = vcombine.low %v343_v28, %v347_v29  ;;  %v606_v28 = vrot.slane %v6065_v33, %v5407_v2 }
  0xcc   : > { %3469 = vmatprep.subr.bf16.mxu0 %v4824_v42  ;;  %3509 = vmatpush2.bf16.msra.mxu1 %v4819_v43  ;;  %v445_v42 = vcombine.low %v351_v30, %v355_v32  ;;  %v586_v43 = vrot.slane %v6065_v33, %v5374_v51  ;;  %v4879_v51 = vld [vmem:[%s6752_s2 + $0x7f0] ss:$8 sps:$4 sm:$0xff]  }
  0xcd   : > { %3510 = vmatprep.subr.bf16.mxu1 %v4827_v45  ;;  %v590_v45 = vrot.slane %v6065_v33, %v5376_v52  ;;  %v4887_v52 = vld [vmem:[%s6752_s2 + $0x7e4] ss:$8 sps:$4 sm:$0xff]  }
  0xce   : > { %v459_v39 = vrot.slane %v445_v42, %v5394_v59  ;;  %v4917_v42 = vld [vmem:[%s6752_s2 + $0x794] ss:$8 sps:$4 sm:$0xff]  }
  0xcf   : > { %3470 = vmatpush2.bf16.msra.mxu0 %v4822_v46  ;;  %v4881_v46 = vld [vmem:[%s6752_s2 + $0x7f4] ss:$8 sps:$4 sm:$0xff]  }
  0xd0   : > { %3521 = vmatprep.subr.bf16.mxu0 %v4830_v50  ;;  %3511 = vmatpush2.bf16.msra.mxu1 %v4825_v53  ;;  %v4884_v50 = vld [vmem:[%s6752_s2 + $0x6e4] ss:$8 sps:$4 sm:$0xff]   ;;  %v452_v53 = vrot.slane %v444_v19, %v5394_v59 }
  0xd1   : > { %3562 = vmatprep.subr.bf16.mxu1 %v4833_v58  ;;  %v680_v58 = vcombine.low %v586_v43, %v590_v45 }
  0xd2   : > { %3472 = vmatmul.mubr.bf16.vlgmr.msra.gmra.mxu0 %v890_v57  ;;  %v679_v57 = vcombine.low %v578_v37, %v582_v38 }
  0xd3   : > { %3522 = vmatpush1.bf16.msra.mxu0 %v4828_v61  ;;  %3553 = vmatprep.mubr.bf16.mxu0 %v895_v62  ;;  %v6105_v61 = vld [vmem:[%s5235_s27 + $0x10] sm:$0xff]  ;;  %v4882_v62 = vld [vmem:[%s6752_s2 + $0x6e0] ss:$8 sps:$4 sm:$0xff]  }
  0xd4   : > { %3513 = vmatmul.mubr.bf16.vlgmr.msra.gmra.mxu1 %v892_v63  ;;  %3523 = vmatprep.subr.bf16.mxu0 %v4836_v0  ;;  %v4890_v63 = vld [vmem:[%s6752_s2 + $0x6d4] ss:$8 sps:$4 sm:$0xff]   ;;  %v4885_v0 = vld [vmem:[%s6752_s2 + $0x7e0] ss:$8 sps:$4 sm:$0xff]  }
  0xd5   : > { %3563 = vmatpush1.bf16.msra.mxu1 %v4831_v26  ;;  %3594 = vmatprep.mubr.bf16.mxu1 %v897_v1  ;;  %v262_v26 = vunpack.c.l.bf16 %v6105_v61  ;;  %v460_v1 = vcombine.low %v452_v53, %v459_v39  ;;  %v4923_v39 = vld [vmem:[%s6752_s2 + $0x784] ss:$8 sps:$4 sm:$0xff]  }
  0xd6   : > { %3564 = vmatprep.subr.bf16.mxu1 %v4839_v40  ;;  %v687_v40 = vrot.slane %v679_v57, %v5394_v59  ;;  %v4918_v57 = vld [vmem:[%s6752_s2 + $0x680] ss:$8 sps:$4 sm:$0xff]  }
  0xd7   : > { %3524 = vmatpush1.bf16.msra.mxu0 %v4834_v31  ;;  %v694_v31 = vrot.slane %v680_v58, %v5394_v59 }
  0xd8   : > { %3525 = vmatprep.subr.bf16.mxu0 %v4842_v3  ;;  %v4893_v3 = vld [vmem:[%s6752_s2 + $0x7d4] ss:$8 sps:$4 sm:$0xff]  }
  0xd9   : > { %3565 = vmatpush1.bf16.msra.mxu1 %v4837_v4  ;;  %v4888_v4 = vld [vmem:[%s6752_s2 + $0x6d0] ss:$8 sps:$4 sm:$0xff]  }
  0xda   : > { %3566 = vmatprep.subr.bf16.mxu1 %v4845_v5  ;;  %v4896_v5 = vld [vmem:[%s6752_s2 + $0x6c4] ss:$8 sps:$4 sm:$0xff]  }
  0xdb   : > { %3526 = vmatpush1.bf16.msra.mxu0 %v4840_v6  ;;  %v4891_v6 = vld [vmem:[%s6752_s2 + $0x7d0] ss:$8 sps:$4 sm:$0xff]  }
  0xdc   : > { %3527 = vmatprep.subr.bf16.mxu0 %v4848_v7  ;;  %v496_v7 = vmul.f32 %v460_v1, %v262_v26  ;;  %v894_v26 = vpack.c.bf16 %v5934_v41, %v5934_v41  ;;  %v4929_v1 = vld [vmem:[%s6752_s2 + $0x974] ss:$8 sps:$4 sm:$0xff]   ;;  %v4932_v41 = vld [vmem:[%s6752_s2 + $0x864] ss:$8 sps:$4 sm:$0xff]  }
  0xdd   : > { %3567 = vmatpush1.bf16.msra.mxu1 %v4843_v8  ;;  %v695_v8 = vcombine.low %v687_v40, %v694_v31  ;;  %v4924_v31 = vld [vmem:[%s6752_s2 + $0x870] ss:$8 sps:$4 sm:$0xff]  }
  0xde   : > { %3568 = vmatprep.subr.bf16.mxu1 %v4851_v9  ;;  %v4899_v9 = vld [vmem:[%s6752_s2 + $0x7c4] ss:$8 sps:$4 sm:$0xff]  }
  0xdf   : > { %3528 = vmatpush1.bf16.msra.mxu0 %v4846_v10  ;;  %v4894_v10 = vld [vmem:[%s6752_s2 + $0x6c0] ss:$8 sps:$4 sm:$0xff]  }
  0xe0   : > { %3529 = vmatprep.subr.bf16.mxu0 %v4854_v12  ;;  %v4902_v12 = vld [vmem:[%s6752_s2 + $0x6b4] ss:$8 sps:$4 sm:$0xff]  }
  0xe1   : > { %3569 = vmatpush1.bf16.msra.mxu1 %v4849_v13  ;;  %v4897_v13 = vld [vmem:[%s6752_s2 + $0x7c0] ss:$8 sps:$4 sm:$0xff]  }
  0xe2   : > { %3570 = vmatprep.subr.bf16.mxu1 %v4857_v14  ;;  %v731_v14 = vadd.f32 %v695_v8, %v496_v7 }
  0xe3   : > { %3530 = vmatpush1.bf16.msra.mxu0 %v4852_v15  ;;  %v359_v15 = vrot.slane %v6049_v25, %v5381_v54 }
  0xe4   : > { %3531 = vmatprep.subr.bf16.mxu0 %v4860_v16  ;;  %v363_v16 = vrot.slane %v6049_v25, %v5383_v55  ;;  %v738_v29 = vmax.f32 %v731_v14, 0.0 }
  0xe5   : > { %3571 = vmatpush1.bf16.msra.mxu1 %v4855_v17  ;;  %v367_v17 = vrot.slane %v6049_v25, %v5396_v60 }
  0xe6   : > { %3572 = vmatprep.subr.bf16.mxu1 %v4863_v56  ;;  %v4905_v56 = vld [vmem:[%s6752_s2 + $0x7b4] ss:$8 sps:$4 sm:$0xff]   ;;  %v816_v19 = vcombine.high %v738_v29, %v738_v29 }
  0xe7   : > { %3532 = vmatpush1.bf16.msra.mxu0 %v4858_v18  ;;  %v371_v18 = vrot.slane %v6049_v25, %v5407_v2  ;;  %v4908_v25 = vld [vmem:[%s6752_s2 + $0x6a4] ss:$8 sps:$4 sm:$0xff]   ;;  %v4906_v2 = vld [vmem:[%s6752_s2 + $0x6a0] ss:$8 sps:$4 sm:$0xff]  }
  0xe8   : > { %3533 = vmatprep.subr.bf16.mxu0 %v4866_v20  ;;  %v4900_v20 = vld [vmem:[%s6752_s2 + $0x6b0] ss:$8 sps:$4 sm:$0xff]   ;;  %v6206_v53 = vrot.slane %v816_v19, %v5394_v59 }
  0xe9   : > { %3573 = vmatpush1.bf16.msra.mxu1 %v4861_v21  ;;  %v461_v21 = vcombine.low %v359_v15, %v363_v16  ;;  %v4933_v16 = vld [vmem:[%s6752_s2 + $0x960] ss:$8 sps:$4 sm:$0xff]   ;;  %v4963_v19 = vld [vmem:[%s6752_s2 + $0x910] ss:$8 sps:$4 sm:$0xff]  }
  0xea   : > { %3574 = vmatprep.subr.bf16.mxu1 %v4869_v22  ;;  %v594_v22 = vrot.slane %v6065_v33, %v5381_v54  ;;  %v4903_v54 = vld [vmem:[%s6752_s2 + $0x7b0] ss:$8 sps:$4 sm:$0xff]  }
  0xeb   : > { %3534 = vmatpush1.bf16.msra.mxu0 %v4864_v23  ;;  %v598_v23 = vrot.slane %v6065_v33, %v5383_v55  ;;  %v469_v55 = vrot.slane %v461_v21, %v5394_v59  ;;  %v4936_v21 = vld [vmem:[%s6752_s2 + $0x850] ss:$8 sps:$4 sm:$0xff]  }
  0xec   : > { %3535 = vmatprep.subr.bf16.mxu0 %v4872_v24  ;;  %v602_v24 = vrot.slane %v6065_v33, %v5396_v60  ;;  %v4911_v60 = vld [vmem:[%s6752_s2 + $0x7a4] ss:$8 sps:$4 sm:$0xff]   ;;  %v263_v33 = vunpack.c.h.bf16 %v6105_v61  ;;  %v1299_v61 = vld [vmem:[%s6753_s3] sm:$0x3] }
  0xed   : > { %3575 = vmatpush1.bf16.msra.mxu1 %v4867_v27  ;;  %v462_v27 = vcombine.low %v367_v17, %v371_v18  ;;  %v696_v30 = vcombine.low %v594_v22, %v598_v23  ;;  %v1304_v40 = vrot.slane %v1299_v61, %v5367_v48  ;;  %v4941_v17 = vld [vmem:[%s6752_s2 + $0x954] ss:$8 sps:$4 sm:$0xff]   ;;  %v4939_v23 = vld [vmem:[%s6752_s2 + $0x950] ss:$8 sps:$4 sm:$0xff]  }
  0xee   : > { %3576 = vmatprep.subr.bf16.mxu1 %v4875_v34  ;;  %v697_v34 = vcombine.low %v602_v24, %v606_v28  ;;  %v4944_v24 = vld [vmem:[%s6752_s2 + $0x844] ss:$8 sps:$4 sm:$0xff]  }
  0xef   : > { %3536 = vmatpush1.bf16.msra.mxu0 %v4870_v35  ;;  %v476_v32 = vrot.slane %v462_v27, %v5394_v59  ;;  %v704_v35 = vrot.slane %v696_v30, %v5394_v59  ;;  %v4942_v27 = vld [vmem:[%s6752_s2 + $0x840] ss:$8 sps:$4 sm:$0xff]   ;;  %v4947_v28 = vld [vmem:[%s6752_s2 + $0x944] ss:$8 sps:$4 sm:$0xff]   ;;  %v4953_v30 = vld [vmem:[%s6752_s2 + $0x934] ss:$8 sps:$4 sm:$0xff]  }
  0xf0   : > { %3537 = vmatprep.subr.bf16.mxu0 %v4878_v36  ;;  %v4914_v36 = vld [vmem:[%s6752_s2 + $0x694] ss:$8 sps:$4 sm:$0xff]   ;;  %v711_v38 = vrot.slane %v697_v34, %v5394_v59  ;;  %v4956_v34 = vld [vmem:[%s6752_s2 + $0x824] ss:$8 sps:$4 sm:$0xff]  }
  0xf1   : > { %3577 = vmatpush1.bf16.msra.mxu1 %v4873_v11  ;;  %v477_v37 = vcombine.low %v469_v55, %v476_v32  ;;  %v4909_v11 = vld [vmem:[%s6752_s2 + $0x7a0] ss:$8 sps:$4 sm:$0xff]   ;;  %v4950_v55 = vld [vmem:[%s6752_s2 + $0x834] ss:$8 sps:$4 sm:$0xff]   ;;  %v4951_v32 = vld [vmem:[%s6752_s2 + $0x930] ss:$8 sps:$4 sm:$0xff]  }
  0xf2   : > { %3578 = vmatprep.subr.bf16.mxu1 %v4881_v46  ;;  %v712_v45 = vcombine.low %v704_v35, %v711_v38  ;;  %v4912_v46 = vld [vmem:[%s6752_s2 + $0x690] ss:$8 sps:$4 sm:$0xff]   ;;  %v4962_v35 = vld [vmem:[%s6752_s2 + $0x814] ss:$8 sps:$4 sm:$0xff]  }
  0xf3   : > { %3538 = vmatpush2.bf16.msra.mxu0 %v4876_v47  ;;  %v497_v43 = vmul.f32 %v477_v37, %v263_v33  ;;  %v6195_v47 = vrot.slane %v738_v29, %v5394_v59  ;;  %v4945_v29 = vld [vmem:[%s6752_s2 + $0x940] ss:$8 sps:$4 sm:$0xff]   ;;  %v4965_v37 = vld [vmem:[%s6752_s2 + $0x914] ss:$8 sps:$4 sm:$0xff]   ;;  %v4960_v38 = vld [vmem:[%s6752_s2 + $0x810] ss:$8 sps:$4 sm:$0xff]  }
  0xf4   : > { %3539 = vmatprep.subr.bf16.mxu0 %v4884_v50  ;;  %v4920_v50 = vld [vmem:[%s6752_s2 + $0x684] ss:$8 sps:$4 sm:$0xff]   ;;  %v4954_v33 = vld [vmem:[%s6752_s2 + $0x820] ss:$8 sps:$4 sm:$0xff]  }
  0xf5   : > { %3579 = vmatpush2.bf16.msra.mxu1 %v4879_v51  ;;  %v6200_v51 = vadd.f32 %v712_v45, %v497_v43  ;;  %v831_v58 = vcombine.high %v6195_v47, %v6195_v47  ;;  %v4966_v43 = vld [vmem:[%s6752_s2 + $0x800] ss:$8 sps:$4 sm:$0xff]   ;;  %v4974_v45 = vld [vmem:[%s6752_s2 + $0x8f4] ss:$8 sps:$4 sm:$0xff]  }
  0xf6   : > { %3580 = vmatprep.subr.bf16.mxu1 %v4887_v52  ;;  %v4915_v52 = vld [vmem:[%s6752_s2 + $0x790] ss:$8 sps:$4 sm:$0xff]  }
  0xf7   : > { %3540 = vmatpush2.bf16.msra.mxu0 %v4882_v62  ;;  %v4926_v62 = vld [vmem:[%s6752_s2 + $0x874] ss:$8 sps:$4 sm:$0xff]  }
  0xf8   : > { %3541 = vmatprep.subr.bf16.mxu0 %v4890_v63  ;;  %v4921_v63 = vld [vmem:[%s6752_s2 + $0x780] ss:$8 sps:$4 sm:$0xff]  }
  0xf9   : > { %3581 = vmatpush2.bf16.msra.mxu1 %v4885_v0  ;;  %v832_v0 = vcombine.high %v6206_v53, %v6206_v53 }
  0xfa   : > { %3582 = vmatprep.subr.bf16.mxu1 %v4893_v3  ;;  %v899_v3 = vpack.c.bf16 %v831_v58, %v831_v58  ;;  %v4983_v58 = vld [vmem:[%s6752_s2 + $0x9e4] ss:$8 sps:$4 sm:$0xff]  }
  0xfb   : > { %3542 = vmatpush2.bf16.msra.mxu0 %v4888_v4  ;;  %v896_v4 = vpack.c.bf16 %v5943_v44, %v5943_v44  ;;  %v901_v7 = vpack.c.bf16 %v832_v0, %v832_v0  ;;  %v4989_v0 = vld [vmem:[%s6752_s2 + $0x9d4] ss:$8 sps:$4 sm:$0xff]  }
  0xfc   : > { %3543 = vmatprep.subr.bf16.mxu0 %v4896_v5  ;;  %v1308_v5 = vrot.slane %v1299_v61, %v5369_v49  ;;  %v4978_v61 = vld [vmem:[%s6752_s2 + $0x8e0] ss:$8 sps:$4 sm:$0xff]  }
  0xfd   : > { %3583 = vmatpush2.bf16.msra.mxu1 %v4891_v6  ;;  %v4927_v6 = vld [vmem:[%s6752_s2 + $0x970] ss:$8 sps:$4 sm:$0xff]  }
  0xfe   : > { %3584 = vmatprep.subr.bf16.mxu1 %v4899_v9  ;;  %v4935_v9 = vld [vmem:[%s6752_s2 + $0x964] ss:$8 sps:$4 sm:$0xff]  }
  0xff   : > { %3544 = vmatpush2.bf16.msra.mxu0 %v4894_v10  ;;  %v4930_v10 = vld [vmem:[%s6752_s2 + $0x860] ss:$8 sps:$4 sm:$0xff]  }
 0x100   : > { %3545 = vmatprep.subr.bf16.mxu0 %v4902_v12 }
 0x101   : > { %3585 = vmatpush2.bf16.msra.mxu1 %v4897_v13  ;;  %v4938_v13 = vld [vmem:[%s6752_s2 + $0x854] ss:$8 sps:$4 sm:$0xff]  }
 0x102   : > { %3586 = vmatprep.subr.bf16.mxu1 %v4905_v56 }
 0x103   : > { %3546 = vmatpush2.bf16.msra.mxu0 %v4900_v20 }
 0x104   : > { %3547 = vmatprep.subr.bf16.mxu0 %v4908_v25 }
 0x105   : > { %3587 = vmatpush2.bf16.msra.mxu1 %v4903_v54 }
 0x106   : > { %3588 = vmatprep.subr.bf16.mxu1 %v4911_v60  ;;  %v4948_v60 = vld [vmem:[%s6752_s2 + $0x830] ss:$8 sps:$4 sm:$0xff]  }
 0x107   : > { %3548 = vmatpush2.bf16.msra.mxu0 %v4906_v2  ;;  %v4959_v2 = vld [vmem:[%s6752_s2 + $0x924] ss:$8 sps:$4 sm:$0xff]  }
 0x108   : > { %3549 = vmatprep.subr.bf16.mxu0 %v4914_v36  ;;  %v4957_v36 = vld [vmem:[%s6752_s2 + $0x920] ss:$8 sps:$4 sm:$0xff]  }
 0x109   : > { %3589 = vmatpush2.bf16.msra.mxu1 %v4909_v11  ;;  %v4968_v11 = vld [vmem:[%s6752_s2 + $0x804] ss:$8 sps:$4 sm:$0xff]  }
 0x10a   : > { %3590 = vmatprep.subr.bf16.mxu1 %v4917_v42  ;;  %v4971_v42 = vld [vmem:[%s6752_s2 + $0x904] ss:$8 sps:$4 sm:$0xff]  }
 0x10b   : > { %3550 = vmatpush2.bf16.msra.mxu0 %v4912_v46  ;;  %v4969_v46 = vld [vmem:[%s6752_s2 + $0x900] ss:$8 sps:$4 sm:$0xff]  }
 0x10c   : > { %3551 = vmatprep.subr.bf16.mxu0 %v4920_v50  ;;  %v4977_v50 = vld [vmem:[%s6752_s2 + $0x9f4] ss:$8 sps:$4 sm:$0xff]  }
 0x10d   : > { %3591 = vmatpush2.bf16.msra.mxu1 %v4915_v52  ;;  %v4972_v52 = vld [vmem:[%s6752_s2 + $0x8f0] ss:$8 sps:$4 sm:$0xff]  }
 0x10e   : > { %3592 = vmatprep.subr.bf16.mxu1 %v4923_v39  ;;  %v4980_v39 = vld [vmem:[%s6752_s2 + $0x8e4] ss:$8 sps:$4 sm:$0xff]  }
 0x10f   : > { %3552 = vmatpush2.bf16.msra.mxu0 %v4918_v57  ;;  %v4975_v57 = vld [vmem:[%s6752_s2 + $0x9f0] ss:$8 sps:$4 sm:$0xff]  }
 0x110   : > { %3603 = vmatprep.subr.bf16.mxu0 %v4926_v62  ;;  %v4986_v62 = vld [vmem:[%s6752_s2 + $0x8d4] ss:$8 sps:$4 sm:$0xff]  }
 0x111   : > { %3593 = vmatpush2.bf16.msra.mxu1 %v4921_v63  ;;  %v4981_v63 = vld [vmem:[%s6752_s2 + $0x9e0] ss:$8 sps:$4 sm:$0xff]  }
 0x112   : > { %v3309_v8 = vpop.f32.mrf.mxu0  ;;  %3554 = vmatmul.mubr.bf16.vlgmr.msra.gmra.mxu0 %v894_v26  ;;  %3644 = vmatprep.subr.bf16.mxu1 %v4929_v1  ;;  %v4984_v26 = vld [vmem:[%s6752_s2 + $0x8d0] ss:$8 sps:$4 sm:$0xff]   ;;  %v4992_v1 = vld [vmem:[%s6752_s2 + $0x8c4] ss:$8 sps:$4 sm:$0xff]  }
 0x113   : > { %v3310_v44 = vadd.f32 %v3309_v8, %v1304_v40  ;;  %3604 = vmatpush1.bf16.msra.mxu0 %v4924_v31  ;;  %3635 = vmatprep.mubr.bf16.mxu0 %v899_v3  ;;  %v3350_v12 = vpop.f32.mrf.mxu1  ;;  %v4987_v40 = vld [vmem:[%s6752_s2 + $0x9d0] ss:$8 sps:$4 sm:$0xff]   ;;  %v4995_v31 = vld [vmem:[%s6752_s2 + $0x9c4] ss:$8 sps:$4 sm:$0xff]   ;;  %v4990_v3 = vld [vmem:[%s6752_s2 + $0x8c0] ss:$8 sps:$4 sm:$0xff]  }
 0x114   : > { %v3311_v49 = vpop.f32.mrf.mxu0  ;;  %3595 = vmatmul.mubr.bf16.vlgmr.msra.gmra.mxu1 %v896_v4  ;;  %3605 = vmatprep.subr.bf16.mxu0 %v4932_v41  ;;  %v4998_v4 = vld [vmem:[%s6752_s2 + $0x8b4] ss:$8 sps:$4 sm:$0xff]   ;;  %v4993_v41 = vld [vmem:[%s6752_s2 + $0x9c0] ss:$8 sps:$4 sm:$0xff]   ;;  %v4999_v8 = vld [vmem:[%s6752_s2 + $0x9b0] ss:$8 sps:$4 sm:$0xff]  }
 0x115   : > { %v3312_v14 = vadd.f32 %v3311_v49, %v1308_v5  ;;  %v6254_v15 = vadd.f32 %v3350_v12, %v3310_v44  ;;  %3645 = vmatpush1.bf16.msra.mxu1 %v4927_v6  ;;  %3676 = vmatprep.mubr.bf16.mxu1 %v901_v7  ;;  %v3352_v18 = vpop.f32.mrf.mxu1  ;;  %v5001_v5 = vld [vmem:[%s6752_s2 + $0x9b4] ss:$8 sps:$4 sm:$0xff]   ;;  %v4996_v6 = vld [vmem:[%s6752_s2 + $0x8b0] ss:$8 sps:$4 sm:$0xff]   ;;  %v5004_v7 = vld [vmem:[%s6752_s2 + $0x8a4] ss:$8 sps:$4 sm:$0xff]  }
 0x116   : > { %v3313_v56 = vpop.f32.mrf.mxu0  ;;  %3646 = vmatprep.subr.bf16.mxu1 %v4935_v9  ;;  %v739_v9 = vmax.f32 %v6200_v51, 0.0  ;;  %v5007_v44 = vld [vmem:[%s6752_s2 + $0x9a4] ss:$8 sps:$4 sm:$0xff]   ;;  %v5010_v49 = vld [vmem:[%s6752_s2 + $0x894] ss:$8 sps:$4 sm:$0xff]  }
 0x117   : > { %v6262_v20 = vadd.f32 %v3352_v18, %v3312_v14  ;;  %3606 = vmatpush1.bf16.msra.mxu0 %v4930_v10  ;;  %v3354_v25 = vpop.f32.mrf.mxu1  ;;  %v5002_v10 = vld [vmem:[%s6752_s2 + $0x8a0] ss:$8 sps:$4 sm:$0xff]   ;;  %v5008_v14 = vld [vmem:[%s6752_s2 + $0x890] ss:$8 sps:$4 sm:$0xff]  }
 0x118   : > { %v3314_v22 = vpop.f32.mrf.mxu0  ;;  %3607 = vmatprep.subr.bf16.mxu0 %v4938_v13  ;;  %v5005_v51 = vld [vmem:[%s6752_s2 + $0x9a0] ss:$8 sps:$4 sm:$0xff]   ;;  %v833_v12 = vcombine.high %v739_v9, %v739_v9  ;;  %v5013_v13 = vld [vmem:[%s6752_s2 + $0x994] ss:$8 sps:$4 sm:$0xff]   ;;  %v5011_v56 = vld [vmem:[%s6752_s2 + $0x990] ss:$8 sps:$4 sm:$0xff]  }
 0x119   : > { %3647 = vmatpush1.bf16.msra.mxu1 %v4933_v16  ;;  %v3355_v54 = vpop.f32.mrf.mxu1  ;;  %v6413_v16 = vrot.slane %v739_v9, %v5394_v59  ;;  %v5014_v22 = vld [vmem:[%s6752_s2 + $0x880] ss:$8 sps:$4 sm:$0xff]   ;;  %v5067_v9 = vld [vmem:[%s6752_s2 + $0xb04] ss:$8 sps:$4 sm:$0xff]  }
 0x11a   : > { %3648 = vmatprep.subr.bf16.mxu1 %v4941_v17  ;;  %v5016_v17 = vld [vmem:[%s6752_s2 + $0x884] ss:$8 sps:$4 sm:$0xff]   ;;  %v6422_v18 = vrot.slane %v833_v12, %v5394_v59  ;;  %v5017_v25 = vld [vmem:[%s6752_s2 + $0x980] ss:$8 sps:$4 sm:$0xff]   ;;  %v5025_v54 = vld [vmem:[%s6752_s2 + $0xb74] ss:$8 sps:$4 sm:$0xff]  }
 0x11b   : > { %3608 = vmatpush1.bf16.msra.mxu0 %v4936_v21  ;;  %v5019_v21 = vld [vmem:[%s6752_s2 + $0x984] ss:$8 sps:$4 sm:$0xff]   ;;  %v5068_v12 = vld [vmem:[%s6752_s2 + $0xaf0] ss:$8 sps:$4 sm:$0xff]  }
 0x11c   : > { %3609 = vmatprep.subr.bf16.mxu0 %v4944_v24  ;;  %v5022_v24 = vld [vmem:[%s6752_s2 + $0xa74] ss:$8 sps:$4 sm:$0xff]  }
 0x11d   : > { %3649 = vmatpush1.bf16.msra.mxu1 %v4939_v23  ;;  %v848_v23 = vcombine.high %v6413_v16, %v6413_v16 }
 0x11e   : > { %3650 = vmatprep.subr.bf16.mxu1 %v4947_v28  ;;  %v898_v28 = vpack.c.bf16 %v6195_v47, %v6195_v47  ;;  %v5023_v47 = vld [vmem:[%s6752_s2 + $0xb70] ss:$8 sps:$4 sm:$0xff]  }
 0x11f   : > { %3610 = vmatpush1.bf16.msra.mxu0 %v4942_v27  ;;  %v849_v27 = vcombine.high %v6422_v18, %v6422_v18 }
 0x120   : > { %3611 = vmatprep.subr.bf16.mxu0 %v4950_v55  ;;  %v903_v55 = vpack.c.bf16 %v848_v23, %v848_v23  ;;  %v5085_v23 = vld [vmem:[%s6752_s2 + $0xbd4] ss:$8 sps:$4 sm:$0xff]  }
 0x121   : > { %3651 = vmatpush1.bf16.msra.mxu1 %v4945_v29  ;;  %v5020_v29 = vld [vmem:[%s6752_s2 + $0xa70] ss:$8 sps:$4 sm:$0xff]  }
 0x122   : > { %3652 = vmatprep.subr.bf16.mxu1 %v4953_v30  ;;  %v900_v30 = vpack.c.bf16 %v6206_v53, %v6206_v53  ;;  %v5026_v53 = vld [vmem:[%s6752_s2 + $0xa60] ss:$8 sps:$4 sm:$0xff]  }
 0x123   : > { %3612 = vmatpush1.bf16.msra.mxu0 %v4948_v60  ;;  %v5028_v60 = vld [vmem:[%s6752_s2 + $0xa64] ss:$8 sps:$4 sm:$0xff]  }
 0x124   : > { %3613 = vmatprep.subr.bf16.mxu0 %v4956_v34 }
 0x125   : > { %3653 = vmatpush1.bf16.msra.mxu1 %v4951_v32  ;;  %v905_v32 = vpack.c.bf16 %v849_v27, %v849_v27  ;;  %v5083_v27 = vld [vmem:[%s6752_s2 + $0xbd0] ss:$8 sps:$4 sm:$0xff]  }
 0x126   : > { %3654 = vmatprep.subr.bf16.mxu1 %v4959_v2  ;;  %v5031_v2 = vld [vmem:[%s6752_s2 + $0xb64] ss:$8 sps:$4 sm:$0xff]  }
 0x127   : > { %3614 = vmatpush1.bf16.msra.mxu0 %v4954_v33 }
 0x128   : > { %3615 = vmatprep.subr.bf16.mxu0 %v4962_v35 }
 0x129   : > { %3655 = vmatpush1.bf16.msra.mxu1 %v4957_v36 }
 0x12a   : > { %3656 = vmatprep.subr.bf16.mxu1 %v4965_v37  ;;  %v5034_v37 = vld [vmem:[%s6752_s2 + $0xa54] ss:$8 sps:$4 sm:$0xff]  }
 0x12b   : > { %3616 = vmatpush1.bf16.msra.mxu0 %v4960_v38 }
 0x12c   : > { %3617 = vmatprep.subr.bf16.mxu0 %v4968_v11 }
 0x12d   : > { %3657 = vmatpush1.bf16.msra.mxu1 %v4963_v19 }
 0x12e   : > { %3658 = vmatprep.subr.bf16.mxu1 %v4971_v42 }
 0x12f   : > { %3618 = vmatpush1.bf16.msra.mxu0 %v4966_v43  ;;  %v5037_v43 = vld [vmem:[%s6752_s2 + $0xb54] ss:$8 sps:$4 sm:$0xff]  }
 0x130   : > { %3619 = vmatprep.subr.bf16.mxu0 %v4974_v45 }
 0x131   : > { %3659 = vmatpush1.bf16.msra.mxu1 %v4969_v46 }
 0x132   : > { %3660 = vmatprep.subr.bf16.mxu1 %v4977_v50  ;;  %v5040_v50 = vld [vmem:[%s6752_s2 + $0xa44] ss:$8 sps:$4 sm:$0xff]  }
 0x133   : > { %3620 = vmatpush2.bf16.msra.mxu0 %v4972_v52 }
 0x134   : > { %3621 = vmatprep.subr.bf16.mxu0 %v4980_v39  ;;  %v5035_v39 = vld [vmem:[%s6752_s2 + $0xb50] ss:$8 sps:$4 sm:$0xff]  }
 0x135   : > { %3661 = vmatpush2.bf16.msra.mxu1 %v4975_v57  ;;  %v5043_v57 = vld [vmem:[%s6752_s2 + $0xb44] ss:$8 sps:$4 sm:$0xff]  }
 0x136   : > { %3662 = vmatprep.subr.bf16.mxu1 %v4983_v58 }
 0x137   : > { %3622 = vmatpush2.bf16.msra.mxu0 %v4978_v61  ;;  %v5038_v61 = vld [vmem:[%s6752_s2 + $0xa40] ss:$8 sps:$4 sm:$0xff]  }
 0x138   : > { %3623 = vmatprep.subr.bf16.mxu0 %v4986_v62  ;;  %v5046_v62 = vld [vmem:[%s6752_s2 + $0xa34] ss:$8 sps:$4 sm:$0xff]  }
 0x139   : > { %3663 = vmatpush2.bf16.msra.mxu1 %v4981_v63  ;;  %v5041_v63 = vld [vmem:[%s6752_s2 + $0xb40] ss:$8 sps:$4 sm:$0xff]  }
 0x13a   : > { %3664 = vmatprep.subr.bf16.mxu1 %v4989_v0  ;;  %v5049_v0 = vld [vmem:[%s6752_s2 + $0xb34] ss:$8 sps:$4 sm:$0xff]  }
 0x13b   : > { %3624 = vmatpush2.bf16.msra.mxu0 %v4984_v26  ;;  %v5044_v26 = vld [vmem:[%s6752_s2 + $0xa30] ss:$8 sps:$4 sm:$0xff]  }
 0x13c   : > { %3625 = vmatprep.subr.bf16.mxu0 %v4992_v1  ;;  %v5052_v1 = vld [vmem:[%s6752_s2 + $0xa24] ss:$8 sps:$4 sm:$0xff]  }
 0x13d   : > { %3665 = vmatpush2.bf16.msra.mxu1 %v4987_v40  ;;  %v5047_v40 = vld [vmem:[%s6752_s2 + $0xb30] ss:$8 sps:$4 sm:$0xff]  }
 0x13e   : > { %3666 = vmatprep.subr.bf16.mxu1 %v4995_v31  ;;  %v5055_v31 = vld [vmem:[%s6752_s2 + $0xb24] ss:$8 sps:$4 sm:$0xff]  }
 0x13f   : > { %3626 = vmatpush2.bf16.msra.mxu0 %v4990_v3  ;;  %v5050_v3 = vld [vmem:[%s6752_s2 + $0xa20] ss:$8 sps:$4 sm:$0xff]  }
 0x140   : > { %3627 = vmatprep.subr.bf16.mxu0 %v4998_v4  ;;  %v5058_v4 = vld [vmem:[%s6752_s2 + $0xa14] ss:$8 sps:$4 sm:$0xff]  }
 0x141   : > { %3667 = vmatpush2.bf16.msra.mxu1 %v4993_v41  ;;  %v5053_v41 = vld [vmem:[%s6752_s2 + $0xb20] ss:$8 sps:$4 sm:$0xff]  }
 0x142   : > { %3668 = vmatprep.subr.bf16.mxu1 %v5001_v5  ;;  %v5061_v5 = vld [vmem:[%s6752_s2 + $0xb14] ss:$8 sps:$4 sm:$0xff]  }
 0x143   : > { %3628 = vmatpush2.bf16.msra.mxu0 %v4996_v6  ;;  %v5056_v6 = vld [vmem:[%s6752_s2 + $0xa10] ss:$8 sps:$4 sm:$0xff]  }
 0x144   : > { %3629 = vmatprep.subr.bf16.mxu0 %v5004_v7  ;;  %v5064_v7 = vld [vmem:[%s6752_s2 + $0xa04] ss:$8 sps:$4 sm:$0xff]  }
 0x145   : > { %3669 = vmatpush2.bf16.msra.mxu1 %v4999_v8  ;;  %v5059_v8 = vld [vmem:[%s6752_s2 + $0xb10] ss:$8 sps:$4 sm:$0xff]  }
 0x146   : > { %3670 = vmatprep.subr.bf16.mxu1 %v5007_v44  ;;  %v5062_v44 = vld [vmem:[%s6752_s2 + $0xa00] ss:$8 sps:$4 sm:$0xff]  }
 0x147   : > { %3630 = vmatpush2.bf16.msra.mxu0 %v5002_v10  ;;  %v5070_v10 = vld [vmem:[%s6752_s2 + $0xaf4] ss:$8 sps:$4 sm:$0xff]  }
 0x148   : > { %3631 = vmatprep.subr.bf16.mxu0 %v5010_v49  ;;  %v5065_v49 = vld [vmem:[%s6752_s2 + $0xb00] ss:$8 sps:$4 sm:$0xff]  }
 0x149   : > { %3671 = vmatpush2.bf16.msra.mxu1 %v5005_v51  ;;  %v5073_v51 = vld [vmem:[%s6752_s2 + $0xbf4] ss:$8 sps:$4 sm:$0xff]  }
 0x14a   : > { %3672 = vmatprep.subr.bf16.mxu1 %v5013_v13  ;;  %v5076_v13 = vld [vmem:[%s6752_s2 + $0xae4] ss:$8 sps:$4 sm:$0xff]  }
 0x14b   : > { %3632 = vmatpush2.bf16.msra.mxu0 %v5008_v14  ;;  %v5071_v14 = vld [vmem:[%s6752_s2 + $0xbf0] ss:$8 sps:$4 sm:$0xff]  }
 0x14c   : > { %3633 = vmatprep.subr.bf16.mxu0 %v5016_v17  ;;  %v5079_v17 = vld [vmem:[%s6752_s2 + $0xbe4] ss:$8 sps:$4 sm:$0xff]  }
 0x14d   : > { %3673 = vmatpush2.bf16.msra.mxu1 %v5011_v56  ;;  %v5074_v56 = vld [vmem:[%s6752_s2 + $0xae0] ss:$8 sps:$4 sm:$0xff]  }
 0x14e   : > { %3674 = vmatprep.subr.bf16.mxu1 %v5019_v21  ;;  %v5082_v21 = vld [vmem:[%s6752_s2 + $0xad4] ss:$8 sps:$4 sm:$0xff]  }
 0x14f   : > { %3634 = vmatpush2.bf16.msra.mxu0 %v5014_v22  ;;  %v5077_v22 = vld [vmem:[%s6752_s2 + $0xbe0] ss:$8 sps:$4 sm:$0xff]  }
 0x150   : > { %3685 = vmatprep.subr.bf16.mxu0 %v5022_v24  ;;  %v5080_v24 = vld [vmem:[%s6752_s2 + $0xad0] ss:$8 sps:$4 sm:$0xff]  }
 0x151   : > { %3675 = vmatpush2.bf16.msra.mxu1 %v5017_v25  ;;  %v5088_v25 = vld [vmem:[%s6752_s2 + $0xac4] ss:$8 sps:$4 sm:$0xff]  }
 0x152   : > { %v3391_v34 = vpop.f32.mrf.mxu0  ;;  %3636 = vmatmul.mubr.bf16.vlgmr.msra.gmra.mxu0 %v898_v28  ;;  %3726 = vmatprep.subr.bf16.mxu1 %v5025_v54  ;;  %v5091_v28 = vld [vmem:[%s6752_s2 + $0xbc4] ss:$8 sps:$4 sm:$0xff]   ;;  %v5086_v54 = vld [vmem:[%s6752_s2 + $0xac0] ss:$8 sps:$4 sm:$0xff]  }
 0x153   : > { %v3392_v33 = vadd.f32 %v3391_v34, %v6254_v15  ;;  %3686 = vmatpush1.bf16.msra.mxu0 %v5020_v29  ;;  %3717 = vmatprep.mubr.bf16.mxu0 %v903_v55  ;;  %v3432_v36 = vpop.f32.mrf.mxu1  ;;  %v5029_v15 = vld [vmem:[%s6752_s2 + $0xb60] ss:$8 sps:$4 sm:$0xff]   ;;  %v5094_v29 = vld [vmem:[%s6752_s2 + $0xab4] ss:$8 sps:$4 sm:$0xff]   ;;  %v5103_v34 = vld [vmem:[%s6752_s2 + $0xba4] ss:$8 sps:$4 sm:$0xff]  }
 0x154   : > { %v3393_v35 = vpop.f32.mrf.mxu0  ;;  %3677 = vmatmul.mubr.bf16.vlgmr.msra.gmra.mxu1 %v900_v30  ;;  %3687 = vmatprep.subr.bf16.mxu0 %v5028_v60  ;;  %v5089_v55 = vld [vmem:[%s6752_s2 + $0xbc0] ss:$8 sps:$4 sm:$0xff]   ;;  %v5097_v30 = vld [vmem:[%s6752_s2 + $0xbb4] ss:$8 sps:$4 sm:$0xff]   ;;  %v5092_v60 = vld [vmem:[%s6752_s2 + $0xab0] ss:$8 sps:$4 sm:$0xff]  }
 0x155   : > { %v3394_v38 = vadd.f32 %v3393_v35, %v6262_v20  ;;  %v6467_v11 = vadd.f32 %v3432_v36, %v3392_v33  ;;  %3727 = vmatpush1.bf16.msra.mxu1 %v5023_v47  ;;  %3758 = vmatprep.mubr.bf16.mxu1 %v905_v32  ;;  %v3434_v42 = vpop.f32.mrf.mxu1  ;;  %v5032_v20 = vld [vmem:[%s6752_s2 + $0xa50] ss:$8 sps:$4 sm:$0xff]   ;;  %v5100_v47 = vld [vmem:[%s6752_s2 + $0xaa4] ss:$8 sps:$4 sm:$0xff]   ;;  %v5101_v35 = vld [vmem:[%s6752_s2 + $0xba0] ss:$8 sps:$4 sm:$0xff]  }
 0x156   : > { %v3395_v19 = vpop.f32.mrf.mxu0  ;;  %3728 = vmatprep.subr.bf16.mxu1 %v5031_v2  ;;  %v5095_v32 = vld [vmem:[%s6752_s2 + $0xbb0] ss:$8 sps:$4 sm:$0xff]   ;;  %v5098_v2 = vld [vmem:[%s6752_s2 + $0xaa0] ss:$8 sps:$4 sm:$0xff]  }
 0x157   : > { %v6475_v45 = vadd.f32 %v3434_v42, %v3394_v38  ;;  %3688 = vmatpush1.bf16.msra.mxu0 %v5026_v53  ;;  %v3436_v52 = vpop.f32.mrf.mxu1  ;;  %v4077_v33 = vld [vmem:[%s6751_s1 + $0x30] ss:$2 sm:$0x1]  ;;  %v5106_v53 = vld [vmem:[%s6752_s2 + $0xa94] ss:$8 sps:$4 sm:$0xff]  }
 0x158   : > { %v3396_v46 = vpop.f32.mrf.mxu0  ;;  %3689 = vmatprep.subr.bf16.mxu0 %v5034_v37  ;;  %v5104_v36 = vld [vmem:[%s6752_s2 + $0xa90] ss:$8 sps:$4 sm:$0xff]   ;;  %v5109_v37 = vld [vmem:[%s6752_s2 + $0xb94] ss:$8 sps:$4 sm:$0xff]   ;;  %v375_v38 = vrot.slane %v4077_v33, %v5367_v48  ;;  %v5112_v42 = vld [vmem:[%s6752_s2 + $0xa84] ss:$8 sps:$4 sm:$0xff]  }
 0x159   : > { %3729 = vmatpush1.bf16.msra.mxu1 %v5029_v15  ;;  %v3437_v58 = vpop.f32.mrf.mxu1  ;;  %v257_v15 = vld [vmem:[%s5235_s27 + $0x18] sm:$0x1]  ;;  %v4081_v19 = vld [vmem:[%s6751_s1 + $0x31] ss:$2 sm:$0x1] }
 0x15a   : > { %3730 = vmatprep.subr.bf16.mxu1 %v5037_v43  ;;  %v5107_v43 = vld [vmem:[%s6752_s2 + $0xb90] ss:$8 sps:$4 sm:$0xff]   ;;  %v264_v46 = vunpack.c.l.bf16 %v257_v15  ;;  %v610_v52 = vrot.slane %v4081_v19, %v5367_v48  ;;  %v5113_v58 = vld [vmem:[%s6752_s2 + $0xb80] ss:$8 sps:$4 sm:$0xff]  }
 0x15b   : > { %3690 = vmatpush1.bf16.msra.mxu0 %v5032_v20  ;;  %v5115_v20 = vld [vmem:[%s6752_s2 + $0xb84] ss:$8 sps:$4 sm:$0xff]   ;;  %v5136_v33 = vld [vmem:[%s6754_s4 + $0x58] sm:$0xff]  }
 0x15c   : > { %3691 = vmatprep.subr.bf16.mxu0 %v5040_v50  ;;  %v484_v50 = vrot.slane %v375_v38, %v5394_v59  ;;  %v5140_v38 = vld [vmem:[%s6754_s4 + $0x48] sm:$0xff]   ;;  %v5142_v19 = vld [vmem:[%s6754_s4 + $0x40] sm:$0xff]  }
 0x15d   : > { %3731 = vmatpush1.bf16.msra.mxu1 %v5035_v39  ;;  %v5110_v39 = vld [vmem:[%s6752_s2 + $0xa80] ss:$8 sps:$4 sm:$0xff]  }
 0x15e   : > { %3732 = vmatprep.subr.bf16.mxu1 %v5043_v57  ;;  %v5118_v57 = vld [vmem:[%s6752_s2 + $0xc34] ss:$8 sps:$4 sm:$0xff]   ;;  %v498_v48 = vmul.f32 %v484_v50, %v264_v46  ;;  %v5141_v15 = vld [vmem:[%s6754_s4 + $0x8] sm:$0xff]  }
 0x15f   : > { %3692 = vmatpush1.bf16.msra.mxu0 %v5038_v61  ;;  %v902_v61 = vpack.c.bf16 %v6413_v16, %v6413_v16 }
 0x160   : > { %3693 = vmatprep.subr.bf16.mxu0 %v5046_v62  ;;  %v719_v62 = vrot.slane %v610_v52, %v5394_v59 }
 0x161   : > { %3733 = vmatpush1.bf16.msra.mxu1 %v5041_v63  ;;  %v5116_v63 = vld [vmem:[%s6752_s2 + $0xc30] ss:$8 sps:$4 sm:$0xff]  }
 0x162   : > { %3734 = vmatprep.subr.bf16.mxu1 %v5049_v0  ;;  %v904_v0 = vpack.c.bf16 %v6422_v18, %v6422_v18  ;;  %v733_v16 = vadd.f32 %v719_v62, %v498_v48  ;;  %v5124_v18 = vld [vmem:[%s6752_s2 + $0xc14] ss:$8 sps:$4 sm:$0xff]  }
 0x163   : > { %3694 = vmatpush1.bf16.msra.mxu0 %v5044_v26  ;;  %v5121_v26 = vld [vmem:[%s6752_s2 + $0xc24] ss:$8 sps:$4 sm:$0xff]  }
 0x164   : > { %3695 = vmatprep.subr.bf16.mxu0 %v5052_v1 }
 0x165   : > { %3735 = vmatpush1.bf16.msra.mxu1 %v5047_v40 }
 0x166   : > { %3736 = vmatprep.subr.bf16.mxu1 %v5055_v31  ;;  %v5119_v31 = vld [vmem:[%s6752_s2 + $0xc20] ss:$8 sps:$4 sm:$0xff]  }
 0x167   : > { %3696 = vmatpush1.bf16.msra.mxu0 %v5050_v3  ;;  %v5182_v3 = vmov 0  }
 0x168   : > { %3697 = vmatprep.subr.bf16.mxu0 %v5058_v4 }
 0x169   : > { %3737 = vmatpush1.bf16.msra.mxu1 %v5053_v41 }
 0x16a   : > { %3738 = vmatprep.subr.bf16.mxu1 %v5061_v5 }
 0x16b   : > { %3698 = vmatpush1.bf16.msra.mxu0 %v5056_v6 }
 0x16c   : > { %3699 = vmatprep.subr.bf16.mxu0 %v5064_v7 }
 0x16d   : > { %3739 = vmatpush1.bf16.msra.mxu1 %v5059_v8  ;;  %v740_v8 = vmax.f32 %v733_v16, 0.0 }
 0x16e   : > { %3740 = vmatprep.subr.bf16.mxu1 %v5067_v9 }
 0x16f   : > { %3700 = vmatpush1.bf16.msra.mxu0 %v5062_v44  ;;  %v5122_v44 = vld [vmem:[%s6752_s2 + $0xc10] ss:$8 sps:$4 sm:$0xff]  }
 0x170   : > { %3701 = vmatprep.subr.bf16.mxu0 %v5070_v10 }
 0x171   : > { %3741 = vmatpush1.bf16.msra.mxu1 %v5065_v49  ;;  %v5127_v49 = vld [vmem:[%s6752_s2 + $0xc04] ss:$8 sps:$4 sm:$0xff]  }
 0x172   : > { %3742 = vmatprep.subr.bf16.mxu1 %v5073_v51 }
 0x173   : > { %3702 = vmatpush2.bf16.msra.mxu0 %v5068_v12 }
 0x174   : > { %3703 = vmatprep.subr.bf16.mxu0 %v5076_v13  ;;  %v5128_v13 = vld [vmem:[%s6754_s4 + $0x78] sm:$0xff]  }
 0x175   : > { %3743 = vmatpush2.bf16.msra.mxu1 %v5071_v14  ;;  %v5129_v14 = vld [vmem:[%s6754_s4 + $0x38] sm:$0xff]  }
 0x176   : > { %3744 = vmatprep.subr.bf16.mxu1 %v5079_v17  ;;  %v5130_v17 = vld [vmem:[%s6754_s4 + $0x70] sm:$0xff]  }
 0x177   : > { %3704 = vmatpush2.bf16.msra.mxu0 %v5074_v56  ;;  %v5125_v56 = vld [vmem:[%s6752_s2 + $0xc00] ss:$8 sps:$4 sm:$0xff]  }
 0x178   : > { %3705 = vmatprep.subr.bf16.mxu0 %v5082_v21  ;;  %v5131_v21 = vld [vmem:[%s6754_s4 + $0x30] sm:$0xff]  }
 0x179   : > { %3745 = vmatpush2.bf16.msra.mxu1 %v5077_v22 }
 0x17a   : > { %3746 = vmatprep.subr.bf16.mxu1 %v5085_v23 }
 0x17b   : > { %3706 = vmatpush2.bf16.msra.mxu0 %v5080_v24  ;;  %v5132_v24 = vld [vmem:[%s6754_s4 + $0x68] sm:$0xff]  }
 0x17c   : > { %3707 = vmatprep.subr.bf16.mxu0 %v5088_v25 }
 0x17d   : > { %3747 = vmatpush2.bf16.msra.mxu1 %v5083_v27 }
 0x17e   : > { %3748 = vmatprep.subr.bf16.mxu1 %v5091_v28  ;;  %v5133_v28 = vld [vmem:[%s6754_s4 + $0x28] sm:$0xff]  }
 0x17f   : > { %3708 = vmatpush2.bf16.msra.mxu0 %v5086_v54 }
 0x180   : > { %3709 = vmatprep.subr.bf16.mxu0 %v5094_v29 }
 0x181   : > { %3749 = vmatpush2.bf16.msra.mxu1 %v5089_v55 }
 0x182   : > { %3750 = vmatprep.subr.bf16.mxu1 %v5097_v30 }
 0x183   : > { %3710 = vmatpush2.bf16.msra.mxu0 %v5092_v60 }
 0x184   : > { %3711 = vmatprep.subr.bf16.mxu0 %v5100_v47  ;;  %v5134_v47 = vld [vmem:[%s6754_s4 + $0x60] sm:$0xff]  }
 0x185   : > { %3751 = vmatpush2.bf16.msra.mxu1 %v5095_v32 }
 0x186   : > { %3752 = vmatprep.subr.bf16.mxu1 %v5103_v34 }
 0x187   : > { %3712 = vmatpush2.bf16.msra.mxu0 %v5098_v2  ;;  %v5135_v2 = vld [vmem:[%s6754_s4 + $0x20] sm:$0xff]  }
 0x188   : > { %3713 = vmatprep.subr.bf16.mxu0 %v5106_v53 }
 0x189   : > { %3753 = vmatpush2.bf16.msra.mxu1 %v5101_v35  ;;  %v5137_v35 = vld [vmem:[%s6754_s4 + $0x18] sm:$0xff]  }
 0x18a   : > { %3754 = vmatprep.subr.bf16.mxu1 %v5109_v37  ;;  %v5139_v37 = vld [vmem:[%s6754_s4 + $0x10] sm:$0xff]  }
 0x18b   : > { %3714 = vmatpush2.bf16.msra.mxu0 %v5104_v36  ;;  %v5138_v36 = vld [vmem:[%s6754_s4 + $0x50] sm:$0xff]  }
 0x18c   : > { %3715 = vmatprep.subr.bf16.mxu0 %v5112_v42  ;;  %v5143_v42 = vld [vmem:[%s6754_s4] sm:$0xff]  }
 0x18d   : > { %3755 = vmatpush2.bf16.msra.mxu1 %v5107_v43 }
 0x18e   : > { %3756 = vmatprep.subr.bf16.mxu1 %v5115_v20 }
 0x18f   : > { %3716 = vmatpush2.bf16.msra.mxu0 %v5110_v39 }
 0x190   : > { %3775 = vmatprep.subr.bf16.mxu0 %v5118_v57 }
 0x191   : > { %3757 = vmatpush2.bf16.msra.mxu1 %v5113_v58 }
 0x192   : > { %v3473_v1 = vpop.f32.mrf.mxu0  ;;  %3718 = vmatmul.mubr.bf16.vlgmr.msra.gmra.mxu0 %v902_v61  ;;  %4497 = vmatprep.subr.bf16.mxu1 %v5128_v13 }
 0x193   : > { %v3474_v40 = vadd.f32 %v3473_v1, %v6467_v11  ;;  %3776 = vmatpush1.bf16.msra.mxu0 %v5116_v63  ;;  %3799 = vmatprep.mubr.bf16.mxu0 %v5182_v3 }
 0x194   : > { %v3475_v4 = vpop.f32.mrf.mxu0  ;;  %v3514_v41 = vpop.f32.mrf.mxu1  ;;  %3759 = vmatmul.mubr.bf16.vlgmr.msra.gmra.mxu1 %v904_v0  ;;  %3777 = vmatprep.subr.bf16.mxu0 %v5121_v26 }
 0x195   : > { %v3476_v5 = vadd.f32 %v3475_v4, %v6475_v45  ;;  %v3515_v6 = vadd.f32 %v3514_v41, %v3474_v40  ;;  %v856_v45 = vrot.slane %v740_v8, %v5394_v59  ;;  %4498 = vmatpush3.bf16.msra.mxu1 %v5129_v14 }
 0x196   : > { %v3477_v7 = vpop.f32.mrf.mxu0  ;;  %v3516_v11 = vpop.f32.mrf.mxu1  ;;  %4499 = vmatprep.subr.bf16.mxu1 %v5130_v17 }
 0x197   : > { %v3517_v9 = vadd.f32 %v3516_v11, %v3476_v5  ;;  %3778 = vmatpush1.bf16.msra.mxu0 %v5119_v31  ;;  %v906_v59 = vpack.c.bf16 %v856_v45, %v856_v45 }
 0x198   : > { %v3478_v10 = vpop.f32.mrf.mxu0  ;;  %3779 = vmatprep.subr.bf16.mxu0 %v5124_v18  ;;  %v3518_v51 = vpop.f32.mrf.mxu1 }
 0x199   : > { %4500 = vmatpush3.bf16.msra.mxu1 %v5131_v21 }
 0x19a   : > { %v3519_v12 = vpop.f32.mrf.mxu1  ;;  %4501 = vmatprep.subr.bf16.mxu1 %v5132_v24 }
 0x19b   : > { %3780 = vmatpush1.bf16.msra.mxu0 %v5122_v44 }
 0x19c   : > { %3781 = vmatprep.subr.bf16.mxu0 %v5127_v49 }
 0x19d   : > { %4502 = vmatpush3.bf16.msra.mxu1 %v5133_v28 }
 0x19e   : > { %4503 = vmatprep.subr.bf16.mxu1 %v5134_v47 }
 0x19f   : > { %3782 = vmatpush1.bf16.msra.mxu0 %v5125_v56  ;;  %v4475_v56 = vld [vmem:[%s6755_s5] ss:$0 sm:$0xff] }
 0x1a1   : > { %4504 = vmatpush3.bf16.msra.mxu1 %v5135_v2 }
 0x1a2   : > { %4474 = vmatmul.mubr.msk.bf16.vlgmr.msra.gmra.mxu0 %vm3271_vm0, %v906_v59  ;;  %4505 = vmatprep.subr.bf16.mxu1 %v5136_v33 }
 0x1a5   : > { %4506 = vmatpush3.bf16.msra.mxu1 %v5137_v35 }
 0x1a6   : > { %4507 = vmatprep.subr.bf16.mxu1 %v5138_v36 }
 0x1a9   : > { %4508 = vmatpush3.bf16.msra.mxu1 %v5139_v37 }
 0x1aa   : > { %4509 = vmatprep.subr.bf16.mxu1 %v5140_v38 }
 0x1ad   : > { %4510 = vmatpush3.bf16.msra.mxu1 %v5141_v15 }
 0x1ae   : > { %4511 = vmatprep.subr.bf16.mxu1 %v5142_v19 }
 0x1b1   : > { %4512 = vmatpush3.bf16.msra.mxu1 %v5143_v42 }
 0x1d2   : > { %v3555_v22 = vpop.f32.mrf.mxu0 }
 0x1d3   : > { %v3556_v23 = vadd.f32 %v3555_v22, %v3515_v6 }
 0x1d4   : > { %v3557_v25 = vpop.f32.mrf.mxu0  ;;  %v3596_v27 = vpop.f32.mrf.mxu1 }
 0x1d5   : > { %v3558_v54 = vadd.f32 %v3557_v25, %v3517_v9  ;;  %v3597_v29 = vadd.f32 %v3596_v27, %v3556_v23 }
 0x1d6   : > { %v3559_v55 = vpop.f32.mrf.mxu0  ;;  %v3598_v30 = vpop.f32.mrf.mxu1 }
 0x1d7   : > { %v3599_v60 = vadd.f32 %v3598_v30, %v3558_v54 }
 0x1d8   : > { %v3560_v32 = vpop.f32.mrf.mxu0  ;;  %v3600_v34 = vpop.f32.mrf.mxu1 }
 0x1da   : > { %v3601_v53 = vpop.f32.mrf.mxu1 }
 0x212   : > { %v3637_v43 = vpop.f32.mrf.mxu0 }
 0x213   : > { %v3638_v20 = vadd.f32 %v3637_v43, %v3597_v29 }
 0x214   : > { %v3639_v46 = vpop.f32.mrf.mxu0  ;;  %v3678_v50 = vpop.f32.mrf.mxu1 }
 0x215   : > { %v3640_v52 = vadd.f32 %v3639_v46, %v3599_v60  ;;  %v3679_v39 = vadd.f32 %v3678_v50, %v3638_v20 }
 0x216   : > { %v3641_v57 = vpop.f32.mrf.mxu0  ;;  %v3680_v58 = vpop.f32.mrf.mxu1 }
 0x217   : > { %v3681_v61 = vadd.f32 %v3680_v58, %v3640_v52 }
 0x218   : > { %v3642_v48 = vpop.f32.mrf.mxu0  ;;  %v3682_v62 = vpop.f32.mrf.mxu1 }
 0x21a   : > { %v3683_v63 = vpop.f32.mrf.mxu1 }
 0x252   : > { %v3719_v0 = vpop.f32.mrf.mxu0 }
 0x253   : > { %v3720_v41 = vadd.f32 %v3719_v0, %v3679_v39 }
 0x254   : > { %v3721_v26 = vpop.f32.mrf.mxu0  ;;  %v3760_v1 = vpop.f32.mrf.mxu1 }
 0x255   : > { %v3722_v18 = vadd.f32 %v3721_v26, %v3681_v61  ;;  %v3761_v5 = vadd.f32 %v3760_v1, %v3720_v41 }
 0x256   : > { %v3723_v16 = vpop.f32.mrf.mxu0  ;;  %v3762_v40 = vpop.f32.mrf.mxu1 }
 0x257   : > { %v3763_v7 = vadd.f32 %v3762_v40, %v3722_v18 }
 0x258   : > { %v3724_v31 = vpop.f32.mrf.mxu0  ;;  %v3764_v3 = vpop.f32.mrf.mxu1 }
 0x25a   : > { %v3765_v4 = vpop.f32.mrf.mxu1 }
 0x262   : > { %v3801_v6 = vpop.f32.mrf.mxu0 }
 0x263   : > { %v3802_v11 = vadd.f32 %v3801_v6, %v3761_v5 }
 0x264   : > { %v3803_v8 = vpop.f32.mrf.mxu0 }
 0x265   : > { %vm3808_vm1 = vcmp.ge.f32.partialorder %v3802_v11, 0.0  ;;  %v3810_v9 = vmul.f32 0.01, %v3802_v11  ;;  %v3804_v44 = vadd.f32 %v3803_v8, %v3763_v7 }
 0x266   : > { %v3805_v10 = vpop.f32.mrf.mxu0 }
 0x267   : > { %vm3809_vm2 = vcmp.ge.f32.partialorder %v3804_v44, 0.0  ;;  %v3811_v49 = vmul.f32 0.01, %v3804_v44  ;;  %v3812_v51 = vsel %vm3808_vm1, %v3802_v11, %v3810_v9 }
 0x268   : > { %v3806_v12 = vpop.f32.mrf.mxu0  ;;  %v3814_v14 = vpack.c.bf16 %v3812_v51, %v3812_v51 }
 0x269   : > { %v3813_v45 = vsel %vm3809_vm2, %v3804_v44, %v3811_v49 }
 0x26a   : > { %v3815_v13 = vpack.c.bf16 %v3813_v45, %v3813_v45 }
 0x26c   : > { %3983 = vmatprep.mubr.bf16.mxu1 %v3815_v13 }
 0x26d   : > { %3984 = vmatmul.mubr.bf16.vlgmr.msra.gmra.mxu1 %v3814_v14 }
 0x32d   : > { %v4513_v17 = vpop.f32.mrf.mxu1 }
 0x32f   : > { %v4514_v59 = vpop.f32.mrf.mxu1 }
 0x330   : > { %v4515_v21 = vadd.f32 %v4514_v59, %v4513_v17 }
 0x331   : > { %v4516_v22 = vpop.f32.mrf.mxu1 }
 0x332   : > { %v3986_v23 = vadd.f32 %v4515_v21, %v4475_v56 }
 0x333   : > { %v4517_v24 = vpop.f32.mrf.mxu1 }
 0x334   : > { %3992 = vst.msk [vmem:[#allocation2] sm:$0x3] %vm3991_vm3, %v3986_v23 }
 0x335 PF: > { %p4492_p5 = scmp.ne.s32.totalorder %s5226_s22, 1 }
 0x337   : > { %3996 = sbr.rel (%p4492_p5) target bundleno = 1038 (0x40e), region = 52 }
 0x33c   : > { %v3997_v25 = vld [vmem:[#allocation2] sm:$0x3]  ;;  %vm3998_vm4 = vcmask 25600   ;;  %v5183_v28 = vmov 4  }
 0x33d   : > { %v3999_v27 = vsel %vm3998_vm4, %v3997_v25, 0.0  ;;  %5144 = vset.pattern.permute.xlu0 %v5183_v28 }
 0x33e   : > { %4000 = vadd.xlane.f32.xlu0 %v3999_v27 }
 0x354   : > { %4016 = vperm.xlu0 %5144, %v3997_v25  }
 0x3c7   : > { %v4001_v54 = vpop.xlane.xlu0 %4000 }
 0x3c8   : > { %v4002_v29 = vrot.slane %v4001_v54, 4 }
 0x3ca   : > { %v4003_v55 = vadd.f32 %v4002_v29, %v4001_v54 }
 0x3cc   : > { %v4004_v30 = vrot.slane %v4003_v55, 2 }
 0x3ce   : > { %v4005_v60 = vadd.f32 %v4004_v30, %v4003_v55 }
 0x3cf   : > { %v4017_v2 = vpop.permute.xlu0 %4016 }
 0x3d0   : > { %v4006_v47 = vrot.slane %v4005_v60, 1 }
 0x3d2   : > { %v4007_v32 = vadd.f32 %v4006_v47, %v4005_v60 }
 0x3d4   : > { %4520 = vpush %v4007_v32 }
 0x405   : > { %s4521_s18 = spop %4520 }
 0x406   : > { %s4011_s19 = smul.f32 0.125, %s4521_s18 }
 0x408   : > { %v4012_v34 = vstv %s4011_s19 }
 0x409   : > { %v4013_v33 = vsub.f32 %v3997_v25, %v4012_v34 }
 0x40b   : > { %v4019_v53 = vadd.f32 %v4017_v2, %v4013_v33 }
 0x40d   : > { %4020 = vst.msk [vmem:[#allocation3] sm:$0x3] %vm3998_vm4, %v4019_v53 }
 0x40e PF: > { %p4526_p6 = scmp.eq.s32.totalorder %s5226_s22, 1  ;;  %s5184_s20 = smov [#allocation3]  }
 0x40f   : > { %s4028_s23 = sshll.u32 %s5184_s20, 4  ;;  %s4029_s23 = int_to_ptr.vmem [resolvable:$true] %s4028_s23 }
 0x410   : > { %s5145_s24 = scalar_lea.vmem %s4029_s23, 32  ;;  %p5152_p10 = scmp.lt.s32.totalorder %s4029_s23, %s4029_s23 }
 0x411   : > { %p5146_p7 = scmp.ne.s32.totalorder %s4029_s23, %s5145_s24  ;;  %p5153_p11 = scmp.lt.s32.totalorder %s5145_s24, %s5145_s24 }
 0x413   : > { %p5147_p8 = pnand %p5146_p7, %p4526_p6  ;;  %p5154_p12 = por %p5153_p11, %p5152_p10 }
 0x415   : > { %p5148_p9 = pneg %p5147_p8 }
 0x417   : > { %p5155_p13 = pnand %p5154_p12, %p5148_p9 }
 0x419   : > { %5158 = shalt.err (!%p5155_p13)
}
 0x41a   : > { %4523 = dma.vmem_to_hbm [thread:$0]  (%p4526_p6), %s4029_s23, 32, %s6756_s6, [#allocation4]  }
 0x41b   : > { %5174 = dma.done.wait (%p4526_p6), [#allocation4], 32  }
 0x41c   : > { %5176 = vsyncadd (%p4526_p6), [#allocation4], 4294967264 }
 0x41d PF: > { %s17_s21 = sadd.s32 1, %s5179_s21  }
 0x41e   : > { %p14_p0 = scmp.ge.s32.totalorder %s17_s21, 4  }
 0x420   :  { %16 = sbr.rel (!%p14_p0) target bundleno = 1 (0x1), region = 86 }
 0x425   :  { %4041 = vsyncpa [#allocation4], 1 }
 0x426   :  { %4043 = vsyncpa [#allocation4 + $0x1], 1 }

</bundles_post_ra>
